<compile_context>
chip_gen: v7x
topology: tpu7x:2x2x1
jax: 0.10.0
libtpu: 0.0.40
codegen_flags: <defaults>
</compile_context>

<pallas_src>
import numpy as np
import jax
import jax.numpy as jnp
from jax.experimental import pallas as pl
from jax.experimental.pallas import tpu as pltpu

# Upsample1d "cubic" kernel (already multiplied by 2, as in the module __init__).
_CUBIC_X2 = np.array(
    [-0.01171875, -0.03515625, 0.11328125, 0.43359375,
     0.43359375, 0.11328125, -0.03515625, -0.01171875], dtype=np.float32) * 2.0
_KTAP = [float(v) for v in _CUBIC_X2]
_GN_EPS = 1e-5                 # torch GroupNorm default eps
_STACK_MAX_CIN = 128           # below this C_in, use the stacked single-matmul conv


def _round_up(n, m):
    return ((n + m - 1) // m) * m


# ---------------------------------------------------------------------------
# Pallas kernel factory: full UpBlock1D forward for one batch element.
# ---------------------------------------------------------------------------
def _make_kernel(block_meta, matmul_dtype, has_stack):
    """block_meta: tuple of (has_skip, conv1_meta, conv2_meta) per ResConvBlock,
    conv_meta = (c_in, c_out, stacked, stride).  All trace-time constants."""

    def kernel(x_ref, vecs_ref, *refs):
        if has_stack:
            wrefs, o_ref, stack_ref = refs[:-2], refs[-2], refs[-1]
        else:
            wrefs, o_ref, stack_ref = refs[:-1], refs[-1], None

        h = x_ref[0]                              # (C_in, L) f32
        L = h.shape[-1]
        lane = jax.lax.broadcasted_iota(jnp.int32, (1, L), 1)

        def zshift(v, d):
            # result[:, m] = v[:, m + d] for 0 <= m + d < L, else 0.
            if d == 0:
                return v
            c = v.shape[0]
            pad = jnp.zeros((c, abs(d)), v.dtype)
            if d > 0:
                return jnp.concatenate([v[:, d:], pad], axis=1)
            return jnp.concatenate([pad, v[:, :L + d]], axis=1)

        def to_mm(v):
            return v if v.dtype == matmul_dtype else v.astype(matmul_dtype)

        def conv5(v, w_ref, bias_col, cmeta):
            # Conv1d(kernel=5, padding=2); bias added post-matmul on the VPU.
            ci, co, stacked, stride = cmeta
            vm = to_mm(v)
            if stacked:
                # one MXU matmul against the sublane-aligned stacked taps
                zpad = (jnp.zeros((stride - ci, L), matmul_dtype)
                        if stride > ci else None)
                for k in range(5):
                    blk = zshift(vm, k - 2)
                    if zpad is not None:
                        blk = jnp.concatenate([blk, zpad], axis=0)
                    stack_ref[k * stride:(k + 1) * stride, :] = blk
                acc = jnp.dot(w_ref[...], stack_ref[0:5 * stride, :],
                              preferred_element_type=jnp.float32)
            else:
                # five accumulating matmuls, no staging scratch (large C_in)
                acc = jnp.dot(w_ref[0], zshift(vm, -2),
                              preferred_element_type=jnp.float32)
                for k in range(1, 5):
                    acc = acc + jnp.dot(w_ref[k], zshift(vm, k - 2),
                                        preferred_element_type=jnp.float32)
            return acc + bias_col

        def sum_all(v):
            return jnp.sum(jnp.sum(v, axis=1, keepdims=True),
                           axis=0, keepdims=True)

        def group_norm(v, g_col, be_col):
            # GroupNorm(num_groups=1): global stats over the whole (C, L) sample,
            # one pass (sum, sum-of-squares); affine folded into one mul + add.
            inv_n = 1.0 / (v.shape[0] * v.shape[1])
            mean = sum_all(v) * inv_n                  # (1, 1)
            ex2 = sum_all(v * v) * inv_n               # (1, 1)
            var = jnp.maximum(ex2 - mean * mean, 0.0)
            rstd = jax.lax.rsqrt(var + _GN_EPS)        # (1, 1)
            scale = g_col * rstd                       # (C, 1)
            shift = be_col - mean * scale              # (C, 1)
            return v * scale + shift

        def gelu(v):
            # exact (erf-based) GELU, matching nn.GELU(); erf via A&S 7.1.26
            # (|err| < 1.5e-7), exact division.
            z = v * 0.7071067811865476
            az = jnp.abs(z)
            t = 1.0 / (1.0 + 0.3275911 * az)
            poly = ((((1.061405429 * t - 1.453152027) * t + 1.421413741) * t
                     - 0.284496736) * t + 0.254829592) * t
            erf_abs = 1.0 - poly * jnp.exp(-az * az)
            erf_z = jnp.where(z >= 0.0, erf_abs, -erf_abs)
            return 0.5 * v * (1.0 + erf_z)

        widx = 0
        for bi, (has_skip, cm1, cm2) in enumerate(block_meta):
            if has_skip:
                residual = jnp.dot(wrefs[widx][...], to_mm(h),
                                   preferred_element_type=jnp.float32)
                widx += 1
            else:
                residual = h                   # identity skip: no matmul
            w1_ref = wrefs[widx]
            w2_ref = wrefs[widx + 1]
            widx += 2

            base = 6 * bi                      # columns of the packed vector table
            co1, co2 = cm1[1], cm2[1]
            t = conv5(h, w1_ref, vecs_ref[0:co1, base + 0:base + 1], cm1)
            t = gelu(group_norm(t, vecs_ref[0:co1, base + 1:base + 2],
                                vecs_ref[0:co1, base + 2:base + 3]))
            t = conv5(t, w2_ref, vecs_ref[0:co2, base + 3:base + 4], cm2)
            t = gelu(group_norm(t, vecs_ref[0:co2, base + 4:base + 5],
                                vecs_ref[0:co2, base + 5:base + 6]))
            h = t + residual

        # Upsample1d(kernel='cubic') = reflect-pad(2) + depthwise
        # conv_transpose1d(stride=2, padding=7, 8 taps), computed depthwise on the
        # VPU as two output phases (even / odd output lanes), 4 taps each:
        #   y[:, 2m]   = k7*h[m-2] + k5*h[m-1] + k3*h[m]   + k1*h[m+1]
        #   y[:, 2m+1] = k6*h[m-1] + k4*h[m]   + k2*h[m+1] + k0*h[m+2]
        # plus reflect corrections on the outer two positions of each edge.
        k0, k1, k2, k3, k4, k5, k6, k7 = _KTAP
        zm2, zm1 = zshift(h, -2), zshift(h, -1)
        zp1, zp2 = zshift(h, 1), zshift(h, 2)
        ye = k7 * zm2 + k5 * zm1 + k3 * h + k1 * zp1
        yo = k6 * zm1 + k4 * h + k2 * zp1 + k0 * zp2
        h1, h2 = h[:, 1:2], h[:, 2:3]
        hm2, hm3 = h[:, L - 2:L - 1], h[:, L - 3:L - 2]
        ye = ye + jnp.where(lane == 0, k7 * h2 + k5 * h1, 0.0)
        ye = ye + jnp.where(lane == 1, k7 * h1, 0.0)
        ye = ye + jnp.where(lane == L - 1, k1 * hm2, 0.0)
        yo = yo + jnp.where(lane == 0, k6 * h1, 0.0)
        yo = yo + jnp.where(lane == L - 2, k0 * hm2, 0.0)
        yo = yo + jnp.where(lane == L - 1, k2 * hm2 + k0 * hm3, 0.0)

        o_ref[0, 0] = ye
        o_ref[0, 1] = yo

    return kernel


# ---------------------------------------------------------------------------
# Parameter init / host-side packing and the pallas_call wrapper.
# ---------------------------------------------------------------------------
def init_params(key, c_in, c_mid, c_out):
    """Deterministic synthetic parameters for the 3 ResConvBlocks."""
    chans = [(c_in, c_mid, c_mid), (c_mid, c_mid, c_mid), (c_mid, c_mid, c_out)]
    raw_blocks = []
    for (ci, cm, co) in chans:
        key, *ks = jax.random.split(key, 10)
        raw_blocks.append(dict(
            wskip=(0.3 * jax.random.normal(ks[0], (co, ci), jnp.float32))
                  if ci != co else None,
            w1=jax.random.normal(ks[1], (cm, ci, 5), jnp.float32) / np.sqrt(5 * ci),
            b1=0.05 * jax.random.normal(ks[2], (cm,), jnp.float32),
            g1=1.0 + 0.1 * jax.random.normal(ks[3], (cm,), jnp.float32),
            be1=0.05 * jax.random.normal(ks[4], (cm,), jnp.float32),
            w2=jax.random.normal(ks[5], (co, cm, 5), jnp.float32) / np.sqrt(5 * cm),
            b2=0.05 * jax.random.normal(ks[6], (co,), jnp.float32),
            g2=1.0 + 0.1 * jax.random.normal(ks[7], (co,), jnp.float32),
            be2=0.05 * jax.random.normal(ks[8], (co,), jnp.float32),
        ))
    return raw_blocks


def pack_for_kernel(raw_blocks, matmul_dtype=jnp.float32):
    """Weights pre-cast to matmul_dtype; stacked-path conv weights packed with a
    sublane-aligned tap stride (zero pad columns); accumulating-path weights packed
    as (5, C_out, C_in); all bias / GN-affine vectors packed into one (C_max, 18)
    table (column layout per block: b1, g1, be1, b2, g2, be2)."""
    align = 16 if matmul_dtype == jnp.bfloat16 else 8
    c_max = 0
    for blk in raw_blocks:
        c_max = max(c_max, blk['w1'].shape[0], blk['w1'].shape[1],
                    blk['w2'].shape[0])
    vecs = np.zeros((c_max, 6 * len(raw_blocks)), np.float32)
    weights, meta = [], []
    stack_rows = 0
    for bi, blk in enumerate(raw_blocks):
        has_skip = blk['wskip'] is not None
        if has_skip:
            weights.append(jnp.asarray(np.asarray(blk['wskip']), matmul_dtype))
        cmetas = []
        for w in (blk['w1'], blk['w2']):
            w = np.asarray(w)
            co, ci, _ = w.shape
            stacked = ci < _STACK_MAX_CIN
            if stacked:
                stride = _round_up(ci, align)
                wp = np.zeros((co, 5 * stride), np.float32)
                for k in range(5):
                    wp[:, k * stride:k * stride + ci] = w[:, :, k]
                weights.append(jnp.asarray(wp, matmul_dtype))
                stack_rows = max(stack_rows, 5 * stride)
            else:
                stride = ci
                weights.append(jnp.asarray(np.transpose(w, (2, 0, 1)),
                                           matmul_dtype))
            cmetas.append((ci, co, stacked, stride))
        base = 6 * bi
        co1, co2 = cmetas[0][1], cmetas[1][1]
        vecs[:co1, base + 0] = np.asarray(blk['b1'])
        vecs[:co1, base + 1] = np.asarray(blk['g1'])
        vecs[:co1, base + 2] = np.asarray(blk['be1'])
        vecs[:co2, base + 3] = np.asarray(blk['b2'])
        vecs[:co2, base + 4] = np.asarray(blk['g2'])
        vecs[:co2, base + 5] = np.asarray(blk['be2'])
        meta.append((has_skip, cmetas[0], cmetas[1]))
    return dict(params=[jnp.asarray(vecs)] + weights,
                meta=tuple(meta),
                c_out=int(raw_blocks[-1]['w2'].shape[0]),
                stack_rows=int(stack_rows),
                matmul_dtype=matmul_dtype)


def _pick_vmem_limit():
    # Generation-aware scoped-VMEM limit: ~48 MiB on v7x (64 MiB physical),
    # ~100 MiB on v5e / v6e (128 MiB physical).
    cap = 128 * 1024 * 1024
    try:
        cap = int(getattr(pltpu.get_tpu_info(), "vmem_capacity_bytes", cap))
    except Exception:
        pass
    return max(32 * 1024 * 1024, min(cap - 16 * 1024 * 1024, 100 * 1024 * 1024))


def upblock1d_forward(x, packed, interleave=True):
    """x: (B, C_in, L) f32.  Returns (B, C_out, 2L) if interleave else the raw
    phase-split kernel output (B, 2, C_out, L) (even / odd output positions)."""
    B, C_in, L = x.shape
    flat = packed['params']
    meta = packed['meta']
    c_out = packed['c_out']
    stack_rows = packed['stack_rows']
    mdt = packed['matmul_dtype']

    def build(single_buffer_params):
        in_specs = [pl.BlockSpec((1, C_in, L), lambda b: (b, 0, 0))]
        for p in flat:
            kwargs = {}
            if single_buffer_params:
                # Parameters have a constant block index: single-buffer them to
                # halve their VMEM footprint (matters at C~512 on v7x's 64 MiB).
                kwargs['pipeline_mode'] = pl.Buffered(1)
            in_specs.append(
                pl.BlockSpec(p.shape, lambda b, nd=p.ndim: (0,) * nd, **kwargs))
        scratch = ([pltpu.VMEM((stack_rows, L), mdt)] if stack_rows > 0 else [])
        return pl.pallas_call(
            _make_kernel(meta, mdt, stack_rows > 0),
            out_shape=jax.ShapeDtypeStruct((B, 2, c_out, L), jnp.float32),
            grid=(B,),                      # B >= 2 feeds both v7x TensorCores
            in_specs=in_specs,
            out_specs=pl.BlockSpec((1, 2, c_out, L), lambda b: (b, 0, 0, 0)),
            scratch_shapes=scratch,
            compiler_params=pltpu.CompilerParams(
                dimension_semantics=("parallel",),
                vmem_limit_bytes=_pick_vmem_limit()),
        )(x, *flat)

    try:
        y = build(True)
    except Exception:      # pl.Buffered(1) unsupported -> default double buffering
        y = build(False)

    if not interleave:
        return y
    # Even/odd phase interleave -> (B, C_out, 2L).  For production, prefer
    # consuming the phase-split (B, 2, C_out, L) directly (or fusing this into the
    # consumer) to avoid an extra HBM round trip.
    return jnp.transpose(y, (0, 2, 3, 1)).reshape(B, c_out, 2 * L)


# ---------------------------------------------------------------------------
# Pure-JAX reference (mirrors the PyTorch forward).
# ---------------------------------------------------------------------------
def reference_forward(x, raw_blocks):
    def conv1d(h, w, b, pad):
        y = jax.lax.conv_general_dilated(
            h, w, window_strides=(1,), padding=[(pad, pad)],
            dimension_numbers=('NCH', 'OIH', 'NCH'))
        return y if b is None else y + b[None, :, None]

    def gn(h, g, be):
        mean = h.mean(axis=(1, 2), keepdims=True)
        var = ((h - mean) ** 2).mean(axis=(1, 2), keepdims=True)
        return (h - mean) / jnp.sqrt(var + _GN_EPS) * g[None, :, None] \
            + be[None, :, None]

    def gelu(h):
        return 0.5 * h * (1.0 + jax.scipy.special.erf(h / np.sqrt(2.0)))

    h = x
    for blk in raw_blocks:
        residual = h if blk['wskip'] is None else \
            conv1d(h, blk['wskip'][:, :, None], None, 0)
        t = conv1d(h, blk['w1'], blk['b1'], 2)
        t = gelu(gn(t, blk['g1'], blk['be1']))
        t = conv1d(t, blk['w2'], blk['b2'], 2)
        t = gelu(gn(t, blk['g2'], blk['be2']))
        h = t + residual
    C = h.shape[1]
    hp = jnp.pad(h, ((0, 0), (0, 0), (2, 2)), mode='reflect')
    w = jnp.tile(jnp.asarray(_CUBIC_X2[::-1].copy())[None, None, :], (C, 1, 1))
    return jax.lax.conv_general_dilated(
        hp, w, window_strides=(1,), padding=[(0, 0)], lhs_dilation=(2,),
        dimension_numbers=('NCH', 'OIH', 'NCH'), feature_group_count=C)


if __name__ == "__main__":
    B, C_IN, C_OUT, L = 2, 4, 8, 16          # mid_channels defaults to in_channels
    key = jax.random.PRNGKey(0)
    kx, kp = jax.random.split(key)
    x = jax.random.normal(kx, (B, C_IN, L), jnp.float32)

    raw_blocks = init_params(kp, C_IN, C_IN, C_OUT)
    ref = jax.block_until_ready(reference_forward(x, raw_blocks))

    # f32-operand path (small channels -> stacked single-matmul conv form).
    out = jax.block_until_ready(
        upblock1d_forward(x, pack_for_kernel(raw_blocks, jnp.float32)))
    assert out.shape == (B, C_OUT, 2 * L), out.shape
    assert np.isfinite(np.asarray(out)).all()
    err = float(jnp.max(jnp.abs(out - ref)))
    assert err < 1e-1, f"f32 max abs error vs reference: {err}"

    # bf16-operand fast path (f32 accumulate) -- MXU-rate win on v5e/v6e/v7x.
    out_bf16 = jax.block_until_ready(
        upblock1d_forward(x, pack_for_kernel(raw_blocks, jnp.bfloat16)))
    assert np.isfinite(np.asarray(out_bf16)).all()
    err_bf16 = float(jnp.max(jnp.abs(out_bf16 - ref)))
    assert err_bf16 < 2.5e-1, f"bf16 max abs error vs reference: {err_bf16}"

    # Larger-channel check to exercise the accumulating-matmul conv path
    # (C_in >= 128, no staging scratch).
    C2 = 128
    raw2 = init_params(jax.random.PRNGKey(1), C2, C2, C2)
    x2 = jax.random.normal(jax.random.PRNGKey(2), (2, C2, L), jnp.float32)
    ref2 = jax.block_until_ready(reference_forward(x2, raw2))
    out2 = jax.block_until_ready(
        upblock1d_forward(x2, pack_for_kernel(raw2, jnp.float32)))
    assert np.isfinite(np.asarray(out2)).all()
    err2 = float(jnp.max(jnp.abs(out2 - ref2)))
    assert err2 < 1.5e-1, f"accumulating-path max abs error vs reference: {err2}"

    print("KERNEL_OK")
</pallas_src>

<mosaic_0001>
module attributes {stable_mosaic.version = 11 : i64} {
  func.func @kernel(%arg0: i32, %arg1: memref<1x4x16xf32, #tpu.memory_space<vmem>>, %arg2: memref<8x18xf32, #tpu.memory_space<vmem>>, %arg3: memref<4x40xf32, #tpu.memory_space<vmem>>, %arg4: memref<4x40xf32, #tpu.memory_space<vmem>>, %arg5: memref<4x40xf32, #tpu.memory_space<vmem>>, %arg6: memref<4x40xf32, #tpu.memory_space<vmem>>, %arg7: memref<8x4xf32, #tpu.memory_space<vmem>>, %arg8: memref<4x40xf32, #tpu.memory_space<vmem>>, %arg9: memref<8x40xf32, #tpu.memory_space<vmem>>, %arg10: memref<1x2x8x16xf32, #tpu.memory_space<vmem>>, %arg11: memref<40x16xf32, #tpu.memory_space<vmem>>) attributes {dimension_semantics = [#tpu.dimension_semantics<parallel>], iteration_bounds = array<i64: 2>, scalar_prefetch = 0 : i64, scratch_operands = 1 : i64, tpu.core_type = #tpu.core_type<tc>, window_params = [{transform_indices = @transform_0, window_bounds = array<i64: 1, 4, 16>}, {pipeline_mode = #tpu.pipeline_mode<synchronous>, transform_indices = @transform_1, window_bounds = array<i64: 8, 18>}, {pipeline_mode = #tpu.pipeline_mode<synchronous>, transform_indices = @transform_2, window_bounds = array<i64: 4, 40>}, {pipeline_mode = #tpu.pipeline_mode<synchronous>, transform_indices = @transform_3, window_bounds = array<i64: 4, 40>}, {pipeline_mode = #tpu.pipeline_mode<synchronous>, transform_indices = @transform_4, window_bounds = array<i64: 4, 40>}, {pipeline_mode = #tpu.pipeline_mode<synchronous>, transform_indices = @transform_5, window_bounds = array<i64: 4, 40>}, {pipeline_mode = #tpu.pipeline_mode<synchronous>, transform_indices = @transform_6, window_bounds = array<i64: 8, 4>}, {pipeline_mode = #tpu.pipeline_mode<synchronous>, transform_indices = @transform_7, window_bounds = array<i64: 4, 40>}, {pipeline_mode = #tpu.pipeline_mode<synchronous>, transform_indices = @transform_8, window_bounds = array<i64: 8, 40>}, {transform_indices = @transform_9, window_bounds = array<i64: 1, 2, 8, 16>}]} {
    %c0 = arith.constant 0 : index
    %c0_0 = arith.constant 0 : index
    %c0_1 = arith.constant 0 : index
    %0 = vector.load %arg1[%c0, %c0_0, %c0_1] : memref<1x4x16xf32, #tpu.memory_space<vmem>>, vector<1x4x16xf32>
    %1 = vector.shape_cast %0 : vector<1x4x16xf32> to vector<4x16xf32>
    %2 = tpu.iota {dimensions = array<i32: 1>} : vector<1x16xi32>
    %c0_2 = arith.constant 0 : index
    %c0_3 = arith.constant 0 : index
    %3 = vector.load %arg2[%c0_2, %c0_3] : memref<8x18xf32, #tpu.memory_space<vmem>>, vector<4x1xf32>
    %cst = arith.constant 0.000000e+00 : f32
    %4 = vector.broadcast %cst : f32 to vector<4x16xf32>
    %cst_4 = arith.constant 0.000000e+00 : f32
    %5 = vector.broadcast %cst_4 : f32 to vector<4x2xf32>
    %6 = vector.extract_strided_slice %1 {offsets = [0, 0], sizes = [4, 14], strides = [1, 1]} : vector<4x16xf32> to vector<4x14xf32>
    %7 = tpu.concatenate %5, %6 in 1 : vector<4x2xf32>, vector<4x14xf32> -> vector<4x16xf32>
    %8 = tpu.concatenate %7, %4 in 0 : vector<4x16xf32>, vector<4x16xf32> -> vector<8x16xf32>
    %c0_5 = arith.constant 0 : index
    %c0_6 = arith.constant 0 : index
    %9 = vector.load %arg11[%c0_5, %c0_6] : memref<40x16xf32, #tpu.memory_space<vmem>>, vector<8x16xf32>
    tpu.vector_store %arg11[%c0_5, %c0_6], %8 {strides = array<i32>} : memref<40x16xf32, #tpu.memory_space<vmem>>, vector<8x16xf32>,
    %cst_7 = arith.constant 0.000000e+00 : f32
    %10 = vector.broadcast %cst_7 : f32 to vector<4x1xf32>
    %11 = vector.extract_strided_slice %1 {offsets = [0, 0], sizes = [4, 15], strides = [1, 1]} : vector<4x16xf32> to vector<4x15xf32>
    %12 = tpu.concatenate %10, %11 in 1 : vector<4x1xf32>, vector<4x15xf32> -> vector<4x16xf32>
    %13 = tpu.concatenate %12, %4 in 0 : vector<4x16xf32>, vector<4x16xf32> -> vector<8x16xf32>
    %c8 = arith.constant 8 : index
    %c0_8 = arith.constant 0 : index
    %14 = vector.load %arg11[%c8, %c0_8] : memref<40x16xf32, #tpu.memory_space<vmem>>, vector<8x16xf32>
    tpu.vector_store %arg11[%c8, %c0_8], %13 {strides = array<i32>} : memref<40x16xf32, #tpu.memory_space<vmem>>, vector<8x16xf32>,
    %15 = tpu.concatenate %1, %4 in 0 : vector<4x16xf32>, vector<4x16xf32> -> vector<8x16xf32>
    %c16 = arith.constant 16 : index
    %c0_9 = arith.constant 0 : index
    %16 = vector.load %arg11[%c16, %c0_9] : memref<40x16xf32, #tpu.memory_space<vmem>>, vector<8x16xf32>
    tpu.vector_store %arg11[%c16, %c0_9], %15 {strides = array<i32>} : memref<40x16xf32, #tpu.memory_space<vmem>>, vector<8x16xf32>,
    %cst_10 = arith.constant 0.000000e+00 : f32
    %17 = vector.broadcast %cst_10 : f32 to vector<4x1xf32>
    %18 = vector.extract_strided_slice %1 {offsets = [0, 1], sizes = [4, 15], strides = [1, 1]} : vector<4x16xf32> to vector<4x15xf32>
    %19 = tpu.concatenate %18, %17 in 1 : vector<4x15xf32>, vector<4x1xf32> -> vector<4x16xf32>
    %20 = tpu.concatenate %19, %4 in 0 : vector<4x16xf32>, vector<4x16xf32> -> vector<8x16xf32>
    %c24 = arith.constant 24 : index
    %c0_11 = arith.constant 0 : index
    %21 = vector.load %arg11[%c24, %c0_11] : memref<40x16xf32, #tpu.memory_space<vmem>>, vector<8x16xf32>
    tpu.vector_store %arg11[%c24, %c0_11], %20 {strides = array<i32>} : memref<40x16xf32, #tpu.memory_space<vmem>>, vector<8x16xf32>,
    %cst_12 = arith.constant 0.000000e+00 : f32
    %22 = vector.broadcast %cst_12 : f32 to vector<4x2xf32>
    %23 = vector.extract_strided_slice %1 {offsets = [0, 2], sizes = [4, 14], strides = [1, 1]} : vector<4x16xf32> to vector<4x14xf32>
    %24 = tpu.concatenate %23, %22 in 1 : vector<4x14xf32>, vector<4x2xf32> -> vector<4x16xf32>
    %25 = tpu.concatenate %24, %4 in 0 : vector<4x16xf32>, vector<4x16xf32> -> vector<8x16xf32>
    %c32 = arith.constant 32 : index
    %c0_13 = arith.constant 0 : index
    %26 = vector.load %arg11[%c32, %c0_13] : memref<40x16xf32, #tpu.memory_space<vmem>>, vector<8x16xf32>
    tpu.vector_store %arg11[%c32, %c0_13], %25 {strides = array<i32>} : memref<40x16xf32, #tpu.memory_space<vmem>>, vector<8x16xf32>,
    %c0_14 = arith.constant 0 : index
    %c0_15 = arith.constant 0 : index
    %27 = vector.load %arg3[%c0_14, %c0_15] : memref<4x40xf32, #tpu.memory_space<vmem>>, vector<4x40xf32>
    %c0_16 = arith.constant 0 : index
    %c0_17 = arith.constant 0 : index
    %28 = vector.load %arg11[%c0_16, %c0_17] : memref<40x16xf32, #tpu.memory_space<vmem>>, vector<40x16xf32>
    %cst_18 = arith.constant dense<0.000000e+00> : vector<4x16xf32>
    %29 = tpu.matmul %27, %28, %cst_18 {dimension_numbers = #tpu.dot_dimension_numbers<[1], [0], [0], [1], [0, 0, 1, 1], [], []>} : vector<4x40xf32>, vector<40x16xf32>, vector<4x16xf32> -> vector<4x16xf32>
    %30 = vector.broadcast %3 : vector<4x1xf32> to vector<4x16xf32>
    %31 = arith.addf %29, %30 : vector<4x16xf32>
    %c0_19 = arith.constant 0 : index
    %c1 = arith.constant 1 : index
    %32 = vector.load %arg2[%c0_19, %c1] : memref<8x18xf32, #tpu.memory_space<vmem>>, vector<4x1xf32>
    %c0_20 = arith.constant 0 : index
    %c2 = arith.constant 2 : index
    %33 = vector.load %arg2[%c0_20, %c2] : memref<8x18xf32, #tpu.memory_space<vmem>>, vector<4x1xf32>
    %cst_21 = arith.constant dense<0.000000e+00> : vector<4xf32>
    %34 = vector.multi_reduction <add>, %31, %cst_21 [1] : vector<4x16xf32> to vector<4xf32>
    %35 = vector.shape_cast %34 : vector<4xf32> to vector<4x1xf32>
    %cst_22 = arith.constant dense<0.000000e+00> : vector<1xf32>
    %36 = vector.multi_reduction <add>, %35, %cst_22 [0] : vector<4x1xf32> to vector<1xf32>
    %37 = vector.shape_cast %36 : vector<1xf32> to vector<1x1xf32>
    %cst_23 = arith.constant 1.562500e-02 : f32
    %38 = vector.broadcast %cst_23 : f32 to vector<1x1xf32>
    %39 = arith.mulf %37, %38 : vector<1x1xf32>
    %40 = arith.mulf %31, %31 : vector<4x16xf32>
    %cst_24 = arith.constant dense<0.000000e+00> : vector<4xf32>
    %41 = vector.multi_reduction <add>, %40, %cst_24 [1] : vector<4x16xf32> to vector<4xf32>
    %42 = vector.shape_cast %41 : vector<4xf32> to vector<4x1xf32>
    %cst_25 = arith.constant dense<0.000000e+00> : vector<1xf32>
    %43 = vector.multi_reduction <add>, %42, %cst_25 [0] : vector<4x1xf32> to vector<1xf32>
    %44 = vector.shape_cast %43 : vector<1xf32> to vector<1x1xf32>
    %cst_26 = arith.constant 1.562500e-02 : f32
    %45 = vector.broadcast %cst_26 : f32 to vector<1x1xf32>
    %46 = arith.mulf %44, %45 : vector<1x1xf32>
    %47 = arith.mulf %39, %39 : vector<1x1xf32>
    %48 = arith.subf %46, %47 : vector<1x1xf32>
    %cst_27 = arith.constant 0.000000e+00 : f32
    %49 = vector.broadcast %cst_27 : f32 to vector<1x1xf32>
    %50 = arith.maximumf %48, %49 : vector<1x1xf32>
    %cst_28 = arith.constant 9.99999974E-6 : f32
    %51 = vector.broadcast %cst_28 : f32 to vector<1x1xf32>
    %52 = arith.addf %50, %51 : vector<1x1xf32>
    %53 = math.rsqrt %52 : vector<1x1xf32>
    %54 = vector.broadcast %53 : vector<1x1xf32> to vector<4x1xf32>
    %55 = arith.mulf %32, %54 : vector<4x1xf32>
    %56 = vector.broadcast %39 : vector<1x1xf32> to vector<4x1xf32>
    %57 = arith.mulf %56, %55 : vector<4x1xf32>
    %58 = arith.subf %33, %57 : vector<4x1xf32>
    %59 = vector.broadcast %55 : vector<4x1xf32> to vector<4x16xf32>
    %60 = arith.mulf %31, %59 : vector<4x16xf32>
    %61 = vector.broadcast %58 : vector<4x1xf32> to vector<4x16xf32>
    %62 = arith.addf %60, %61 : vector<4x16xf32>
    %cst_29 = arith.constant 0.707106769 : f32
    %63 = vector.broadcast %cst_29 : f32 to vector<4x16xf32>
    %64 = arith.mulf %62, %63 : vector<4x16xf32>
    %65 = math.absf %64 : vector<4x16xf32>
    %cst_30 = arith.constant 0.327591091 : f32
    %66 = vector.broadcast %cst_30 : f32 to vector<4x16xf32>
    %67 = arith.mulf %66, %65 : vector<4x16xf32>
    %cst_31 = arith.constant 1.000000e+00 : f32
    %68 = vector.broadcast %cst_31 : f32 to vector<4x16xf32>
    %69 = arith.addf %68, %67 : vector<4x16xf32>
    %cst_32 = arith.constant 1.000000e+00 : f32
    %70 = vector.broadcast %cst_32 : f32 to vector<4x16xf32>
    %71 = arith.divf %70, %69 : vector<4x16xf32>
    %cst_33 = arith.constant 1.06140542 : f32
    %72 = vector.broadcast %cst_33 : f32 to vector<4x16xf32>
    %73 = arith.mulf %72, %71 : vector<4x16xf32>
    %cst_34 = arith.constant 1.45315206 : f32
    %74 = vector.broadcast %cst_34 : f32 to vector<4x16xf32>
    %75 = arith.subf %73, %74 : vector<4x16xf32>
    %76 = arith.mulf %75, %71 : vector<4x16xf32>
    %cst_35 = arith.constant 1.42141378 : f32
    %77 = vector.broadcast %cst_35 : f32 to vector<4x16xf32>
    %78 = arith.addf %76, %77 : vector<4x16xf32>
    %79 = arith.mulf %78, %71 : vector<4x16xf32>
    %cst_36 = arith.constant 0.284496725 : f32
    %80 = vector.broadcast %cst_36 : f32 to vector<4x16xf32>
    %81 = arith.subf %79, %80 : vector<4x16xf32>
    %82 = arith.mulf %81, %71 : vector<4x16xf32>
    %cst_37 = arith.constant 0.254829586 : f32
    %83 = vector.broadcast %cst_37 : f32 to vector<4x16xf32>
    %84 = arith.addf %82, %83 : vector<4x16xf32>
    %85 = arith.mulf %84, %71 : vector<4x16xf32>
    %cst_38 = arith.constant 0.000000e+00 : f32
    %86 = vector.broadcast %cst_38 : f32 to vector<4x16xf32>
    %87 = arith.subf %86, %65 : vector<4x16xf32>
    %88 = arith.mulf %87, %65 : vector<4x16xf32>
    %89 = math.exp %88 : vector<4x16xf32>
    %90 = arith.mulf %85, %89 : vector<4x16xf32>
    %cst_39 = arith.constant 1.000000e+00 : f32
    %91 = vector.broadcast %cst_39 : f32 to vector<4x16xf32>
    %92 = arith.subf %91, %90 : vector<4x16xf32>
    %cst_40 = arith.constant 0.000000e+00 : f32
    %93 = vector.broadcast %cst_40 : f32 to vector<4x16xf32>
    %94 = arith.cmpf oge, %64, %93 : vector<4x16xf32>
    %cst_41 = arith.constant 0.000000e+00 : f32
    %95 = vector.broadcast %cst_41 : f32 to vector<4x16xf32>
    %96 = arith.subf %95, %92 : vector<4x16xf32>
    %97 = arith.select %94, %92, %96 : vector<4x16xi1>, vector<4x16xf32>
    %cst_42 = arith.constant 5.000000e-01 : f32
    %98 = vector.broadcast %cst_42 : f32 to vector<4x16xf32>
    %99 = arith.mulf %98, %62 : vector<4x16xf32>
    %cst_43 = arith.constant 1.000000e+00 : f32
    %100 = vector.broadcast %cst_43 : f32 to vector<4x16xf32>
    %101 = arith.addf %100, %97 : vector<4x16xf32>
    %102 = arith.mulf %99, %101 : vector<4x16xf32>
    %c0_44 = arith.constant 0 : index
    %c3 = arith.constant 3 : index
    %103 = vector.load %arg2[%c0_44, %c3] : memref<8x18xf32, #tpu.memory_space<vmem>>, vector<4x1xf32>
    %cst_45 = arith.constant 0.000000e+00 : f32
    %104 = vector.broadcast %cst_45 : f32 to vector<4x16xf32>
    %cst_46 = arith.constant 0.000000e+00 : f32
    %105 = vector.broadcast %cst_46 : f32 to vector<4x2xf32>
    %106 = vector.extract_strided_slice %102 {offsets = [0, 0], sizes = [4, 14], strides = [1, 1]} : vector<4x16xf32> to vector<4x14xf32>
    %107 = tpu.concatenate %105, %106 in 1 : vector<4x2xf32>, vector<4x14xf32> -> vector<4x16xf32>
    %108 = tpu.concatenate %107, %104 in 0 : vector<4x16xf32>, vector<4x16xf32> -> vector<8x16xf32>
    %c0_47 = arith.constant 0 : index
    %c0_48 = arith.constant 0 : index
    %109 = vector.load %arg11[%c0_47, %c0_48] : memref<40x16xf32, #tpu.memory_space<vmem>>, vector<8x16xf32>
    tpu.vector_store %arg11[%c0_47, %c0_48], %108 {strides = array<i32>} : memref<40x16xf32, #tpu.memory_space<vmem>>, vector<8x16xf32>,
    %cst_49 = arith.constant 0.000000e+00 : f32
    %110 = vector.broadcast %cst_49 : f32 to vector<4x1xf32>
    %111 = vector.extract_strided_slice %102 {offsets = [0, 0], sizes = [4, 15], strides = [1, 1]} : vector<4x16xf32> to vector<4x15xf32>
    %112 = tpu.concatenate %110, %111 in 1 : vector<4x1xf32>, vector<4x15xf32> -> vector<4x16xf32>
    %113 = tpu.concatenate %112, %104 in 0 : vector<4x16xf32>, vector<4x16xf32> -> vector<8x16xf32>
    %c8_50 = arith.constant 8 : index
    %c0_51 = arith.constant 0 : index
    %114 = vector.load %arg11[%c8_50, %c0_51] : memref<40x16xf32, #tpu.memory_space<vmem>>, vector<8x16xf32>
    tpu.vector_store %arg11[%c8_50, %c0_51], %113 {strides = array<i32>} : memref<40x16xf32, #tpu.memory_space<vmem>>, vector<8x16xf32>,
    %115 = tpu.concatenate %102, %104 in 0 : vector<4x16xf32>, vector<4x16xf32> -> vector<8x16xf32>
    %c16_52 = arith.constant 16 : index
    %c0_53 = arith.constant 0 : index
    %116 = vector.load %arg11[%c16_52, %c0_53] : memref<40x16xf32, #tpu.memory_space<vmem>>, vector<8x16xf32>
    tpu.vector_store %arg11[%c16_52, %c0_53], %115 {strides = array<i32>} : memref<40x16xf32, #tpu.memory_space<vmem>>, vector<8x16xf32>,
    %cst_54 = arith.constant 0.000000e+00 : f32
    %117 = vector.broadcast %cst_54 : f32 to vector<4x1xf32>
    %118 = vector.extract_strided_slice %102 {offsets = [0, 1], sizes = [4, 15], strides = [1, 1]} : vector<4x16xf32> to vector<4x15xf32>
    %119 = tpu.concatenate %118, %117 in 1 : vector<4x15xf32>, vector<4x1xf32> -> vector<4x16xf32>
    %120 = tpu.concatenate %119, %104 in 0 : vector<4x16xf32>, vector<4x16xf32> -> vector<8x16xf32>
    %c24_55 = arith.constant 24 : index
    %c0_56 = arith.constant 0 : index
    %121 = vector.load %arg11[%c24_55, %c0_56] : memref<40x16xf32, #tpu.memory_space<vmem>>, vector<8x16xf32>
    tpu.vector_store %arg11[%c24_55, %c0_56], %120 {strides = array<i32>} : memref<40x16xf32, #tpu.memory_space<vmem>>, vector<8x16xf32>,
    %cst_57 = arith.constant 0.000000e+00 : f32
    %122 = vector.broadcast %cst_57 : f32 to vector<4x2xf32>
    %123 = vector.extract_strided_slice %102 {offsets = [0, 2], sizes = [4, 14], strides = [1, 1]} : vector<4x16xf32> to vector<4x14xf32>
    %124 = tpu.concatenate %123, %122 in 1 : vector<4x14xf32>, vector<4x2xf32> -> vector<4x16xf32>
    %125 = tpu.concatenate %124, %104 in 0 : vector<4x16xf32>, vector<4x16xf32> -> vector<8x16xf32>
    %c32_58 = arith.constant 32 : index
    %c0_59 = arith.constant 0 : index
    %126 = vector.load %arg11[%c32_58, %c0_59] : memref<40x16xf32, #tpu.memory_space<vmem>>, vector<8x16xf32>
    tpu.vector_store %arg11[%c32_58, %c0_59], %125 {strides = array<i32>} : memref<40x16xf32, #tpu.memory_space<vmem>>, vector<8x16xf32>,
    %c0_60 = arith.constant 0 : index
    %c0_61 = arith.constant 0 : index
    %127 = vector.load %arg4[%c0_60, %c0_61] : memref<4x40xf32, #tpu.memory_space<vmem>>, vector<4x40xf32>
    %c0_62 = arith.constant 0 : index
    %c0_63 = arith.constant 0 : index
    %128 = vector.load %arg11[%c0_62, %c0_63] : memref<40x16xf32, #tpu.memory_space<vmem>>, vector<40x16xf32>
    %cst_64 = arith.constant dense<0.000000e+00> : vector<4x16xf32>
    %129 = tpu.matmul %127, %128, %cst_64 {dimension_numbers = #tpu.dot_dimension_numbers<[1], [0], [0], [1], [0, 0, 1, 1], [], []>} : vector<4x40xf32>, vector<40x16xf32>, vector<4x16xf32> -> vector<4x16xf32>
    %130 = vector.broadcast %103 : vector<4x1xf32> to vector<4x16xf32>
    %131 = arith.addf %129, %130 : vector<4x16xf32>
    %c0_65 = arith.constant 0 : index
    %c4 = arith.constant 4 : index
    %132 = vector.load %arg2[%c0_65, %c4] : memref<8x18xf32, #tpu.memory_space<vmem>>, vector<4x1xf32>
    %c0_66 = arith.constant 0 : index
    %c5 = arith.constant 5 : index
    %133 = vector.load %arg2[%c0_66, %c5] : memref<8x18xf32, #tpu.memory_space<vmem>>, vector<4x1xf32>
    %cst_67 = arith.constant dense<0.000000e+00> : vector<4xf32>
    %134 = vector.multi_reduction <add>, %131, %cst_67 [1] : vector<4x16xf32> to vector<4xf32>
    %135 = vector.shape_cast %134 : vector<4xf32> to vector<4x1xf32>
    %cst_68 = arith.constant dense<0.000000e+00> : vector<1xf32>
    %136 = vector.multi_reduction <add>, %135, %cst_68 [0] : vector<4x1xf32> to vector<1xf32>
    %137 = vector.shape_cast %136 : vector<1xf32> to vector<1x1xf32>
    %cst_69 = arith.constant 1.562500e-02 : f32
    %138 = vector.broadcast %cst_69 : f32 to vector<1x1xf32>
    %139 = arith.mulf %137, %138 : vector<1x1xf32>
    %140 = arith.mulf %131, %131 : vector<4x16xf32>
    %cst_70 = arith.constant dense<0.000000e+00> : vector<4xf32>
    %141 = vector.multi_reduction <add>, %140, %cst_70 [1] : vector<4x16xf32> to vector<4xf32>
    %142 = vector.shape_cast %141 : vector<4xf32> to vector<4x1xf32>
    %cst_71 = arith.constant dense<0.000000e+00> : vector<1xf32>
    %143 = vector.multi_reduction <add>, %142, %cst_71 [0] : vector<4x1xf32> to vector<1xf32>
    %144 = vector.shape_cast %143 : vector<1xf32> to vector<1x1xf32>
    %cst_72 = arith.constant 1.562500e-02 : f32
    %145 = vector.broadcast %cst_72 : f32 to vector<1x1xf32>
    %146 = arith.mulf %144, %145 : vector<1x1xf32>
    %147 = arith.mulf %139, %139 : vector<1x1xf32>
    %148 = arith.subf %146, %147 : vector<1x1xf32>
    %cst_73 = arith.constant 0.000000e+00 : f32
    %149 = vector.broadcast %cst_73 : f32 to vector<1x1xf32>
    %150 = arith.maximumf %148, %149 : vector<1x1xf32>
    %cst_74 = arith.constant 9.99999974E-6 : f32
    %151 = vector.broadcast %cst_74 : f32 to vector<1x1xf32>
    %152 = arith.addf %150, %151 : vector<1x1xf32>
    %153 = math.rsqrt %152 : vector<1x1xf32>
    %154 = vector.broadcast %153 : vector<1x1xf32> to vector<4x1xf32>
    %155 = arith.mulf %132, %154 : vector<4x1xf32>
    %156 = vector.broadcast %139 : vector<1x1xf32> to vector<4x1xf32>
    %157 = arith.mulf %156, %155 : vector<4x1xf32>
    %158 = arith.subf %133, %157 : vector<4x1xf32>
    %159 = vector.broadcast %155 : vector<4x1xf32> to vector<4x16xf32>
    %160 = arith.mulf %131, %159 : vector<4x16xf32>
    %161 = vector.broadcast %158 : vector<4x1xf32> to vector<4x16xf32>
    %162 = arith.addf %160, %161 : vector<4x16xf32>
    %cst_75 = arith.constant 0.707106769 : f32
    %163 = vector.broadcast %cst_75 : f32 to vector<4x16xf32>
    %164 = arith.mulf %162, %163 : vector<4x16xf32>
    %165 = math.absf %164 : vector<4x16xf32>
    %cst_76 = arith.constant 0.327591091 : f32
    %166 = vector.broadcast %cst_76 : f32 to vector<4x16xf32>
    %167 = arith.mulf %166, %165 : vector<4x16xf32>
    %cst_77 = arith.constant 1.000000e+00 : f32
    %168 = vector.broadcast %cst_77 : f32 to vector<4x16xf32>
    %169 = arith.addf %168, %167 : vector<4x16xf32>
    %cst_78 = arith.constant 1.000000e+00 : f32
    %170 = vector.broadcast %cst_78 : f32 to vector<4x16xf32>
    %171 = arith.divf %170, %169 : vector<4x16xf32>
    %cst_79 = arith.constant 1.06140542 : f32
    %172 = vector.broadcast %cst_79 : f32 to vector<4x16xf32>
    %173 = arith.mulf %172, %171 : vector<4x16xf32>
    %cst_80 = arith.constant 1.45315206 : f32
    %174 = vector.broadcast %cst_80 : f32 to vector<4x16xf32>
    %175 = arith.subf %173, %174 : vector<4x16xf32>
    %176 = arith.mulf %175, %171 : vector<4x16xf32>
    %cst_81 = arith.constant 1.42141378 : f32
    %177 = vector.broadcast %cst_81 : f32 to vector<4x16xf32>
    %178 = arith.addf %176, %177 : vector<4x16xf32>
    %179 = arith.mulf %178, %171 : vector<4x16xf32>
    %cst_82 = arith.constant 0.284496725 : f32
    %180 = vector.broadcast %cst_82 : f32 to vector<4x16xf32>
    %181 = arith.subf %179, %180 : vector<4x16xf32>
    %182 = arith.mulf %181, %171 : vector<4x16xf32>
    %cst_83 = arith.constant 0.254829586 : f32
    %183 = vector.broadcast %cst_83 : f32 to vector<4x16xf32>
    %184 = arith.addf %182, %183 : vector<4x16xf32>
    %185 = arith.mulf %184, %171 : vector<4x16xf32>
    %cst_84 = arith.constant 0.000000e+00 : f32
    %186 = vector.broadcast %cst_84 : f32 to vector<4x16xf32>
    %187 = arith.subf %186, %165 : vector<4x16xf32>
    %188 = arith.mulf %187, %165 : vector<4x16xf32>
    %189 = math.exp %188 : vector<4x16xf32>
    %190 = arith.mulf %185, %189 : vector<4x16xf32>
    %cst_85 = arith.constant 1.000000e+00 : f32
    %191 = vector.broadcast %cst_85 : f32 to vector<4x16xf32>
    %192 = arith.subf %191, %190 : vector<4x16xf32>
    %cst_86 = arith.constant 0.000000e+00 : f32
    %193 = vector.broadcast %cst_86 : f32 to vector<4x16xf32>
    %194 = arith.cmpf oge, %164, %193 : vector<4x16xf32>
    %cst_87 = arith.constant 0.000000e+00 : f32
    %195 = vector.broadcast %cst_87 : f32 to vector<4x16xf32>
    %196 = arith.subf %195, %192 : vector<4x16xf32>
    %197 = arith.select %194, %192, %196 : vector<4x16xi1>, vector<4x16xf32>
    %cst_88 = arith.constant 5.000000e-01 : f32
    %198 = vector.broadcast %cst_88 : f32 to vector<4x16xf32>
    %199 = arith.mulf %198, %162 : vector<4x16xf32>
    %cst_89 = arith.constant 1.000000e+00 : f32
    %200 = vector.broadcast %cst_89 : f32 to vector<4x16xf32>
    %201 = arith.addf %200, %197 : vector<4x16xf32>
    %202 = arith.mulf %199, %201 : vector<4x16xf32>
    %203 = arith.addf %202, %1 : vector<4x16xf32>
    %c0_90 = arith.constant 0 : index
    %c6 = arith.constant 6 : index
    %204 = vector.load %arg2[%c0_90, %c6] : memref<8x18xf32, #tpu.memory_space<vmem>>, vector<4x1xf32>
    %cst_91 = arith.constant 0.000000e+00 : f32
    %205 = vector.broadcast %cst_91 : f32 to vector<4x16xf32>
    %cst_92 = arith.constant 0.000000e+00 : f32
    %206 = vector.broadcast %cst_92 : f32 to vector<4x2xf32>
    %207 = vector.extract_strided_slice %203 {offsets = [0, 0], sizes = [4, 14], strides = [1, 1]} : vector<4x16xf32> to vector<4x14xf32>
    %208 = tpu.concatenate %206, %207 in 1 : vector<4x2xf32>, vector<4x14xf32> -> vector<4x16xf32>
    %209 = tpu.concatenate %208, %205 in 0 : vector<4x16xf32>, vector<4x16xf32> -> vector<8x16xf32>
    %c0_93 = arith.constant 0 : index
    %c0_94 = arith.constant 0 : index
    %210 = vector.load %arg11[%c0_93, %c0_94] : memref<40x16xf32, #tpu.memory_space<vmem>>, vector<8x16xf32>
    tpu.vector_store %arg11[%c0_93, %c0_94], %209 {strides = array<i32>} : memref<40x16xf32, #tpu.memory_space<vmem>>, vector<8x16xf32>,
    %cst_95 = arith.constant 0.000000e+00 : f32
    %211 = vector.broadcast %cst_95 : f32 to vector<4x1xf32>
    %212 = vector.extract_strided_slice %203 {offsets = [0, 0], sizes = [4, 15], strides = [1, 1]} : vector<4x16xf32> to vector<4x15xf32>
    %213 = tpu.concatenate %211, %212 in 1 : vector<4x1xf32>, vector<4x15xf32> -> vector<4x16xf32>
    %214 = tpu.concatenate %213, %205 in 0 : vector<4x16xf32>, vector<4x16xf32> -> vector<8x16xf32>
    %c8_96 = arith.constant 8 : index
    %c0_97 = arith.constant 0 : index
    %215 = vector.load %arg11[%c8_96, %c0_97] : memref<40x16xf32, #tpu.memory_space<vmem>>, vector<8x16xf32>
    tpu.vector_store %arg11[%c8_96, %c0_97], %214 {strides = array<i32>} : memref<40x16xf32, #tpu.memory_space<vmem>>, vector<8x16xf32>,
    %216 = tpu.concatenate %203, %205 in 0 : vector<4x16xf32>, vector<4x16xf32> -> vector<8x16xf32>
    %c16_98 = arith.constant 16 : index
    %c0_99 = arith.constant 0 : index
    %217 = vector.load %arg11[%c16_98, %c0_99] : memref<40x16xf32, #tpu.memory_space<vmem>>, vector<8x16xf32>
    tpu.vector_store %arg11[%c16_98, %c0_99], %216 {strides = array<i32>} : memref<40x16xf32, #tpu.memory_space<vmem>>, vector<8x16xf32>,
    %cst_100 = arith.constant 0.000000e+00 : f32
    %218 = vector.broadcast %cst_100 : f32 to vector<4x1xf32>
    %219 = vector.extract_strided_slice %203 {offsets = [0, 1], sizes = [4, 15], strides = [1, 1]} : vector<4x16xf32> to vector<4x15xf32>
    %220 = tpu.concatenate %219, %218 in 1 : vector<4x15xf32>, vector<4x1xf32> -> vector<4x16xf32>
    %221 = tpu.concatenate %220, %205 in 0 : vector<4x16xf32>, vector<4x16xf32> -> vector<8x16xf32>
    %c24_101 = arith.constant 24 : index
    %c0_102 = arith.constant 0 : index
    %222 = vector.load %arg11[%c24_101, %c0_102] : memref<40x16xf32, #tpu.memory_space<vmem>>, vector<8x16xf32>
    tpu.vector_store %arg11[%c24_101, %c0_102], %221 {strides = array<i32>} : memref<40x16xf32, #tpu.memory_space<vmem>>, vector<8x16xf32>,
    %cst_103 = arith.constant 0.000000e+00 : f32
    %223 = vector.broadcast %cst_103 : f32 to vector<4x2xf32>
    %224 = vector.extract_strided_slice %203 {offsets = [0, 2], sizes = [4, 14], strides = [1, 1]} : vector<4x16xf32> to vector<4x14xf32>
    %225 = tpu.concatenate %224, %223 in 1 : vector<4x14xf32>, vector<4x2xf32> -> vector<4x16xf32>
    %226 = tpu.concatenate %225, %205 in 0 : vector<4x16xf32>, vector<4x16xf32> -> vector<8x16xf32>
    %c32_104 = arith.constant 32 : index
    %c0_105 = arith.constant 0 : index
    %227 = vector.load %arg11[%c32_104, %c0_105] : memref<40x16xf32, #tpu.memory_space<vmem>>, vector<8x16xf32>
    tpu.vector_store %arg11[%c32_104, %c0_105], %226 {strides = array<i32>} : memref<40x16xf32, #tpu.memory_space<vmem>>, vector<8x16xf32>,
    %c0_106 = arith.constant 0 : index
    %c0_107 = arith.constant 0 : index
    %228 = vector.load %arg5[%c0_106, %c0_107] : memref<4x40xf32, #tpu.memory_space<vmem>>, vector<4x40xf32>
    %c0_108 = arith.constant 0 : index
    %c0_109 = arith.constant 0 : index
    %229 = vector.load %arg11[%c0_108, %c0_109] : memref<40x16xf32, #tpu.memory_space<vmem>>, vector<40x16xf32>
    %cst_110 = arith.constant dense<0.000000e+00> : vector<4x16xf32>
    %230 = tpu.matmul %228, %229, %cst_110 {dimension_numbers = #tpu.dot_dimension_numbers<[1], [0], [0], [1], [0, 0, 1, 1], [], []>} : vector<4x40xf32>, vector<40x16xf32>, vector<4x16xf32> -> vector<4x16xf32>
    %231 = vector.broadcast %204 : vector<4x1xf32> to vector<4x16xf32>
    %232 = arith.addf %230, %231 : vector<4x16xf32>
    %c0_111 = arith.constant 0 : index
    %c7 = arith.constant 7 : index
    %233 = vector.load %arg2[%c0_111, %c7] : memref<8x18xf32, #tpu.memory_space<vmem>>, vector<4x1xf32>
    %c0_112 = arith.constant 0 : index
    %c8_113 = arith.constant 8 : index
    %234 = vector.load %arg2[%c0_112, %c8_113] : memref<8x18xf32, #tpu.memory_space<vmem>>, vector<4x1xf32>
    %cst_114 = arith.constant dense<0.000000e+00> : vector<4xf32>
    %235 = vector.multi_reduction <add>, %232, %cst_114 [1] : vector<4x16xf32> to vector<4xf32>
    %236 = vector.shape_cast %235 : vector<4xf32> to vector<4x1xf32>
    %cst_115 = arith.constant dense<0.000000e+00> : vector<1xf32>
    %237 = vector.multi_reduction <add>, %236, %cst_115 [0] : vector<4x1xf32> to vector<1xf32>
    %238 = vector.shape_cast %237 : vector<1xf32> to vector<1x1xf32>
    %cst_116 = arith.constant 1.562500e-02 : f32
    %239 = vector.broadcast %cst_116 : f32 to vector<1x1xf32>
    %240 = arith.mulf %238, %239 : vector<1x1xf32>
    %241 = arith.mulf %232, %232 : vector<4x16xf32>
    %cst_117 = arith.constant dense<0.000000e+00> : vector<4xf32>
    %242 = vector.multi_reduction <add>, %241, %cst_117 [1] : vector<4x16xf32> to vector<4xf32>
    %243 = vector.shape_cast %242 : vector<4xf32> to vector<4x1xf32>
    %cst_118 = arith.constant dense<0.000000e+00> : vector<1xf32>
    %244 = vector.multi_reduction <add>, %243, %cst_118 [0] : vector<4x1xf32> to vector<1xf32>
    %245 = vector.shape_cast %244 : vector<1xf32> to vector<1x1xf32>
    %cst_119 = arith.constant 1.562500e-02 : f32
    %246 = vector.broadcast %cst_119 : f32 to vector<1x1xf32>
    %247 = arith.mulf %245, %246 : vector<1x1xf32>
    %248 = arith.mulf %240, %240 : vector<1x1xf32>
    %249 = arith.subf %247, %248 : vector<1x1xf32>
    %cst_120 = arith.constant 0.000000e+00 : f32
    %250 = vector.broadcast %cst_120 : f32 to vector<1x1xf32>
    %251 = arith.maximumf %249, %250 : vector<1x1xf32>
    %cst_121 = arith.constant 9.99999974E-6 : f32
    %252 = vector.broadcast %cst_121 : f32 to vector<1x1xf32>
    %253 = arith.addf %251, %252 : vector<1x1xf32>
    %254 = math.rsqrt %253 : vector<1x1xf32>
    %255 = vector.broadcast %254 : vector<1x1xf32> to vector<4x1xf32>
    %256 = arith.mulf %233, %255 : vector<4x1xf32>
    %257 = vector.broadcast %240 : vector<1x1xf32> to vector<4x1xf32>
    %258 = arith.mulf %257, %256 : vector<4x1xf32>
    %259 = arith.subf %234, %258 : vector<4x1xf32>
    %260 = vector.broadcast %256 : vector<4x1xf32> to vector<4x16xf32>
    %261 = arith.mulf %232, %260 : vector<4x16xf32>
    %262 = vector.broadcast %259 : vector<4x1xf32> to vector<4x16xf32>
    %263 = arith.addf %261, %262 : vector<4x16xf32>
    %cst_122 = arith.constant 0.707106769 : f32
    %264 = vector.broadcast %cst_122 : f32 to vector<4x16xf32>
    %265 = arith.mulf %263, %264 : vector<4x16xf32>
    %266 = math.absf %265 : vector<4x16xf32>
    %cst_123 = arith.constant 0.327591091 : f32
    %267 = vector.broadcast %cst_123 : f32 to vector<4x16xf32>
    %268 = arith.mulf %267, %266 : vector<4x16xf32>
    %cst_124 = arith.constant 1.000000e+00 : f32
    %269 = vector.broadcast %cst_124 : f32 to vector<4x16xf32>
    %270 = arith.addf %269, %268 : vector<4x16xf32>
    %cst_125 = arith.constant 1.000000e+00 : f32
    %271 = vector.broadcast %cst_125 : f32 to vector<4x16xf32>
    %272 = arith.divf %271, %270 : vector<4x16xf32>
    %cst_126 = arith.constant 1.06140542 : f32
    %273 = vector.broadcast %cst_126 : f32 to vector<4x16xf32>
    %274 = arith.mulf %273, %272 : vector<4x16xf32>
    %cst_127 = arith.constant 1.45315206 : f32
    %275 = vector.broadcast %cst_127 : f32 to vector<4x16xf32>
    %276 = arith.subf %274, %275 : vector<4x16xf32>
    %277 = arith.mulf %276, %272 : vector<4x16xf32>
    %cst_128 = arith.constant 1.42141378 : f32
    %278 = vector.broadcast %cst_128 : f32 to vector<4x16xf32>
    %279 = arith.addf %277, %278 : vector<4x16xf32>
    %280 = arith.mulf %279, %272 : vector<4x16xf32>
    %cst_129 = arith.constant 0.284496725 : f32
    %281 = vector.broadcast %cst_129 : f32 to vector<4x16xf32>
    %282 = arith.subf %280, %281 : vector<4x16xf32>
    %283 = arith.mulf %282, %272 : vector<4x16xf32>
    %cst_130 = arith.constant 0.254829586 : f32
    %284 = vector.broadcast %cst_130 : f32 to vector<4x16xf32>
    %285 = arith.addf %283, %284 : vector<4x16xf32>
    %286 = arith.mulf %285, %272 : vector<4x16xf32>
    %cst_131 = arith.constant 0.000000e+00 : f32
    %287 = vector.broadcast %cst_131 : f32 to vector<4x16xf32>
    %288 = arith.subf %287, %266 : vector<4x16xf32>
    %289 = arith.mulf %288, %266 : vector<4x16xf32>
    %290 = math.exp %289 : vector<4x16xf32>
    %291 = arith.mulf %286, %290 : vector<4x16xf32>
    %cst_132 = arith.constant 1.000000e+00 : f32
    %292 = vector.broadcast %cst_132 : f32 to vector<4x16xf32>
    %293 = arith.subf %292, %291 : vector<4x16xf32>
    %cst_133 = arith.constant 0.000000e+00 : f32
    %294 = vector.broadcast %cst_133 : f32 to vector<4x16xf32>
    %295 = arith.cmpf oge, %265, %294 : vector<4x16xf32>
    %cst_134 = arith.constant 0.000000e+00 : f32
    %296 = vector.broadcast %cst_134 : f32 to vector<4x16xf32>
    %297 = arith.subf %296, %293 : vector<4x16xf32>
    %298 = arith.select %295, %293, %297 : vector<4x16xi1>, vector<4x16xf32>
    %cst_135 = arith.constant 5.000000e-01 : f32
    %299 = vector.broadcast %cst_135 : f32 to vector<4x16xf32>
    %300 = arith.mulf %299, %263 : vector<4x16xf32>
    %cst_136 = arith.constant 1.000000e+00 : f32
    %301 = vector.broadcast %cst_136 : f32 to vector<4x16xf32>
    %302 = arith.addf %301, %298 : vector<4x16xf32>
    %303 = arith.mulf %300, %302 : vector<4x16xf32>
    %c0_137 = arith.constant 0 : index
    %c9 = arith.constant 9 : index
    %304 = vector.load %arg2[%c0_137, %c9] : memref<8x18xf32, #tpu.memory_space<vmem>>, vector<4x1xf32>
    %cst_138 = arith.constant 0.000000e+00 : f32
    %305 = vector.broadcast %cst_138 : f32 to vector<4x16xf32>
    %cst_139 = arith.constant 0.000000e+00 : f32
    %306 = vector.broadcast %cst_139 : f32 to vector<4x2xf32>
    %307 = vector.extract_strided_slice %303 {offsets = [0, 0], sizes = [4, 14], strides = [1, 1]} : vector<4x16xf32> to vector<4x14xf32>
    %308 = tpu.concatenate %306, %307 in 1 : vector<4x2xf32>, vector<4x14xf32> -> vector<4x16xf32>
    %309 = tpu.concatenate %308, %305 in 0 : vector<4x16xf32>, vector<4x16xf32> -> vector<8x16xf32>
    %c0_140 = arith.constant 0 : index
    %c0_141 = arith.constant 0 : index
    %310 = vector.load %arg11[%c0_140, %c0_141] : memref<40x16xf32, #tpu.memory_space<vmem>>, vector<8x16xf32>
    tpu.vector_store %arg11[%c0_140, %c0_141], %309 {strides = array<i32>} : memref<40x16xf32, #tpu.memory_space<vmem>>, vector<8x16xf32>,
    %cst_142 = arith.constant 0.000000e+00 : f32
    %311 = vector.broadcast %cst_142 : f32 to vector<4x1xf32>
    %312 = vector.extract_strided_slice %303 {offsets = [0, 0], sizes = [4, 15], strides = [1, 1]} : vector<4x16xf32> to vector<4x15xf32>
    %313 = tpu.concatenate %311, %312 in 1 : vector<4x1xf32>, vector<4x15xf32> -> vector<4x16xf32>
    %314 = tpu.concatenate %313, %305 in 0 : vector<4x16xf32>, vector<4x16xf32> -> vector<8x16xf32>
    %c8_143 = arith.constant 8 : index
    %c0_144 = arith.constant 0 : index
    %315 = vector.load %arg11[%c8_143, %c0_144] : memref<40x16xf32, #tpu.memory_space<vmem>>, vector<8x16xf32>
    tpu.vector_store %arg11[%c8_143, %c0_144], %314 {strides = array<i32>} : memref<40x16xf32, #tpu.memory_space<vmem>>, vector<8x16xf32>,
    %316 = tpu.concatenate %303, %305 in 0 : vector<4x16xf32>, vector<4x16xf32> -> vector<8x16xf32>
    %c16_145 = arith.constant 16 : index
    %c0_146 = arith.constant 0 : index
    %317 = vector.load %arg11[%c16_145, %c0_146] : memref<40x16xf32, #tpu.memory_space<vmem>>, vector<8x16xf32>
    tpu.vector_store %arg11[%c16_145, %c0_146], %316 {strides = array<i32>} : memref<40x16xf32, #tpu.memory_space<vmem>>, vector<8x16xf32>,
    %cst_147 = arith.constant 0.000000e+00 : f32
    %318 = vector.broadcast %cst_147 : f32 to vector<4x1xf32>
    %319 = vector.extract_strided_slice %303 {offsets = [0, 1], sizes = [4, 15], strides = [1, 1]} : vector<4x16xf32> to vector<4x15xf32>
    %320 = tpu.concatenate %319, %318 in 1 : vector<4x15xf32>, vector<4x1xf32> -> vector<4x16xf32>
    %321 = tpu.concatenate %320, %305 in 0 : vector<4x16xf32>, vector<4x16xf32> -> vector<8x16xf32>
    %c24_148 = arith.constant 24 : index
    %c0_149 = arith.constant 0 : index
    %322 = vector.load %arg11[%c24_148, %c0_149] : memref<40x16xf32, #tpu.memory_space<vmem>>, vector<8x16xf32>
    tpu.vector_store %arg11[%c24_148, %c0_149], %321 {strides = array<i32>} : memref<40x16xf32, #tpu.memory_space<vmem>>, vector<8x16xf32>,
    %cst_150 = arith.constant 0.000000e+00 : f32
    %323 = vector.broadcast %cst_150 : f32 to vector<4x2xf32>
    %324 = vector.extract_strided_slice %303 {offsets = [0, 2], sizes = [4, 14], strides = [1, 1]} : vector<4x16xf32> to vector<4x14xf32>
    %325 = tpu.concatenate %324, %323 in 1 : vector<4x14xf32>, vector<4x2xf32> -> vector<4x16xf32>
    %326 = tpu.concatenate %325, %305 in 0 : vector<4x16xf32>, vector<4x16xf32> -> vector<8x16xf32>
    %c32_151 = arith.constant 32 : index
    %c0_152 = arith.constant 0 : index
    %327 = vector.load %arg11[%c32_151, %c0_152] : memref<40x16xf32, #tpu.memory_space<vmem>>, vector<8x16xf32>
    tpu.vector_store %arg11[%c32_151, %c0_152], %326 {strides = array<i32>} : memref<40x16xf32, #tpu.memory_space<vmem>>, vector<8x16xf32>,
    %c0_153 = arith.constant 0 : index
    %c0_154 = arith.constant 0 : index
    %328 = vector.load %arg6[%c0_153, %c0_154] : memref<4x40xf32, #tpu.memory_space<vmem>>, vector<4x40xf32>
    %c0_155 = arith.constant 0 : index
    %c0_156 = arith.constant 0 : index
    %329 = vector.load %arg11[%c0_155, %c0_156] : memref<40x16xf32, #tpu.memory_space<vmem>>, vector<40x16xf32>
    %cst_157 = arith.constant dense<0.000000e+00> : vector<4x16xf32>
    %330 = tpu.matmul %328, %329, %cst_157 {dimension_numbers = #tpu.dot_dimension_numbers<[1], [0], [0], [1], [0, 0, 1, 1], [], []>} : vector<4x40xf32>, vector<40x16xf32>, vector<4x16xf32> -> vector<4x16xf32>
    %331 = vector.broadcast %304 : vector<4x1xf32> to vector<4x16xf32>
    %332 = arith.addf %330, %331 : vector<4x16xf32>
    %c0_158 = arith.constant 0 : index
    %c10 = arith.constant 10 : index
    %333 = vector.load %arg2[%c0_158, %c10] : memref<8x18xf32, #tpu.memory_space<vmem>>, vector<4x1xf32>
    %c0_159 = arith.constant 0 : index
    %c11 = arith.constant 11 : index
    %334 = vector.load %arg2[%c0_159, %c11] : memref<8x18xf32, #tpu.memory_space<vmem>>, vector<4x1xf32>
    %cst_160 = arith.constant dense<0.000000e+00> : vector<4xf32>
    %335 = vector.multi_reduction <add>, %332, %cst_160 [1] : vector<4x16xf32> to vector<4xf32>
    %336 = vector.shape_cast %335 : vector<4xf32> to vector<4x1xf32>
    %cst_161 = arith.constant dense<0.000000e+00> : vector<1xf32>
    %337 = vector.multi_reduction <add>, %336, %cst_161 [0] : vector<4x1xf32> to vector<1xf32>
    %338 = vector.shape_cast %337 : vector<1xf32> to vector<1x1xf32>
    %cst_162 = arith.constant 1.562500e-02 : f32
    %339 = vector.broadcast %cst_162 : f32 to vector<1x1xf32>
    %340 = arith.mulf %338, %339 : vector<1x1xf32>
    %341 = arith.mulf %332, %332 : vector<4x16xf32>
    %cst_163 = arith.constant dense<0.000000e+00> : vector<4xf32>
    %342 = vector.multi_reduction <add>, %341, %cst_163 [1] : vector<4x16xf32> to vector<4xf32>
    %343 = vector.shape_cast %342 : vector<4xf32> to vector<4x1xf32>
    %cst_164 = arith.constant dense<0.000000e+00> : vector<1xf32>
    %344 = vector.multi_reduction <add>, %343, %cst_164 [0] : vector<4x1xf32> to vector<1xf32>
    %345 = vector.shape_cast %344 : vector<1xf32> to vector<1x1xf32>
    %cst_165 = arith.constant 1.562500e-02 : f32
    %346 = vector.broadcast %cst_165 : f32 to vector<1x1xf32>
    %347 = arith.mulf %345, %346 : vector<1x1xf32>
    %348 = arith.mulf %340, %340 : vector<1x1xf32>
    %349 = arith.subf %347, %348 : vector<1x1xf32>
    %cst_166 = arith.constant 0.000000e+00 : f32
    %350 = vector.broadcast %cst_166 : f32 to vector<1x1xf32>
    %351 = arith.maximumf %349, %350 : vector<1x1xf32>
    %cst_167 = arith.constant 9.99999974E-6 : f32
    %352 = vector.broadcast %cst_167 : f32 to vector<1x1xf32>
    %353 = arith.addf %351, %352 : vector<1x1xf32>
    %354 = math.rsqrt %353 : vector<1x1xf32>
    %355 = vector.broadcast %354 : vector<1x1xf32> to vector<4x1xf32>
    %356 = arith.mulf %333, %355 : vector<4x1xf32>
    %357 = vector.broadcast %340 : vector<1x1xf32> to vector<4x1xf32>
    %358 = arith.mulf %357, %356 : vector<4x1xf32>
    %359 = arith.subf %334, %358 : vector<4x1xf32>
    %360 = vector.broadcast %356 : vector<4x1xf32> to vector<4x16xf32>
    %361 = arith.mulf %332, %360 : vector<4x16xf32>
    %362 = vector.broadcast %359 : vector<4x1xf32> to vector<4x16xf32>
    %363 = arith.addf %361, %362 : vector<4x16xf32>
    %cst_168 = arith.constant 0.707106769 : f32
    %364 = vector.broadcast %cst_168 : f32 to vector<4x16xf32>
    %365 = arith.mulf %363, %364 : vector<4x16xf32>
    %366 = math.absf %365 : vector<4x16xf32>
    %cst_169 = arith.constant 0.327591091 : f32
    %367 = vector.broadcast %cst_169 : f32 to vector<4x16xf32>
    %368 = arith.mulf %367, %366 : vector<4x16xf32>
    %cst_170 = arith.constant 1.000000e+00 : f32
    %369 = vector.broadcast %cst_170 : f32 to vector<4x16xf32>
    %370 = arith.addf %369, %368 : vector<4x16xf32>
    %cst_171 = arith.constant 1.000000e+00 : f32
    %371 = vector.broadcast %cst_171 : f32 to vector<4x16xf32>
    %372 = arith.divf %371, %370 : vector<4x16xf32>
    %cst_172 = arith.constant 1.06140542 : f32
    %373 = vector.broadcast %cst_172 : f32 to vector<4x16xf32>
    %374 = arith.mulf %373, %372 : vector<4x16xf32>
    %cst_173 = arith.constant 1.45315206 : f32
    %375 = vector.broadcast %cst_173 : f32 to vector<4x16xf32>
    %376 = arith.subf %374, %375 : vector<4x16xf32>
    %377 = arith.mulf %376, %372 : vector<4x16xf32>
    %cst_174 = arith.constant 1.42141378 : f32
    %378 = vector.broadcast %cst_174 : f32 to vector<4x16xf32>
    %379 = arith.addf %377, %378 : vector<4x16xf32>
    %380 = arith.mulf %379, %372 : vector<4x16xf32>
    %cst_175 = arith.constant 0.284496725 : f32
    %381 = vector.broadcast %cst_175 : f32 to vector<4x16xf32>
    %382 = arith.subf %380, %381 : vector<4x16xf32>
    %383 = arith.mulf %382, %372 : vector<4x16xf32>
    %cst_176 = arith.constant 0.254829586 : f32
    %384 = vector.broadcast %cst_176 : f32 to vector<4x16xf32>
    %385 = arith.addf %383, %384 : vector<4x16xf32>
    %386 = arith.mulf %385, %372 : vector<4x16xf32>
    %cst_177 = arith.constant 0.000000e+00 : f32
    %387 = vector.broadcast %cst_177 : f32 to vector<4x16xf32>
    %388 = arith.subf %387, %366 : vector<4x16xf32>
    %389 = arith.mulf %388, %366 : vector<4x16xf32>
    %390 = math.exp %389 : vector<4x16xf32>
    %391 = arith.mulf %386, %390 : vector<4x16xf32>
    %cst_178 = arith.constant 1.000000e+00 : f32
    %392 = vector.broadcast %cst_178 : f32 to vector<4x16xf32>
    %393 = arith.subf %392, %391 : vector<4x16xf32>
    %cst_179 = arith.constant 0.000000e+00 : f32
    %394 = vector.broadcast %cst_179 : f32 to vector<4x16xf32>
    %395 = arith.cmpf oge, %365, %394 : vector<4x16xf32>
    %cst_180 = arith.constant 0.000000e+00 : f32
    %396 = vector.broadcast %cst_180 : f32 to vector<4x16xf32>
    %397 = arith.subf %396, %393 : vector<4x16xf32>
    %398 = arith.select %395, %393, %397 : vector<4x16xi1>, vector<4x16xf32>
    %cst_181 = arith.constant 5.000000e-01 : f32
    %399 = vector.broadcast %cst_181 : f32 to vector<4x16xf32>
    %400 = arith.mulf %399, %363 : vector<4x16xf32>
    %cst_182 = arith.constant 1.000000e+00 : f32
    %401 = vector.broadcast %cst_182 : f32 to vector<4x16xf32>
    %402 = arith.addf %401, %398 : vector<4x16xf32>
    %403 = arith.mulf %400, %402 : vector<4x16xf32>
    %404 = arith.addf %403, %203 : vector<4x16xf32>
    %c0_183 = arith.constant 0 : index
    %c0_184 = arith.constant 0 : index
    %405 = vector.load %arg7[%c0_183, %c0_184] : memref<8x4xf32, #tpu.memory_space<vmem>>, vector<8x4xf32>
    %cst_185 = arith.constant dense<0.000000e+00> : vector<8x16xf32>
    %406 = tpu.matmul %405, %404, %cst_185 {dimension_numbers = #tpu.dot_dimension_numbers<[1], [0], [0], [1], [0, 0, 1, 1], [], []>} : vector<8x4xf32>, vector<4x16xf32>, vector<8x16xf32> -> vector<8x16xf32>
    %c0_186 = arith.constant 0 : index
    %c12 = arith.constant 12 : index
    %407 = vector.load %arg2[%c0_186, %c12] : memref<8x18xf32, #tpu.memory_space<vmem>>, vector<4x1xf32>
    %cst_187 = arith.constant 0.000000e+00 : f32
    %408 = vector.broadcast %cst_187 : f32 to vector<4x16xf32>
    %cst_188 = arith.constant 0.000000e+00 : f32
    %409 = vector.broadcast %cst_188 : f32 to vector<4x2xf32>
    %410 = vector.extract_strided_slice %404 {offsets = [0, 0], sizes = [4, 14], strides = [1, 1]} : vector<4x16xf32> to vector<4x14xf32>
    %411 = tpu.concatenate %409, %410 in 1 : vector<4x2xf32>, vector<4x14xf32> -> vector<4x16xf32>
    %412 = tpu.concatenate %411, %408 in 0 : vector<4x16xf32>, vector<4x16xf32> -> vector<8x16xf32>
    %c0_189 = arith.constant 0 : index
    %c0_190 = arith.constant 0 : index
    %413 = vector.load %arg11[%c0_189, %c0_190] : memref<40x16xf32, #tpu.memory_space<vmem>>, vector<8x16xf32>
    tpu.vector_store %arg11[%c0_189, %c0_190], %412 {strides = array<i32>} : memref<40x16xf32, #tpu.memory_space<vmem>>, vector<8x16xf32>,
    %cst_191 = arith.constant 0.000000e+00 : f32
    %414 = vector.broadcast %cst_191 : f32 to vector<4x1xf32>
    %415 = vector.extract_strided_slice %404 {offsets = [0, 0], sizes = [4, 15], strides = [1, 1]} : vector<4x16xf32> to vector<4x15xf32>
    %416 = tpu.concatenate %414, %415 in 1 : vector<4x1xf32>, vector<4x15xf32> -> vector<4x16xf32>
    %417 = tpu.concatenate %416, %408 in 0 : vector<4x16xf32>, vector<4x16xf32> -> vector<8x16xf32>
    %c8_192 = arith.constant 8 : index
    %c0_193 = arith.constant 0 : index
    %418 = vector.load %arg11[%c8_192, %c0_193] : memref<40x16xf32, #tpu.memory_space<vmem>>, vector<8x16xf32>
    tpu.vector_store %arg11[%c8_192, %c0_193], %417 {strides = array<i32>} : memref<40x16xf32, #tpu.memory_space<vmem>>, vector<8x16xf32>,
    %419 = tpu.concatenate %404, %408 in 0 : vector<4x16xf32>, vector<4x16xf32> -> vector<8x16xf32>
    %c16_194 = arith.constant 16 : index
    %c0_195 = arith.constant 0 : index
    %420 = vector.load %arg11[%c16_194, %c0_195] : memref<40x16xf32, #tpu.memory_space<vmem>>, vector<8x16xf32>
    tpu.vector_store %arg11[%c16_194, %c0_195], %419 {strides = array<i32>} : memref<40x16xf32, #tpu.memory_space<vmem>>, vector<8x16xf32>,
    %cst_196 = arith.constant 0.000000e+00 : f32
    %421 = vector.broadcast %cst_196 : f32 to vector<4x1xf32>
    %422 = vector.extract_strided_slice %404 {offsets = [0, 1], sizes = [4, 15], strides = [1, 1]} : vector<4x16xf32> to vector<4x15xf32>
    %423 = tpu.concatenate %422, %421 in 1 : vector<4x15xf32>, vector<4x1xf32> -> vector<4x16xf32>
    %424 = tpu.concatenate %423, %408 in 0 : vector<4x16xf32>, vector<4x16xf32> -> vector<8x16xf32>
    %c24_197 = arith.constant 24 : index
    %c0_198 = arith.constant 0 : index
    %425 = vector.load %arg11[%c24_197, %c0_198] : memref<40x16xf32, #tpu.memory_space<vmem>>, vector<8x16xf32>
    tpu.vector_store %arg11[%c24_197, %c0_198], %424 {strides = array<i32>} : memref<40x16xf32, #tpu.memory_space<vmem>>, vector<8x16xf32>,
    %cst_199 = arith.constant 0.000000e+00 : f32
    %426 = vector.broadcast %cst_199 : f32 to vector<4x2xf32>
    %427 = vector.extract_strided_slice %404 {offsets = [0, 2], sizes = [4, 14], strides = [1, 1]} : vector<4x16xf32> to vector<4x14xf32>
    %428 = tpu.concatenate %427, %426 in 1 : vector<4x14xf32>, vector<4x2xf32> -> vector<4x16xf32>
    %429 = tpu.concatenate %428, %408 in 0 : vector<4x16xf32>, vector<4x16xf32> -> vector<8x16xf32>
    %c32_200 = arith.constant 32 : index
    %c0_201 = arith.constant 0 : index
    %430 = vector.load %arg11[%c32_200, %c0_201] : memref<40x16xf32, #tpu.memory_space<vmem>>, vector<8x16xf32>
    tpu.vector_store %arg11[%c32_200, %c0_201], %429 {strides = array<i32>} : memref<40x16xf32, #tpu.memory_space<vmem>>, vector<8x16xf32>,
    %c0_202 = arith.constant 0 : index
    %c0_203 = arith.constant 0 : index
    %431 = vector.load %arg8[%c0_202, %c0_203] : memref<4x40xf32, #tpu.memory_space<vmem>>, vector<4x40xf32>
    %c0_204 = arith.constant 0 : index
    %c0_205 = arith.constant 0 : index
    %432 = vector.load %arg11[%c0_204, %c0_205] : memref<40x16xf32, #tpu.memory_space<vmem>>, vector<40x16xf32>
    %cst_206 = arith.constant dense<0.000000e+00> : vector<4x16xf32>
    %433 = tpu.matmul %431, %432, %cst_206 {dimension_numbers = #tpu.dot_dimension_numbers<[1], [0], [0], [1], [0, 0, 1, 1], [], []>} : vector<4x40xf32>, vector<40x16xf32>, vector<4x16xf32> -> vector<4x16xf32>
    %434 = vector.broadcast %407 : vector<4x1xf32> to vector<4x16xf32>
    %435 = arith.addf %433, %434 : vector<4x16xf32>
    %c0_207 = arith.constant 0 : index
    %c13 = arith.constant 13 : index
    %436 = vector.load %arg2[%c0_207, %c13] : memref<8x18xf32, #tpu.memory_space<vmem>>, vector<4x1xf32>
    %c0_208 = arith.constant 0 : index
    %c14 = arith.constant 14 : index
    %437 = vector.load %arg2[%c0_208, %c14] : memref<8x18xf32, #tpu.memory_space<vmem>>, vector<4x1xf32>
    %cst_209 = arith.constant dense<0.000000e+00> : vector<4xf32>
    %438 = vector.multi_reduction <add>, %435, %cst_209 [1] : vector<4x16xf32> to vector<4xf32>
    %439 = vector.shape_cast %438 : vector<4xf32> to vector<4x1xf32>
    %cst_210 = arith.constant dense<0.000000e+00> : vector<1xf32>
    %440 = vector.multi_reduction <add>, %439, %cst_210 [0] : vector<4x1xf32> to vector<1xf32>
    %441 = vector.shape_cast %440 : vector<1xf32> to vector<1x1xf32>
    %cst_211 = arith.constant 1.562500e-02 : f32
    %442 = vector.broadcast %cst_211 : f32 to vector<1x1xf32>
    %443 = arith.mulf %441, %442 : vector<1x1xf32>
    %444 = arith.mulf %435, %435 : vector<4x16xf32>
    %cst_212 = arith.constant dense<0.000000e+00> : vector<4xf32>
    %445 = vector.multi_reduction <add>, %444, %cst_212 [1] : vector<4x16xf32> to vector<4xf32>
    %446 = vector.shape_cast %445 : vector<4xf32> to vector<4x1xf32>
    %cst_213 = arith.constant dense<0.000000e+00> : vector<1xf32>
    %447 = vector.multi_reduction <add>, %446, %cst_213 [0] : vector<4x1xf32> to vector<1xf32>
    %448 = vector.shape_cast %447 : vector<1xf32> to vector<1x1xf32>
    %cst_214 = arith.constant 1.562500e-02 : f32
    %449 = vector.broadcast %cst_214 : f32 to vector<1x1xf32>
    %450 = arith.mulf %448, %449 : vector<1x1xf32>
    %451 = arith.mulf %443, %443 : vector<1x1xf32>
    %452 = arith.subf %450, %451 : vector<1x1xf32>
    %cst_215 = arith.constant 0.000000e+00 : f32
    %453 = vector.broadcast %cst_215 : f32 to vector<1x1xf32>
    %454 = arith.maximumf %452, %453 : vector<1x1xf32>
    %cst_216 = arith.constant 9.99999974E-6 : f32
    %455 = vector.broadcast %cst_216 : f32 to vector<1x1xf32>
    %456 = arith.addf %454, %455 : vector<1x1xf32>
    %457 = math.rsqrt %456 : vector<1x1xf32>
    %458 = vector.broadcast %457 : vector<1x1xf32> to vector<4x1xf32>
    %459 = arith.mulf %436, %458 : vector<4x1xf32>
    %460 = vector.broadcast %443 : vector<1x1xf32> to vector<4x1xf32>
    %461 = arith.mulf %460, %459 : vector<4x1xf32>
    %462 = arith.subf %437, %461 : vector<4x1xf32>
    %463 = vector.broadcast %459 : vector<4x1xf32> to vector<4x16xf32>
    %464 = arith.mulf %435, %463 : vector<4x16xf32>
    %465 = vector.broadcast %462 : vector<4x1xf32> to vector<4x16xf32>
    %466 = arith.addf %464, %465 : vector<4x16xf32>
    %cst_217 = arith.constant 0.707106769 : f32
    %467 = vector.broadcast %cst_217 : f32 to vector<4x16xf32>
    %468 = arith.mulf %466, %467 : vector<4x16xf32>
    %469 = math.absf %468 : vector<4x16xf32>
    %cst_218 = arith.constant 0.327591091 : f32
    %470 = vector.broadcast %cst_218 : f32 to vector<4x16xf32>
    %471 = arith.mulf %470, %469 : vector<4x16xf32>
    %cst_219 = arith.constant 1.000000e+00 : f32
    %472 = vector.broadcast %cst_219 : f32 to vector<4x16xf32>
    %473 = arith.addf %472, %471 : vector<4x16xf32>
    %cst_220 = arith.constant 1.000000e+00 : f32
    %474 = vector.broadcast %cst_220 : f32 to vector<4x16xf32>
    %475 = arith.divf %474, %473 : vector<4x16xf32>
    %cst_221 = arith.constant 1.06140542 : f32
    %476 = vector.broadcast %cst_221 : f32 to vector<4x16xf32>
    %477 = arith.mulf %476, %475 : vector<4x16xf32>
    %cst_222 = arith.constant 1.45315206 : f32
    %478 = vector.broadcast %cst_222 : f32 to vector<4x16xf32>
    %479 = arith.subf %477, %478 : vector<4x16xf32>
    %480 = arith.mulf %479, %475 : vector<4x16xf32>
    %cst_223 = arith.constant 1.42141378 : f32
    %481 = vector.broadcast %cst_223 : f32 to vector<4x16xf32>
    %482 = arith.addf %480, %481 : vector<4x16xf32>
    %483 = arith.mulf %482, %475 : vector<4x16xf32>
    %cst_224 = arith.constant 0.284496725 : f32
    %484 = vector.broadcast %cst_224 : f32 to vector<4x16xf32>
    %485 = arith.subf %483, %484 : vector<4x16xf32>
    %486 = arith.mulf %485, %475 : vector<4x16xf32>
    %cst_225 = arith.constant 0.254829586 : f32
    %487 = vector.broadcast %cst_225 : f32 to vector<4x16xf32>
    %488 = arith.addf %486, %487 : vector<4x16xf32>
    %489 = arith.mulf %488, %475 : vector<4x16xf32>
    %cst_226 = arith.constant 0.000000e+00 : f32
    %490 = vector.broadcast %cst_226 : f32 to vector<4x16xf32>
    %491 = arith.subf %490, %469 : vector<4x16xf32>
    %492 = arith.mulf %491, %469 : vector<4x16xf32>
    %493 = math.exp %492 : vector<4x16xf32>
    %494 = arith.mulf %489, %493 : vector<4x16xf32>
    %cst_227 = arith.constant 1.000000e+00 : f32
    %495 = vector.broadcast %cst_227 : f32 to vector<4x16xf32>
    %496 = arith.subf %495, %494 : vector<4x16xf32>
    %cst_228 = arith.constant 0.000000e+00 : f32
    %497 = vector.broadcast %cst_228 : f32 to vector<4x16xf32>
    %498 = arith.cmpf oge, %468, %497 : vector<4x16xf32>
    %cst_229 = arith.constant 0.000000e+00 : f32
    %499 = vector.broadcast %cst_229 : f32 to vector<4x16xf32>
    %500 = arith.subf %499, %496 : vector<4x16xf32>
    %501 = arith.select %498, %496, %500 : vector<4x16xi1>, vector<4x16xf32>
    %cst_230 = arith.constant 5.000000e-01 : f32
    %502 = vector.broadcast %cst_230 : f32 to vector<4x16xf32>
    %503 = arith.mulf %502, %466 : vector<4x16xf32>
    %cst_231 = arith.constant 1.000000e+00 : f32
    %504 = vector.broadcast %cst_231 : f32 to vector<4x16xf32>
    %505 = arith.addf %504, %501 : vector<4x16xf32>
    %506 = arith.mulf %503, %505 : vector<4x16xf32>
    %c0_232 = arith.constant 0 : index
    %c15 = arith.constant 15 : index
    %507 = vector.load %arg2[%c0_232, %c15] : memref<8x18xf32, #tpu.memory_space<vmem>>, vector<8x1xf32>
    %cst_233 = arith.constant 0.000000e+00 : f32
    %508 = vector.broadcast %cst_233 : f32 to vector<4x16xf32>
    %cst_234 = arith.constant 0.000000e+00 : f32
    %509 = vector.broadcast %cst_234 : f32 to vector<4x2xf32>
    %510 = vector.extract_strided_slice %506 {offsets = [0, 0], sizes = [4, 14], strides = [1, 1]} : vector<4x16xf32> to vector<4x14xf32>
    %511 = tpu.concatenate %509, %510 in 1 : vector<4x2xf32>, vector<4x14xf32> -> vector<4x16xf32>
    %512 = tpu.concatenate %511, %508 in 0 : vector<4x16xf32>, vector<4x16xf32> -> vector<8x16xf32>
    %c0_235 = arith.constant 0 : index
    %c0_236 = arith.constant 0 : index
    %513 = vector.load %arg11[%c0_235, %c0_236] : memref<40x16xf32, #tpu.memory_space<vmem>>, vector<8x16xf32>
    tpu.vector_store %arg11[%c0_235, %c0_236], %512 {strides = array<i32>} : memref<40x16xf32, #tpu.memory_space<vmem>>, vector<8x16xf32>,
    %cst_237 = arith.constant 0.000000e+00 : f32
    %514 = vector.broadcast %cst_237 : f32 to vector<4x1xf32>
    %515 = vector.extract_strided_slice %506 {offsets = [0, 0], sizes = [4, 15], strides = [1, 1]} : vector<4x16xf32> to vector<4x15xf32>
    %516 = tpu.concatenate %514, %515 in 1 : vector<4x1xf32>, vector<4x15xf32> -> vector<4x16xf32>
    %517 = tpu.concatenate %516, %508 in 0 : vector<4x16xf32>, vector<4x16xf32> -> vector<8x16xf32>
    %c8_238 = arith.constant 8 : index
    %c0_239 = arith.constant 0 : index
    %518 = vector.load %arg11[%c8_238, %c0_239] : memref<40x16xf32, #tpu.memory_space<vmem>>, vector<8x16xf32>
    tpu.vector_store %arg11[%c8_238, %c0_239], %517 {strides = array<i32>} : memref<40x16xf32, #tpu.memory_space<vmem>>, vector<8x16xf32>,
    %519 = tpu.concatenate %506, %508 in 0 : vector<4x16xf32>, vector<4x16xf32> -> vector<8x16xf32>
    %c16_240 = arith.constant 16 : index
    %c0_241 = arith.constant 0 : index
    %520 = vector.load %arg11[%c16_240, %c0_241] : memref<40x16xf32, #tpu.memory_space<vmem>>, vector<8x16xf32>
    tpu.vector_store %arg11[%c16_240, %c0_241], %519 {strides = array<i32>} : memref<40x16xf32, #tpu.memory_space<vmem>>, vector<8x16xf32>,
    %cst_242 = arith.constant 0.000000e+00 : f32
    %521 = vector.broadcast %cst_242 : f32 to vector<4x1xf32>
    %522 = vector.extract_strided_slice %506 {offsets = [0, 1], sizes = [4, 15], strides = [1, 1]} : vector<4x16xf32> to vector<4x15xf32>
    %523 = tpu.concatenate %522, %521 in 1 : vector<4x15xf32>, vector<4x1xf32> -> vector<4x16xf32>
    %524 = tpu.concatenate %523, %508 in 0 : vector<4x16xf32>, vector<4x16xf32> -> vector<8x16xf32>
    %c24_243 = arith.constant 24 : index
    %c0_244 = arith.constant 0 : index
    %525 = vector.load %arg11[%c24_243, %c0_244] : memref<40x16xf32, #tpu.memory_space<vmem>>, vector<8x16xf32>
    tpu.vector_store %arg11[%c24_243, %c0_244], %524 {strides = array<i32>} : memref<40x16xf32, #tpu.memory_space<vmem>>, vector<8x16xf32>,
    %cst_245 = arith.constant 0.000000e+00 : f32
    %526 = vector.broadcast %cst_245 : f32 to vector<4x2xf32>
    %527 = vector.extract_strided_slice %506 {offsets = [0, 2], sizes = [4, 14], strides = [1, 1]} : vector<4x16xf32> to vector<4x14xf32>
    %528 = tpu.concatenate %527, %526 in 1 : vector<4x14xf32>, vector<4x2xf32> -> vector<4x16xf32>
    %529 = tpu.concatenate %528, %508 in 0 : vector<4x16xf32>, vector<4x16xf32> -> vector<8x16xf32>
    %c32_246 = arith.constant 32 : index
    %c0_247 = arith.constant 0 : index
    %530 = vector.load %arg11[%c32_246, %c0_247] : memref<40x16xf32, #tpu.memory_space<vmem>>, vector<8x16xf32>
    tpu.vector_store %arg11[%c32_246, %c0_247], %529 {strides = array<i32>} : memref<40x16xf32, #tpu.memory_space<vmem>>, vector<8x16xf32>,
    %c0_248 = arith.constant 0 : index
    %c0_249 = arith.constant 0 : index
    %531 = vector.load %arg9[%c0_248, %c0_249] : memref<8x40xf32, #tpu.memory_space<vmem>>, vector<8x40xf32>
    %c0_250 = arith.constant 0 : index
    %c0_251 = arith.constant 0 : index
    %532 = vector.load %arg11[%c0_250, %c0_251] : memref<40x16xf32, #tpu.memory_space<vmem>>, vector<40x16xf32>
    %cst_252 = arith.constant dense<0.000000e+00> : vector<8x16xf32>
    %533 = tpu.matmul %531, %532, %cst_252 {dimension_numbers = #tpu.dot_dimension_numbers<[1], [0], [0], [1], [0, 0, 1, 1], [], []>} : vector<8x40xf32>, vector<40x16xf32>, vector<8x16xf32> -> vector<8x16xf32>
    %534 = vector.broadcast %507 : vector<8x1xf32> to vector<8x16xf32>
    %535 = arith.addf %533, %534 : vector<8x16xf32>
    %c0_253 = arith.constant 0 : index
    %c16_254 = arith.constant 16 : index
    %536 = vector.load %arg2[%c0_253, %c16_254] : memref<8x18xf32, #tpu.memory_space<vmem>>, vector<8x1xf32>
    %c0_255 = arith.constant 0 : index
    %c17 = arith.constant 17 : index
    %537 = vector.load %arg2[%c0_255, %c17] : memref<8x18xf32, #tpu.memory_space<vmem>>, vector<8x1xf32>
    %cst_256 = arith.constant dense<0.000000e+00> : vector<8xf32>
    %538 = vector.multi_reduction <add>, %535, %cst_256 [1] : vector<8x16xf32> to vector<8xf32>
    %539 = vector.shape_cast %538 : vector<8xf32> to vector<8x1xf32>
    %cst_257 = arith.constant dense<0.000000e+00> : vector<1xf32>
    %540 = vector.multi_reduction <add>, %539, %cst_257 [0] : vector<8x1xf32> to vector<1xf32>
    %541 = vector.shape_cast %540 : vector<1xf32> to vector<1x1xf32>
    %cst_258 = arith.constant 7.812500e-03 : f32
    %542 = vector.broadcast %cst_258 : f32 to vector<1x1xf32>
    %543 = arith.mulf %541, %542 : vector<1x1xf32>
    %544 = arith.mulf %535, %535 : vector<8x16xf32>
    %cst_259 = arith.constant dense<0.000000e+00> : vector<8xf32>
    %545 = vector.multi_reduction <add>, %544, %cst_259 [1] : vector<8x16xf32> to vector<8xf32>
    %546 = vector.shape_cast %545 : vector<8xf32> to vector<8x1xf32>
    %cst_260 = arith.constant dense<0.000000e+00> : vector<1xf32>
    %547 = vector.multi_reduction <add>, %546, %cst_260 [0] : vector<8x1xf32> to vector<1xf32>
    %548 = vector.shape_cast %547 : vector<1xf32> to vector<1x1xf32>
    %cst_261 = arith.constant 7.812500e-03 : f32
    %549 = vector.broadcast %cst_261 : f32 to vector<1x1xf32>
    %550 = arith.mulf %548, %549 : vector<1x1xf32>
    %551 = arith.mulf %543, %543 : vector<1x1xf32>
    %552 = arith.subf %550, %551 : vector<1x1xf32>
    %cst_262 = arith.constant 0.000000e+00 : f32
    %553 = vector.broadcast %cst_262 : f32 to vector<1x1xf32>
    %554 = arith.maximumf %552, %553 : vector<1x1xf32>
    %cst_263 = arith.constant 9.99999974E-6 : f32
    %555 = vector.broadcast %cst_263 : f32 to vector<1x1xf32>
    %556 = arith.addf %554, %555 : vector<1x1xf32>
    %557 = math.rsqrt %556 : vector<1x1xf32>
    %558 = vector.broadcast %557 : vector<1x1xf32> to vector<8x1xf32>
    %559 = arith.mulf %536, %558 : vector<8x1xf32>
    %560 = vector.broadcast %543 : vector<1x1xf32> to vector<8x1xf32>
    %561 = arith.mulf %560, %559 : vector<8x1xf32>
    %562 = arith.subf %537, %561 : vector<8x1xf32>
    %563 = vector.broadcast %559 : vector<8x1xf32> to vector<8x16xf32>
    %564 = arith.mulf %535, %563 : vector<8x16xf32>
    %565 = vector.broadcast %562 : vector<8x1xf32> to vector<8x16xf32>
    %566 = arith.addf %564, %565 : vector<8x16xf32>
    %cst_264 = arith.constant 0.707106769 : f32
    %567 = vector.broadcast %cst_264 : f32 to vector<8x16xf32>
    %568 = arith.mulf %566, %567 : vector<8x16xf32>
    %569 = math.absf %568 : vector<8x16xf32>
    %cst_265 = arith.constant 0.327591091 : f32
    %570 = vector.broadcast %cst_265 : f32 to vector<8x16xf32>
    %571 = arith.mulf %570, %569 : vector<8x16xf32>
    %cst_266 = arith.constant 1.000000e+00 : f32
    %572 = vector.broadcast %cst_266 : f32 to vector<8x16xf32>
    %573 = arith.addf %572, %571 : vector<8x16xf32>
    %cst_267 = arith.constant 1.000000e+00 : f32
    %574 = vector.broadcast %cst_267 : f32 to vector<8x16xf32>
    %575 = arith.divf %574, %573 : vector<8x16xf32>
    %cst_268 = arith.constant 1.06140542 : f32
    %576 = vector.broadcast %cst_268 : f32 to vector<8x16xf32>
    %577 = arith.mulf %576, %575 : vector<8x16xf32>
    %cst_269 = arith.constant 1.45315206 : f32
    %578 = vector.broadcast %cst_269 : f32 to vector<8x16xf32>
    %579 = arith.subf %577, %578 : vector<8x16xf32>
    %580 = arith.mulf %579, %575 : vector<8x16xf32>
    %cst_270 = arith.constant 1.42141378 : f32
    %581 = vector.broadcast %cst_270 : f32 to vector<8x16xf32>
    %582 = arith.addf %580, %581 : vector<8x16xf32>
    %583 = arith.mulf %582, %575 : vector<8x16xf32>
    %cst_271 = arith.constant 0.284496725 : f32
    %584 = vector.broadcast %cst_271 : f32 to vector<8x16xf32>
    %585 = arith.subf %583, %584 : vector<8x16xf32>
    %586 = arith.mulf %585, %575 : vector<8x16xf32>
    %cst_272 = arith.constant 0.254829586 : f32
    %587 = vector.broadcast %cst_272 : f32 to vector<8x16xf32>
    %588 = arith.addf %586, %587 : vector<8x16xf32>
    %589 = arith.mulf %588, %575 : vector<8x16xf32>
    %cst_273 = arith.constant 0.000000e+00 : f32
    %590 = vector.broadcast %cst_273 : f32 to vector<8x16xf32>
    %591 = arith.subf %590, %569 : vector<8x16xf32>
    %592 = arith.mulf %591, %569 : vector<8x16xf32>
    %593 = math.exp %592 : vector<8x16xf32>
    %594 = arith.mulf %589, %593 : vector<8x16xf32>
    %cst_274 = arith.constant 1.000000e+00 : f32
    %595 = vector.broadcast %cst_274 : f32 to vector<8x16xf32>
    %596 = arith.subf %595, %594 : vector<8x16xf32>
    %cst_275 = arith.constant 0.000000e+00 : f32
    %597 = vector.broadcast %cst_275 : f32 to vector<8x16xf32>
    %598 = arith.cmpf oge, %568, %597 : vector<8x16xf32>
    %cst_276 = arith.constant 0.000000e+00 : f32
    %599 = vector.broadcast %cst_276 : f32 to vector<8x16xf32>
    %600 = arith.subf %599, %596 : vector<8x16xf32>
    %601 = arith.select %598, %596, %600 : vector<8x16xi1>, vector<8x16xf32>
    %cst_277 = arith.constant 5.000000e-01 : f32
    %602 = vector.broadcast %cst_277 : f32 to vector<8x16xf32>
    %603 = arith.mulf %602, %566 : vector<8x16xf32>
    %cst_278 = arith.constant 1.000000e+00 : f32
    %604 = vector.broadcast %cst_278 : f32 to vector<8x16xf32>
    %605 = arith.addf %604, %601 : vector<8x16xf32>
    %606 = arith.mulf %603, %605 : vector<8x16xf32>
    %607 = arith.addf %606, %406 : vector<8x16xf32>
    %cst_279 = arith.constant 0.000000e+00 : f32
    %608 = vector.broadcast %cst_279 : f32 to vector<8x2xf32>
    %609 = vector.extract_strided_slice %607 {offsets = [0, 0], sizes = [8, 14], strides = [1, 1]} : vector<8x16xf32> to vector<8x14xf32>
    %610 = tpu.concatenate %608, %609 in 1 : vector<8x2xf32>, vector<8x14xf32> -> vector<8x16xf32>
    %cst_280 = arith.constant 0.000000e+00 : f32
    %611 = vector.broadcast %cst_280 : f32 to vector<8x1xf32>
    %612 = vector.extract_strided_slice %607 {offsets = [0, 0], sizes = [8, 15], strides = [1, 1]} : vector<8x16xf32> to vector<8x15xf32>
    %613 = tpu.concatenate %611, %612 in 1 : vector<8x1xf32>, vector<8x15xf32> -> vector<8x16xf32>
    %cst_281 = arith.constant 0.000000e+00 : f32
    %614 = vector.broadcast %cst_281 : f32 to vector<8x1xf32>
    %615 = vector.extract_strided_slice %607 {offsets = [0, 1], sizes = [8, 15], strides = [1, 1]} : vector<8x16xf32> to vector<8x15xf32>
    %616 = tpu.concatenate %615, %614 in 1 : vector<8x15xf32>, vector<8x1xf32> -> vector<8x16xf32>
    %cst_282 = arith.constant 0.000000e+00 : f32
    %617 = vector.broadcast %cst_282 : f32 to vector<8x2xf32>
    %618 = vector.extract_strided_slice %607 {offsets = [0, 2], sizes = [8, 14], strides = [1, 1]} : vector<8x16xf32> to vector<8x14xf32>
    %619 = tpu.concatenate %618, %617 in 1 : vector<8x14xf32>, vector<8x2xf32> -> vector<8x16xf32>
    %cst_283 = arith.constant -2.343750e-02 : f32
    %620 = vector.broadcast %cst_283 : f32 to vector<8x16xf32>
    %621 = arith.mulf %620, %610 : vector<8x16xf32>
    %cst_284 = arith.constant 0.2265625 : f32
    %622 = vector.broadcast %cst_284 : f32 to vector<8x16xf32>
    %623 = arith.mulf %622, %613 : vector<8x16xf32>
    %624 = arith.addf %621, %623 : vector<8x16xf32>
    %cst_285 = arith.constant 0.8671875 : f32
    %625 = vector.broadcast %cst_285 : f32 to vector<8x16xf32>
    %626 = arith.mulf %625, %607 : vector<8x16xf32>
    %627 = arith.addf %624, %626 : vector<8x16xf32>
    %cst_286 = arith.constant -7.031250e-02 : f32
    %628 = vector.broadcast %cst_286 : f32 to vector<8x16xf32>
    %629 = arith.mulf %628, %616 : vector<8x16xf32>
    %630 = arith.addf %627, %629 : vector<8x16xf32>
    %cst_287 = arith.constant -7.031250e-02 : f32
    %631 = vector.broadcast %cst_287 : f32 to vector<8x16xf32>
    %632 = arith.mulf %631, %613 : vector<8x16xf32>
    %cst_288 = arith.constant 0.8671875 : f32
    %633 = vector.broadcast %cst_288 : f32 to vector<8x16xf32>
    %634 = arith.mulf %633, %607 : vector<8x16xf32>
    %635 = arith.addf %632, %634 : vector<8x16xf32>
    %cst_289 = arith.constant 0.2265625 : f32
    %636 = vector.broadcast %cst_289 : f32 to vector<8x16xf32>
    %637 = arith.mulf %636, %616 : vector<8x16xf32>
    %638 = arith.addf %635, %637 : vector<8x16xf32>
    %cst_290 = arith.constant -2.343750e-02 : f32
    %639 = vector.broadcast %cst_290 : f32 to vector<8x16xf32>
    %640 = arith.mulf %639, %619 : vector<8x16xf32>
    %641 = arith.addf %638, %640 : vector<8x16xf32>
    %642 = vector.extract_strided_slice %607 {offsets = [0, 1], sizes = [8, 1], strides = [1, 1]} : vector<8x16xf32> to vector<8x1xf32>
    %643 = vector.extract_strided_slice %607 {offsets = [0, 2], sizes = [8, 1], strides = [1, 1]} : vector<8x16xf32> to vector<8x1xf32>
    %644 = vector.extract_strided_slice %607 {offsets = [0, 14], sizes = [8, 1], strides = [1, 1]} : vector<8x16xf32> to vector<8x1xf32>
    %645 = vector.extract_strided_slice %607 {offsets = [0, 13], sizes = [8, 1], strides = [1, 1]} : vector<8x16xf32> to vector<8x1xf32>
    %c0_i32 = arith.constant 0 : i32
    %646 = vector.broadcast %c0_i32 : i32 to vector<1x16xi32>
    %647 = arith.cmpi eq, %2, %646 : vector<1x16xi32>
    %cst_291 = arith.constant -2.343750e-02 : f32
    %648 = vector.broadcast %cst_291 : f32 to vector<8x1xf32>
    %649 = arith.mulf %648, %643 : vector<8x1xf32>
    %cst_292 = arith.constant 0.2265625 : f32
    %650 = vector.broadcast %cst_292 : f32 to vector<8x1xf32>
    %651 = arith.mulf %650, %642 : vector<8x1xf32>
    %652 = arith.addf %649, %651 : vector<8x1xf32>
    %cst_293 = arith.constant 0.000000e+00 : f32
    %653 = vector.shape_cast %647 : vector<1x16xi1> to vector<1x16xi1>
    %654 = vector.broadcast %653 : vector<1x16xi1> to vector<8x16xi1>
    %655 = vector.shape_cast %652 : vector<8x1xf32> to vector<8x1xf32>
    %656 = vector.broadcast %655 : vector<8x1xf32> to vector<8x16xf32>
    %657 = vector.broadcast %cst_293 : f32 to vector<8x16xf32>
    %658 = arith.select %654, %656, %657 : vector<8x16xi1>, vector<8x16xf32>
    %659 = arith.addf %630, %658 : vector<8x16xf32>
    %c1_i32 = arith.constant 1 : i32
    %660 = vector.broadcast %c1_i32 : i32 to vector<1x16xi32>
    %661 = arith.cmpi eq, %2, %660 : vector<1x16xi32>
    %cst_294 = arith.constant -2.343750e-02 : f32
    %662 = vector.broadcast %cst_294 : f32 to vector<8x1xf32>
    %663 = arith.mulf %662, %642 : vector<8x1xf32>
    %cst_295 = arith.constant 0.000000e+00 : f32
    %664 = vector.shape_cast %661 : vector<1x16xi1> to vector<1x16xi1>
    %665 = vector.broadcast %664 : vector<1x16xi1> to vector<8x16xi1>
    %666 = vector.shape_cast %663 : vector<8x1xf32> to vector<8x1xf32>
    %667 = vector.broadcast %666 : vector<8x1xf32> to vector<8x16xf32>
    %668 = vector.broadcast %cst_295 : f32 to vector<8x16xf32>
    %669 = arith.select %665, %667, %668 : vector<8x16xi1>, vector<8x16xf32>
    %670 = arith.addf %659, %669 : vector<8x16xf32>
    %c15_i32 = arith.constant 15 : i32
    %671 = vector.broadcast %c15_i32 : i32 to vector<1x16xi32>
    %672 = arith.cmpi eq, %2, %671 : vector<1x16xi32>
    %cst_296 = arith.constant -7.031250e-02 : f32
    %673 = vector.broadcast %cst_296 : f32 to vector<8x1xf32>
    %674 = arith.mulf %673, %644 : vector<8x1xf32>
    %cst_297 = arith.constant 0.000000e+00 : f32
    %675 = vector.shape_cast %672 : vector<1x16xi1> to vector<1x16xi1>
    %676 = vector.broadcast %675 : vector<1x16xi1> to vector<8x16xi1>
    %677 = vector.shape_cast %674 : vector<8x1xf32> to vector<8x1xf32>
    %678 = vector.broadcast %677 : vector<8x1xf32> to vector<8x16xf32>
    %679 = vector.broadcast %cst_297 : f32 to vector<8x16xf32>
    %680 = arith.select %676, %678, %679 : vector<8x16xi1>, vector<8x16xf32>
    %681 = arith.addf %670, %680 : vector<8x16xf32>
    %c0_i32_298 = arith.constant 0 : i32
    %682 = vector.broadcast %c0_i32_298 : i32 to vector<1x16xi32>
    %683 = arith.cmpi eq, %2, %682 : vector<1x16xi32>
    %cst_299 = arith.constant -7.031250e-02 : f32
    %684 = vector.broadcast %cst_299 : f32 to vector<8x1xf32>
    %685 = arith.mulf %684, %642 : vector<8x1xf32>
    %cst_300 = arith.constant 0.000000e+00 : f32
    %686 = vector.shape_cast %683 : vector<1x16xi1> to vector<1x16xi1>
    %687 = vector.broadcast %686 : vector<1x16xi1> to vector<8x16xi1>
    %688 = vector.shape_cast %685 : vector<8x1xf32> to vector<8x1xf32>
    %689 = vector.broadcast %688 : vector<8x1xf32> to vector<8x16xf32>
    %690 = vector.broadcast %cst_300 : f32 to vector<8x16xf32>
    %691 = arith.select %687, %689, %690 : vector<8x16xi1>, vector<8x16xf32>
    %692 = arith.addf %641, %691 : vector<8x16xf32>
    %c14_i32 = arith.constant 14 : i32
    %693 = vector.broadcast %c14_i32 : i32 to vector<1x16xi32>
    %694 = arith.cmpi eq, %2, %693 : vector<1x16xi32>
    %cst_301 = arith.constant -2.343750e-02 : f32
    %695 = vector.broadcast %cst_301 : f32 to vector<8x1xf32>
    %696 = arith.mulf %695, %644 : vector<8x1xf32>
    %cst_302 = arith.constant 0.000000e+00 : f32
    %697 = vector.shape_cast %694 : vector<1x16xi1> to vector<1x16xi1>
    %698 = vector.broadcast %697 : vector<1x16xi1> to vector<8x16xi1>
    %699 = vector.shape_cast %696 : vector<8x1xf32> to vector<8x1xf32>
    %700 = vector.broadcast %699 : vector<8x1xf32> to vector<8x16xf32>
    %701 = vector.broadcast %cst_302 : f32 to vector<8x16xf32>
    %702 = arith.select %698, %700, %701 : vector<8x16xi1>, vector<8x16xf32>
    %703 = arith.addf %692, %702 : vector<8x16xf32>
    %c15_i32_303 = arith.constant 15 : i32
    %704 = vector.broadcast %c15_i32_303 : i32 to vector<1x16xi32>
    %705 = arith.cmpi eq, %2, %704 : vector<1x16xi32>
    %cst_304 = arith.constant 0.2265625 : f32
    %706 = vector.broadcast %cst_304 : f32 to vector<8x1xf32>
    %707 = arith.mulf %706, %644 : vector<8x1xf32>
    %cst_305 = arith.constant -2.343750e-02 : f32
    %708 = vector.broadcast %cst_305 : f32 to vector<8x1xf32>
    %709 = arith.mulf %708, %645 : vector<8x1xf32>
    %710 = arith.addf %707, %709 : vector<8x1xf32>
    %cst_306 = arith.constant 0.000000e+00 : f32
    %711 = vector.shape_cast %705 : vector<1x16xi1> to vector<1x16xi1>
    %712 = vector.broadcast %711 : vector<1x16xi1> to vector<8x16xi1>
    %713 = vector.shape_cast %710 : vector<8x1xf32> to vector<8x1xf32>
    %714 = vector.broadcast %713 : vector<8x1xf32> to vector<8x16xf32>
    %715 = vector.broadcast %cst_306 : f32 to vector<8x16xf32>
    %716 = arith.select %712, %714, %715 : vector<8x16xi1>, vector<8x16xf32>
    %717 = arith.addf %703, %716 : vector<8x16xf32>
    %c0_307 = arith.constant 0 : index
    %c0_308 = arith.constant 0 : index
    %c0_309 = arith.constant 0 : index
    %c0_310 = arith.constant 0 : index
    %718 = vector.load %arg10[%c0_307, %c0_308, %c0_309, %c0_310] : memref<1x2x8x16xf32, #tpu.memory_space<vmem>>, vector<1x1x8x16xf32>
    %719 = vector.shape_cast %718 : vector<1x1x8x16xf32> to vector<8x16xf32>
    %720 = vector.shape_cast %681 : vector<8x16xf32> to vector<1x1x8x16xf32>
    tpu.vector_store %arg10[%c0_307, %c0_308, %c0_309, %c0_310], %720 {strides = array<i32>} : memref<1x2x8x16xf32, #tpu.memory_space<vmem>>, vector<1x1x8x16xf32>,
    %c0_311 = arith.constant 0 : index
    %c1_312 = arith.constant 1 : index
    %c0_313 = arith.constant 0 : index
    %c0_314 = arith.constant 0 : index
    %721 = vector.load %arg10[%c0_311, %c1_312, %c0_313, %c0_314] : memref<1x2x8x16xf32, #tpu.memory_space<vmem>>, vector<1x1x8x16xf32>
    %722 = vector.shape_cast %721 : vector<1x1x8x16xf32> to vector<8x16xf32>
    %723 = vector.shape_cast %717 : vector<8x16xf32> to vector<1x1x8x16xf32>
    tpu.vector_store %arg10[%c0_311, %c1_312, %c0_313, %c0_314], %723 {strides = array<i32>} : memref<1x2x8x16xf32, #tpu.memory_space<vmem>>, vector<1x1x8x16xf32>,
    return
  }
  func.func @transform_0(%arg0: i32) -> (i32, i32, i32) {
    %c0_i32 = arith.constant 0 : i32
    %c0_i32_0 = arith.constant 0 : i32
    %c0_i32_1 = arith.constant 0 : i32
    return %arg0, %c0_i32, %c0_i32_0 : i32, i32, i32
  }
  func.func @transform_1(%arg0: i32) -> (i32, i32) {
    %c0_i32 = arith.constant 0 : i32
    %c0_i32_0 = arith.constant 0 : i32
    %c0_i32_1 = arith.constant 0 : i32
    return %c0_i32, %c0_i32_0 : i32, i32
  }
  func.func @transform_2(%arg0: i32) -> (i32, i32) {
    %c0_i32 = arith.constant 0 : i32
    %c0_i32_0 = arith.constant 0 : i32
    %c0_i32_1 = arith.constant 0 : i32
    return %c0_i32, %c0_i32_0 : i32, i32
  }
  func.func @transform_3(%arg0: i32) -> (i32, i32) {
    %c0_i32 = arith.constant 0 : i32
    %c0_i32_0 = arith.constant 0 : i32
    %c0_i32_1 = arith.constant 0 : i32
    return %c0_i32, %c0_i32_0 : i32, i32
  }
  func.func @transform_4(%arg0: i32) -> (i32, i32) {
    %c0_i32 = arith.constant 0 : i32
    %c0_i32_0 = arith.constant 0 : i32
    %c0_i32_1 = arith.constant 0 : i32
    return %c0_i32, %c0_i32_0 : i32, i32
  }
  func.func @transform_5(%arg0: i32) -> (i32, i32) {
    %c0_i32 = arith.constant 0 : i32
    %c0_i32_0 = arith.constant 0 : i32
    %c0_i32_1 = arith.constant 0 : i32
    return %c0_i32, %c0_i32_0 : i32, i32
  }
  func.func @transform_6(%arg0: i32) -> (i32, i32) {
    %c0_i32 = arith.constant 0 : i32
    %c0_i32_0 = arith.constant 0 : i32
    %c0_i32_1 = arith.constant 0 : i32
    return %c0_i32, %c0_i32_0 : i32, i32
  }
  func.func @transform_7(%arg0: i32) -> (i32, i32) {
    %c0_i32 = arith.constant 0 : i32
    %c0_i32_0 = arith.constant 0 : i32
    %c0_i32_1 = arith.constant 0 : i32
    return %c0_i32, %c0_i32_0 : i32, i32
  }
  func.func @transform_8(%arg0: i32) -> (i32, i32) {
    %c0_i32 = arith.constant 0 : i32
    %c0_i32_0 = arith.constant 0 : i32
    %c0_i32_1 = arith.constant 0 : i32
    return %c0_i32, %c0_i32_0 : i32, i32
  }
  func.func @transform_9(%arg0: i32) -> (i32, i32, i32, i32) {
    %c0_i32 = arith.constant 0 : i32
    %c0_i32_0 = arith.constant 0 : i32
    %c0_i32_1 = arith.constant 0 : i32
    %c0_i32_2 = arith.constant 0 : i32
    return %arg0, %c0_i32, %c0_i32_0, %c0_i32_1 : i32, i32, i32, i32
  }
}

module attributes {stable_mosaic.version = 11 : i64} {
  func.func @kernel(%arg0: i32, %arg1: memref<1x4x16xf32, #tpu.memory_space<vmem>>, %arg2: memref<8x18xf32, #tpu.memory_space<vmem>>, %arg3: memref<4x40xf32, #tpu.memory_space<vmem>>, %arg4: memref<4x40xf32, #tpu.memory_space<vmem>>, %arg5: memref<4x40xf32, #tpu.memory_space<vmem>>, %arg6: memref<4x40xf32, #tpu.memory_space<vmem>>, %arg7: memref<8x4xf32, #tpu.memory_space<vmem>>, %arg8: memref<4x40xf32, #tpu.memory_space<vmem>>, %arg9: memref<8x40xf32, #tpu.memory_space<vmem>>, %arg10: memref<1x2x8x16xf32, #tpu.memory_space<vmem>>, %arg11: memref<40x16xf32, #tpu.memory_space<vmem>>) attributes {dimension_semantics = [#tpu.dimension_semantics<parallel>], iteration_bounds = array<i64: 2>, scalar_prefetch = 0 : i64, scratch_operands = 1 : i64, tpu.core_type = #tpu.core_type<tc>, window_params = [{transform_indices = @transform_0, window_bounds = array<i64: 1, 4, 16>}, {pipeline_mode = #tpu.pipeline_mode<synchronous>, transform_indices = @transform_1, window_bounds = array<i64: 8, 18>}, {pipeline_mode = #tpu.pipeline_mode<synchronous>, transform_indices = @transform_2, window_bounds = array<i64: 4, 40>}, {pipeline_mode = #tpu.pipeline_mode<synchronous>, transform_indices = @transform_3, window_bounds = array<i64: 4, 40>}, {pipeline_mode = #tpu.pipeline_mode<synchronous>, transform_indices = @transform_4, window_bounds = array<i64: 4, 40>}, {pipeline_mode = #tpu.pipeline_mode<synchronous>, transform_indices = @transform_5, window_bounds = array<i64: 4, 40>}, {pipeline_mode = #tpu.pipeline_mode<synchronous>, transform_indices = @transform_6, window_bounds = array<i64: 8, 4>}, {pipeline_mode = #tpu.pipeline_mode<synchronous>, transform_indices = @transform_7, window_bounds = array<i64: 4, 40>}, {pipeline_mode = #tpu.pipeline_mode<synchronous>, transform_indices = @transform_8, window_bounds = array<i64: 8, 40>}, {transform_indices = @transform_9, window_bounds = array<i64: 1, 2, 8, 16>}]} {
    %c0 = arith.constant 0 : index
    %c0_0 = arith.constant 0 : index
    %c0_1 = arith.constant 0 : index
    %0 = vector.load %arg1[%c0, %c0_0, %c0_1] : memref<1x4x16xf32, #tpu.memory_space<vmem>>, vector<1x4x16xf32>
    %1 = vector.shape_cast %0 : vector<1x4x16xf32> to vector<4x16xf32>
    %2 = tpu.iota {dimensions = array<i32: 1>} : vector<1x16xi32>
    %c0_2 = arith.constant 0 : index
    %c0_3 = arith.constant 0 : index
    %3 = vector.load %arg2[%c0_2, %c0_3] : memref<8x18xf32, #tpu.memory_space<vmem>>, vector<4x1xf32>
    %cst = arith.constant 0.000000e+00 : f32
    %4 = vector.broadcast %cst : f32 to vector<4x16xf32>
    %cst_4 = arith.constant 0.000000e+00 : f32
    %5 = vector.broadcast %cst_4 : f32 to vector<4x2xf32>
    %6 = vector.extract_strided_slice %1 {offsets = [0, 0], sizes = [4, 14], strides = [1, 1]} : vector<4x16xf32> to vector<4x14xf32>
    %7 = tpu.concatenate %5, %6 in 1 : vector<4x2xf32>, vector<4x14xf32> -> vector<4x16xf32>
    %8 = tpu.concatenate %7, %4 in 0 : vector<4x16xf32>, vector<4x16xf32> -> vector<8x16xf32>
    %c0_5 = arith.constant 0 : index
    %c0_6 = arith.constant 0 : index
    %9 = vector.load %arg11[%c0_5, %c0_6] : memref<40x16xf32, #tpu.memory_space<vmem>>, vector<8x16xf32>
    tpu.vector_store %arg11[%c0_5, %c0_6], %8 {strides = array<i32>} : memref<40x16xf32, #tpu.memory_space<vmem>>, vector<8x16xf32>,
    %cst_7 = arith.constant 0.000000e+00 : f32
    %10 = vector.broadcast %cst_7 : f32 to vector<4x1xf32>
    %11 = vector.extract_strided_slice %1 {offsets = [0, 0], sizes = [4, 15], strides = [1, 1]} : vector<4x16xf32> to vector<4x15xf32>
    %12 = tpu.concatenate %10, %11 in 1 : vector<4x1xf32>, vector<4x15xf32> -> vector<4x16xf32>
    %13 = tpu.concatenate %12, %4 in 0 : vector<4x16xf32>, vector<4x16xf32> -> vector<8x16xf32>
    %c8 = arith.constant 8 : index
    %c0_8 = arith.constant 0 : index
    %14 = vector.load %arg11[%c8, %c0_8] : memref<40x16xf32, #tpu.memory_space<vmem>>, vector<8x16xf32>
    tpu.vector_store %arg11[%c8, %c0_8], %13 {strides = array<i32>} : memref<40x16xf32, #tpu.memory_space<vmem>>, vector<8x16xf32>,
    %15 = tpu.concatenate %1, %4 in 0 : vector<4x16xf32>, vector<4x16xf32> -> vector<8x16xf32>
    %c16 = arith.constant 16 : index
    %c0_9 = arith.constant 0 : index
    %16 = vector.load %arg11[%c16, %c0_9] : memref<40x16xf32, #tpu.memory_space<vmem>>, vector<8x16xf32>
    tpu.vector_store %arg11[%c16, %c0_9], %15 {strides = array<i32>} : memref<40x16xf32, #tpu.memory_space<vmem>>, vector<8x16xf32>,
    %cst_10 = arith.constant 0.000000e+00 : f32
    %17 = vector.broadcast %cst_10 : f32 to vector<4x1xf32>
    %18 = vector.extract_strided_slice %1 {offsets = [0, 1], sizes = [4, 15], strides = [1, 1]} : vector<4x16xf32> to vector<4x15xf32>
    %19 = tpu.concatenate %18, %17 in 1 : vector<4x15xf32>, vector<4x1xf32> -> vector<4x16xf32>
    %20 = tpu.concatenate %19, %4 in 0 : vector<4x16xf32>, vector<4x16xf32> -> vector<8x16xf32>
    %c24 = arith.constant 24 : index
    %c0_11 = arith.constant 0 : index
    %21 = vector.load %arg11[%c24, %c0_11] : memref<40x16xf32, #tpu.memory_space<vmem>>, vector<8x16xf32>
    tpu.vector_store %arg11[%c24, %c0_11], %20 {strides = array<i32>} : memref<40x16xf32, #tpu.memory_space<vmem>>, vector<8x16xf32>,
    %cst_12 = arith.constant 0.000000e+00 : f32
    %22 = vector.broadcast %cst_12 : f32 to vector<4x2xf32>
    %23 = vector.extract_strided_slice %1 {offsets = [0, 2], sizes = [4, 14], strides = [1, 1]} : vector<4x16xf32> to vector<4x14xf32>
    %24 = tpu.concatenate %23, %22 in 1 : vector<4x14xf32>, vector<4x2xf32> -> vector<4x16xf32>
    %25 = tpu.concatenate %24, %4 in 0 : vector<4x16xf32>, vector<4x16xf32> -> vector<8x16xf32>
    %c32 = arith.constant 32 : index
    %c0_13 = arith.constant 0 : index
    %26 = vector.load %arg11[%c32, %c0_13] : memref<40x16xf32, #tpu.memory_space<vmem>>, vector<8x16xf32>
    tpu.vector_store %arg11[%c32, %c0_13], %25 {strides = array<i32>} : memref<40x16xf32, #tpu.memory_space<vmem>>, vector<8x16xf32>,
    %c0_14 = arith.constant 0 : index
    %c0_15 = arith.constant 0 : index
    %27 = vector.load %arg3[%c0_14, %c0_15] : memref<4x40xf32, #tpu.memory_space<vmem>>, vector<4x40xf32>
    %c0_16 = arith.constant 0 : index
    %c0_17 = arith.constant 0 : index
    %28 = vector.load %arg11[%c0_16, %c0_17] : memref<40x16xf32, #tpu.memory_space<vmem>>, vector<40x16xf32>
    %cst_18 = arith.constant dense<0.000000e+00> : vector<4x16xf32>
    %29 = tpu.matmul %27, %28, %cst_18 {dimension_numbers = #tpu.dot_dimension_numbers<[1], [0], [0], [1], [0, 0, 1, 1], [], []>} : vector<4x40xf32>, vector<40x16xf32>, vector<4x16xf32> -> vector<4x16xf32>
    %30 = vector.broadcast %3 : vector<4x1xf32> to vector<4x16xf32>
    %31 = arith.addf %29, %30 : vector<4x16xf32>
    %c0_19 = arith.constant 0 : index
    %c1 = arith.constant 1 : index
    %32 = vector.load %arg2[%c0_19, %c1] : memref<8x18xf32, #tpu.memory_space<vmem>>, vector<4x1xf32>
    %c0_20 = arith.constant 0 : index
    %c2 = arith.constant 2 : index
    %33 = vector.load %arg2[%c0_20, %c2] : memref<8x18xf32, #tpu.memory_space<vmem>>, vector<4x1xf32>
    %cst_21 = arith.constant dense<0.000000e+00> : vector<4xf32>
    %34 = vector.multi_reduction <add>, %31, %cst_21 [1] : vector<4x16xf32> to vector<4xf32>
    %35 = vector.shape_cast %34 : vector<4xf32> to vector<4x1xf32>
    %cst_22 = arith.constant dense<0.000000e+00> : vector<1xf32>
    %36 = vector.multi_reduction <add>, %35, %cst_22 [0] : vector<4x1xf32> to vector<1xf32>
    %37 = vector.shape_cast %36 : vector<1xf32> to vector<1x1xf32>
    %cst_23 = arith.constant 1.562500e-02 : f32
    %38 = vector.broadcast %cst_23 : f32 to vector<1x1xf32>
    %39 = arith.mulf %37, %38 : vector<1x1xf32>
    %40 = arith.mulf %31, %31 : vector<4x16xf32>
    %cst_24 = arith.constant dense<0.000000e+00> : vector<4xf32>
    %41 = vector.multi_reduction <add>, %40, %cst_24 [1] : vector<4x16xf32> to vector<4xf32>
    %42 = vector.shape_cast %41 : vector<4xf32> to vector<4x1xf32>
    %cst_25 = arith.constant dense<0.000000e+00> : vector<1xf32>
    %43 = vector.multi_reduction <add>, %42, %cst_25 [0] : vector<4x1xf32> to vector<1xf32>
    %44 = vector.shape_cast %43 : vector<1xf32> to vector<1x1xf32>
    %cst_26 = arith.constant 1.562500e-02 : f32
    %45 = vector.broadcast %cst_26 : f32 to vector<1x1xf32>
    %46 = arith.mulf %44, %45 : vector<1x1xf32>
    %47 = arith.mulf %39, %39 : vector<1x1xf32>
    %48 = arith.subf %46, %47 : vector<1x1xf32>
    %cst_27 = arith.constant 0.000000e+00 : f32
    %49 = vector.broadcast %cst_27 : f32 to vector<1x1xf32>
    %50 = arith.maximumf %48, %49 : vector<1x1xf32>
    %cst_28 = arith.constant 9.99999974E-6 : f32
    %51 = vector.broadcast %cst_28 : f32 to vector<1x1xf32>
    %52 = arith.addf %50, %51 : vector<1x1xf32>
    %53 = math.rsqrt %52 : vector<1x1xf32>
    %54 = vector.broadcast %53 : vector<1x1xf32> to vector<4x1xf32>
    %55 = arith.mulf %32, %54 : vector<4x1xf32>
    %56 = vector.broadcast %39 : vector<1x1xf32> to vector<4x1xf32>
    %57 = arith.mulf %56, %55 : vector<4x1xf32>
    %58 = arith.subf %33, %57 : vector<4x1xf32>
    %59 = vector.broadcast %55 : vector<4x1xf32> to vector<4x16xf32>
    %60 = arith.mulf %31, %59 : vector<4x16xf32>
    %61 = vector.broadcast %58 : vector<4x1xf32> to vector<4x16xf32>
    %62 = arith.addf %60, %61 : vector<4x16xf32>
    %cst_29 = arith.constant 0.707106769 : f32
    %63 = vector.broadcast %cst_29 : f32 to vector<4x16xf32>
    %64 = arith.mulf %62, %63 : vector<4x16xf32>
    %65 = math.absf %64 : vector<4x16xf32>
    %cst_30 = arith.constant 0.327591091 : f32
    %66 = vector.broadcast %cst_30 : f32 to vector<4x16xf32>
    %67 = arith.mulf %66, %65 : vector<4x16xf32>
    %cst_31 = arith.constant 1.000000e+00 : f32
    %68 = vector.broadcast %cst_31 : f32 to vector<4x16xf32>
    %69 = arith.addf %68, %67 : vector<4x16xf32>
    %cst_32 = arith.constant 1.000000e+00 : f32
    %70 = vector.broadcast %cst_32 : f32 to vector<4x16xf32>
    %71 = arith.divf %70, %69 : vector<4x16xf32>
    %cst_33 = arith.constant 1.06140542 : f32
    %72 = vector.broadcast %cst_33 : f32 to vector<4x16xf32>
    %73 = arith.mulf %72, %71 : vector<4x16xf32>
    %cst_34 = arith.constant 1.45315206 : f32
    %74 = vector.broadcast %cst_34 : f32 to vector<4x16xf32>
    %75 = arith.subf %73, %74 : vector<4x16xf32>
    %76 = arith.mulf %75, %71 : vector<4x16xf32>
    %cst_35 = arith.constant 1.42141378 : f32
    %77 = vector.broadcast %cst_35 : f32 to vector<4x16xf32>
    %78 = arith.addf %76, %77 : vector<4x16xf32>
    %79 = arith.mulf %78, %71 : vector<4x16xf32>
    %cst_36 = arith.constant 0.284496725 : f32
    %80 = vector.broadcast %cst_36 : f32 to vector<4x16xf32>
    %81 = arith.subf %79, %80 : vector<4x16xf32>
    %82 = arith.mulf %81, %71 : vector<4x16xf32>
    %cst_37 = arith.constant 0.254829586 : f32
    %83 = vector.broadcast %cst_37 : f32 to vector<4x16xf32>
    %84 = arith.addf %82, %83 : vector<4x16xf32>
    %85 = arith.mulf %84, %71 : vector<4x16xf32>
    %cst_38 = arith.constant 0.000000e+00 : f32
    %86 = vector.broadcast %cst_38 : f32 to vector<4x16xf32>
    %87 = arith.subf %86, %65 : vector<4x16xf32>
    %88 = arith.mulf %87, %65 : vector<4x16xf32>
    %89 = math.exp %88 : vector<4x16xf32>
    %90 = arith.mulf %85, %89 : vector<4x16xf32>
    %cst_39 = arith.constant 1.000000e+00 : f32
    %91 = vector.broadcast %cst_39 : f32 to vector<4x16xf32>
    %92 = arith.subf %91, %90 : vector<4x16xf32>
    %cst_40 = arith.constant 0.000000e+00 : f32
    %93 = vector.broadcast %cst_40 : f32 to vector<4x16xf32>
    %94 = arith.cmpf oge, %64, %93 : vector<4x16xf32>
    %cst_41 = arith.constant 0.000000e+00 : f32
    %95 = vector.broadcast %cst_41 : f32 to vector<4x16xf32>
    %96 = arith.subf %95, %92 : vector<4x16xf32>
    %97 = arith.select %94, %92, %96 : vector<4x16xi1>, vector<4x16xf32>
    %cst_42 = arith.constant 5.000000e-01 : f32
    %98 = vector.broadcast %cst_42 : f32 to vector<4x16xf32>
    %99 = arith.mulf %98, %62 : vector<4x16xf32>
    %cst_43 = arith.constant 1.000000e+00 : f32
    %100 = vector.broadcast %cst_43 : f32 to vector<4x16xf32>
    %101 = arith.addf %100, %97 : vector<4x16xf32>
    %102 = arith.mulf %99, %101 : vector<4x16xf32>
    %c0_44 = arith.constant 0 : index
    %c3 = arith.constant 3 : index
    %103 = vector.load %arg2[%c0_44, %c3] : memref<8x18xf32, #tpu.memory_space<vmem>>, vector<4x1xf32>
    %cst_45 = arith.constant 0.000000e+00 : f32
    %104 = vector.broadcast %cst_45 : f32 to vector<4x16xf32>
    %cst_46 = arith.constant 0.000000e+00 : f32
    %105 = vector.broadcast %cst_46 : f32 to vector<4x2xf32>
    %106 = vector.extract_strided_slice %102 {offsets = [0, 0], sizes = [4, 14], strides = [1, 1]} : vector<4x16xf32> to vector<4x14xf32>
    %107 = tpu.concatenate %105, %106 in 1 : vector<4x2xf32>, vector<4x14xf32> -> vector<4x16xf32>
    %108 = tpu.concatenate %107, %104 in 0 : vector<4x16xf32>, vector<4x16xf32> -> vector<8x16xf32>
    %c0_47 = arith.constant 0 : index
    %c0_48 = arith.constant 0 : index
    %109 = vector.load %arg11[%c0_47, %c0_48] : memref<40x16xf32, #tpu.memory_space<vmem>>, vector<8x16xf32>
    tpu.vector_store %arg11[%c0_47, %c0_48], %108 {strides = array<i32>} : memref<40x16xf32, #tpu.memory_space<vmem>>, vector<8x16xf32>,
    %cst_49 = arith.constant 0.000000e+00 : f32
    %110 = vector.broadcast %cst_49 : f32 to vector<4x1xf32>
    %111 = vector.extract_strided_slice %102 {offsets = [0, 0], sizes = [4, 15], strides = [1, 1]} : vector<4x16xf32> to vector<4x15xf32>
    %112 = tpu.concatenate %110, %111 in 1 : vector<4x1xf32>, vector<4x15xf32> -> vector<4x16xf32>
    %113 = tpu.concatenate %112, %104 in 0 : vector<4x16xf32>, vector<4x16xf32> -> vector<8x16xf32>
    %c8_50 = arith.constant 8 : index
    %c0_51 = arith.constant 0 : index
    %114 = vector.load %arg11[%c8_50, %c0_51] : memref<40x16xf32, #tpu.memory_space<vmem>>, vector<8x16xf32>
    tpu.vector_store %arg11[%c8_50, %c0_51], %113 {strides = array<i32>} : memref<40x16xf32, #tpu.memory_space<vmem>>, vector<8x16xf32>,
    %115 = tpu.concatenate %102, %104 in 0 : vector<4x16xf32>, vector<4x16xf32> -> vector<8x16xf32>
    %c16_52 = arith.constant 16 : index
    %c0_53 = arith.constant 0 : index
    %116 = vector.load %arg11[%c16_52, %c0_53] : memref<40x16xf32, #tpu.memory_space<vmem>>, vector<8x16xf32>
    tpu.vector_store %arg11[%c16_52, %c0_53], %115 {strides = array<i32>} : memref<40x16xf32, #tpu.memory_space<vmem>>, vector<8x16xf32>,
    %cst_54 = arith.constant 0.000000e+00 : f32
    %117 = vector.broadcast %cst_54 : f32 to vector<4x1xf32>
    %118 = vector.extract_strided_slice %102 {offsets = [0, 1], sizes = [4, 15], strides = [1, 1]} : vector<4x16xf32> to vector<4x15xf32>
    %119 = tpu.concatenate %118, %117 in 1 : vector<4x15xf32>, vector<4x1xf32> -> vector<4x16xf32>
    %120 = tpu.concatenate %119, %104 in 0 : vector<4x16xf32>, vector<4x16xf32> -> vector<8x16xf32>
    %c24_55 = arith.constant 24 : index
    %c0_56 = arith.constant 0 : index
    %121 = vector.load %arg11[%c24_55, %c0_56] : memref<40x16xf32, #tpu.memory_space<vmem>>, vector<8x16xf32>
    tpu.vector_store %arg11[%c24_55, %c0_56], %120 {strides = array<i32>} : memref<40x16xf32, #tpu.memory_space<vmem>>, vector<8x16xf32>,
    %cst_57 = arith.constant 0.000000e+00 : f32
    %122 = vector.broadcast %cst_57 : f32 to vector<4x2xf32>
    %123 = vector.extract_strided_slice %102 {offsets = [0, 2], sizes = [4, 14], strides = [1, 1]} : vector<4x16xf32> to vector<4x14xf32>
    %124 = tpu.concatenate %123, %122 in 1 : vector<4x14xf32>, vector<4x2xf32> -> vector<4x16xf32>
    %125 = tpu.concatenate %124, %104 in 0 : vector<4x16xf32>, vector<4x16xf32> -> vector<8x16xf32>
    %c32_58 = arith.constant 32 : index
    %c0_59 = arith.constant 0 : index
    %126 = vector.load %arg11[%c32_58, %c0_59] : memref<40x16xf32, #tpu.memory_space<vmem>>, vector<8x16xf32>
    tpu.vector_store %arg11[%c32_58, %c0_59], %125 {strides = array<i32>} : memref<40x16xf32, #tpu.memory_space<vmem>>, vector<8x16xf32>,
    %c0_60 = arith.constant 0 : index
    %c0_61 = arith.constant 0 : index
    %127 = vector.load %arg4[%c0_60, %c0_61] : memref<4x40xf32, #tpu.memory_space<vmem>>, vector<4x40xf32>
    %c0_62 = arith.constant 0 : index
    %c0_63 = arith.constant 0 : index
    %128 = vector.load %arg11[%c0_62, %c0_63] : memref<40x16xf32, #tpu.memory_space<vmem>>, vector<40x16xf32>
    %cst_64 = arith.constant dense<0.000000e+00> : vector<4x16xf32>
    %129 = tpu.matmul %127, %128, %cst_64 {dimension_numbers = #tpu.dot_dimension_numbers<[1], [0], [0], [1], [0, 0, 1, 1], [], []>} : vector<4x40xf32>, vector<40x16xf32>, vector<4x16xf32> -> vector<4x16xf32>
    %130 = vector.broadcast %103 : vector<4x1xf32> to vector<4x16xf32>
    %131 = arith.addf %129, %130 : vector<4x16xf32>
    %c0_65 = arith.constant 0 : index
    %c4 = arith.constant 4 : index
    %132 = vector.load %arg2[%c0_65, %c4] : memref<8x18xf32, #tpu.memory_space<vmem>>, vector<4x1xf32>
    %c0_66 = arith.constant 0 : index
    %c5 = arith.constant 5 : index
    %133 = vector.load %arg2[%c0_66, %c5] : memref<8x18xf32, #tpu.memory_space<vmem>>, vector<4x1xf32>
    %cst_67 = arith.constant dense<0.000000e+00> : vector<4xf32>
    %134 = vector.multi_reduction <add>, %131, %cst_67 [1] : vector<4x16xf32> to vector<4xf32>
    %135 = vector.shape_cast %134 : vector<4xf32> to vector<4x1xf32>
    %cst_68 = arith.constant dense<0.000000e+00> : vector<1xf32>
    %136 = vector.multi_reduction <add>, %135, %cst_68 [0] : vector<4x1xf32> to vector<1xf32>
    %137 = vector.shape_cast %136 : vector<1xf32> to vector<1x1xf32>
    %cst_69 = arith.constant 1.562500e-02 : f32
    %138 = vector.broadcast %cst_69 : f32 to vector<1x1xf32>
    %139 = arith.mulf %137, %138 : vector<1x1xf32>
    %140 = arith.mulf %131, %131 : vector<4x16xf32>
    %cst_70 = arith.constant dense<0.000000e+00> : vector<4xf32>
    %141 = vector.multi_reduction <add>, %140, %cst_70 [1] : vector<4x16xf32> to vector<4xf32>
    %142 = vector.shape_cast %141 : vector<4xf32> to vector<4x1xf32>
    %cst_71 = arith.constant dense<0.000000e+00> : vector<1xf32>
    %143 = vector.multi_reduction <add>, %142, %cst_71 [0] : vector<4x1xf32> to vector<1xf32>
    %144 = vector.shape_cast %143 : vector<1xf32> to vector<1x1xf32>
    %cst_72 = arith.constant 1.562500e-02 : f32
    %145 = vector.broadcast %cst_72 : f32 to vector<1x1xf32>
    %146 = arith.mulf %144, %145 : vector<1x1xf32>
    %147 = arith.mulf %139, %139 : vector<1x1xf32>
    %148 = arith.subf %146, %147 : vector<1x1xf32>
    %cst_73 = arith.constant 0.000000e+00 : f32
    %149 = vector.broadcast %cst_73 : f32 to vector<1x1xf32>
    %150 = arith.maximumf %148, %149 : vector<1x1xf32>
    %cst_74 = arith.constant 9.99999974E-6 : f32
    %151 = vector.broadcast %cst_74 : f32 to vector<1x1xf32>
    %152 = arith.addf %150, %151 : vector<1x1xf32>
    %153 = math.rsqrt %152 : vector<1x1xf32>
    %154 = vector.broadcast %153 : vector<1x1xf32> to vector<4x1xf32>
    %155 = arith.mulf %132, %154 : vector<4x1xf32>
    %156 = vector.broadcast %139 : vector<1x1xf32> to vector<4x1xf32>
    %157 = arith.mulf %156, %155 : vector<4x1xf32>
    %158 = arith.subf %133, %157 : vector<4x1xf32>
    %159 = vector.broadcast %155 : vector<4x1xf32> to vector<4x16xf32>
    %160 = arith.mulf %131, %159 : vector<4x16xf32>
    %161 = vector.broadcast %158 : vector<4x1xf32> to vector<4x16xf32>
    %162 = arith.addf %160, %161 : vector<4x16xf32>
    %cst_75 = arith.constant 0.707106769 : f32
    %163 = vector.broadcast %cst_75 : f32 to vector<4x16xf32>
    %164 = arith.mulf %162, %163 : vector<4x16xf32>
    %165 = math.absf %164 : vector<4x16xf32>
    %cst_76 = arith.constant 0.327591091 : f32
    %166 = vector.broadcast %cst_76 : f32 to vector<4x16xf32>
    %167 = arith.mulf %166, %165 : vector<4x16xf32>
    %cst_77 = arith.constant 1.000000e+00 : f32
    %168 = vector.broadcast %cst_77 : f32 to vector<4x16xf32>
    %169 = arith.addf %168, %167 : vector<4x16xf32>
    %cst_78 = arith.constant 1.000000e+00 : f32
    %170 = vector.broadcast %cst_78 : f32 to vector<4x16xf32>
    %171 = arith.divf %170, %169 : vector<4x16xf32>
    %cst_79 = arith.constant 1.06140542 : f32
    %172 = vector.broadcast %cst_79 : f32 to vector<4x16xf32>
    %173 = arith.mulf %172, %171 : vector<4x16xf32>
    %cst_80 = arith.constant 1.45315206 : f32
    %174 = vector.broadcast %cst_80 : f32 to vector<4x16xf32>
    %175 = arith.subf %173, %174 : vector<4x16xf32>
    %176 = arith.mulf %175, %171 : vector<4x16xf32>
    %cst_81 = arith.constant 1.42141378 : f32
    %177 = vector.broadcast %cst_81 : f32 to vector<4x16xf32>
    %178 = arith.addf %176, %177 : vector<4x16xf32>
    %179 = arith.mulf %178, %171 : vector<4x16xf32>
    %cst_82 = arith.constant 0.284496725 : f32
    %180 = vector.broadcast %cst_82 : f32 to vector<4x16xf32>
    %181 = arith.subf %179, %180 : vector<4x16xf32>
    %182 = arith.mulf %181, %171 : vector<4x16xf32>
    %cst_83 = arith.constant 0.254829586 : f32
    %183 = vector.broadcast %cst_83 : f32 to vector<4x16xf32>
    %184 = arith.addf %182, %183 : vector<4x16xf32>
    %185 = arith.mulf %184, %171 : vector<4x16xf32>
    %cst_84 = arith.constant 0.000000e+00 : f32
    %186 = vector.broadcast %cst_84 : f32 to vector<4x16xf32>
    %187 = arith.subf %186, %165 : vector<4x16xf32>
    %188 = arith.mulf %187, %165 : vector<4x16xf32>
    %189 = math.exp %188 : vector<4x16xf32>
    %190 = arith.mulf %185, %189 : vector<4x16xf32>
    %cst_85 = arith.constant 1.000000e+00 : f32
    %191 = vector.broadcast %cst_85 : f32 to vector<4x16xf32>
    %192 = arith.subf %191, %190 : vector<4x16xf32>
    %cst_86 = arith.constant 0.000000e+00 : f32
    %193 = vector.broadcast %cst_86 : f32 to vector<4x16xf32>
    %194 = arith.cmpf oge, %164, %193 : vector<4x16xf32>
    %cst_87 = arith.constant 0.000000e+00 : f32
    %195 = vector.broadcast %cst_87 : f32 to vector<4x16xf32>
    %196 = arith.subf %195, %192 : vector<4x16xf32>
    %197 = arith.select %194, %192, %196 : vector<4x16xi1>, vector<4x16xf32>
    %cst_88 = arith.constant 5.000000e-01 : f32
    %198 = vector.broadcast %cst_88 : f32 to vector<4x16xf32>
    %199 = arith.mulf %198, %162 : vector<4x16xf32>
    %cst_89 = arith.constant 1.000000e+00 : f32
    %200 = vector.broadcast %cst_89 : f32 to vector<4x16xf32>
    %201 = arith.addf %200, %197 : vector<4x16xf32>
    %202 = arith.mulf %199, %201 : vector<4x16xf32>
    %203 = arith.addf %202, %1 : vector<4x16xf32>
    %c0_90 = arith.constant 0 : index
    %c6 = arith.constant 6 : index
    %204 = vector.load %arg2[%c0_90, %c6] : memref<8x18xf32, #tpu.memory_space<vmem>>, vector<4x1xf32>
    %cst_91 = arith.constant 0.000000e+00 : f32
    %205 = vector.broadcast %cst_91 : f32 to vector<4x16xf32>
    %cst_92 = arith.constant 0.000000e+00 : f32
    %206 = vector.broadcast %cst_92 : f32 to vector<4x2xf32>
    %207 = vector.extract_strided_slice %203 {offsets = [0, 0], sizes = [4, 14], strides = [1, 1]} : vector<4x16xf32> to vector<4x14xf32>
    %208 = tpu.concatenate %206, %207 in 1 : vector<4x2xf32>, vector<4x14xf32> -> vector<4x16xf32>
    %209 = tpu.concatenate %208, %205 in 0 : vector<4x16xf32>, vector<4x16xf32> -> vector<8x16xf32>
    %c0_93 = arith.constant 0 : index
    %c0_94 = arith.constant 0 : index
    %210 = vector.load %arg11[%c0_93, %c0_94] : memref<40x16xf32, #tpu.memory_space<vmem>>, vector<8x16xf32>
    tpu.vector_store %arg11[%c0_93, %c0_94], %209 {strides = array<i32>} : memref<40x16xf32, #tpu.memory_space<vmem>>, vector<8x16xf32>,
    %cst_95 = arith.constant 0.000000e+00 : f32
    %211 = vector.broadcast %cst_95 : f32 to vector<4x1xf32>
    %212 = vector.extract_strided_slice %203 {offsets = [0, 0], sizes = [4, 15], strides = [1, 1]} : vector<4x16xf32> to vector<4x15xf32>
    %213 = tpu.concatenate %211, %212 in 1 : vector<4x1xf32>, vector<4x15xf32> -> vector<4x16xf32>
    %214 = tpu.concatenate %213, %205 in 0 : vector<4x16xf32>, vector<4x16xf32> -> vector<8x16xf32>
    %c8_96 = arith.constant 8 : index
    %c0_97 = arith.constant 0 : index
    %215 = vector.load %arg11[%c8_96, %c0_97] : memref<40x16xf32, #tpu.memory_space<vmem>>, vector<8x16xf32>
    tpu.vector_store %arg11[%c8_96, %c0_97], %214 {strides = array<i32>} : memref<40x16xf32, #tpu.memory_space<vmem>>, vector<8x16xf32>,
    %216 = tpu.concatenate %203, %205 in 0 : vector<4x16xf32>, vector<4x16xf32> -> vector<8x16xf32>
    %c16_98 = arith.constant 16 : index
    %c0_99 = arith.constant 0 : index
    %217 = vector.load %arg11[%c16_98, %c0_99] : memref<40x16xf32, #tpu.memory_space<vmem>>, vector<8x16xf32>
    tpu.vector_store %arg11[%c16_98, %c0_99], %216 {strides = array<i32>} : memref<40x16xf32, #tpu.memory_space<vmem>>, vector<8x16xf32>,
    %cst_100 = arith.constant 0.000000e+00 : f32
    %218 = vector.broadcast %cst_100 : f32 to vector<4x1xf32>
    %219 = vector.extract_strided_slice %203 {offsets = [0, 1], sizes = [4, 15], strides = [1, 1]} : vector<4x16xf32> to vector<4x15xf32>
    %220 = tpu.concatenate %219, %218 in 1 : vector<4x15xf32>, vector<4x1xf32> -> vector<4x16xf32>
    %221 = tpu.concatenate %220, %205 in 0 : vector<4x16xf32>, vector<4x16xf32> -> vector<8x16xf32>
    %c24_101 = arith.constant 24 : index
    %c0_102 = arith.constant 0 : index
    %222 = vector.load %arg11[%c24_101, %c0_102] : memref<40x16xf32, #tpu.memory_space<vmem>>, vector<8x16xf32>
    tpu.vector_store %arg11[%c24_101, %c0_102], %221 {strides = array<i32>} : memref<40x16xf32, #tpu.memory_space<vmem>>, vector<8x16xf32>,
    %cst_103 = arith.constant 0.000000e+00 : f32
    %223 = vector.broadcast %cst_103 : f32 to vector<4x2xf32>
    %224 = vector.extract_strided_slice %203 {offsets = [0, 2], sizes = [4, 14], strides = [1, 1]} : vector<4x16xf32> to vector<4x14xf32>
    %225 = tpu.concatenate %224, %223 in 1 : vector<4x14xf32>, vector<4x2xf32> -> vector<4x16xf32>
    %226 = tpu.concatenate %225, %205 in 0 : vector<4x16xf32>, vector<4x16xf32> -> vector<8x16xf32>
    %c32_104 = arith.constant 32 : index
    %c0_105 = arith.constant 0 : index
    %227 = vector.load %arg11[%c32_104, %c0_105] : memref<40x16xf32, #tpu.memory_space<vmem>>, vector<8x16xf32>
    tpu.vector_store %arg11[%c32_104, %c0_105], %226 {strides = array<i32>} : memref<40x16xf32, #tpu.memory_space<vmem>>, vector<8x16xf32>,
    %c0_106 = arith.constant 0 : index
    %c0_107 = arith.constant 0 : index
    %228 = vector.load %arg5[%c0_106, %c0_107] : memref<4x40xf32, #tpu.memory_space<vmem>>, vector<4x40xf32>
    %c0_108 = arith.constant 0 : index
    %c0_109 = arith.constant 0 : index
    %229 = vector.load %arg11[%c0_108, %c0_109] : memref<40x16xf32, #tpu.memory_space<vmem>>, vector<40x16xf32>
    %cst_110 = arith.constant dense<0.000000e+00> : vector<4x16xf32>
    %230 = tpu.matmul %228, %229, %cst_110 {dimension_numbers = #tpu.dot_dimension_numbers<[1], [0], [0], [1], [0, 0, 1, 1], [], []>} : vector<4x40xf32>, vector<40x16xf32>, vector<4x16xf32> -> vector<4x16xf32>
    %231 = vector.broadcast %204 : vector<4x1xf32> to vector<4x16xf32>
    %232 = arith.addf %230, %231 : vector<4x16xf32>
    %c0_111 = arith.constant 0 : index
    %c7 = arith.constant 7 : index
    %233 = vector.load %arg2[%c0_111, %c7] : memref<8x18xf32, #tpu.memory_space<vmem>>, vector<4x1xf32>
    %c0_112 = arith.constant 0 : index
    %c8_113 = arith.constant 8 : index
    %234 = vector.load %arg2[%c0_112, %c8_113] : memref<8x18xf32, #tpu.memory_space<vmem>>, vector<4x1xf32>
    %cst_114 = arith.constant dense<0.000000e+00> : vector<4xf32>
    %235 = vector.multi_reduction <add>, %232, %cst_114 [1] : vector<4x16xf32> to vector<4xf32>
    %236 = vector.shape_cast %235 : vector<4xf32> to vector<4x1xf32>
    %cst_115 = arith.constant dense<0.000000e+00> : vector<1xf32>
    %237 = vector.multi_reduction <add>, %236, %cst_115 [0] : vector<4x1xf32> to vector<1xf32>
    %238 = vector.shape_cast %237 : vector<1xf32> to vector<1x1xf32>
    %cst_116 = arith.constant 1.562500e-02 : f32
    %239 = vector.broadcast %cst_116 : f32 to vector<1x1xf32>
    %240 = arith.mulf %238, %239 : vector<1x1xf32>
    %241 = arith.mulf %232, %232 : vector<4x16xf32>
    %cst_117 = arith.constant dense<0.000000e+00> : vector<4xf32>
    %242 = vector.multi_reduction <add>, %241, %cst_117 [1] : vector<4x16xf32> to vector<4xf32>
    %243 = vector.shape_cast %242 : vector<4xf32> to vector<4x1xf32>
    %cst_118 = arith.constant dense<0.000000e+00> : vector<1xf32>
    %244 = vector.multi_reduction <add>, %243, %cst_118 [0] : vector<4x1xf32> to vector<1xf32>
    %245 = vector.shape_cast %244 : vector<1xf32> to vector<1x1xf32>
    %cst_119 = arith.constant 1.562500e-02 : f32
    %246 = vector.broadcast %cst_119 : f32 to vector<1x1xf32>
    %247 = arith.mulf %245, %246 : vector<1x1xf32>
    %248 = arith.mulf %240, %240 : vector<1x1xf32>
    %249 = arith.subf %247, %248 : vector<1x1xf32>
    %cst_120 = arith.constant 0.000000e+00 : f32
    %250 = vector.broadcast %cst_120 : f32 to vector<1x1xf32>
    %251 = arith.maximumf %249, %250 : vector<1x1xf32>
    %cst_121 = arith.constant 9.99999974E-6 : f32
    %252 = vector.broadcast %cst_121 : f32 to vector<1x1xf32>
    %253 = arith.addf %251, %252 : vector<1x1xf32>
    %254 = math.rsqrt %253 : vector<1x1xf32>
    %255 = vector.broadcast %254 : vector<1x1xf32> to vector<4x1xf32>
    %256 = arith.mulf %233, %255 : vector<4x1xf32>
    %257 = vector.broadcast %240 : vector<1x1xf32> to vector<4x1xf32>
    %258 = arith.mulf %257, %256 : vector<4x1xf32>
    %259 = arith.subf %234, %258 : vector<4x1xf32>
    %260 = vector.broadcast %256 : vector<4x1xf32> to vector<4x16xf32>
    %261 = arith.mulf %232, %260 : vector<4x16xf32>
    %262 = vector.broadcast %259 : vector<4x1xf32> to vector<4x16xf32>
    %263 = arith.addf %261, %262 : vector<4x16xf32>
    %cst_122 = arith.constant 0.707106769 : f32
    %264 = vector.broadcast %cst_122 : f32 to vector<4x16xf32>
    %265 = arith.mulf %263, %264 : vector<4x16xf32>
    %266 = math.absf %265 : vector<4x16xf32>
    %cst_123 = arith.constant 0.327591091 : f32
    %267 = vector.broadcast %cst_123 : f32 to vector<4x16xf32>
    %268 = arith.mulf %267, %266 : vector<4x16xf32>
    %cst_124 = arith.constant 1.000000e+00 : f32
    %269 = vector.broadcast %cst_124 : f32 to vector<4x16xf32>
    %270 = arith.addf %269, %268 : vector<4x16xf32>
    %cst_125 = arith.constant 1.000000e+00 : f32
    %271 = vector.broadcast %cst_125 : f32 to vector<4x16xf32>
    %272 = arith.divf %271, %270 : vector<4x16xf32>
    %cst_126 = arith.constant 1.06140542 : f32
    %273 = vector.broadcast %cst_126 : f32 to vector<4x16xf32>
    %274 = arith.mulf %273, %272 : vector<4x16xf32>
    %cst_127 = arith.constant 1.45315206 : f32
    %275 = vector.broadcast %cst_127 : f32 to vector<4x16xf32>
    %276 = arith.subf %274, %275 : vector<4x16xf32>
    %277 = arith.mulf %276, %272 : vector<4x16xf32>
    %cst_128 = arith.constant 1.42141378 : f32
    %278 = vector.broadcast %cst_128 : f32 to vector<4x16xf32>
    %279 = arith.addf %277, %278 : vector<4x16xf32>
    %280 = arith.mulf %279, %272 : vector<4x16xf32>
    %cst_129 = arith.constant 0.284496725 : f32
    %281 = vector.broadcast %cst_129 : f32 to vector<4x16xf32>
    %282 = arith.subf %280, %281 : vector<4x16xf32>
    %283 = arith.mulf %282, %272 : vector<4x16xf32>
    %cst_130 = arith.constant 0.254829586 : f32
    %284 = vector.broadcast %cst_130 : f32 to vector<4x16xf32>
    %285 = arith.addf %283, %284 : vector<4x16xf32>
    %286 = arith.mulf %285, %272 : vector<4x16xf32>
    %cst_131 = arith.constant 0.000000e+00 : f32
    %287 = vector.broadcast %cst_131 : f32 to vector<4x16xf32>
    %288 = arith.subf %287, %266 : vector<4x16xf32>
    %289 = arith.mulf %288, %266 : vector<4x16xf32>
    %290 = math.exp %289 : vector<4x16xf32>
    %291 = arith.mulf %286, %290 : vector<4x16xf32>
    %cst_132 = arith.constant 1.000000e+00 : f32
    %292 = vector.broadcast %cst_132 : f32 to vector<4x16xf32>
    %293 = arith.subf %292, %291 : vector<4x16xf32>
    %cst_133 = arith.constant 0.000000e+00 : f32
    %294 = vector.broadcast %cst_133 : f32 to vector<4x16xf32>
    %295 = arith.cmpf oge, %265, %294 : vector<4x16xf32>
    %cst_134 = arith.constant 0.000000e+00 : f32
    %296 = vector.broadcast %cst_134 : f32 to vector<4x16xf32>
    %297 = arith.subf %296, %293 : vector<4x16xf32>
    %298 = arith.select %295, %293, %297 : vector<4x16xi1>, vector<4x16xf32>
    %cst_135 = arith.constant 5.000000e-01 : f32
    %299 = vector.broadcast %cst_135 : f32 to vector<4x16xf32>
    %300 = arith.mulf %299, %263 : vector<4x16xf32>
    %cst_136 = arith.constant 1.000000e+00 : f32
    %301 = vector.broadcast %cst_136 : f32 to vector<4x16xf32>
    %302 = arith.addf %301, %298 : vector<4x16xf32>
    %303 = arith.mulf %300, %302 : vector<4x16xf32>
    %c0_137 = arith.constant 0 : index
    %c9 = arith.constant 9 : index
    %304 = vector.load %arg2[%c0_137, %c9] : memref<8x18xf32, #tpu.memory_space<vmem>>, vector<4x1xf32>
    %cst_138 = arith.constant 0.000000e+00 : f32
    %305 = vector.broadcast %cst_138 : f32 to vector<4x16xf32>
    %cst_139 = arith.constant 0.000000e+00 : f32
    %306 = vector.broadcast %cst_139 : f32 to vector<4x2xf32>
    %307 = vector.extract_strided_slice %303 {offsets = [0, 0], sizes = [4, 14], strides = [1, 1]} : vector<4x16xf32> to vector<4x14xf32>
    %308 = tpu.concatenate %306, %307 in 1 : vector<4x2xf32>, vector<4x14xf32> -> vector<4x16xf32>
    %309 = tpu.concatenate %308, %305 in 0 : vector<4x16xf32>, vector<4x16xf32> -> vector<8x16xf32>
    %c0_140 = arith.constant 0 : index
    %c0_141 = arith.constant 0 : index
    %310 = vector.load %arg11[%c0_140, %c0_141] : memref<40x16xf32, #tpu.memory_space<vmem>>, vector<8x16xf32>
    tpu.vector_store %arg11[%c0_140, %c0_141], %309 {strides = array<i32>} : memref<40x16xf32, #tpu.memory_space<vmem>>, vector<8x16xf32>,
    %cst_142 = arith.constant 0.000000e+00 : f32
    %311 = vector.broadcast %cst_142 : f32 to vector<4x1xf32>
    %312 = vector.extract_strided_slice %303 {offsets = [0, 0], sizes = [4, 15], strides = [1, 1]} : vector<4x16xf32> to vector<4x15xf32>
    %313 = tpu.concatenate %311, %312 in 1 : vector<4x1xf32>, vector<4x15xf32> -> vector<4x16xf32>
    %314 = tpu.concatenate %313, %305 in 0 : vector<4x16xf32>, vector<4x16xf32> -> vector<8x16xf32>
    %c8_143 = arith.constant 8 : index
    %c0_144 = arith.constant 0 : index
    %315 = vector.load %arg11[%c8_143, %c0_144] : memref<40x16xf32, #tpu.memory_space<vmem>>, vector<8x16xf32>
    tpu.vector_store %arg11[%c8_143, %c0_144], %314 {strides = array<i32>} : memref<40x16xf32, #tpu.memory_space<vmem>>, vector<8x16xf32>,
    %316 = tpu.concatenate %303, %305 in 0 : vector<4x16xf32>, vector<4x16xf32> -> vector<8x16xf32>
    %c16_145 = arith.constant 16 : index
    %c0_146 = arith.constant 0 : index
    %317 = vector.load %arg11[%c16_145, %c0_146] : memref<40x16xf32, #tpu.memory_space<vmem>>, vector<8x16xf32>
    tpu.vector_store %arg11[%c16_145, %c0_146], %316 {strides = array<i32>} : memref<40x16xf32, #tpu.memory_space<vmem>>, vector<8x16xf32>,
    %cst_147 = arith.constant 0.000000e+00 : f32
    %318 = vector.broadcast %cst_147 : f32 to vector<4x1xf32>
    %319 = vector.extract_strided_slice %303 {offsets = [0, 1], sizes = [4, 15], strides = [1, 1]} : vector<4x16xf32> to vector<4x15xf32>
    %320 = tpu.concatenate %319, %318 in 1 : vector<4x15xf32>, vector<4x1xf32> -> vector<4x16xf32>
    %321 = tpu.concatenate %320, %305 in 0 : vector<4x16xf32>, vector<4x16xf32> -> vector<8x16xf32>
    %c24_148 = arith.constant 24 : index
    %c0_149 = arith.constant 0 : index
    %322 = vector.load %arg11[%c24_148, %c0_149] : memref<40x16xf32, #tpu.memory_space<vmem>>, vector<8x16xf32>
    tpu.vector_store %arg11[%c24_148, %c0_149], %321 {strides = array<i32>} : memref<40x16xf32, #tpu.memory_space<vmem>>, vector<8x16xf32>,
    %cst_150 = arith.constant 0.000000e+00 : f32
    %323 = vector.broadcast %cst_150 : f32 to vector<4x2xf32>
    %324 = vector.extract_strided_slice %303 {offsets = [0, 2], sizes = [4, 14], strides = [1, 1]} : vector<4x16xf32> to vector<4x14xf32>
    %325 = tpu.concatenate %324, %323 in 1 : vector<4x14xf32>, vector<4x2xf32> -> vector<4x16xf32>
    %326 = tpu.concatenate %325, %305 in 0 : vector<4x16xf32>, vector<4x16xf32> -> vector<8x16xf32>
    %c32_151 = arith.constant 32 : index
    %c0_152 = arith.constant 0 : index
    %327 = vector.load %arg11[%c32_151, %c0_152] : memref<40x16xf32, #tpu.memory_space<vmem>>, vector<8x16xf32>
    tpu.vector_store %arg11[%c32_151, %c0_152], %326 {strides = array<i32>} : memref<40x16xf32, #tpu.memory_space<vmem>>, vector<8x16xf32>,
    %c0_153 = arith.constant 0 : index
    %c0_154 = arith.constant 0 : index
    %328 = vector.load %arg6[%c0_153, %c0_154] : memref<4x40xf32, #tpu.memory_space<vmem>>, vector<4x40xf32>
    %c0_155 = arith.constant 0 : index
    %c0_156 = arith.constant 0 : index
    %329 = vector.load %arg11[%c0_155, %c0_156] : memref<40x16xf32, #tpu.memory_space<vmem>>, vector<40x16xf32>
    %cst_157 = arith.constant dense<0.000000e+00> : vector<4x16xf32>
    %330 = tpu.matmul %328, %329, %cst_157 {dimension_numbers = #tpu.dot_dimension_numbers<[1], [0], [0], [1], [0, 0, 1, 1], [], []>} : vector<4x40xf32>, vector<40x16xf32>, vector<4x16xf32> -> vector<4x16xf32>
    %331 = vector.broadcast %304 : vector<4x1xf32> to vector<4x16xf32>
    %332 = arith.addf %330, %331 : vector<4x16xf32>
    %c0_158 = arith.constant 0 : index
    %c10 = arith.constant 10 : index
    %333 = vector.load %arg2[%c0_158, %c10] : memref<8x18xf32, #tpu.memory_space<vmem>>, vector<4x1xf32>
    %c0_159 = arith.constant 0 : index
    %c11 = arith.constant 11 : index
    %334 = vector.load %arg2[%c0_159, %c11] : memref<8x18xf32, #tpu.memory_space<vmem>>, vector<4x1xf32>
    %cst_160 = arith.constant dense<0.000000e+00> : vector<4xf32>
    %335 = vector.multi_reduction <add>, %332, %cst_160 [1] : vector<4x16xf32> to vector<4xf32>
    %336 = vector.shape_cast %335 : vector<4xf32> to vector<4x1xf32>
    %cst_161 = arith.constant dense<0.000000e+00> : vector<1xf32>
    %337 = vector.multi_reduction <add>, %336, %cst_161 [0] : vector<4x1xf32> to vector<1xf32>
    %338 = vector.shape_cast %337 : vector<1xf32> to vector<1x1xf32>
    %cst_162 = arith.constant 1.562500e-02 : f32
    %339 = vector.broadcast %cst_162 : f32 to vector<1x1xf32>
    %340 = arith.mulf %338, %339 : vector<1x1xf32>
    %341 = arith.mulf %332, %332 : vector<4x16xf32>
    %cst_163 = arith.constant dense<0.000000e+00> : vector<4xf32>
    %342 = vector.multi_reduction <add>, %341, %cst_163 [1] : vector<4x16xf32> to vector<4xf32>
    %343 = vector.shape_cast %342 : vector<4xf32> to vector<4x1xf32>
    %cst_164 = arith.constant dense<0.000000e+00> : vector<1xf32>
    %344 = vector.multi_reduction <add>, %343, %cst_164 [0] : vector<4x1xf32> to vector<1xf32>
    %345 = vector.shape_cast %344 : vector<1xf32> to vector<1x1xf32>
    %cst_165 = arith.constant 1.562500e-02 : f32
    %346 = vector.broadcast %cst_165 : f32 to vector<1x1xf32>
    %347 = arith.mulf %345, %346 : vector<1x1xf32>
    %348 = arith.mulf %340, %340 : vector<1x1xf32>
    %349 = arith.subf %347, %348 : vector<1x1xf32>
    %cst_166 = arith.constant 0.000000e+00 : f32
    %350 = vector.broadcast %cst_166 : f32 to vector<1x1xf32>
    %351 = arith.maximumf %349, %350 : vector<1x1xf32>
    %cst_167 = arith.constant 9.99999974E-6 : f32
    %352 = vector.broadcast %cst_167 : f32 to vector<1x1xf32>
    %353 = arith.addf %351, %352 : vector<1x1xf32>
    %354 = math.rsqrt %353 : vector<1x1xf32>
    %355 = vector.broadcast %354 : vector<1x1xf32> to vector<4x1xf32>
    %356 = arith.mulf %333, %355 : vector<4x1xf32>
    %357 = vector.broadcast %340 : vector<1x1xf32> to vector<4x1xf32>
    %358 = arith.mulf %357, %356 : vector<4x1xf32>
    %359 = arith.subf %334, %358 : vector<4x1xf32>
    %360 = vector.broadcast %356 : vector<4x1xf32> to vector<4x16xf32>
    %361 = arith.mulf %332, %360 : vector<4x16xf32>
    %362 = vector.broadcast %359 : vector<4x1xf32> to vector<4x16xf32>
    %363 = arith.addf %361, %362 : vector<4x16xf32>
    %cst_168 = arith.constant 0.707106769 : f32
    %364 = vector.broadcast %cst_168 : f32 to vector<4x16xf32>
    %365 = arith.mulf %363, %364 : vector<4x16xf32>
    %366 = math.absf %365 : vector<4x16xf32>
    %cst_169 = arith.constant 0.327591091 : f32
    %367 = vector.broadcast %cst_169 : f32 to vector<4x16xf32>
    %368 = arith.mulf %367, %366 : vector<4x16xf32>
    %cst_170 = arith.constant 1.000000e+00 : f32
    %369 = vector.broadcast %cst_170 : f32 to vector<4x16xf32>
    %370 = arith.addf %369, %368 : vector<4x16xf32>
    %cst_171 = arith.constant 1.000000e+00 : f32
    %371 = vector.broadcast %cst_171 : f32 to vector<4x16xf32>
    %372 = arith.divf %371, %370 : vector<4x16xf32>
    %cst_172 = arith.constant 1.06140542 : f32
    %373 = vector.broadcast %cst_172 : f32 to vector<4x16xf32>
    %374 = arith.mulf %373, %372 : vector<4x16xf32>
    %cst_173 = arith.constant 1.45315206 : f32
    %375 = vector.broadcast %cst_173 : f32 to vector<4x16xf32>
    %376 = arith.subf %374, %375 : vector<4x16xf32>
    %377 = arith.mulf %376, %372 : vector<4x16xf32>
    %cst_174 = arith.constant 1.42141378 : f32
    %378 = vector.broadcast %cst_174 : f32 to vector<4x16xf32>
    %379 = arith.addf %377, %378 : vector<4x16xf32>
    %380 = arith.mulf %379, %372 : vector<4x16xf32>
    %cst_175 = arith.constant 0.284496725 : f32
    %381 = vector.broadcast %cst_175 : f32 to vector<4x16xf32>
    %382 = arith.subf %380, %381 : vector<4x16xf32>
    %383 = arith.mulf %382, %372 : vector<4x16xf32>
    %cst_176 = arith.constant 0.254829586 : f32
    %384 = vector.broadcast %cst_176 : f32 to vector<4x16xf32>
    %385 = arith.addf %383, %384 : vector<4x16xf32>
    %386 = arith.mulf %385, %372 : vector<4x16xf32>
    %cst_177 = arith.constant 0.000000e+00 : f32
    %387 = vector.broadcast %cst_177 : f32 to vector<4x16xf32>
    %388 = arith.subf %387, %366 : vector<4x16xf32>
    %389 = arith.mulf %388, %366 : vector<4x16xf32>
    %390 = math.exp %389 : vector<4x16xf32>
    %391 = arith.mulf %386, %390 : vector<4x16xf32>
    %cst_178 = arith.constant 1.000000e+00 : f32
    %392 = vector.broadcast %cst_178 : f32 to vector<4x16xf32>
    %393 = arith.subf %392, %391 : vector<4x16xf32>
    %cst_179 = arith.constant 0.000000e+00 : f32
    %394 = vector.broadcast %cst_179 : f32 to vector<4x16xf32>
    %395 = arith.cmpf oge, %365, %394 : vector<4x16xf32>
    %cst_180 = arith.constant 0.000000e+00 : f32
    %396 = vector.broadcast %cst_180 : f32 to vector<4x16xf32>
    %397 = arith.subf %396, %393 : vector<4x16xf32>
    %398 = arith.select %395, %393, %397 : vector<4x16xi1>, vector<4x16xf32>
    %cst_181 = arith.constant 5.000000e-01 : f32
    %399 = vector.broadcast %cst_181 : f32 to vector<4x16xf32>
    %400 = arith.mulf %399, %363 : vector<4x16xf32>
    %cst_182 = arith.constant 1.000000e+00 : f32
    %401 = vector.broadcast %cst_182 : f32 to vector<4x16xf32>
    %402 = arith.addf %401, %398 : vector<4x16xf32>
    %403 = arith.mulf %400, %402 : vector<4x16xf32>
    %404 = arith.addf %403, %203 : vector<4x16xf32>
    %c0_183 = arith.constant 0 : index
    %c0_184 = arith.constant 0 : index
    %405 = vector.load %arg7[%c0_183, %c0_184] : memref<8x4xf32, #tpu.memory_space<vmem>>, vector<8x4xf32>
    %cst_185 = arith.constant dense<0.000000e+00> : vector<8x16xf32>
    %406 = tpu.matmul %405, %404, %cst_185 {dimension_numbers = #tpu.dot_dimension_numbers<[1], [0], [0], [1], [0, 0, 1, 1], [], []>} : vector<8x4xf32>, vector<4x16xf32>, vector<8x16xf32> -> vector<8x16xf32>
    %c0_186 = arith.constant 0 : index
    %c12 = arith.constant 12 : index
    %407 = vector.load %arg2[%c0_186, %c12] : memref<8x18xf32, #tpu.memory_space<vmem>>, vector<4x1xf32>
    %cst_187 = arith.constant 0.000000e+00 : f32
    %408 = vector.broadcast %cst_187 : f32 to vector<4x16xf32>
    %cst_188 = arith.constant 0.000000e+00 : f32
    %409 = vector.broadcast %cst_188 : f32 to vector<4x2xf32>
    %410 = vector.extract_strided_slice %404 {offsets = [0, 0], sizes = [4, 14], strides = [1, 1]} : vector<4x16xf32> to vector<4x14xf32>
    %411 = tpu.concatenate %409, %410 in 1 : vector<4x2xf32>, vector<4x14xf32> -> vector<4x16xf32>
    %412 = tpu.concatenate %411, %408 in 0 : vector<4x16xf32>, vector<4x16xf32> -> vector<8x16xf32>
    %c0_189 = arith.constant 0 : index
    %c0_190 = arith.constant 0 : index
    %413 = vector.load %arg11[%c0_189, %c0_190] : memref<40x16xf32, #tpu.memory_space<vmem>>, vector<8x16xf32>
    tpu.vector_store %arg11[%c0_189, %c0_190], %412 {strides = array<i32>} : memref<40x16xf32, #tpu.memory_space<vmem>>, vector<8x16xf32>,
    %cst_191 = arith.constant 0.000000e+00 : f32
    %414 = vector.broadcast %cst_191 : f32 to vector<4x1xf32>
    %415 = vector.extract_strided_slice %404 {offsets = [0, 0], sizes = [4, 15], strides = [1, 1]} : vector<4x16xf32> to vector<4x15xf32>
    %416 = tpu.concatenate %414, %415 in 1 : vector<4x1xf32>, vector<4x15xf32> -> vector<4x16xf32>
    %417 = tpu.concatenate %416, %408 in 0 : vector<4x16xf32>, vector<4x16xf32> -> vector<8x16xf32>
    %c8_192 = arith.constant 8 : index
    %c0_193 = arith.constant 0 : index
    %418 = vector.load %arg11[%c8_192, %c0_193] : memref<40x16xf32, #tpu.memory_space<vmem>>, vector<8x16xf32>
    tpu.vector_store %arg11[%c8_192, %c0_193], %417 {strides = array<i32>} : memref<40x16xf32, #tpu.memory_space<vmem>>, vector<8x16xf32>,
    %419 = tpu.concatenate %404, %408 in 0 : vector<4x16xf32>, vector<4x16xf32> -> vector<8x16xf32>
    %c16_194 = arith.constant 16 : index
    %c0_195 = arith.constant 0 : index
    %420 = vector.load %arg11[%c16_194, %c0_195] : memref<40x16xf32, #tpu.memory_space<vmem>>, vector<8x16xf32>
    tpu.vector_store %arg11[%c16_194, %c0_195], %419 {strides = array<i32>} : memref<40x16xf32, #tpu.memory_space<vmem>>, vector<8x16xf32>,
    %cst_196 = arith.constant 0.000000e+00 : f32
    %421 = vector.broadcast %cst_196 : f32 to vector<4x1xf32>
    %422 = vector.extract_strided_slice %404 {offsets = [0, 1], sizes = [4, 15], strides = [1, 1]} : vector<4x16xf32> to vector<4x15xf32>
    %423 = tpu.concatenate %422, %421 in 1 : vector<4x15xf32>, vector<4x1xf32> -> vector<4x16xf32>
    %424 = tpu.concatenate %423, %408 in 0 : vector<4x16xf32>, vector<4x16xf32> -> vector<8x16xf32>
    %c24_197 = arith.constant 24 : index
    %c0_198 = arith.constant 0 : index
    %425 = vector.load %arg11[%c24_197, %c0_198] : memref<40x16xf32, #tpu.memory_space<vmem>>, vector<8x16xf32>
    tpu.vector_store %arg11[%c24_197, %c0_198], %424 {strides = array<i32>} : memref<40x16xf32, #tpu.memory_space<vmem>>, vector<8x16xf32>,
    %cst_199 = arith.constant 0.000000e+00 : f32
    %426 = vector.broadcast %cst_199 : f32 to vector<4x2xf32>
    %427 = vector.extract_strided_slice %404 {offsets = [0, 2], sizes = [4, 14], strides = [1, 1]} : vector<4x16xf32> to vector<4x14xf32>
    %428 = tpu.concatenate %427, %426 in 1 : vector<4x14xf32>, vector<4x2xf32> -> vector<4x16xf32>
    %429 = tpu.concatenate %428, %408 in 0 : vector<4x16xf32>, vector<4x16xf32> -> vector<8x16xf32>
    %c32_200 = arith.constant 32 : index
    %c0_201 = arith.constant 0 : index
    %430 = vector.load %arg11[%c32_200, %c0_201] : memref<40x16xf32, #tpu.memory_space<vmem>>, vector<8x16xf32>
    tpu.vector_store %arg11[%c32_200, %c0_201], %429 {strides = array<i32>} : memref<40x16xf32, #tpu.memory_space<vmem>>, vector<8x16xf32>,
    %c0_202 = arith.constant 0 : index
    %c0_203 = arith.constant 0 : index
    %431 = vector.load %arg8[%c0_202, %c0_203] : memref<4x40xf32, #tpu.memory_space<vmem>>, vector<4x40xf32>
    %c0_204 = arith.constant 0 : index
    %c0_205 = arith.constant 0 : index
    %432 = vector.load %arg11[%c0_204, %c0_205] : memref<40x16xf32, #tpu.memory_space<vmem>>, vector<40x16xf32>
    %cst_206 = arith.constant dense<0.000000e+00> : vector<4x16xf32>
    %433 = tpu.matmul %431, %432, %cst_206 {dimension_numbers = #tpu.dot_dimension_numbers<[1], [0], [0], [1], [0, 0, 1, 1], [], []>} : vector<4x40xf32>, vector<40x16xf32>, vector<4x16xf32> -> vector<4x16xf32>
    %434 = vector.broadcast %407 : vector<4x1xf32> to vector<4x16xf32>
    %435 = arith.addf %433, %434 : vector<4x16xf32>
    %c0_207 = arith.constant 0 : index
    %c13 = arith.constant 13 : index
    %436 = vector.load %arg2[%c0_207, %c13] : memref<8x18xf32, #tpu.memory_space<vmem>>, vector<4x1xf32>
    %c0_208 = arith.constant 0 : index
    %c14 = arith.constant 14 : index
    %437 = vector.load %arg2[%c0_208, %c14] : memref<8x18xf32, #tpu.memory_space<vmem>>, vector<4x1xf32>
    %cst_209 = arith.constant dense<0.000000e+00> : vector<4xf32>
    %438 = vector.multi_reduction <add>, %435, %cst_209 [1] : vector<4x16xf32> to vector<4xf32>
    %439 = vector.shape_cast %438 : vector<4xf32> to vector<4x1xf32>
    %cst_210 = arith.constant dense<0.000000e+00> : vector<1xf32>
    %440 = vector.multi_reduction <add>, %439, %cst_210 [0] : vector<4x1xf32> to vector<1xf32>
    %441 = vector.shape_cast %440 : vector<1xf32> to vector<1x1xf32>
    %cst_211 = arith.constant 1.562500e-02 : f32
    %442 = vector.broadcast %cst_211 : f32 to vector<1x1xf32>
    %443 = arith.mulf %441, %442 : vector<1x1xf32>
    %444 = arith.mulf %435, %435 : vector<4x16xf32>
    %cst_212 = arith.constant dense<0.000000e+00> : vector<4xf32>
    %445 = vector.multi_reduction <add>, %444, %cst_212 [1] : vector<4x16xf32> to vector<4xf32>
    %446 = vector.shape_cast %445 : vector<4xf32> to vector<4x1xf32>
    %cst_213 = arith.constant dense<0.000000e+00> : vector<1xf32>
    %447 = vector.multi_reduction <add>, %446, %cst_213 [0] : vector<4x1xf32> to vector<1xf32>
    %448 = vector.shape_cast %447 : vector<1xf32> to vector<1x1xf32>
    %cst_214 = arith.constant 1.562500e-02 : f32
    %449 = vector.broadcast %cst_214 : f32 to vector<1x1xf32>
    %450 = arith.mulf %448, %449 : vector<1x1xf32>
    %451 = arith.mulf %443, %443 : vector<1x1xf32>
    %452 = arith.subf %450, %451 : vector<1x1xf32>
    %cst_215 = arith.constant 0.000000e+00 : f32
    %453 = vector.broadcast %cst_215 : f32 to vector<1x1xf32>
    %454 = arith.maximumf %452, %453 : vector<1x1xf32>
    %cst_216 = arith.constant 9.99999974E-6 : f32
    %455 = vector.broadcast %cst_216 : f32 to vector<1x1xf32>
    %456 = arith.addf %454, %455 : vector<1x1xf32>
    %457 = math.rsqrt %456 : vector<1x1xf32>
    %458 = vector.broadcast %457 : vector<1x1xf32> to vector<4x1xf32>
    %459 = arith.mulf %436, %458 : vector<4x1xf32>
    %460 = vector.broadcast %443 : vector<1x1xf32> to vector<4x1xf32>
    %461 = arith.mulf %460, %459 : vector<4x1xf32>
    %462 = arith.subf %437, %461 : vector<4x1xf32>
    %463 = vector.broadcast %459 : vector<4x1xf32> to vector<4x16xf32>
    %464 = arith.mulf %435, %463 : vector<4x16xf32>
    %465 = vector.broadcast %462 : vector<4x1xf32> to vector<4x16xf32>
    %466 = arith.addf %464, %465 : vector<4x16xf32>
    %cst_217 = arith.constant 0.707106769 : f32
    %467 = vector.broadcast %cst_217 : f32 to vector<4x16xf32>
    %468 = arith.mulf %466, %467 : vector<4x16xf32>
    %469 = math.absf %468 : vector<4x16xf32>
    %cst_218 = arith.constant 0.327591091 : f32
    %470 = vector.broadcast %cst_218 : f32 to vector<4x16xf32>
    %471 = arith.mulf %470, %469 : vector<4x16xf32>
    %cst_219 = arith.constant 1.000000e+00 : f32
    %472 = vector.broadcast %cst_219 : f32 to vector<4x16xf32>
    %473 = arith.addf %472, %471 : vector<4x16xf32>
    %cst_220 = arith.constant 1.000000e+00 : f32
    %474 = vector.broadcast %cst_220 : f32 to vector<4x16xf32>
    %475 = arith.divf %474, %473 : vector<4x16xf32>
    %cst_221 = arith.constant 1.06140542 : f32
    %476 = vector.broadcast %cst_221 : f32 to vector<4x16xf32>
    %477 = arith.mulf %476, %475 : vector<4x16xf32>
    %cst_222 = arith.constant 1.45315206 : f32
    %478 = vector.broadcast %cst_222 : f32 to vector<4x16xf32>
    %479 = arith.subf %477, %478 : vector<4x16xf32>
    %480 = arith.mulf %479, %475 : vector<4x16xf32>
    %cst_223 = arith.constant 1.42141378 : f32
    %481 = vector.broadcast %cst_223 : f32 to vector<4x16xf32>
    %482 = arith.addf %480, %481 : vector<4x16xf32>
    %483 = arith.mulf %482, %475 : vector<4x16xf32>
    %cst_224 = arith.constant 0.284496725 : f32
    %484 = vector.broadcast %cst_224 : f32 to vector<4x16xf32>
    %485 = arith.subf %483, %484 : vector<4x16xf32>
    %486 = arith.mulf %485, %475 : vector<4x16xf32>
    %cst_225 = arith.constant 0.254829586 : f32
    %487 = vector.broadcast %cst_225 : f32 to vector<4x16xf32>
    %488 = arith.addf %486, %487 : vector<4x16xf32>
    %489 = arith.mulf %488, %475 : vector<4x16xf32>
    %cst_226 = arith.constant 0.000000e+00 : f32
    %490 = vector.broadcast %cst_226 : f32 to vector<4x16xf32>
    %491 = arith.subf %490, %469 : vector<4x16xf32>
    %492 = arith.mulf %491, %469 : vector<4x16xf32>
    %493 = math.exp %492 : vector<4x16xf32>
    %494 = arith.mulf %489, %493 : vector<4x16xf32>
    %cst_227 = arith.constant 1.000000e+00 : f32
    %495 = vector.broadcast %cst_227 : f32 to vector<4x16xf32>
    %496 = arith.subf %495, %494 : vector<4x16xf32>
    %cst_228 = arith.constant 0.000000e+00 : f32
    %497 = vector.broadcast %cst_228 : f32 to vector<4x16xf32>
    %498 = arith.cmpf oge, %468, %497 : vector<4x16xf32>
    %cst_229 = arith.constant 0.000000e+00 : f32
    %499 = vector.broadcast %cst_229 : f32 to vector<4x16xf32>
    %500 = arith.subf %499, %496 : vector<4x16xf32>
    %501 = arith.select %498, %496, %500 : vector<4x16xi1>, vector<4x16xf32>
    %cst_230 = arith.constant 5.000000e-01 : f32
    %502 = vector.broadcast %cst_230 : f32 to vector<4x16xf32>
    %503 = arith.mulf %502, %466 : vector<4x16xf32>
    %cst_231 = arith.constant 1.000000e+00 : f32
    %504 = vector.broadcast %cst_231 : f32 to vector<4x16xf32>
    %505 = arith.addf %504, %501 : vector<4x16xf32>
    %506 = arith.mulf %503, %505 : vector<4x16xf32>
    %c0_232 = arith.constant 0 : index
    %c15 = arith.constant 15 : index
    %507 = vector.load %arg2[%c0_232, %c15] : memref<8x18xf32, #tpu.memory_space<vmem>>, vector<8x1xf32>
    %cst_233 = arith.constant 0.000000e+00 : f32
    %508 = vector.broadcast %cst_233 : f32 to vector<4x16xf32>
    %cst_234 = arith.constant 0.000000e+00 : f32
    %509 = vector.broadcast %cst_234 : f32 to vector<4x2xf32>
    %510 = vector.extract_strided_slice %506 {offsets = [0, 0], sizes = [4, 14], strides = [1, 1]} : vector<4x16xf32> to vector<4x14xf32>
    %511 = tpu.concatenate %509, %510 in 1 : vector<4x2xf32>, vector<4x14xf32> -> vector<4x16xf32>
    %512 = tpu.concatenate %511, %508 in 0 : vector<4x16xf32>, vector<4x16xf32> -> vector<8x16xf32>
    %c0_235 = arith.constant 0 : index
    %c0_236 = arith.constant 0 : index
    %513 = vector.load %arg11[%c0_235, %c0_236] : memref<40x16xf32, #tpu.memory_space<vmem>>, vector<8x16xf32>
    tpu.vector_store %arg11[%c0_235, %c0_236], %512 {strides = array<i32>} : memref<40x16xf32, #tpu.memory_space<vmem>>, vector<8x16xf32>,
    %cst_237 = arith.constant 0.000000e+00 : f32
    %514 = vector.broadcast %cst_237 : f32 to vector<4x1xf32>
    %515 = vector.extract_strided_slice %506 {offsets = [0, 0], sizes = [4, 15], strides = [1, 1]} : vector<4x16xf32> to vector<4x15xf32>
    %516 = tpu.concatenate %514, %515 in 1 : vector<4x1xf32>, vector<4x15xf32> -> vector<4x16xf32>
    %517 = tpu.concatenate %516, %508 in 0 : vector<4x16xf32>, vector<4x16xf32> -> vector<8x16xf32>
    %c8_238 = arith.constant 8 : index
    %c0_239 = arith.constant 0 : index
    %518 = vector.load %arg11[%c8_238, %c0_239] : memref<40x16xf32, #tpu.memory_space<vmem>>, vector<8x16xf32>
    tpu.vector_store %arg11[%c8_238, %c0_239], %517 {strides = array<i32>} : memref<40x16xf32, #tpu.memory_space<vmem>>, vector<8x16xf32>,
    %519 = tpu.concatenate %506, %508 in 0 : vector<4x16xf32>, vector<4x16xf32> -> vector<8x16xf32>
    %c16_240 = arith.constant 16 : index
    %c0_241 = arith.constant 0 : index
    %520 = vector.load %arg11[%c16_240, %c0_241] : memref<40x16xf32, #tpu.memory_space<vmem>>, vector<8x16xf32>
    tpu.vector_store %arg11[%c16_240, %c0_241], %519 {strides = array<i32>} : memref<40x16xf32, #tpu.memory_space<vmem>>, vector<8x16xf32>,
    %cst_242 = arith.constant 0.000000e+00 : f32
    %521 = vector.broadcast %cst_242 : f32 to vector<4x1xf32>
    %522 = vector.extract_strided_slice %506 {offsets = [0, 1], sizes = [4, 15], strides = [1, 1]} : vector<4x16xf32> to vector<4x15xf32>
    %523 = tpu.concatenate %522, %521 in 1 : vector<4x15xf32>, vector<4x1xf32> -> vector<4x16xf32>
    %524 = tpu.concatenate %523, %508 in 0 : vector<4x16xf32>, vector<4x16xf32> -> vector<8x16xf32>
    %c24_243 = arith.constant 24 : index
    %c0_244 = arith.constant 0 : index
    %525 = vector.load %arg11[%c24_243, %c0_244] : memref<40x16xf32, #tpu.memory_space<vmem>>, vector<8x16xf32>
    tpu.vector_store %arg11[%c24_243, %c0_244], %524 {strides = array<i32>} : memref<40x16xf32, #tpu.memory_space<vmem>>, vector<8x16xf32>,
    %cst_245 = arith.constant 0.000000e+00 : f32
    %526 = vector.broadcast %cst_245 : f32 to vector<4x2xf32>
    %527 = vector.extract_strided_slice %506 {offsets = [0, 2], sizes = [4, 14], strides = [1, 1]} : vector<4x16xf32> to vector<4x14xf32>
    %528 = tpu.concatenate %527, %526 in 1 : vector<4x14xf32>, vector<4x2xf32> -> vector<4x16xf32>
    %529 = tpu.concatenate %528, %508 in 0 : vector<4x16xf32>, vector<4x16xf32> -> vector<8x16xf32>
    %c32_246 = arith.constant 32 : index
    %c0_247 = arith.constant 0 : index
    %530 = vector.load %arg11[%c32_246, %c0_247] : memref<40x16xf32, #tpu.memory_space<vmem>>, vector<8x16xf32>
    tpu.vector_store %arg11[%c32_246, %c0_247], %529 {strides = array<i32>} : memref<40x16xf32, #tpu.memory_space<vmem>>, vector<8x16xf32>,
    %c0_248 = arith.constant 0 : index
    %c0_249 = arith.constant 0 : index
    %531 = vector.load %arg9[%c0_248, %c0_249] : memref<8x40xf32, #tpu.memory_space<vmem>>, vector<8x40xf32>
    %c0_250 = arith.constant 0 : index
    %c0_251 = arith.constant 0 : index
    %532 = vector.load %arg11[%c0_250, %c0_251] : memref<40x16xf32, #tpu.memory_space<vmem>>, vector<40x16xf32>
    %cst_252 = arith.constant dense<0.000000e+00> : vector<8x16xf32>
    %533 = tpu.matmul %531, %532, %cst_252 {dimension_numbers = #tpu.dot_dimension_numbers<[1], [0], [0], [1], [0, 0, 1, 1], [], []>} : vector<8x40xf32>, vector<40x16xf32>, vector<8x16xf32> -> vector<8x16xf32>
    %534 = vector.broadcast %507 : vector<8x1xf32> to vector<8x16xf32>
    %535 = arith.addf %533, %534 : vector<8x16xf32>
    %c0_253 = arith.constant 0 : index
    %c16_254 = arith.constant 16 : index
    %536 = vector.load %arg2[%c0_253, %c16_254] : memref<8x18xf32, #tpu.memory_space<vmem>>, vector<8x1xf32>
    %c0_255 = arith.constant 0 : index
    %c17 = arith.constant 17 : index
    %537 = vector.load %arg2[%c0_255, %c17] : memref<8x18xf32, #tpu.memory_space<vmem>>, vector<8x1xf32>
    %cst_256 = arith.constant dense<0.000000e+00> : vector<8xf32>
    %538 = vector.multi_reduction <add>, %535, %cst_256 [1] : vector<8x16xf32> to vector<8xf32>
    %539 = vector.shape_cast %538 : vector<8xf32> to vector<8x1xf32>
    %cst_257 = arith.constant dense<0.000000e+00> : vector<1xf32>
    %540 = vector.multi_reduction <add>, %539, %cst_257 [0] : vector<8x1xf32> to vector<1xf32>
    %541 = vector.shape_cast %540 : vector<1xf32> to vector<1x1xf32>
    %cst_258 = arith.constant 7.812500e-03 : f32
    %542 = vector.broadcast %cst_258 : f32 to vector<1x1xf32>
    %543 = arith.mulf %541, %542 : vector<1x1xf32>
    %544 = arith.mulf %535, %535 : vector<8x16xf32>
    %cst_259 = arith.constant dense<0.000000e+00> : vector<8xf32>
    %545 = vector.multi_reduction <add>, %544, %cst_259 [1] : vector<8x16xf32> to vector<8xf32>
    %546 = vector.shape_cast %545 : vector<8xf32> to vector<8x1xf32>
    %cst_260 = arith.constant dense<0.000000e+00> : vector<1xf32>
    %547 = vector.multi_reduction <add>, %546, %cst_260 [0] : vector<8x1xf32> to vector<1xf32>
    %548 = vector.shape_cast %547 : vector<1xf32> to vector<1x1xf32>
    %cst_261 = arith.constant 7.812500e-03 : f32
    %549 = vector.broadcast %cst_261 : f32 to vector<1x1xf32>
    %550 = arith.mulf %548, %549 : vector<1x1xf32>
    %551 = arith.mulf %543, %543 : vector<1x1xf32>
    %552 = arith.subf %550, %551 : vector<1x1xf32>
    %cst_262 = arith.constant 0.000000e+00 : f32
    %553 = vector.broadcast %cst_262 : f32 to vector<1x1xf32>
    %554 = arith.maximumf %552, %553 : vector<1x1xf32>
    %cst_263 = arith.constant 9.99999974E-6 : f32
    %555 = vector.broadcast %cst_263 : f32 to vector<1x1xf32>
    %556 = arith.addf %554, %555 : vector<1x1xf32>
    %557 = math.rsqrt %556 : vector<1x1xf32>
    %558 = vector.broadcast %557 : vector<1x1xf32> to vector<8x1xf32>
    %559 = arith.mulf %536, %558 : vector<8x1xf32>
    %560 = vector.broadcast %543 : vector<1x1xf32> to vector<8x1xf32>
    %561 = arith.mulf %560, %559 : vector<8x1xf32>
    %562 = arith.subf %537, %561 : vector<8x1xf32>
    %563 = vector.broadcast %559 : vector<8x1xf32> to vector<8x16xf32>
    %564 = arith.mulf %535, %563 : vector<8x16xf32>
    %565 = vector.broadcast %562 : vector<8x1xf32> to vector<8x16xf32>
    %566 = arith.addf %564, %565 : vector<8x16xf32>
    %cst_264 = arith.constant 0.707106769 : f32
    %567 = vector.broadcast %cst_264 : f32 to vector<8x16xf32>
    %568 = arith.mulf %566, %567 : vector<8x16xf32>
    %569 = math.absf %568 : vector<8x16xf32>
    %cst_265 = arith.constant 0.327591091 : f32
    %570 = vector.broadcast %cst_265 : f32 to vector<8x16xf32>
    %571 = arith.mulf %570, %569 : vector<8x16xf32>
    %cst_266 = arith.constant 1.000000e+00 : f32
    %572 = vector.broadcast %cst_266 : f32 to vector<8x16xf32>
    %573 = arith.addf %572, %571 : vector<8x16xf32>
    %cst_267 = arith.constant 1.000000e+00 : f32
    %574 = vector.broadcast %cst_267 : f32 to vector<8x16xf32>
    %575 = arith.divf %574, %573 : vector<8x16xf32>
    %cst_268 = arith.constant 1.06140542 : f32
    %576 = vector.broadcast %cst_268 : f32 to vector<8x16xf32>
    %577 = arith.mulf %576, %575 : vector<8x16xf32>
    %cst_269 = arith.constant 1.45315206 : f32
    %578 = vector.broadcast %cst_269 : f32 to vector<8x16xf32>
    %579 = arith.subf %577, %578 : vector<8x16xf32>
    %580 = arith.mulf %579, %575 : vector<8x16xf32>
    %cst_270 = arith.constant 1.42141378 : f32
    %581 = vector.broadcast %cst_270 : f32 to vector<8x16xf32>
    %582 = arith.addf %580, %581 : vector<8x16xf32>
    %583 = arith.mulf %582, %575 : vector<8x16xf32>
    %cst_271 = arith.constant 0.284496725 : f32
    %584 = vector.broadcast %cst_271 : f32 to vector<8x16xf32>
    %585 = arith.subf %583, %584 : vector<8x16xf32>
    %586 = arith.mulf %585, %575 : vector<8x16xf32>
    %cst_272 = arith.constant 0.254829586 : f32
    %587 = vector.broadcast %cst_272 : f32 to vector<8x16xf32>
    %588 = arith.addf %586, %587 : vector<8x16xf32>
    %589 = arith.mulf %588, %575 : vector<8x16xf32>
    %cst_273 = arith.constant 0.000000e+00 : f32
    %590 = vector.broadcast %cst_273 : f32 to vector<8x16xf32>
    %591 = arith.subf %590, %569 : vector<8x16xf32>
    %592 = arith.mulf %591, %569 : vector<8x16xf32>
    %593 = math.exp %592 : vector<8x16xf32>
    %594 = arith.mulf %589, %593 : vector<8x16xf32>
    %cst_274 = arith.constant 1.000000e+00 : f32
    %595 = vector.broadcast %cst_274 : f32 to vector<8x16xf32>
    %596 = arith.subf %595, %594 : vector<8x16xf32>
    %cst_275 = arith.constant 0.000000e+00 : f32
    %597 = vector.broadcast %cst_275 : f32 to vector<8x16xf32>
    %598 = arith.cmpf oge, %568, %597 : vector<8x16xf32>
    %cst_276 = arith.constant 0.000000e+00 : f32
    %599 = vector.broadcast %cst_276 : f32 to vector<8x16xf32>
    %600 = arith.subf %599, %596 : vector<8x16xf32>
    %601 = arith.select %598, %596, %600 : vector<8x16xi1>, vector<8x16xf32>
    %cst_277 = arith.constant 5.000000e-01 : f32
    %602 = vector.broadcast %cst_277 : f32 to vector<8x16xf32>
    %603 = arith.mulf %602, %566 : vector<8x16xf32>
    %cst_278 = arith.constant 1.000000e+00 : f32
    %604 = vector.broadcast %cst_278 : f32 to vector<8x16xf32>
    %605 = arith.addf %604, %601 : vector<8x16xf32>
    %606 = arith.mulf %603, %605 : vector<8x16xf32>
    %607 = arith.addf %606, %406 : vector<8x16xf32>
    %cst_279 = arith.constant 0.000000e+00 : f32
    %608 = vector.broadcast %cst_279 : f32 to vector<8x2xf32>
    %609 = vector.extract_strided_slice %607 {offsets = [0, 0], sizes = [8, 14], strides = [1, 1]} : vector<8x16xf32> to vector<8x14xf32>
    %610 = tpu.concatenate %608, %609 in 1 : vector<8x2xf32>, vector<8x14xf32> -> vector<8x16xf32>
    %cst_280 = arith.constant 0.000000e+00 : f32
    %611 = vector.broadcast %cst_280 : f32 to vector<8x1xf32>
    %612 = vector.extract_strided_slice %607 {offsets = [0, 0], sizes = [8, 15], strides = [1, 1]} : vector<8x16xf32> to vector<8x15xf32>
    %613 = tpu.concatenate %611, %612 in 1 : vector<8x1xf32>, vector<8x15xf32> -> vector<8x16xf32>
    %cst_281 = arith.constant 0.000000e+00 : f32
    %614 = vector.broadcast %cst_281 : f32 to vector<8x1xf32>
    %615 = vector.extract_strided_slice %607 {offsets = [0, 1], sizes = [8, 15], strides = [1, 1]} : vector<8x16xf32> to vector<8x15xf32>
    %616 = tpu.concatenate %615, %614 in 1 : vector<8x15xf32>, vector<8x1xf32> -> vector<8x16xf32>
    %cst_282 = arith.constant 0.000000e+00 : f32
    %617 = vector.broadcast %cst_282 : f32 to vector<8x2xf32>
    %618 = vector.extract_strided_slice %607 {offsets = [0, 2], sizes = [8, 14], strides = [1, 1]} : vector<8x16xf32> to vector<8x14xf32>
    %619 = tpu.concatenate %618, %617 in 1 : vector<8x14xf32>, vector<8x2xf32> -> vector<8x16xf32>
    %cst_283 = arith.constant -2.343750e-02 : f32
    %620 = vector.broadcast %cst_283 : f32 to vector<8x16xf32>
    %621 = arith.mulf %620, %610 : vector<8x16xf32>
    %cst_284 = arith.constant 0.2265625 : f32
    %622 = vector.broadcast %cst_284 : f32 to vector<8x16xf32>
    %623 = arith.mulf %622, %613 : vector<8x16xf32>
    %624 = arith.addf %621, %623 : vector<8x16xf32>
    %cst_285 = arith.constant 0.8671875 : f32
    %625 = vector.broadcast %cst_285 : f32 to vector<8x16xf32>
    %626 = arith.mulf %625, %607 : vector<8x16xf32>
    %627 = arith.addf %624, %626 : vector<8x16xf32>
    %cst_286 = arith.constant -7.031250e-02 : f32
    %628 = vector.broadcast %cst_286 : f32 to vector<8x16xf32>
    %629 = arith.mulf %628, %616 : vector<8x16xf32>
    %630 = arith.addf %627, %629 : vector<8x16xf32>
    %cst_287 = arith.constant -7.031250e-02 : f32
    %631 = vector.broadcast %cst_287 : f32 to vector<8x16xf32>
    %632 = arith.mulf %631, %613 : vector<8x16xf32>
    %cst_288 = arith.constant 0.8671875 : f32
    %633 = vector.broadcast %cst_288 : f32 to vector<8x16xf32>
    %634 = arith.mulf %633, %607 : vector<8x16xf32>
    %635 = arith.addf %632, %634 : vector<8x16xf32>
    %cst_289 = arith.constant 0.2265625 : f32
    %636 = vector.broadcast %cst_289 : f32 to vector<8x16xf32>
    %637 = arith.mulf %636, %616 : vector<8x16xf32>
    %638 = arith.addf %635, %637 : vector<8x16xf32>
    %cst_290 = arith.constant -2.343750e-02 : f32
    %639 = vector.broadcast %cst_290 : f32 to vector<8x16xf32>
    %640 = arith.mulf %639, %619 : vector<8x16xf32>
    %641 = arith.addf %638, %640 : vector<8x16xf32>
    %642 = vector.extract_strided_slice %607 {offsets = [0, 1], sizes = [8, 1], strides = [1, 1]} : vector<8x16xf32> to vector<8x1xf32>
    %643 = vector.extract_strided_slice %607 {offsets = [0, 2], sizes = [8, 1], strides = [1, 1]} : vector<8x16xf32> to vector<8x1xf32>
    %644 = vector.extract_strided_slice %607 {offsets = [0, 14], sizes = [8, 1], strides = [1, 1]} : vector<8x16xf32> to vector<8x1xf32>
    %645 = vector.extract_strided_slice %607 {offsets = [0, 13], sizes = [8, 1], strides = [1, 1]} : vector<8x16xf32> to vector<8x1xf32>
    %c0_i32 = arith.constant 0 : i32
    %646 = vector.broadcast %c0_i32 : i32 to vector<1x16xi32>
    %647 = arith.cmpi eq, %2, %646 : vector<1x16xi32>
    %cst_291 = arith.constant -2.343750e-02 : f32
    %648 = vector.broadcast %cst_291 : f32 to vector<8x1xf32>
    %649 = arith.mulf %648, %643 : vector<8x1xf32>
    %cst_292 = arith.constant 0.2265625 : f32
    %650 = vector.broadcast %cst_292 : f32 to vector<8x1xf32>
    %651 = arith.mulf %650, %642 : vector<8x1xf32>
    %652 = arith.addf %649, %651 : vector<8x1xf32>
    %cst_293 = arith.constant 0.000000e+00 : f32
    %653 = vector.shape_cast %647 : vector<1x16xi1> to vector<1x16xi1>
    %654 = vector.broadcast %653 : vector<1x16xi1> to vector<8x16xi1>
    %655 = vector.shape_cast %652 : vector<8x1xf32> to vector<8x1xf32>
    %656 = vector.broadcast %655 : vector<8x1xf32> to vector<8x16xf32>
    %657 = vector.broadcast %cst_293 : f32 to vector<8x16xf32>
    %658 = arith.select %654, %656, %657 : vector<8x16xi1>, vector<8x16xf32>
    %659 = arith.addf %630, %658 : vector<8x16xf32>
    %c1_i32 = arith.constant 1 : i32
    %660 = vector.broadcast %c1_i32 : i32 to vector<1x16xi32>
    %661 = arith.cmpi eq, %2, %660 : vector<1x16xi32>
    %cst_294 = arith.constant -2.343750e-02 : f32
    %662 = vector.broadcast %cst_294 : f32 to vector<8x1xf32>
    %663 = arith.mulf %662, %642 : vector<8x1xf32>
    %cst_295 = arith.constant 0.000000e+00 : f32
    %664 = vector.shape_cast %661 : vector<1x16xi1> to vector<1x16xi1>
    %665 = vector.broadcast %664 : vector<1x16xi1> to vector<8x16xi1>
    %666 = vector.shape_cast %663 : vector<8x1xf32> to vector<8x1xf32>
    %667 = vector.broadcast %666 : vector<8x1xf32> to vector<8x16xf32>
    %668 = vector.broadcast %cst_295 : f32 to vector<8x16xf32>
    %669 = arith.select %665, %667, %668 : vector<8x16xi1>, vector<8x16xf32>
    %670 = arith.addf %659, %669 : vector<8x16xf32>
    %c15_i32 = arith.constant 15 : i32
    %671 = vector.broadcast %c15_i32 : i32 to vector<1x16xi32>
    %672 = arith.cmpi eq, %2, %671 : vector<1x16xi32>
    %cst_296 = arith.constant -7.031250e-02 : f32
    %673 = vector.broadcast %cst_296 : f32 to vector<8x1xf32>
    %674 = arith.mulf %673, %644 : vector<8x1xf32>
    %cst_297 = arith.constant 0.000000e+00 : f32
    %675 = vector.shape_cast %672 : vector<1x16xi1> to vector<1x16xi1>
    %676 = vector.broadcast %675 : vector<1x16xi1> to vector<8x16xi1>
    %677 = vector.shape_cast %674 : vector<8x1xf32> to vector<8x1xf32>
    %678 = vector.broadcast %677 : vector<8x1xf32> to vector<8x16xf32>
    %679 = vector.broadcast %cst_297 : f32 to vector<8x16xf32>
    %680 = arith.select %676, %678, %679 : vector<8x16xi1>, vector<8x16xf32>
    %681 = arith.addf %670, %680 : vector<8x16xf32>
    %c0_i32_298 = arith.constant 0 : i32
    %682 = vector.broadcast %c0_i32_298 : i32 to vector<1x16xi32>
    %683 = arith.cmpi eq, %2, %682 : vector<1x16xi32>
    %cst_299 = arith.constant -7.031250e-02 : f32
    %684 = vector.broadcast %cst_299 : f32 to vector<8x1xf32>
    %685 = arith.mulf %684, %642 : vector<8x1xf32>
    %cst_300 = arith.constant 0.000000e+00 : f32
    %686 = vector.shape_cast %683 : vector<1x16xi1> to vector<1x16xi1>
    %687 = vector.broadcast %686 : vector<1x16xi1> to vector<8x16xi1>
    %688 = vector.shape_cast %685 : vector<8x1xf32> to vector<8x1xf32>
    %689 = vector.broadcast %688 : vector<8x1xf32> to vector<8x16xf32>
    %690 = vector.broadcast %cst_300 : f32 to vector<8x16xf32>
    %691 = arith.select %687, %689, %690 : vector<8x16xi1>, vector<8x16xf32>
    %692 = arith.addf %641, %691 : vector<8x16xf32>
    %c14_i32 = arith.constant 14 : i32
    %693 = vector.broadcast %c14_i32 : i32 to vector<1x16xi32>
    %694 = arith.cmpi eq, %2, %693 : vector<1x16xi32>
    %cst_301 = arith.constant -2.343750e-02 : f32
    %695 = vector.broadcast %cst_301 : f32 to vector<8x1xf32>
    %696 = arith.mulf %695, %644 : vector<8x1xf32>
    %cst_302 = arith.constant 0.000000e+00 : f32
    %697 = vector.shape_cast %694 : vector<1x16xi1> to vector<1x16xi1>
    %698 = vector.broadcast %697 : vector<1x16xi1> to vector<8x16xi1>
    %699 = vector.shape_cast %696 : vector<8x1xf32> to vector<8x1xf32>
    %700 = vector.broadcast %699 : vector<8x1xf32> to vector<8x16xf32>
    %701 = vector.broadcast %cst_302 : f32 to vector<8x16xf32>
    %702 = arith.select %698, %700, %701 : vector<8x16xi1>, vector<8x16xf32>
    %703 = arith.addf %692, %702 : vector<8x16xf32>
    %c15_i32_303 = arith.constant 15 : i32
    %704 = vector.broadcast %c15_i32_303 : i32 to vector<1x16xi32>
    %705 = arith.cmpi eq, %2, %704 : vector<1x16xi32>
    %cst_304 = arith.constant 0.2265625 : f32
    %706 = vector.broadcast %cst_304 : f32 to vector<8x1xf32>
    %707 = arith.mulf %706, %644 : vector<8x1xf32>
    %cst_305 = arith.constant -2.343750e-02 : f32
    %708 = vector.broadcast %cst_305 : f32 to vector<8x1xf32>
    %709 = arith.mulf %708, %645 : vector<8x1xf32>
    %710 = arith.addf %707, %709 : vector<8x1xf32>
    %cst_306 = arith.constant 0.000000e+00 : f32
    %711 = vector.shape_cast %705 : vector<1x16xi1> to vector<1x16xi1>
    %712 = vector.broadcast %711 : vector<1x16xi1> to vector<8x16xi1>
    %713 = vector.shape_cast %710 : vector<8x1xf32> to vector<8x1xf32>
    %714 = vector.broadcast %713 : vector<8x1xf32> to vector<8x16xf32>
    %715 = vector.broadcast %cst_306 : f32 to vector<8x16xf32>
    %716 = arith.select %712, %714, %715 : vector<8x16xi1>, vector<8x16xf32>
    %717 = arith.addf %703, %716 : vector<8x16xf32>
    %c0_307 = arith.constant 0 : index
    %c0_308 = arith.constant 0 : index
    %c0_309 = arith.constant 0 : index
    %c0_310 = arith.constant 0 : index
    %718 = vector.load %arg10[%c0_307, %c0_308, %c0_309, %c0_310] : memref<1x2x8x16xf32, #tpu.memory_space<vmem>>, vector<1x1x8x16xf32>
    %719 = vector.shape_cast %718 : vector<1x1x8x16xf32> to vector<8x16xf32>
    %720 = vector.shape_cast %681 : vector<8x16xf32> to vector<1x1x8x16xf32>
    tpu.vector_store %arg10[%c0_307, %c0_308, %c0_309, %c0_310], %720 {strides = array<i32>} : memref<1x2x8x16xf32, #tpu.memory_space<vmem>>, vector<1x1x8x16xf32>,
    %c0_311 = arith.constant 0 : index
    %c1_312 = arith.constant 1 : index
    %c0_313 = arith.constant 0 : index
    %c0_314 = arith.constant 0 : index
    %721 = vector.load %arg10[%c0_311, %c1_312, %c0_313, %c0_314] : memref<1x2x8x16xf32, #tpu.memory_space<vmem>>, vector<1x1x8x16xf32>
    %722 = vector.shape_cast %721 : vector<1x1x8x16xf32> to vector<8x16xf32>
    %723 = vector.shape_cast %717 : vector<8x16xf32> to vector<1x1x8x16xf32>
    tpu.vector_store %arg10[%c0_311, %c1_312, %c0_313, %c0_314], %723 {strides = array<i32>} : memref<1x2x8x16xf32, #tpu.memory_space<vmem>>, vector<1x1x8x16xf32>,
    return
  }
  func.func @transform_0(%arg0: i32) -> (i32, i32, i32) {
    %c0_i32 = arith.constant 0 : i32
    %c0_i32_0 = arith.constant 0 : i32
    %c0_i32_1 = arith.constant 0 : i32
    return %arg0, %c0_i32, %c0_i32_0 : i32, i32, i32
  }
  func.func @transform_1(%arg0: i32) -> (i32, i32) {
    %c0_i32 = arith.constant 0 : i32
    %c0_i32_0 = arith.constant 0 : i32
    %c0_i32_1 = arith.constant 0 : i32
    return %c0_i32, %c0_i32_0 : i32, i32
  }
  func.func @transform_2(%arg0: i32) -> (i32, i32) {
    %c0_i32 = arith.constant 0 : i32
    %c0_i32_0 = arith.constant 0 : i32
    %c0_i32_1 = arith.constant 0 : i32
    return %c0_i32, %c0_i32_0 : i32, i32
  }
  func.func @transform_3(%arg0: i32) -> (i32, i32) {
    %c0_i32 = arith.constant 0 : i32
    %c0_i32_0 = arith.constant 0 : i32
    %c0_i32_1 = arith.constant 0 : i32
    return %c0_i32, %c0_i32_0 : i32, i32
  }
  func.func @transform_4(%arg0: i32) -> (i32, i32) {
    %c0_i32 = arith.constant 0 : i32
    %c0_i32_0 = arith.constant 0 : i32
    %c0_i32_1 = arith.constant 0 : i32
    return %c0_i32, %c0_i32_0 : i32, i32
  }
  func.func @transform_5(%arg0: i32) -> (i32, i32) {
    %c0_i32 = arith.constant 0 : i32
    %c0_i32_0 = arith.constant 0 : i32
    %c0_i32_1 = arith.constant 0 : i32
    return %c0_i32, %c0_i32_0 : i32, i32
  }
  func.func @transform_6(%arg0: i32) -> (i32, i32) {
    %c0_i32 = arith.constant 0 : i32
    %c0_i32_0 = arith.constant 0 : i32
    %c0_i32_1 = arith.constant 0 : i32
    return %c0_i32, %c0_i32_0 : i32, i32
  }
  func.func @transform_7(%arg0: i32) -> (i32, i32) {
    %c0_i32 = arith.constant 0 : i32
    %c0_i32_0 = arith.constant 0 : i32
    %c0_i32_1 = arith.constant 0 : i32
    return %c0_i32, %c0_i32_0 : i32, i32
  }
  func.func @transform_8(%arg0: i32) -> (i32, i32) {
    %c0_i32 = arith.constant 0 : i32
    %c0_i32_0 = arith.constant 0 : i32
    %c0_i32_1 = arith.constant 0 : i32
    return %c0_i32, %c0_i32_0 : i32, i32
  }
  func.func @transform_9(%arg0: i32) -> (i32, i32, i32, i32) {
    %c0_i32 = arith.constant 0 : i32
    %c0_i32_0 = arith.constant 0 : i32
    %c0_i32_1 = arith.constant 0 : i32
    %c0_i32_2 = arith.constant 0 : i32
    return %arg0, %c0_i32, %c0_i32_0, %c0_i32_1 : i32, i32, i32, i32
  }
}

</mosaic_0001>

<bundles_post_ra>
// kernel: tpu_custom_call.1
= control target key start
LH: loop header
LB: loop body
LE: loop exit
PB: predicated region body
PF: predicated region fallthrough
CT: control target
= control target key end

     0   :  { %s3351_s0 = inlined_call_operand.hbm [shape: f32[2,4,16], index: 0, kind: input, shape index: {}]   ;;  %s3352_s1 = inlined_call_operand.hbm [shape: f32[8,18], index: 1, kind: input, shape index: {}]   ;;  %s3353_s2 = inlined_call_operand.hbm [shape: f32[4,40], index: 2, kind: input, shape index: {}]   ;;  %s3354_s3 = inlined_call_operand.hbm [shape: f32[4,40], index: 3, kind: input, shape index: {}]   ;;  %s3355_s4 = inlined_call_operand.hbm [shape: f32[4,40], index: 4, kind: input, shape index: {}]   ;;  %s3356_s5 = inlined_call_operand.hbm [shape: f32[4,40], index: 5, kind: input, shape index: {}]   ;;  %s3357_s6 = inlined_call_operand.hbm [shape: f32[8,4], index: 6, kind: input, shape index: {}]   ;;  %s3358_s7 = inlined_call_operand.hbm [shape: f32[4,40], index: 7, kind: input, shape index: {}]   ;;  %s3359_s8 = inlined_call_operand.hbm [shape: f32[8,40], index: 8, kind: input, shape index: {}]   ;;  %s3360_s9 = inlined_call_operand.hbm [shape: f32[2,2,8,16], index: 9, kind: output, shape index: {}]  }
   0x1   :  { %3364 = sst [smem:[#allocation25_spill]] %s3352_s1 }
   0x2   :  { %3365 = sst [smem:[#allocation26_spill]] %s3353_s2 }
   0x3   :  { %14 = vsyncpa [#allocation4], 0 }
   0x4   :  { %16 = vsyncpa [#allocation4 + $0x1], 0 }
   0x5   :  { %17 = vsyncpa [#allocation7], 0 }
   0x6   :  { %18 = vsyncpa [#allocation10], 0 }
   0x7   :  { %19 = vsyncpa [#allocation13], 0 }
   0x8   :  { %20 = vsyncpa [#allocation16], 0 }
   0x9   :  { %21 = vsyncpa [#allocation5], 0 }
   0xa   :  { %23 = vsyncpa [#allocation5 + $0x1], 0  ;;  %s2761_s30 = smov 0   ;;  %s2763_s10 = smov 0  }
   0xb   :  { %s2765_s11 = smov 0   ;;  %s2767_s12 = smov 0  }
   0xc LB: > { %s2674_s13 = smov [#allocation6]   ;;  %s2782_s15 = sadd.s32 4294967295, %s2672_s12   ;;  %s2672_s12 = sphi %s2767_s12, %s3392_s12   ;;  %s2668_s11 = sphi %s2765_s11, %s3391_s11   ;;  %s2664_s10 = sphi %s2763_s10, %s3390_s10   ;;  %s2660_s30 = sphi %s2761_s30, %s3389_s30  }
   0xd   : > { %s267_s14 = sshll.u32 %s2674_s13, 4  ;;  %p1916_p0 = scmp.ge.s32.totalorder %s2672_s12, 1  ;;  %s2787_s14 = int_to_ptr.vmem [resolvable:$true] %s267_s14 }
   0xe   : > { %p3361_p1 = scmp.eq.s32.totalorder %s2782_s15, 0  ;;  %p254_p2 = scmp.lt.s32.totalorder %s2672_s12, 3 }
   0xf   : > { %s2675_s17 = smov [#allocation9]   ;;  %s2676_s19 = smov [#allocation12]  }
  0x10   : > { %p2789_p3 = pnand %p1916_p0, %p254_p2  ;;  %s289_s18 = sshll.u32 %s2675_s17, 4  ;;  %s2796_s18 = int_to_ptr.vmem [resolvable:$true] %s289_s18 }
  0x11   : > { %s311_s20 = sshll.u32 %s2676_s19, 4  ;;  %s2677_s22 = smov [#allocation15]   ;;  %s2804_s20 = int_to_ptr.vmem [resolvable:$true] %s311_s20 }
  0x12   : > { %s3366_s16 = scalar_select %p2789_p3, 1, 0 }
  0x13   : > { %p2159_p5 = pneg %p2789_p3  ;;  %s2806_s23 = sshll.u32 %s2677_s22, 4  ;;  %s334_s23 = int_to_ptr.vmem [resolvable:$true] %s2806_s23 }
  0x14   : > { %s3368_s1 = sld [smem:[#allocation25_spill]] }
  0x15   : > { %p2800_p6 = pnand %p2159_p5, %p3361_p1 }
  0x17   : > { %p2816_p8 = pneg %p2800_p6 }
  0x1a   : > { %s2336_s26 = scalar_lea.hbm %s3368_s1, 128 }
  0x1b   : > { %p2337_p7 = scmp.ne.s32.totalorder %s3368_s1, %s2336_s26  ;;  %p2343_p11 = scmp.lt.u32.totalorder %s2336_s26, %s3368_s1 }
  0x1d   : > { %p2339_p9 = pnand %p2816_p8, %p2337_p7 }
  0x1f   : > { %p2340_p10 = pneg %p2339_p9 }
  0x21   : > { %p2345_p12 = pnand %p2343_p11, %p2340_p10 }
  0x23   : > { %2348 = shalt.err (!%p2345_p12)
}
  0x24   : > { %s2349_s19 = scalar_lea.vmem %s2787_s14, 128  ;;  %p2357_p5 = scmp.lt.s32.totalorder %s2787_s14, %s2787_s14 }
  0x25   : > { %p2350_p13 = scmp.ne.s32.totalorder %s2787_s14, %s2349_s19  ;;  %p2358_p4 = scmp.lt.s32.totalorder %s2349_s19, %s2349_s19 }
  0x27   : > { %p2352_p0 = pnand %p2350_p13, %p2816_p8  ;;  %p2359_p7 = por %p2358_p4, %p2357_p5 }
  0x29   : > { %p2353_p2 = pneg %p2352_p0 }
  0x2b   : > { %p2360_p9 = pnand %p2359_p7, %p2353_p2 }
  0x2d   : > { %2363 = shalt.err (!%p2360_p9)
}
  0x2e   : > { %2162 = dma.hbm_to_vmem [thread:$0]  (!%p2800_p6), %s3368_s1, 128, %s2787_s14, [#allocation7]  }
  0x2f   : > { %s2364_s27 = scalar_lea.hbm %s3354_s3, 64 }
  0x30   : > { %p2365_p10 = scmp.ne.s32.totalorder %s3354_s3, %s2364_s27  ;;  %p2371_p12 = scmp.lt.u32.totalorder %s2364_s27, %s3354_s3 }
  0x32   : > { %p2367_p4 = pnand %p2365_p10, %p2816_p8 }
  0x34   : > { %p2368_p11 = pneg %p2367_p4 }
  0x36   : > { %p2373_p13 = pnand %p2371_p12, %p2368_p11 }
  0x38   : > { %2376 = shalt.err (!%p2373_p13)
}
  0x39   : > { %s2377_s14 = scalar_lea.vmem %s2796_s18, 64  ;;  %p2385_p7 = scmp.lt.s32.totalorder %s2796_s18, %s2796_s18 }
  0x3a   : > { %p2378_p0 = scmp.ne.s32.totalorder %s2796_s18, %s2377_s14  ;;  %p2386_p9 = scmp.lt.s32.totalorder %s2377_s14, %s2377_s14 }
  0x3c   : > { %p2380_p2 = pnand %p2378_p0, %p2816_p8  ;;  %p2387_p10 = por %p2386_p9, %p2385_p7 }
  0x3e   : > { %p2381_p5 = pneg %p2380_p2 }
  0x40   : > { %p2388_p4 = pnand %p2387_p10, %p2381_p5 }
  0x42   : > { %2391 = shalt.err (!%p2388_p4)
}
  0x43   : > { %2168 = dma.hbm_to_vmem [thread:$0]  (!%p2800_p6), %s3354_s3, 64, %s2796_s18, [#allocation10]  }
  0x44   : > { %s2392_s27 = scalar_lea.hbm %s3356_s5, 64 }
  0x45   : > { %p2393_p11 = scmp.ne.s32.totalorder %s3356_s5, %s2392_s27  ;;  %p2399_p0 = scmp.lt.u32.totalorder %s2392_s27, %s3356_s5 }
  0x47   : > { %p2395_p12 = pnand %p2393_p11, %p2816_p8 }
  0x49   : > { %p2396_p13 = pneg %p2395_p12 }
  0x4b   : > { %p2401_p2 = pnand %p2399_p0, %p2396_p13 }
  0x4d   : > { %2404 = shalt.err (!%p2401_p2)
}
  0x4e   : > { %s2405_s18 = scalar_lea.vmem %s2804_s20, 64  ;;  %p2413_p10 = scmp.lt.s32.totalorder %s2804_s20, %s2804_s20 }
  0x4f   : > { %p2406_p5 = scmp.ne.s32.totalorder %s2804_s20, %s2405_s18  ;;  %p2414_p4 = scmp.lt.s32.totalorder %s2405_s18, %s2405_s18 }
  0x51   : > { %p2408_p7 = pnand %p2406_p5, %p2816_p8  ;;  %p2415_p11 = por %p2414_p4, %p2413_p10 }
  0x53   : > { %p2409_p9 = pneg %p2408_p7 }
  0x55   : > { %p2416_p12 = pnand %p2415_p11, %p2409_p9 }
  0x57   : > { %2419 = shalt.err (!%p2416_p12)
}
  0x58   : > { %2174 = dma.hbm_to_vmem [thread:$0]  (!%p2800_p6), %s3356_s5, 64, %s2804_s20, [#allocation13]  }
  0x59   : > { %s2678_s24 = smov [#allocation8]   ;;  %s2420_s28 = scalar_lea.hbm %s3358_s7, 64 }
  0x5a   : > { %s278_s25 = sshll.u32 %s2678_s24, 4  ;;  %p2421_p13 = scmp.ne.s32.totalorder %s3358_s7, %s2420_s28  ;;  %s279_s25 = int_to_ptr.vmem [resolvable:$true] %s278_s25 }
  0x5b   : > { %p2427_p5 = scmp.lt.u32.totalorder %s2420_s28, %s3358_s7 }
  0x5c   : > { %p2423_p0 = pnand %p2421_p13, %p2816_p8 }
  0x5e   : > { %p2424_p2 = pneg %p2423_p0 }
  0x60   : > { %p2429_p7 = pnand %p2427_p5, %p2424_p2 }
  0x62   : > { %2432 = shalt.err (!%p2429_p7)
}
  0x63   : > { %s2433_s20 = scalar_lea.vmem %s334_s23, 64  ;;  %p2441_p11 = scmp.lt.s32.totalorder %s334_s23, %s334_s23 }
  0x64   : > { %p2434_p9 = scmp.ne.s32.totalorder %s334_s23, %s2433_s20  ;;  %p2442_p12 = scmp.lt.s32.totalorder %s2433_s20, %s2433_s20 }
  0x66   : > { %p2436_p10 = pnand %p2434_p9, %p2816_p8  ;;  %p2443_p1 = por %p2442_p12, %p2441_p11 }
  0x68   : > { %p2437_p4 = pneg %p2436_p10 }
  0x6a   : > { %p2444_p3 = pnand %p2443_p1, %p2437_p4 }
  0x6c   : > { %2447 = shalt.err (!%p2444_p3)
}
  0x6d   : > { %2180 = dma.hbm_to_vmem [thread:$0]  (!%p2800_p6), %s3358_s7, 64, %s334_s23, [#allocation16]  }
  0x6e   : > { %s3370_s2 = sld [smem:[#allocation26_spill]] }
  0x74   : > { %s2448_s27 = scalar_lea.hbm %s3370_s2, 64 }
  0x75   : > { %p2449_p13 = scmp.ne.s32.totalorder %s3370_s2, %s2448_s27  ;;  %p2455_p3 = scmp.lt.u32.totalorder %s2448_s27, %s3370_s2 }
  0x77   : > { %p2451_p0 = pnand %p2449_p13, %p2816_p8 }
  0x79   : > { %p2452_p1 = pneg %p2451_p0 }
  0x7b   : > { %p2457_p2 = pnand %p2455_p3, %p2452_p1 }
  0x7d   : > { %2460 = shalt.err (!%p2457_p2)
}
  0x7e   : > { %s2461_s18 = scalar_lea.vmem %s279_s25, 64  ;;  %p2469_p10 = scmp.lt.s32.totalorder %s279_s25, %s279_s25 }
  0x7f   : > { %p2462_p5 = scmp.ne.s32.totalorder %s279_s25, %s2461_s18  ;;  %p2470_p4 = scmp.lt.s32.totalorder %s2461_s18, %s2461_s18 }
  0x81   : > { %p2464_p7 = pnand %p2462_p5, %p2816_p8  ;;  %p2471_p11 = por %p2470_p4, %p2469_p10 }
  0x83   : > { %p2465_p9 = pneg %p2464_p7 }
  0x85   : > { %p2472_p12 = pnand %p2471_p11, %p2465_p9 }
  0x87   : > { %2475 = shalt.err (!%p2472_p12)
}
  0x88   : > { %2165 = dma.hbm_to_vmem [thread:$0]  (!%p2800_p6), %s3370_s2, 64, %s279_s25, [#allocation7]  }
  0x89   : > { %s2679_s14 = smov [#allocation11]   ;;  %s2680_s24 = smov [#allocation14]  }
  0x8a   : > { %s300_s22 = sshll.u32 %s2679_s14, 4  ;;  %s322_s26 = sshll.u32 %s2680_s24, 4  ;;  %s301_s22 = int_to_ptr.vmem [resolvable:$true] %s300_s22  ;;  %s323_s26 = int_to_ptr.vmem [resolvable:$true] %s322_s26 }
  0x8b   : > { %s2476_s13 = scalar_lea.hbm %s3355_s4, 64 }
  0x8c   : > { %p2477_p13 = scmp.ne.s32.totalorder %s3355_s4, %s2476_s13  ;;  %p2483_p3 = scmp.lt.u32.totalorder %s2476_s13, %s3355_s4 }
  0x8e   : > { %p2479_p0 = pnand %p2477_p13, %p2816_p8 }
  0x90   : > { %p2480_p1 = pneg %p2479_p0 }
  0x92   : > { %p2485_p2 = pnand %p2483_p3, %p2480_p1 }
  0x94   : > { %2488 = shalt.err (!%p2485_p2)
}
  0x95   : > { %s2489_s25 = scalar_lea.vmem %s301_s22, 64  ;;  %p2497_p10 = scmp.lt.s32.totalorder %s301_s22, %s301_s22 }
  0x96   : > { %p2490_p5 = scmp.ne.s32.totalorder %s301_s22, %s2489_s25  ;;  %p2498_p4 = scmp.lt.s32.totalorder %s2489_s25, %s2489_s25 }
  0x98   : > { %p2492_p7 = pnand %p2490_p5, %p2816_p8  ;;  %p2499_p11 = por %p2498_p4, %p2497_p10 }
  0x9a   : > { %p2493_p9 = pneg %p2492_p7 }
  0x9c   : > { %p2500_p12 = pnand %p2499_p11, %p2493_p9 }
  0x9e   : > { %2503 = shalt.err (!%p2500_p12)
}
  0x9f   : > { %2171 = dma.hbm_to_vmem [thread:$0]  (!%p2800_p6), %s3355_s4, 64, %s301_s22, [#allocation10]  }
  0xa0   : > { %s2504_s28 = scalar_lea.hbm %s3357_s6, 128 }
  0xa1   : > { %p2505_p13 = scmp.ne.s32.totalorder %s3357_s6, %s2504_s28  ;;  %p2511_p3 = scmp.lt.u32.totalorder %s2504_s28, %s3357_s6 }
  0xa3   : > { %p2507_p0 = pnand %p2505_p13, %p2816_p8 }
  0xa5   : > { %p2508_p1 = pneg %p2507_p0 }
  0xa7   : > { %p2513_p2 = pnand %p2511_p3, %p2508_p1 }
  0xa9   : > { %2516 = shalt.err (!%p2513_p2)
}
  0xaa   : > { %s2517_s23 = scalar_lea.vmem %s323_s26, 128  ;;  %p2525_p10 = scmp.lt.s32.totalorder %s323_s26, %s323_s26 }
  0xab   : > { %p2518_p5 = scmp.ne.s32.totalorder %s323_s26, %s2517_s23  ;;  %p2526_p4 = scmp.lt.s32.totalorder %s2517_s23, %s2517_s23 }
  0xad   : > { %p2520_p7 = pnand %p2518_p5, %p2816_p8  ;;  %p2527_p11 = por %p2526_p4, %p2525_p10 }
  0xaf   : > { %p2521_p9 = pneg %p2520_p7 }
  0xb1   : > { %p2528_p12 = pnand %p2527_p11, %p2521_p9 }
  0xb3   : > { %2531 = shalt.err (!%p2528_p12)
}
  0xb4   : > { %2177 = dma.hbm_to_vmem [thread:$0]  (!%p2800_p6), %s3357_s6, 128, %s323_s26, [#allocation13]  }
  0xb5   : > { %s2681_s20 = smov [#allocation17]   ;;  %s2532_s28 = scalar_lea.hbm %s3359_s8, 128 }
  0xb6   : > { %s344_s14 = sshll.u32 %s2681_s20, 4  ;;  %p2533_p13 = scmp.ne.s32.totalorder %s3359_s8, %s2532_s28  ;;  %s345_s14 = int_to_ptr.vmem [resolvable:$true] %s344_s14 }
  0xb7   : > { %p2539_p3 = scmp.lt.u32.totalorder %s2532_s28, %s3359_s8 }
  0xb8   : > { %p2535_p0 = pnand %p2533_p13, %p2816_p8 }
  0xba   : > { %p2536_p1 = pneg %p2535_p0 }
  0xbc   : > { %p2541_p2 = pnand %p2539_p3, %p2536_p1 }
  0xbe   : > { %2544 = shalt.err (!%p2541_p2)
}
  0xbf   : > { %s2545_s26 = scalar_lea.vmem %s345_s14, 128  ;;  %p2553_p10 = scmp.lt.s32.totalorder %s345_s14, %s345_s14 }
  0xc0   : > { %p2546_p5 = scmp.ne.s32.totalorder %s345_s14, %s2545_s26  ;;  %p2554_p4 = scmp.lt.s32.totalorder %s2545_s26, %s2545_s26 }
  0xc2   : > { %p2548_p7 = pnand %p2546_p5, %p2816_p8  ;;  %p2555_p11 = por %p2554_p4, %p2553_p10 }
  0xc4   : > { %p2549_p9 = pneg %p2548_p7 }
  0xc6   : > { %p2556_p12 = pnand %p2555_p11, %p2549_p9 }
  0xc8   : > { %2559 = shalt.err (!%p2556_p12)
}
  0xc9   : > { %2183 = dma.hbm_to_vmem [thread:$0]  (!%p2800_p6), %s3359_s8, 128, %s345_s14, [#allocation16]  }
  0xca   : > { %s1915_s29 = sadd.s32 4294967294, %s2672_s12   ;;  %s2976_s21 = sadd.s32 1, %s2672_s12  }
  0xcb   : > { %s33_s25 = ssub.s32 %s2672_s12, %s2976_s21  ;;  %s36_s20 = sadd.s32 1, %s2668_s11 }
  0xcc   : > { %p34_p8 = scmp.eq.s32.totalorder %s33_s25, 0  ;;  %p43_p13 = scmp.ne.s32.totalorder %s2668_s11, %s2664_s10 }
  0xcd   : > { %p44_p0 = scmp.eq.s32.totalorder %s2672_s12, 0  ;;  %p49_p1 = scmp.ne.s32.totalorder %s2664_s10, %s2660_s30 }
  0xce   : > { %s2987_s24 = scalar_select %p34_p8, %s2668_s11, %s36_s20  }
  0xcf   : > { %p2989_p3 = por %p44_p0, %p43_p13  ;;  %p3372_p2 = scmp.eq.s32.totalorder %s2782_s15, 0 }
  0xd0   : > { %p241_p5 = scmp.eq.s32.totalorder %s2782_s15, 1  ;;  %p247_p7 = scmp.eq.s32.totalorder %s1915_s29, 1 }
  0xd1   : > { %p2995_p6 = por %p3372_p2, %p49_p1  ;;  %p2200_p9 = scmp.lt.s32.totalorder %s2672_s12, 2 }
  0xd2   : > { %s355_s28 = sand.u32 1, %s2668_s11   ;;  %p3002_p10 = por %p241_p5, %p43_p13 }
  0xd3   : > { %p3006_p4 = por %p247_p7, %p49_p1  ;;  %s1926_s19 = sshll.u32 %s355_s28, 2 }
  0xd4   : > { %s3374_s13 = scalar_select %p3002_p10, 1, 0 }
  0xd5   : > { %s3375_s17 = scalar_select %p3006_p4, 1, 0 }
  0xd6   : > { %s1927_s18 = sshll.u32 %s2672_s12, 6  ;;  %s359_s29 = scalar_lea.vmem [#allocation3], %s1926_s19 }
  0xd7   : > { %s3014_s22 = scalar_lea.hbm %s3351_s0, %s1927_s18  ;;  %s366_s25 = sshll.u32 %s359_s29, 4  ;;  %s3016_s25 = int_to_ptr.vmem [resolvable:$true] %s366_s25 }
  0xd8   : > { %p3020_p11 = pnand %p2200_p9, %p2989_p3  ;;  %s356_s1 = scalar_lea.sflag [#allocation4], %s355_s28 }
  0xd9   : > { %s2560_s2 = scalar_lea.hbm %s3014_s22, 64  ;;  %s2565_s26 = scalar_lea.hbm %s3351_s0, 128 }
  0xda   : > { %p2561_p12 = scmp.ne.s32.totalorder %s3014_s22, %s2560_s2  ;;  %p2562_p8 = pneg %p3020_p11 }
  0xdb   : > { %p2566_p1 = scmp.lt.u32.totalorder %s3014_s22, %s3351_s0  ;;  %p2567_p3 = scmp.lt.u32.totalorder %s2565_s26, %s2560_s2 }
  0xdc   : > { %p2563_p13 = pnand %p2562_p8, %p2561_p12  ;;  %p2569_p5 = scmp.lt.u32.totalorder %s2560_s2, %s3014_s22 }
  0xdd   : > { %p2568_p2 = por %p2567_p3, %p2566_p1 }
  0xde   : > { %p2564_p0 = pneg %p2563_p13 }
  0xdf   : > { %p2570_p7 = por %p2569_p5, %p2568_p2 }
  0xe1   : > { %p2571_p9 = pnand %p2570_p7, %p2564_p0 }
  0xe3   : > { %2574 = shalt.err (!%p2571_p9)
}
  0xe4   : > { %s2575_s28 = scalar_lea.vmem %s3016_s25, 64  ;;  %s2682_s29 = smov [#allocation3]  }
  0xe5   : > { %p2576_p12 = scmp.ne.s32.totalorder %s3016_s25, %s2575_s28  ;;  %s2580_s19 = sshll.u32 %s2682_s29, 4  ;;  %s2581_s19 = int_to_ptr.vmem [resolvable:$false] %s2580_s19 }
  0xe6   : > { %s2582_s18 = scalar_lea.vmem %s2581_s19, 128  ;;  %p2583_p10 = scmp.lt.s32.totalorder %s3016_s25, %s2581_s19 }
  0xe7   : > { %p2578_p13 = pnand %p2576_p12, %p2562_p8  ;;  %p2584_p1 = scmp.lt.s32.totalorder %s2582_s18, %s2575_s28 }
  0xe9   : > { %p2579_p4 = pneg %p2578_p13  ;;  %p2585_p3 = por %p2584_p1, %p2583_p10 }
  0xeb   : > { %p2586_p2 = pnand %p2585_p3, %p2579_p4 }
  0xed   : > { %2589 = shalt.err (!%p2586_p2)
}
  0xee   : > { %2187 = dma.hbm_to_vmem [thread:$0]  (!%p3020_p11), %s3014_s22, 64, %s3016_s25, %s356_s1  }
  0xef   : > { %p3377_p0 = scmp.ne.s32.totalorder %s3366_s16, 0 }
  0xf0   : > { %s3052_s2 = sand.u32 (!%p3377_p0), 1, %s2664_s10  }
  0xf1   : > { %375 = sbr.rel (%p3377_p0) target bundleno = 5515 (0x158b), region = 56  ;;  %s1929_s26 = sshll.u32 (!%p3377_p0), %s3052_s2, 2 }
  0xf2   : > { %s378_s27 = scalar_lea.sflag (!%p3377_p0), [#allocation4], %s3052_s2  ;;  %s381_s23 = scalar_lea.vmem (!%p3377_p0), [#allocation3], %s1929_s26 }
  0xf8   : > { %2635 = dma.done.wait (%p2995_p6), %s378_s27, 64  }
  0xf9   : > { %2637 = vsyncadd (%p2995_p6), %s378_s27, 4294967232  ;;  %p3378_p10 = scmp.eq.s32.totalorder %s2782_s15, 0 }
  0xfb   : > { %2639 = dma.done.wait (%p3378_p10), [#allocation7], 192   ;;  %p3379_p4 = pmov %p3378_p10 }
  0xfd   : > { %2641 = vsyncadd (%p3379_p4), [#allocation7], 4294967104  ;;  %p3380_p11 = pmov %p3379_p4 }
  0xfe   : > { %p3381_p8 = pmov %p3379_p4 }
  0xff   : > { %2643 = dma.done.wait (%p3380_p11), [#allocation10], 128  }
 0x100   : > { %2645 = vsyncadd (%p3381_p8), [#allocation10], 4294967168  ;;  %p3382_p5 = pmov %p3379_p4 }
 0x101   : > { %p3383_p7 = pmov %p3379_p4 }
 0x102   : > { %2647 = dma.done.wait (%p3382_p5), [#allocation13], 192  }
 0x103   : > { %2649 = vsyncadd (%p3383_p7), [#allocation13], 4294967104  ;;  %p3384_p6 = pmov %p3379_p4 }
 0x104   : > { %p3385_p9 = pmov %p3379_p4 }
 0x105   : > { %2651 = dma.done.wait (%p3384_p6), [#allocation16], 192  }
 0x106   : > { %2653 = vsyncadd (%p3385_p9), [#allocation16], 4294967104  ;;  %v2683_v0 = vmov 0.0|0.0   ;;  %v3078_v1 = vld [vmem:[%s381_s23] sm:$0xf]  ;;  %vm458_vm0 = vcmask 1043456  }
 0x107   : > { %2087 = vmatprep.subr.bf16.mxu0 %v2683_v0  ;;  %2093 = vmatprep.subr.bf16.mxu1 %v2683_v0  ;;  %vm460_vm1 = vcmask 130048   ;;  %s2684_s1 = smov 2   ;;  %v469_v2 = vsel %vm458_vm0, %v3078_v1, 0.0  ;;  %s2685_s16 = smov 127   ;;  %vm2688_vm2 = vmmov 0   ;;  %v2689_v3 = vmov 0.0  }
 0x108   : > { %453 = vrot.lane.b32.xlu0 %v3078_v1, %s2684_s1  ;;  %471 = vrot.lane.b32.xlu1 %v3078_v1, %s2685_s16  ;;  %470 = vst.msk [vmem:[#allocation2 + $0x10] sm:$0xff] %vm460_vm1, %v469_v2  ;;  %s2686_s14 = smov 1   ;;  %s2687_s22 = smov 126   ;;  %v451_v4 = vld [vmem:[#allocation6] sm:$0xf]  ;;  %v2690_v5 = vmov 0  }
 0x109   : > { %2014 = vmatprep.mubr.msk.f32.mxu0 %vm2688_vm2, %v2689_v3  ;;  %2027 = vmatprep.mubr.msk.f32.mxu1 %vm2688_vm2, %v2689_v3  ;;  %vm456_vm3 = vcmask 15360   ;;  %vm474_vm4 = vcmask 121856   ;;  %vm465_vm5 = vcmask 7168   ;;  %vm481_vm6 = vcmask 113664   ;;  %v485_v25 = vld [vmem:[#allocation8] sm:$0xf] }
 0x10a   : > { %2277 = vset.pattern.permute.xlu0 %v2690_v5  ;;  %vm496_vm7 = vcmask 326656   ;;  %vm571_vm8 = vcmask 125952   ;;  %v2691_v33 = vmov 1   ;;  %v2692_v56 = vmov 2   ;;  %v570_v57 = vld [vmem:[#allocation6] sm:$0xf] }
 0x10b   : > { %2279 = vset.pattern.permute.xlu1 %v2692_v56  ;;  %vm1207_vm14 = vcmask 31744   ;;  %s1938_s25 = sshll.u32 %s3052_s2, 4  ;;  %s1965_s20 = sshll.u32 %s2782_s15, 8 }
 0x10c   : > { %462 = vrot.lane.b32.xlu0 %v3078_v1, %s2686_s14  ;;  %478 = vrot.lane.b32.xlu1 %v3078_v1, %s2687_s22  ;;  %s447_s28 = scalar_lea.vmem [#allocation18], %s1938_s25  ;;  %s3304_s26 = scalar_lea.hbm %s3360_s9, %s1965_s20 }
 0x10d   : > { %s1766_s29 = sshll.u32 %s447_s28, 4  ;;  %s1753_s15 = scalar_lea.sflag [#allocation5], %s3052_s2  ;;  %s3306_s29 = int_to_ptr.vmem [resolvable:$true] %s1766_s29 }
 0x10e   : > { %s2590_s27 = scalar_lea.vmem %s3306_s29, 256  ;;  %p3386_p13 = scmp.ne.s32.totalorder %s3374_s13, 0 }
 0x10f   : > { %v488_v18 = vld [vmem:[#allocation2 + $0x10] sm:$0xff]  ;;  %p2591_p12 = scmp.ne.s32.totalorder %s3306_s29, %s2590_s27  ;;  %s2708_s23 = smov [#allocation18]  }
 0x110   : > { %493 = vperm.xlu0 %2277, %v451_v4  }
 0x111   : > { %p2592_p1 = pnand %p2591_p12, %p3386_p13 }
 0x113   : > { %p2593_p3 = pneg %p2592_p1 }
 0x114   : > { %2278 = vset.pattern.permute.xlu0 %v2691_v33 }
 0x17a   : > { %v454_v6 = vpop.permute.xlu0 %453  ;;  %v472_v7 = vpop.permute.xlu1 %471 }
 0x17b   : > { %v457_v8 = vsel %vm456_vm3, 0.0, %v454_v6  ;;  %v475_v9 = vsel %vm474_vm4, %v472_v7, 0.0 }
 0x17c   : > { %v459_v10 = vsel %vm458_vm0, %v457_v8, 0.0  ;;  %v476_v11 = vsel %vm458_vm0, %v475_v9, 0.0 }
 0x17d   : > { %461 = vst.msk [vmem:[#allocation2] sm:$0xff] %vm460_vm1, %v459_v10  ;;  %477 = vst.msk [vmem:[#allocation2 + $0x18] sm:$0xff] %vm460_vm1, %v476_v11 }
 0x17e   : > { %v463_v12 = vpop.permute.xlu0 %462  ;;  %v479_v13 = vpop.permute.xlu1 %478 }
 0x17f   : > { %v466_v14 = vsel %vm465_vm5, 0.0, %v463_v12  ;;  %v482_v15 = vsel %vm481_vm6, %v479_v13, 0.0 }
 0x180   : > { %v467_v16 = vsel %vm458_vm0, %v466_v14, 0.0  ;;  %v483_v17 = vsel %vm458_vm0, %v482_v15, 0.0 }
 0x181   : > { %468 = vst.msk [vmem:[#allocation2 + $0x8] sm:$0xff] %vm460_vm1, %v467_v16  ;;  %484 = vst.msk [vmem:[#allocation2 + $0x20] sm:$0xff] %vm460_vm1, %v483_v17 }
 0x184   : > { %v486_v19 = vld [vmem:[#allocation2] sm:$0xff]  ;;  %v489_v21 = vld [vmem:[#allocation2 + $0x18] sm:$0xff] }
 0x185   : > { %v2091_v23 = vpack.c.bf16 %v489_v21, %v488_v18 }
 0x188   : > { %v487_v20 = vld [vmem:[#allocation2 + $0x8] sm:$0xff]  ;;  %v490_v24 = vld [vmem:[#allocation2 + $0x20] sm:$0xff] }
 0x189   : > { %v2088_v22 = vpack.c.bf16 %v487_v20, %v486_v19 }
 0x18b   : > { %2089 = vmatpush3.bf16.msra.mxu0 %v2088_v22 }
 0x18c   : > { %2090 = vmatprep.subr.bf16.mxu0 %v2683_v0 }
 0x18f   : > { %2092 = vmatpush3.bf16.msra.mxu0 %v2091_v23  ;;  %v494_v26 = vpop.permute.xlu0 %493 }
 0x190   : > { %2012 = vmatprep.subr.mxu0 %v2689_v3 }
 0x193   : > { %2013 = vmatpush3.msra.mxu0 %v490_v24 }
 0x194   : > { %2015 = vmatmul.mubr.msk.f32.vlgmr.msra.gmra.mrb[0].mxu0 %vm496_vm7, %v485_v25  ;;  %2099 = vmatprep.subr.bf16.mxu0 %v2683_v0 }
 0x195   : > { %2040 = vmatprep.mubr.msk.f32.mxu0 %vm2688_vm2, %v2689_v3 }
 0x267   : > { %v566_v27 = vpop.f32.mrb[0].mxu0 }
 0x268   : > { %v567_v28 = vadd.f32 %v566_v27, %v494_v26  ;;  %v2016_v29 = vpop.f32.mrb[1].mxu0 }
 0x26a   : > { %v572_v30 = vsel %vm571_vm8, %v567_v28, 0.0  ;;  %v583_v31 = vmul.f32 %v567_v28, %v567_v28 }
 0x26b   : > { %573 = vadd.xlane.f32.xlu1 %v572_v30 }
 0x26c   : > { %v584_v32 = vsel %vm571_vm8, %v583_v31, 0.0 }
 0x26d   : > { %585 = vadd.xlane.f32.xlu0 %v584_v32  ;;  %v2693_v32 = vmov 3  }
 0x2f8   : > { %v574_v34 = vpop.xlane.xlu1 %573 }
 0x2f9   : > { %v575_v35 = vsel %vm458_vm0, %v574_v34, 0.0 }
 0x2fa   : > { %v576_v36 = vrot.slane %v575_v35, 4  ;;  %v586_v37 = vpop.xlane.xlu0 %585 }
 0x2fb   : > { %v587_v38 = vsel %vm458_vm0, %v586_v37, 0.0 }
 0x2fc   : > { %v577_v39 = vadd.f32 %v576_v36, %v575_v35  ;;  %v588_v40 = vrot.slane %v587_v38, 4 }
 0x2fe   : > { %v578_v41 = vrot.slane %v577_v39, 2  ;;  %v589_v42 = vadd.f32 %v588_v40, %v587_v38 }
 0x300   : > { %v579_v43 = vadd.f32 %v578_v41, %v577_v39  ;;  %v590_v44 = vrot.slane %v589_v42, 2 }
 0x302   : > { %v580_v45 = vrot.slane %v579_v43, 1  ;;  %v591_v46 = vadd.f32 %v590_v44, %v589_v42 }
 0x304   : > { %v581_v47 = vadd.f32 %v580_v45, %v579_v43  ;;  %v592_v48 = vrot.slane %v591_v46, 1 }
 0x306   : > { %v582_v49 = vmul.f32 0.015625, %v581_v47  ;;  %v593_v50 = vadd.f32 %v592_v48, %v591_v46 }
 0x308   : > { %v595_v51 = vmul.f32 %v582_v49, %v582_v49  ;;  %v594_v52 = vmul.f32 0.015625, %v593_v50 }
 0x30a   : > { %v596_v53 = vsub.f32 %v594_v52, %v595_v51  ;;  %v673_v52 = vld [vmem:[#allocation9] sm:$0xf] }
 0x30c   : > { %v597_v54 = vmax.f32 %v596_v53, 0.0 }
 0x30e   : > { %v598_v55 = vadd.f32 1e-05, %v597_v54 }
 0x310   : > { %2300 = vrsqrt.f32 %v598_v55 }
 0x31a   : > { %v2301_v58 = vpop.eup %2300 }
 0x31b   : > { %v600_v59 = vmul.f32 %v2301_v58, %v570_v57 }
 0x31d   : > { %609 = vperm.xlu0 %2278, %v600_v59   ;;  %v601_v60 = vmul.f32 %v600_v59, %v582_v49 }
 0x31f   : > { %603 = vrot.lane.b32.xlu1 %v601_v60, %s2686_s14 }
 0x391   : > { %v604_v61 = vpop.permute.xlu1 %603 }
 0x392   : > { %v606_v62 = vsub.f32 %v570_v57, %v604_v61 }
 0x394   : > { %615 = vperm.xlu1 %2279, %v606_v62   ;;  %v2694_v62 = vmov 4  }
 0x395   : > { %2281 = vset.pattern.permute.xlu0 %v2694_v62 }
 0x398   : > { %2280 = vset.pattern.permute.xlu1 %v2693_v32 }
 0x39c   : > { %v610_v63 = vpop.permute.xlu0 %609 }
 0x39d   : > { %v612_v2 = vmul.f32 %v610_v63, %v567_v28 }
 0x413   : > { %v616_v4 = vpop.permute.xlu1 %615 }
 0x414   : > { %v618_v5 = vadd.f32 %v616_v4, %v612_v2 }
 0x416   : > { %v619_v6 = vmul.f32 0.70710677, %v618_v5  ;;  %v643_v28 = vmul.f32 0.5, %v618_v5 }
 0x418   : > { %v620_v7 = vand.u32 2147483647, %v619_v6  ;;  %vm640_vm9 = vcmp.ge.f32.partialorder %v619_v6, 0.0 }
 0x41a   : > { %v621_v8 = vmul.f32 0.3275911, %v620_v7  ;;  %v634_v10 = vsub.f32 0.0, %v620_v7 }
 0x41c   : > { %v622_v9 = vadd.f32 1.0, %v621_v8  ;;  %v635_v12 = vmul.f32 %v634_v10, %v620_v7 }
 0x41e   : > { %2302 = vrcp.f32 %v622_v9  ;;  %v636_v15 = vmul.f32 1.442695, %v635_v12 }
 0x420   : > { %2304 = vpow2.f32 %v636_v15 }
 0x428   : > { %v2303_v11 = vpop.eup %2302 }
 0x429   : > { %v625_v13 = vmul.f32 1.0614054, %v2303_v11 }
 0x42a   : > { %v2305_v23 = vpop.eup %2304 }
 0x42b   : > { %v1940_v14 = vadd.f32 -1.4531521, %v625_v13 }
 0x42d   : > { %v627_v16 = vmul.f32 %v2303_v11, %v1940_v14 }
 0x42f   : > { %v628_v17 = vadd.f32 1.4214138, %v627_v16 }
 0x431   : > { %v629_v18 = vmul.f32 %v2303_v11, %v628_v17 }
 0x433   : > { %v1941_v19 = vadd.f32 -0.28449672, %v629_v18 }
 0x435   : > { %v631_v20 = vmul.f32 %v2303_v11, %v1941_v19 }
 0x437   : > { %v632_v21 = vadd.f32 0.2548296, %v631_v20 }
 0x439   : > { %v633_v22 = vmul.f32 %v2303_v11, %v632_v21 }
 0x43b   : > { %v638_v24 = vmul.f32 %v2305_v23, %v633_v22 }
 0x43d   : > { %v639_v25 = vsub.f32 1.0, %v638_v24  ;;  %v2695_v24 = vmov 5  }
 0x43f   : > { %v641_v26 = vsub.f32 0.0, %v639_v25 }
 0x441   : > { %v642_v27 = vsel %vm640_vm9, %v639_v25, %v641_v26  ;;  %v757_v25 = vld [vmem:[#allocation6] sm:$0xf] }
 0x442   : > { %v644_v29 = vadd.f32 1.0, %v642_v27 }
 0x444   : > { %v645_v30 = vmul.f32 %v644_v29, %v643_v28 }
 0x446   : > { %v659_v31 = vsel %vm458_vm0, %v645_v30, 0.0  ;;  %647 = vrot.lane.b32.xlu1 %v645_v30, %s2684_s1 }
 0x447   : > { %660 = vst.msk [vmem:[#allocation2 + $0x10] sm:$0xff] %vm460_vm1, %v659_v31 }
 0x44a   : > { %653 = vrot.lane.b32.xlu1 %v645_v30, %s2686_s14 }
 0x44e   : > { %661 = vrot.lane.b32.xlu1 %v645_v30, %s2685_s16  ;;  %v676_v49 = vld [vmem:[#allocation2 + $0x10] sm:$0xff] }
 0x452   : > { %667 = vrot.lane.b32.xlu1 %v645_v30, %s2687_s22 }
 0x456   : > { %681 = vperm.xlu1 %2280, %v570_v57  }
 0x45a   : > { %2282 = vset.pattern.permute.xlu1 %v2695_v24 }
 0x4b8   : > { %v648_v34 = vpop.permute.xlu1 %647 }
 0x4b9   : > { %v650_v35 = vsel %vm456_vm3, 0.0, %v648_v34 }
 0x4ba   : > { %v651_v36 = vsel %vm458_vm0, %v650_v35, 0.0 }
 0x4bb   : > { %652 = vst.msk [vmem:[#allocation2] sm:$0xff] %vm460_vm1, %v651_v36 }
 0x4bc   : > { %v654_v37 = vpop.permute.xlu1 %653 }
 0x4bd   : > { %v656_v38 = vsel %vm465_vm5, 0.0, %v654_v37 }
 0x4be   : > { %v657_v39 = vsel %vm458_vm0, %v656_v38, 0.0 }
 0x4bf   : > { %658 = vst.msk [vmem:[#allocation2 + $0x8] sm:$0xff] %vm460_vm1, %v657_v39 }
 0x4c0   : > { %v662_v40 = vpop.permute.xlu1 %661 }
 0x4c1   : > { %v664_v41 = vsel %vm474_vm4, %v662_v40, 0.0 }
 0x4c2   : > { %v665_v42 = vsel %vm458_vm0, %v664_v41, 0.0  ;;  %v674_v46 = vld [vmem:[#allocation2] sm:$0xff] }
 0x4c3   : > { %666 = vst.msk [vmem:[#allocation2 + $0x18] sm:$0xff] %vm460_vm1, %v665_v42 }
 0x4c4   : > { %v668_v43 = vpop.permute.xlu1 %667 }
 0x4c5   : > { %v670_v44 = vsel %vm481_vm6, %v668_v43, 0.0 }
 0x4c6   : > { %v671_v45 = vsel %vm458_vm0, %v670_v44, 0.0  ;;  %v675_v47 = vld [vmem:[#allocation2 + $0x8] sm:$0xff] }
 0x4c7   : > { %672 = vst.msk [vmem:[#allocation2 + $0x20] sm:$0xff] %vm460_vm1, %v671_v45  ;;  %v2094_v48 = vpack.c.bf16 %v675_v47, %v674_v46 }
 0x4c9   : > { %2095 = vmatpush3.bf16.msra.mxu1 %v2094_v48 }
 0x4ca   : > { %2096 = vmatprep.subr.bf16.mxu1 %v2683_v0  ;;  %v677_v50 = vld [vmem:[#allocation2 + $0x18] sm:$0xff] }
 0x4cb   : > { %v2097_v51 = vpack.c.bf16 %v677_v50, %v676_v49 }
 0x4cd   : > { %2098 = vmatpush3.bf16.msra.mxu1 %v2097_v51 }
 0x4ce   : > { %2025 = vmatprep.subr.mxu1 %v2689_v3  ;;  %v678_v53 = vld [vmem:[#allocation2 + $0x20] sm:$0xff] }
 0x4d1   : > { %2026 = vmatpush3.msra.mxu1 %v678_v53 }
 0x4d2   : > { %2028 = vmatmul.mubr.msk.f32.vlgmr.msra.gmra.mrb[0].mxu1 %vm496_vm7, %v673_v52  ;;  %2105 = vmatprep.subr.bf16.mxu1 %v2683_v0 }
 0x4d3   : > { %2053 = vmatprep.mubr.msk.f32.mxu1 %vm2688_vm2, %v2689_v3 }
 0x4d5   : > { %v682_v54 = vpop.permute.xlu1 %681 }
 0x5a5   : > { %v753_v55 = vpop.f32.mrb[0].mxu1 }
 0x5a6   : > { %v754_v57 = vadd.f32 %v753_v55, %v682_v54  ;;  %v2029_v58 = vpop.f32.mrb[1].mxu1 }
 0x5a8   : > { %v758_v59 = vsel %vm571_vm8, %v754_v57, 0.0  ;;  %v769_v60 = vmul.f32 %v754_v57, %v754_v57 }
 0x5a9   : > { %759 = vadd.xlane.f32.xlu1 %v758_v59 }
 0x5aa   : > { %v770_v61 = vsel %vm571_vm8, %v769_v60, 0.0 }
 0x5ab   : > { %771 = vadd.xlane.f32.xlu0 %v770_v61 }
 0x636   : > { %v760_v63 = vpop.xlane.xlu1 %759 }
 0x637   : > { %v761_v2 = vsel %vm458_vm0, %v760_v63, 0.0 }
 0x638   : > { %v762_v4 = vrot.slane %v761_v2, 4  ;;  %v772_v5 = vpop.xlane.xlu0 %771 }
 0x639   : > { %v773_v6 = vsel %vm458_vm0, %v772_v5, 0.0 }
 0x63a   : > { %v763_v7 = vadd.f32 %v762_v4, %v761_v2  ;;  %v774_v8 = vrot.slane %v773_v6, 4  ;;  %v2696_v2 = vmov 6  }
 0x63c   : > { %v764_v9 = vrot.slane %v763_v7, 2  ;;  %v775_v10 = vadd.f32 %v774_v8, %v773_v6 }
 0x63e   : > { %v765_v11 = vadd.f32 %v764_v9, %v763_v7  ;;  %v776_v12 = vrot.slane %v775_v10, 2 }
 0x640   : > { %v766_v13 = vrot.slane %v765_v11, 1  ;;  %v777_v14 = vadd.f32 %v776_v12, %v775_v10 }
 0x642   : > { %v767_v15 = vadd.f32 %v766_v13, %v765_v11  ;;  %v778_v16 = vrot.slane %v777_v14, 1 }
 0x644   : > { %v768_v17 = vmul.f32 0.015625, %v767_v15  ;;  %v779_v18 = vadd.f32 %v778_v16, %v777_v14 }
 0x646   : > { %v781_v19 = vmul.f32 %v768_v17, %v768_v17  ;;  %v780_v20 = vmul.f32 0.015625, %v779_v18 }
 0x648   : > { %v782_v21 = vsub.f32 %v780_v20, %v781_v19 }
 0x64a   : > { %v783_v22 = vmax.f32 %v782_v21, 0.0  ;;  %v860_v21 = vld [vmem:[#allocation11] sm:$0xf] }
 0x64c   : > { %v784_v23 = vadd.f32 1e-05, %v783_v22 }
 0x64e   : > { %2306 = vrsqrt.f32 %v784_v23 }
 0x658   : > { %v2307_v26 = vpop.eup %2306 }
 0x659   : > { %v786_v27 = vmul.f32 %v2307_v26, %v757_v25 }
 0x65b   : > { %795 = vperm.xlu0 %2281, %v786_v27   ;;  %v787_v28 = vmul.f32 %v786_v27, %v768_v17 }
 0x65d   : > { %789 = vrot.lane.b32.xlu1 %v787_v28, %s2686_s14 }
 0x6cf   : > { %v790_v29 = vpop.permute.xlu1 %789 }
 0x6d0   : > { %v792_v30 = vsub.f32 %v757_v25, %v790_v29 }
 0x6d2   : > { %801 = vperm.xlu1 %2282, %v792_v30   ;;  %v2697_v30 = vmov 7  }
 0x6d6   : > { %2283 = vset.pattern.permute.xlu1 %v2696_v2 }
 0x6da   : > { %v796_v31 = vpop.permute.xlu0 %795 }
 0x6db   : > { %v798_v32 = vmul.f32 %v796_v31, %v754_v57 }
 0x751   : > { %v802_v34 = vpop.permute.xlu1 %801 }
 0x752   : > { %v804_v35 = vadd.f32 %v802_v34, %v798_v32 }
 0x754   : > { %v805_v36 = vmul.f32 0.70710677, %v804_v35  ;;  %v829_v59 = vmul.f32 0.5, %v804_v35 }
 0x756   : > { %v806_v37 = vand.u32 2147483647, %v805_v36  ;;  %vm826_vm10 = vcmp.ge.f32.partialorder %v805_v36, 0.0 }
 0x758   : > { %v807_v38 = vmul.f32 0.3275911, %v806_v37  ;;  %v820_v40 = vsub.f32 0.0, %v806_v37 }
 0x75a   : > { %v808_v39 = vadd.f32 1.0, %v807_v38  ;;  %v821_v42 = vmul.f32 %v820_v40, %v806_v37 }
 0x75c   : > { %2308 = vrcp.f32 %v808_v39  ;;  %v822_v45 = vmul.f32 1.442695, %v821_v42 }
 0x75e   : > { %2310 = vpow2.f32 %v822_v45 }
 0x766   : > { %v2309_v41 = vpop.eup %2308 }
 0x767   : > { %v811_v43 = vmul.f32 1.0614054, %v2309_v41 }
 0x768   : > { %v2311_v53 = vpop.eup %2310 }
 0x769   : > { %v1943_v44 = vadd.f32 -1.4531521, %v811_v43 }
 0x76b   : > { %v813_v46 = vmul.f32 %v2309_v41, %v1943_v44 }
 0x76d   : > { %v814_v47 = vadd.f32 1.4214138, %v813_v46 }
 0x76f   : > { %v815_v48 = vmul.f32 %v2309_v41, %v814_v47 }
 0x771   : > { %v1944_v49 = vadd.f32 -0.28449672, %v815_v48 }
 0x773   : > { %v817_v50 = vmul.f32 %v2309_v41, %v1944_v49 }
 0x775   : > { %v818_v51 = vadd.f32 0.2548296, %v817_v50 }
 0x777   : > { %v819_v52 = vmul.f32 %v2309_v41, %v818_v51 }
 0x779   : > { %v824_v54 = vmul.f32 %v2311_v53, %v819_v52 }
 0x77b   : > { %v825_v55 = vsub.f32 1.0, %v824_v54  ;;  %v944_v54 = vld [vmem:[#allocation6] sm:$0xf] }
 0x77d   : > { %v827_v57 = vsub.f32 0.0, %v825_v55 }
 0x77f   : > { %v828_v58 = vsel %vm826_vm10, %v825_v55, %v827_v57 }
 0x780   : > { %v830_v60 = vadd.f32 1.0, %v828_v58 }
 0x782   : > { %v831_v61 = vmul.f32 %v830_v60, %v829_v59  ;;  %v2698_v59 = vmov 8  }
 0x784   : > { %v3150_v62 = vadd.f32 %v831_v61, %v3078_v1 }
 0x786   : > { %v846_v63 = vsel %vm458_vm0, %v3150_v62, 0.0  ;;  %834 = vrot.lane.b32.xlu1 %v3150_v62, %s2684_s1 }
 0x787   : > { %847 = vst.msk [vmem:[#allocation2 + $0x10] sm:$0xff] %vm460_vm1, %v846_v63 }
 0x78a   : > { %840 = vrot.lane.b32.xlu1 %v3150_v62, %s2686_s14 }
 0x78e   : > { %848 = vrot.lane.b32.xlu1 %v3150_v62, %s2685_s16  ;;  %v863_v18 = vld [vmem:[#allocation2 + $0x10] sm:$0xff] }
 0x792   : > { %854 = vrot.lane.b32.xlu1 %v3150_v62, %s2687_s22 }
 0x796   : > { %868 = vperm.xlu1 %2283, %v757_v25  }
 0x79a   : > { %2284 = vset.pattern.permute.xlu1 %v2697_v30 }
 0x7f8   : > { %v835_v1 = vpop.permute.xlu1 %834 }
 0x7f9   : > { %v837_v4 = vsel %vm456_vm3, 0.0, %v835_v1 }
 0x7fa   : > { %v838_v5 = vsel %vm458_vm0, %v837_v4, 0.0 }
 0x7fb   : > { %839 = vst.msk [vmem:[#allocation2] sm:$0xff] %vm460_vm1, %v838_v5 }
 0x7fc   : > { %v841_v6 = vpop.permute.xlu1 %840 }
 0x7fd   : > { %v843_v7 = vsel %vm465_vm5, 0.0, %v841_v6 }
 0x7fe   : > { %v844_v8 = vsel %vm458_vm0, %v843_v7, 0.0 }
 0x7ff   : > { %845 = vst.msk [vmem:[#allocation2 + $0x8] sm:$0xff] %vm460_vm1, %v844_v8 }
 0x800   : > { %v849_v9 = vpop.permute.xlu1 %848 }
 0x801   : > { %v851_v10 = vsel %vm474_vm4, %v849_v9, 0.0 }
 0x802   : > { %v852_v11 = vsel %vm458_vm0, %v851_v10, 0.0  ;;  %v861_v15 = vld [vmem:[#allocation2] sm:$0xff] }
 0x803   : > { %853 = vst.msk [vmem:[#allocation2 + $0x18] sm:$0xff] %vm460_vm1, %v852_v11 }
 0x804   : > { %v855_v12 = vpop.permute.xlu1 %854 }
 0x805   : > { %v857_v13 = vsel %vm481_vm6, %v855_v12, 0.0 }
 0x806   : > { %v858_v14 = vsel %vm458_vm0, %v857_v13, 0.0  ;;  %v862_v16 = vld [vmem:[#allocation2 + $0x8] sm:$0xff] }
 0x807   : > { %859 = vst.msk [vmem:[#allocation2 + $0x20] sm:$0xff] %vm460_vm1, %v858_v14  ;;  %v2100_v17 = vpack.c.bf16 %v862_v16, %v861_v15 }
 0x809   : > { %2101 = vmatpush3.bf16.msra.mxu0 %v2100_v17 }
 0x80a   : > { %2102 = vmatprep.subr.bf16.mxu0 %v2683_v0  ;;  %v864_v19 = vld [vmem:[#allocation2 + $0x18] sm:$0xff] }
 0x80b   : > { %v2103_v20 = vpack.c.bf16 %v864_v19, %v863_v18 }
 0x80d   : > { %2104 = vmatpush3.bf16.msra.mxu0 %v2103_v20 }
 0x80e   : > { %2038 = vmatprep.subr.mxu0 %v2689_v3  ;;  %v865_v22 = vld [vmem:[#allocation2 + $0x20] sm:$0xff] }
 0x811   : > { %2039 = vmatpush3.msra.mxu0 %v865_v22 }
 0x812   : > { %2041 = vmatmul.mubr.msk.f32.vlgmr.msra.gmra.mrb[2].mxu0 %vm496_vm7, %v860_v21  ;;  %2056 = vmatprep.subr.mxu0 %v2689_v3 }
 0x813   : > { %2058 = vmatprep.mubr.msk.f32.mxu0 %vm2688_vm2, %v2689_v3 }
 0x815   : > { %v869_v23 = vpop.permute.xlu1 %868 }
 0x8e5   : > { %v940_v24 = vpop.f32.mrb[2].mxu0 }
 0x8e6   : > { %v941_v25 = vadd.f32 %v940_v24, %v869_v23  ;;  %v2042_v26 = vpop.f32.mrb[3].mxu0 }
 0x8e8   : > { %v945_v27 = vsel %vm571_vm8, %v941_v25, 0.0  ;;  %v956_v28 = vmul.f32 %v941_v25, %v941_v25 }
 0x8e9   : > { %946 = vadd.xlane.f32.xlu1 %v945_v27 }
 0x8ea   : > { %v957_v29 = vsel %vm571_vm8, %v956_v28, 0.0 }
 0x8eb   : > { %958 = vadd.xlane.f32.xlu0 %v957_v29 }
 0x976   : > { %v947_v31 = vpop.xlane.xlu1 %946 }
 0x977   : > { %v948_v32 = vsel %vm458_vm0, %v947_v31, 0.0  ;;  %v2699_v31 = vmov 9  }
 0x978   : > { %v949_v34 = vrot.slane %v948_v32, 4  ;;  %v959_v35 = vpop.xlane.xlu0 %958  ;;  %2286 = vset.pattern.permute.xlu0 %v2699_v31 }
 0x979   : > { %v960_v36 = vsel %vm458_vm0, %v959_v35, 0.0 }
 0x97a   : > { %v950_v37 = vadd.f32 %v949_v34, %v948_v32  ;;  %v961_v38 = vrot.slane %v960_v36, 4 }
 0x97c   : > { %v951_v39 = vrot.slane %v950_v37, 2  ;;  %v962_v40 = vadd.f32 %v961_v38, %v960_v36 }
 0x97e   : > { %v952_v41 = vadd.f32 %v951_v39, %v950_v37  ;;  %v963_v42 = vrot.slane %v962_v40, 2 }
 0x980   : > { %v953_v43 = vrot.slane %v952_v41, 1  ;;  %v964_v44 = vadd.f32 %v963_v42, %v962_v40 }
 0x982   : > { %v954_v45 = vadd.f32 %v953_v43, %v952_v41  ;;  %v965_v46 = vrot.slane %v964_v44, 1 }
 0x984   : > { %v955_v47 = vmul.f32 0.015625, %v954_v45  ;;  %v966_v48 = vadd.f32 %v965_v46, %v964_v44 }
 0x986   : > { %v968_v49 = vmul.f32 %v955_v47, %v955_v47  ;;  %v967_v50 = vmul.f32 0.015625, %v966_v48 }
 0x988   : > { %v969_v51 = vsub.f32 %v967_v50, %v968_v49 }
 0x98a   : > { %v970_v52 = vmax.f32 %v969_v51, 0.0  ;;  %v1046_v51 = vld [vmem:[#allocation12] sm:$0xf] }
 0x98c   : > { %v971_v53 = vadd.f32 1e-05, %v970_v52 }
 0x98e   : > { %2312 = vrsqrt.f32 %v971_v53 }
 0x998   : > { %v2313_v55 = vpop.eup %2312 }
 0x999   : > { %v973_v57 = vmul.f32 %v2313_v55, %v944_v54 }
 0x99b   : > { %982 = vperm.xlu1 %2284, %v973_v57   ;;  %v974_v58 = vmul.f32 %v973_v57, %v955_v47 }
 0x99d   : > { %976 = vrot.lane.b32.xlu0 %v974_v58, %s2686_s14 }
 0x99f   : > { %2285 = vset.pattern.permute.xlu1 %v2698_v59 }
 0xa0f   : > { %v977_v60 = vpop.permute.xlu0 %976 }
 0xa10   : > { %v979_v61 = vsub.f32 %v944_v54, %v977_v60 }
 0xa12   : > { %988 = vperm.xlu1 %2285, %v979_v61   ;;  %v2700_v61 = vmov 10  }
 0xa1a   : > { %v983_v63 = vpop.permute.xlu1 %982 }
 0xa1b   : > { %v985_v2 = vmul.f32 %v983_v63, %v941_v25 }
 0xa91   : > { %v989_v1 = vpop.permute.xlu1 %988 }
 0xa92   : > { %v991_v4 = vadd.f32 %v989_v1, %v985_v2 }
 0xa94   : > { %v992_v5 = vmul.f32 0.70710677, %v991_v4  ;;  %v1016_v27 = vmul.f32 0.5, %v991_v4 }
 0xa96   : > { %v993_v6 = vand.u32 2147483647, %v992_v5  ;;  %vm1013_vm11 = vcmp.ge.f32.partialorder %v992_v5, 0.0 }
 0xa98   : > { %v994_v7 = vmul.f32 0.3275911, %v993_v6  ;;  %v1007_v9 = vsub.f32 0.0, %v993_v6 }
 0xa9a   : > { %v995_v8 = vadd.f32 1.0, %v994_v7  ;;  %v1008_v11 = vmul.f32 %v1007_v9, %v993_v6 }
 0xa9c   : > { %2314 = vrcp.f32 %v995_v8  ;;  %v1009_v14 = vmul.f32 1.442695, %v1008_v11 }
 0xa9e   : > { %2316 = vpow2.f32 %v1009_v14 }
 0xaa6   : > { %v2315_v10 = vpop.eup %2314 }
 0xaa7   : > { %v998_v12 = vmul.f32 1.0614054, %v2315_v10 }
 0xaa8   : > { %v2317_v22 = vpop.eup %2316 }
 0xaa9   : > { %v1946_v13 = vadd.f32 -1.4531521, %v998_v12 }
 0xaab   : > { %v1000_v15 = vmul.f32 %v2315_v10, %v1946_v13 }
 0xaad   : > { %v1001_v16 = vadd.f32 1.4214138, %v1000_v15 }
 0xaaf   : > { %v1002_v17 = vmul.f32 %v2315_v10, %v1001_v16 }
 0xab1   : > { %v1947_v18 = vadd.f32 -0.28449672, %v1002_v17 }
 0xab3   : > { %v1004_v19 = vmul.f32 %v2315_v10, %v1947_v18 }
 0xab5   : > { %v1005_v20 = vadd.f32 0.2548296, %v1004_v19 }
 0xab7   : > { %v1006_v21 = vmul.f32 %v2315_v10, %v1005_v20 }
 0xab9   : > { %v1011_v23 = vmul.f32 %v2317_v22, %v1006_v21 }
 0xabb   : > { %v1012_v24 = vsub.f32 1.0, %v1011_v23  ;;  %v2701_v23 = vmov 11  }
 0xabc   : > { %2288 = vset.pattern.permute.xlu1 %v2701_v23 }
 0xabd   : > { %v1014_v25 = vsub.f32 0.0, %v1012_v24 }
 0xabf   : > { %v1015_v26 = vsel %vm1013_vm11, %v1012_v24, %v1014_v25  ;;  %v1130_v24 = vld [vmem:[#allocation6] sm:$0xf] }
 0xac0   : > { %v1017_v28 = vadd.f32 1.0, %v1015_v26 }
 0xac2   : > { %v1018_v29 = vmul.f32 %v1017_v28, %v1016_v27 }
 0xac4   : > { %v1032_v30 = vsel %vm458_vm0, %v1018_v29, 0.0  ;;  %1026 = vrot.lane.b32.xlu1 %v1018_v29, %s2686_s14  ;;  %1020 = vrot.lane.b32.xlu0 %v1018_v29, %s2684_s1 }
 0xac5   : > { %1033 = vst.msk [vmem:[#allocation2 + $0x10] sm:$0xff] %vm460_vm1, %v1032_v30 }
 0xac8   : > { %1040 = vrot.lane.b32.xlu1 %v1018_v29, %s2687_s22  ;;  %1034 = vrot.lane.b32.xlu0 %v1018_v29, %s2685_s16 }
 0xacc   : > { %1054 = vperm.xlu0 %2286, %v944_v54   ;;  %v1049_v48 = vld [vmem:[#allocation2 + $0x10] sm:$0xff] }
 0xad0   : > { %2287 = vset.pattern.permute.xlu0 %v2700_v61 }
 0xb36   : > { %v1027_v32 = vpop.permute.xlu1 %1026  ;;  %v1021_v34 = vpop.permute.xlu0 %1020 }
 0xb37   : > { %v1029_v35 = vsel %vm465_vm5, 0.0, %v1027_v32  ;;  %v1023_v36 = vsel %vm456_vm3, 0.0, %v1021_v34 }
 0xb38   : > { %v1030_v37 = vsel %vm458_vm0, %v1029_v35, 0.0  ;;  %v1024_v38 = vsel %vm458_vm0, %v1023_v36, 0.0 }
 0xb39   : > { %1031 = vst.msk [vmem:[#allocation2 + $0x8] sm:$0xff] %vm460_vm1, %v1030_v37  ;;  %1025 = vst.msk [vmem:[#allocation2] sm:$0xff] %vm460_vm1, %v1024_v38 }
 0xb3a   : > { %v1041_v39 = vpop.permute.xlu1 %1040  ;;  %v1035_v40 = vpop.permute.xlu0 %1034 }
 0xb3b   : > { %v1043_v41 = vsel %vm481_vm6, %v1041_v39, 0.0  ;;  %v1037_v42 = vsel %vm474_vm4, %v1035_v40, 0.0 }
 0xb3c   : > { %v1044_v43 = vsel %vm458_vm0, %v1043_v41, 0.0  ;;  %v1038_v44 = vsel %vm458_vm0, %v1037_v42, 0.0 }
 0xb3d   : > { %1045 = vst.msk [vmem:[#allocation2 + $0x20] sm:$0xff] %vm460_vm1, %v1044_v43  ;;  %1039 = vst.msk [vmem:[#allocation2 + $0x18] sm:$0xff] %vm460_vm1, %v1038_v44 }
 0xb40   : > { %v1047_v45 = vld [vmem:[#allocation2] sm:$0xff]  ;;  %v1048_v46 = vld [vmem:[#allocation2 + $0x8] sm:$0xff] }
 0xb41   : > { %v2106_v47 = vpack.c.bf16 %v1048_v46, %v1047_v45 }
 0xb43   : > { %2107 = vmatpush3.bf16.msra.mxu1 %v2106_v47 }
 0xb44   : > { %2108 = vmatprep.subr.bf16.mxu1 %v2683_v0  ;;  %v1050_v49 = vld [vmem:[#allocation2 + $0x18] sm:$0xff]  ;;  %v1051_v52 = vld [vmem:[#allocation2 + $0x20] sm:$0xff] }
 0xb45   : > { %v2109_v50 = vpack.c.bf16 %v1050_v49, %v1049_v48 }
 0xb47   : > { %2110 = vmatpush3.bf16.msra.mxu1 %v2109_v50 }
 0xb48   : > { %2051 = vmatprep.subr.mxu1 %v2689_v3 }
 0xb4b   : > { %2052 = vmatpush3.msra.mxu1 %v1051_v52  ;;  %v1055_v53 = vpop.permute.xlu0 %1054 }
 0xb4c   : > { %2054 = vmatmul.mubr.msk.f32.vlgmr.msra.gmra.mrb[2].mxu1 %vm496_vm7, %v1046_v51  ;;  %2111 = vmatprep.subr.bf16.mxu1 %v2683_v0 }
 0xb4d   : > { %2071 = vmatprep.mubr.msk.f32.mxu1 %vm2688_vm2, %v2689_v3 }
 0xc1f   : > { %v1126_v54 = vpop.f32.mrb[2].mxu1 }
 0xc20   : > { %v1127_v55 = vadd.f32 %v1126_v54, %v1055_v53  ;;  %v2055_v57 = vpop.f32.mrb[3].mxu1 }
 0xc22   : > { %v1131_v58 = vsel %vm571_vm8, %v1127_v55, 0.0  ;;  %v1142_v59 = vmul.f32 %v1127_v55, %v1127_v55 }
 0xc23   : > { %1132 = vadd.xlane.f32.xlu1 %v1131_v58 }
 0xc24   : > { %v1143_v60 = vsel %vm571_vm8, %v1142_v59, 0.0 }
 0xc25   : > { %1144 = vadd.xlane.f32.xlu0 %v1143_v60 }
 0xcb0   : > { %v1133_v63 = vpop.xlane.xlu1 %1132 }
 0xcb1   : > { %v1134_v2 = vsel %vm458_vm0, %v1133_v63, 0.0 }
 0xcb2   : > { %v1135_v1 = vrot.slane %v1134_v2, 4  ;;  %v1145_v4 = vpop.xlane.xlu0 %1144 }
 0xcb3   : > { %v1146_v5 = vsel %vm458_vm0, %v1145_v4, 0.0 }
 0xcb4   : > { %v1136_v6 = vadd.f32 %v1135_v1, %v1134_v2  ;;  %v1147_v7 = vrot.slane %v1146_v5, 4  ;;  %v2702_v2 = vmov 12  }
 0xcb6   : > { %v1137_v8 = vrot.slane %v1136_v6, 2  ;;  %v1148_v9 = vadd.f32 %v1147_v7, %v1146_v5 }
 0xcb8   : > { %v1138_v10 = vadd.f32 %v1137_v8, %v1136_v6  ;;  %v1149_v11 = vrot.slane %v1148_v9, 2 }
 0xcba   : > { %v1139_v12 = vrot.slane %v1138_v10, 1  ;;  %v1150_v13 = vadd.f32 %v1149_v11, %v1148_v9 }
 0xcbc   : > { %v1140_v14 = vadd.f32 %v1139_v12, %v1138_v10  ;;  %v1151_v15 = vrot.slane %v1150_v13, 1 }
 0xcbe   : > { %v1141_v16 = vmul.f32 0.015625, %v1140_v14  ;;  %v1152_v17 = vadd.f32 %v1151_v15, %v1150_v13 }
 0xcc0   : > { %v1154_v18 = vmul.f32 %v1141_v16, %v1141_v16  ;;  %v1153_v19 = vmul.f32 0.015625, %v1152_v17 }
 0xcc2   : > { %v1155_v20 = vsub.f32 %v1153_v19, %v1154_v18 }
 0xcc4   : > { %v1156_v21 = vmax.f32 %v1155_v20, 0.0  ;;  %v1310_v20 = vld [vmem:[#allocation15] sm:$0xf] }
 0xcc6   : > { %v1157_v22 = vadd.f32 1e-05, %v1156_v21 }
 0xcc8   : > { %2318 = vrsqrt.f32 %v1157_v22 }
 0xcd2   : > { %v2319_v25 = vpop.eup %2318 }
 0xcd3   : > { %v1159_v26 = vmul.f32 %v2319_v25, %v1130_v24 }
 0xcd5   : > { %1168 = vperm.xlu0 %2287, %v1159_v26   ;;  %v1160_v27 = vmul.f32 %v1159_v26, %v1141_v16 }
 0xcd7   : > { %1162 = vrot.lane.b32.xlu1 %v1160_v27, %s2686_s14 }
 0xd49   : > { %v1163_v28 = vpop.permute.xlu1 %1162 }
 0xd4a   : > { %v1165_v29 = vsub.f32 %v1130_v24, %v1163_v28 }
 0xd4c   : > { %1174 = vperm.xlu1 %2288, %v1165_v29   ;;  %v2703_v29 = vmov 13  }
 0xd4d   : > { %2290 = vset.pattern.permute.xlu0 %v2703_v29  ;;  %v1206_v29 = vld [vmem:[#allocation14] sm:$0xff] }
 0xd50   : > { %2289 = vset.pattern.permute.xlu1 %v2702_v2 }
 0xd54   : > { %v1169_v30 = vpop.permute.xlu0 %1168 }
 0xd55   : > { %v1171_v31 = vmul.f32 %v1169_v30, %v1127_v55 }
 0xdcb   : > { %v1175_v32 = vpop.permute.xlu1 %1174 }
 0xdcc   : > { %v1177_v34 = vadd.f32 %v1175_v32, %v1171_v31 }
 0xdce   : > { %v1178_v35 = vmul.f32 0.70710677, %v1177_v34  ;;  %v1202_v58 = vmul.f32 0.5, %v1177_v34 }
 0xdd0   : > { %v1179_v36 = vand.u32 2147483647, %v1178_v35  ;;  %vm1199_vm12 = vcmp.ge.f32.partialorder %v1178_v35, 0.0 }
 0xdd2   : > { %v1180_v37 = vmul.f32 0.3275911, %v1179_v36  ;;  %v1193_v39 = vsub.f32 0.0, %v1179_v36 }
 0xdd4   : > { %v1181_v38 = vadd.f32 1.0, %v1180_v37  ;;  %v1194_v41 = vmul.f32 %v1193_v39, %v1179_v36 }
 0xdd6   : > { %2320 = vrcp.f32 %v1181_v38  ;;  %v1195_v44 = vmul.f32 1.442695, %v1194_v41 }
 0xdd8   : > { %2322 = vpow2.f32 %v1195_v44 }
 0xde0   : > { %v2321_v40 = vpop.eup %2320 }
 0xde1   : > { %v1184_v42 = vmul.f32 1.0614054, %v2321_v40 }
 0xde2   : > { %v2323_v52 = vpop.eup %2322 }
 0xde3   : > { %v1949_v43 = vadd.f32 -1.4531521, %v1184_v42 }
 0xde5   : > { %v1186_v45 = vmul.f32 %v2321_v40, %v1949_v43 }
 0xde7   : > { %v1187_v46 = vadd.f32 1.4214138, %v1186_v45 }
 0xde9   : > { %v1188_v47 = vmul.f32 %v2321_v40, %v1187_v46 }
 0xdeb   : > { %v1950_v48 = vadd.f32 -0.28449672, %v1188_v47 }
 0xded   : > { %v1190_v49 = vmul.f32 %v2321_v40, %v1950_v48 }
 0xdef   : > { %v1191_v50 = vadd.f32 0.2548296, %v1190_v49 }
 0xdf1   : > { %v1192_v51 = vmul.f32 %v2321_v40, %v1191_v50 }
 0xdf3   : > { %v1197_v53 = vmul.f32 %v2323_v52, %v1192_v51 }
 0xdf5   : > { %v1198_v54 = vsub.f32 1.0, %v1197_v53  ;;  %v2704_v53 = vmov 14  }
 0xdf7   : > { %v1200_v55 = vsub.f32 0.0, %v1198_v54 }
 0xdf9   : > { %v1201_v57 = vsel %vm1199_vm12, %v1198_v54, %v1200_v55  ;;  %v1394_v54 = vld [vmem:[#allocation6] sm:$0xf] }
 0xdfa   : > { %v1203_v59 = vadd.f32 1.0, %v1201_v57 }
 0xdfc   : > { %v1204_v60 = vmul.f32 %v1203_v59, %v1202_v58 }
 0xdfe   : > { %v1205_v61 = vadd.f32 %v1204_v60, %v3150_v62 }
 0xe00   : > { %v1296_v63 = vsel %vm458_vm0, %v1205_v61, 0.0  ;;  %1284 = vrot.lane.b32.xlu1 %v1205_v61, %s2684_s1  ;;  %2057 = vmatpush3.msk.msra.mxu0 %vm458_vm0, %v1205_v61 }
 0xe01   : > { %1297 = vst.msk [vmem:[#allocation2 + $0x10] sm:$0xff] %vm460_vm1, %v1296_v63  ;;  %2117 = vmatprep.subr.bf16.mxu0 %v2683_v0  ;;  %2059 = vmatmul.mubr.msk.f32.vlgmr.msra.gmra.mrb[4].mxu0 %vm1207_vm14, %v1206_v29 }
 0xe02   : > { %2084 = vmatprep.mubr.msk.f32.mxu0 %vm2688_vm2, %v2689_v3 }
 0xe04   : > { %1290 = vrot.lane.b32.xlu1 %v1205_v61, %s2686_s14 }
 0xe08   : > { %1298 = vrot.lane.b32.xlu1 %v1205_v61, %s2685_s16  ;;  %v1313_v17 = vld [vmem:[#allocation2 + $0x10] sm:$0xff] }
 0xe0c   : > { %1304 = vrot.lane.b32.xlu1 %v1205_v61, %s2687_s22 }
 0xe10   : > { %1318 = vperm.xlu1 %2289, %v1130_v24  }
 0xe14   : > { %2291 = vset.pattern.permute.xlu1 %v2704_v53 }
 0xe72   : > { %v1285_v62 = vpop.permute.xlu1 %1284 }
 0xe73   : > { %v1287_v1 = vsel %vm456_vm3, 0.0, %v1285_v62 }
 0xe74   : > { %v1288_v4 = vsel %vm458_vm0, %v1287_v1, 0.0 }
 0xe75   : > { %1289 = vst.msk [vmem:[#allocation2] sm:$0xff] %vm460_vm1, %v1288_v4 }
 0xe76   : > { %v1291_v5 = vpop.permute.xlu1 %1290 }
 0xe77   : > { %v1293_v6 = vsel %vm465_vm5, 0.0, %v1291_v5 }
 0xe78   : > { %v1294_v7 = vsel %vm458_vm0, %v1293_v6, 0.0 }
 0xe79   : > { %1295 = vst.msk [vmem:[#allocation2 + $0x8] sm:$0xff] %vm460_vm1, %v1294_v7 }
 0xe7a   : > { %v1299_v8 = vpop.permute.xlu1 %1298 }
 0xe7b   : > { %v1301_v9 = vsel %vm474_vm4, %v1299_v8, 0.0 }
 0xe7c   : > { %v1302_v10 = vsel %vm458_vm0, %v1301_v9, 0.0  ;;  %v1311_v14 = vld [vmem:[#allocation2] sm:$0xff] }
 0xe7d   : > { %1303 = vst.msk [vmem:[#allocation2 + $0x18] sm:$0xff] %vm460_vm1, %v1302_v10 }
 0xe7e   : > { %v1305_v11 = vpop.permute.xlu1 %1304 }
 0xe7f   : > { %v1307_v12 = vsel %vm481_vm6, %v1305_v11, 0.0 }
 0xe80   : > { %v1308_v13 = vsel %vm458_vm0, %v1307_v12, 0.0  ;;  %v1312_v15 = vld [vmem:[#allocation2 + $0x8] sm:$0xff] }
 0xe81   : > { %1309 = vst.msk [vmem:[#allocation2 + $0x20] sm:$0xff] %vm460_vm1, %v1308_v13  ;;  %v2112_v16 = vpack.c.bf16 %v1312_v15, %v1311_v14 }
 0xe83   : > { %2113 = vmatpush3.bf16.msra.mxu1 %v2112_v16 }
 0xe84   : > { %2114 = vmatprep.subr.bf16.mxu1 %v2683_v0  ;;  %v1314_v18 = vld [vmem:[#allocation2 + $0x18] sm:$0xff] }
 0xe85   : > { %v2115_v19 = vpack.c.bf16 %v1314_v18, %v1313_v17 }
 0xe87   : > { %2116 = vmatpush3.bf16.msra.mxu1 %v2115_v19 }
 0xe88   : > { %2069 = vmatprep.subr.mxu1 %v2689_v3  ;;  %v1315_v21 = vld [vmem:[#allocation2 + $0x20] sm:$0xff] }
 0xe8b   : > { %2070 = vmatpush3.msra.mxu1 %v1315_v21 }
 0xe8c   : > { %2072 = vmatmul.mubr.msk.f32.vlgmr.msra.gmra.mrb[4].mxu1 %vm496_vm7, %v1310_v20 }
 0xe8f   : > { %v1319_v22 = vpop.permute.xlu1 %1318 }
 0xf5f   : > { %v1390_v23 = vpop.f32.mrb[4].mxu1 }
 0xf60   : > { %v1391_v24 = vadd.f32 %v1390_v23, %v1319_v22  ;;  %v2073_v25 = vpop.f32.mrb[5].mxu1 }
 0xf62   : > { %v1395_v26 = vsel %vm571_vm8, %v1391_v24, 0.0  ;;  %v1406_v27 = vmul.f32 %v1391_v24, %v1391_v24 }
 0xf63   : > { %1396 = vadd.xlane.f32.xlu1 %v1395_v26 }
 0xf64   : > { %v1407_v28 = vsel %vm571_vm8, %v1406_v27, 0.0 }
 0xf65   : > { %1408 = vadd.xlane.f32.xlu0 %v1407_v28 }
 0xff0   : > { %v1397_v30 = vpop.xlane.xlu1 %1396 }
 0xff1   : > { %v1398_v31 = vsel %vm458_vm0, %v1397_v30, 0.0  ;;  %v2705_v30 = vmov 15  }
 0xff2   : > { %v1399_v32 = vrot.slane %v1398_v31, 4  ;;  %v1409_v34 = vpop.xlane.xlu0 %1408 }
 0xff3   : > { %v1410_v35 = vsel %vm458_vm0, %v1409_v34, 0.0 }
 0xff4   : > { %v1400_v36 = vadd.f32 %v1399_v32, %v1398_v31  ;;  %v1411_v37 = vrot.slane %v1410_v35, 4  ;;  %v3254_v31 = vld [vmem:[#allocation6] sm:$0xff] }
 0xff6   : > { %v1401_v38 = vrot.slane %v1400_v36, 2  ;;  %v1412_v39 = vadd.f32 %v1411_v37, %v1410_v35 }
 0xff8   : > { %v1402_v40 = vadd.f32 %v1401_v38, %v1400_v36  ;;  %v1413_v41 = vrot.slane %v1412_v39, 2 }
 0xffa   : > { %v1403_v42 = vrot.slane %v1402_v40, 1  ;;  %v1414_v43 = vadd.f32 %v1413_v41, %v1412_v39 }
 0xffc   : > { %v1404_v44 = vadd.f32 %v1403_v42, %v1402_v40  ;;  %v1415_v45 = vrot.slane %v1414_v43, 1 }
 0xffe   : > { %v1405_v46 = vmul.f32 0.015625, %v1404_v44  ;;  %v1416_v47 = vadd.f32 %v1415_v45, %v1414_v43 }
0x1000   : > { %v1418_v48 = vmul.f32 %v1405_v46, %v1405_v46  ;;  %v1417_v49 = vmul.f32 0.015625, %v1416_v47 }
0x1002   : > { %v1419_v50 = vsub.f32 %v1417_v49, %v1418_v48 }
0x1004   : > { %v1420_v51 = vmax.f32 %v1419_v50, 0.0 }
0x1006   : > { %v1421_v52 = vadd.f32 1e-05, %v1420_v51  ;;  %v1497_v51 = vld [vmem:[#allocation17] sm:$0xff] }
0x1008   : > { %2324 = vrsqrt.f32 %v1421_v52 }
0x1012   : > { %v2325_v55 = vpop.eup %2324 }
0x1013   : > { %v1423_v57 = vmul.f32 %v2325_v55, %v1394_v54 }
0x1015   : > { %1432 = vperm.xlu0 %2290, %v1423_v57   ;;  %v1424_v58 = vmul.f32 %v1423_v57, %v1405_v46 }
0x1017   : > { %1426 = vrot.lane.b32.xlu1 %v1424_v58, %s2686_s14 }
0x1019   : > { %2296 = vset.pattern.permute.xlu0 %v2691_v33 }
0x1089   : > { %v1427_v59 = vpop.permute.xlu1 %1426 }
0x108a   : > { %v1429_v60 = vsub.f32 %v1394_v54, %v1427_v59  ;;  %v3272_v54 = vpop.f32.mrb[4].mxu0 }
0x108b   : > { %v2060_v55 = vpop.f32.mrb[5].mxu0 }
0x108c   : > { %1438 = vperm.xlu1 %2291, %v1429_v60  }
0x1090   : > { %2292 = vset.pattern.permute.xlu1 %v2705_v30 }
0x1094   : > { %v1433_v61 = vpop.permute.xlu0 %1432 }
0x1095   : > { %v1435_v63 = vmul.f32 %v1433_v61, %v1391_v24 }
0x110b   : > { %v1439_v2 = vpop.permute.xlu1 %1438 }
0x110c   : > { %v1441_v62 = vadd.f32 %v1439_v2, %v1435_v63 }
0x110e   : > { %v1442_v1 = vmul.f32 0.70710677, %v1441_v62  ;;  %v1466_v25 = vmul.f32 0.5, %v1441_v62 }
0x1110   : > { %v1443_v4 = vand.u32 2147483647, %v1442_v1  ;;  %vm1463_vm13 = vcmp.ge.f32.partialorder %v1442_v1, 0.0 }
0x1112   : > { %v1444_v5 = vmul.f32 0.3275911, %v1443_v4  ;;  %v1457_v7 = vsub.f32 0.0, %v1443_v4 }
0x1114   : > { %v1445_v6 = vadd.f32 1.0, %v1444_v5  ;;  %v1458_v9 = vmul.f32 %v1457_v7, %v1443_v4 }
0x1116   : > { %2326 = vrcp.f32 %v1445_v6  ;;  %v1459_v12 = vmul.f32 1.442695, %v1458_v9 }
0x1118   : > { %2328 = vpow2.f32 %v1459_v12 }
0x1120   : > { %v2327_v8 = vpop.eup %2326 }
0x1121   : > { %v1448_v10 = vmul.f32 1.0614054, %v2327_v8 }
0x1122   : > { %v2329_v20 = vpop.eup %2328 }
0x1123   : > { %v1954_v11 = vadd.f32 -1.4531521, %v1448_v10 }
0x1125   : > { %v1450_v13 = vmul.f32 %v2327_v8, %v1954_v11 }
0x1127   : > { %v1451_v14 = vadd.f32 1.4214138, %v1450_v13 }
0x1129   : > { %v1452_v15 = vmul.f32 %v2327_v8, %v1451_v14 }
0x112b   : > { %v1955_v16 = vadd.f32 -0.28449672, %v1452_v15 }
0x112d   : > { %v1454_v17 = vmul.f32 %v2327_v8, %v1955_v16 }
0x112f   : > { %v1455_v18 = vadd.f32 0.2548296, %v1454_v17 }
0x1131   : > { %v1456_v19 = vmul.f32 %v2327_v8, %v1455_v18 }
0x1133   : > { %v1461_v21 = vmul.f32 %v2329_v20, %v1456_v19 }
0x1135   : > { %v1462_v22 = vsub.f32 1.0, %v1461_v21 }
0x1137   : > { %v1464_v23 = vsub.f32 0.0, %v1462_v22 }
0x1139   : > { %v1465_v24 = vsel %vm1463_vm13, %v1462_v22, %v1464_v23 }
0x113a   : > { %v1467_v26 = vadd.f32 1.0, %v1465_v24  ;;  %v2707_v24 = vmov 17  }
0x113c   : > { %v1468_v27 = vmul.f32 %v1467_v26, %v1466_v25 }
0x113e   : > { %v1483_v28 = vsel %vm458_vm0, %v1468_v27, 0.0  ;;  %1471 = vrot.lane.b32.xlu1 %v1468_v27, %s2684_s1 }
0x113f   : > { %1484 = vst.msk [vmem:[#allocation2 + $0x10] sm:$0xff] %vm460_vm1, %v1483_v28 }
0x1142   : > { %1477 = vrot.lane.b32.xlu1 %v1468_v27, %s2686_s14 }
0x1146   : > { %1485 = vrot.lane.b32.xlu1 %v1468_v27, %s2685_s16  ;;  %v1500_v48 = vld [vmem:[#allocation2 + $0x10] sm:$0xff] }
0x114a   : > { %1491 = vrot.lane.b32.xlu1 %v1468_v27, %s2687_s22 }
0x114e   : > { %1505 = vperm.xlu1 %2292, %v3254_v31  }
0x11b0   : > { %v1472_v32 = vpop.permute.xlu1 %1471 }
0x11b1   : > { %v1474_v34 = vsel %vm456_vm3, 0.0, %v1472_v32 }
0x11b2   : > { %v1475_v35 = vsel %vm458_vm0, %v1474_v34, 0.0 }
0x11b3   : > { %1476 = vst.msk [vmem:[#allocation2] sm:$0xff] %vm460_vm1, %v1475_v35 }
0x11b4   : > { %v1478_v36 = vpop.permute.xlu1 %1477 }
0x11b5   : > { %v1480_v37 = vsel %vm465_vm5, 0.0, %v1478_v36 }
0x11b6   : > { %v1481_v38 = vsel %vm458_vm0, %v1480_v37, 0.0 }
0x11b7   : > { %1482 = vst.msk [vmem:[#allocation2 + $0x8] sm:$0xff] %vm460_vm1, %v1481_v38 }
0x11b8   : > { %v1486_v39 = vpop.permute.xlu1 %1485 }
0x11b9   : > { %v1488_v40 = vsel %vm474_vm4, %v1486_v39, 0.0 }
0x11ba   : > { %v1489_v41 = vsel %vm458_vm0, %v1488_v40, 0.0  ;;  %v1498_v45 = vld [vmem:[#allocation2] sm:$0xff] }
0x11bb   : > { %1490 = vst.msk [vmem:[#allocation2 + $0x18] sm:$0xff] %vm460_vm1, %v1489_v41 }
0x11bc   : > { %v1492_v42 = vpop.permute.xlu1 %1491 }
0x11bd   : > { %v1494_v43 = vsel %vm481_vm6, %v1492_v42, 0.0 }
0x11be   : > { %v1495_v44 = vsel %vm458_vm0, %v1494_v43, 0.0  ;;  %v1499_v46 = vld [vmem:[#allocation2 + $0x8] sm:$0xff] }
0x11bf   : > { %1496 = vst.msk [vmem:[#allocation2 + $0x20] sm:$0xff] %vm460_vm1, %v1495_v44  ;;  %v2118_v47 = vpack.c.bf16 %v1499_v46, %v1498_v45 }
0x11c1   : > { %2119 = vmatpush3.bf16.msra.mxu0 %v2118_v47 }
0x11c2   : > { %2120 = vmatprep.subr.bf16.mxu0 %v2683_v0  ;;  %v1501_v49 = vld [vmem:[#allocation2 + $0x18] sm:$0xff] }
0x11c3   : > { %v2121_v50 = vpack.c.bf16 %v1501_v49, %v1500_v48 }
0x11c5   : > { %2122 = vmatpush3.bf16.msra.mxu0 %v2121_v50 }
0x11c6   : > { %2082 = vmatprep.subr.mxu0 %v2689_v3  ;;  %v1502_v52 = vld [vmem:[#allocation2 + $0x20] sm:$0xff]  ;;  %v2706_v3 = vmov 16  }
0x11c7   : > { %2293 = vset.pattern.permute.xlu1 %v2706_v3 }
0x11c9   : > { %2083 = vmatpush3.msra.mxu0 %v1502_v52 }
0x11ca   : > { %2085 = vmatmul.mubr.msk.f32.vlgmr.msra.gmra.mrb[6].mxu0 %vm496_vm7, %v1497_v51 }
0x11cd   : > { %v1506_v57 = vpop.permute.xlu1 %1505 }
0x129d   : > { %v1577_v58 = vpop.f32.mrb[6].mxu0 }
0x129e   : > { %v1578_v59 = vadd.f32 %v1577_v58, %v1506_v57  ;;  %v2086_v60 = vpop.f32.mrb[7].mxu0 }
0x12a0   : > { %v1582_v0 = vsel %vm460_vm1, %v1578_v59, 0.0  ;;  %v1592_v61 = vmul.f32 %v1578_v59, %v1578_v59 }
0x12a1   : > { %1583 = vadd.xlane.f32.xlu1 %v1582_v0 }
0x12a2   : > { %v1593_v63 = vsel %vm460_vm1, %v1592_v61, 0.0 }
0x12a3   : > { %1594 = vadd.xlane.f32.xlu0 %v1593_v63 }
0x132e   : > { %v1584_v2 = vpop.xlane.xlu1 %1583 }
0x132f   : > { %v1585_v62 = vrot.slane %v1584_v2, 4 }
0x1330   : > { %v1595_v1 = vpop.xlane.xlu0 %1594 }
0x1331   : > { %v1586_v4 = vadd.f32 %v1585_v62, %v1584_v2  ;;  %v1596_v5 = vrot.slane %v1595_v1, 4 }
0x1333   : > { %v1587_v6 = vrot.slane %v1586_v4, 2  ;;  %v1597_v7 = vadd.f32 %v1596_v5, %v1595_v1 }
0x1335   : > { %v1588_v8 = vadd.f32 %v1587_v6, %v1586_v4  ;;  %v1598_v9 = vrot.slane %v1597_v7, 2 }
0x1337   : > { %v1589_v10 = vrot.slane %v1588_v8, 1  ;;  %v1599_v11 = vadd.f32 %v1598_v9, %v1597_v7  ;;  %v449_v7 = vlaneseq }
0x1339   : > { %v1590_v12 = vadd.f32 %v1589_v10, %v1588_v8  ;;  %v1600_v13 = vrot.slane %v1599_v11, 1 }
0x133b   : > { %v1591_v14 = vmul.f32 0.0078125, %v1590_v12  ;;  %v1601_v15 = vadd.f32 %v1600_v13, %v1599_v11 }
0x133d   : > { %v1603_v16 = vmul.f32 %v1591_v14, %v1591_v14  ;;  %v1602_v17 = vmul.f32 0.0078125, %v1601_v15  ;;  %v450_v15 = vand.u32 127, %v449_v7 }
0x133f   : > { %v1604_v18 = vsub.f32 %v1602_v17, %v1603_v16  ;;  %vm1685_vm0 = vcmp.eq.s32.totalorder %v450_v15, 0  ;;  %vm1729_vm2 = vcmp.eq.s32.totalorder %v450_v15, 14 }
0x1341   : > { %v1605_v19 = vmax.f32 %v1604_v18, 0.0 }
0x1343   : > { %v1606_v20 = vadd.f32 1e-05, %v1605_v19 }
0x1345   : > { %2330 = vrsqrt.f32 %v1606_v20 }
0x134f   : > { %v2331_v21 = vpop.eup %2330 }
0x1350   : > { %v1608_v22 = vmul.f32 %v2331_v21, %v3254_v31 }
0x1352   : > { %1617 = vperm.xlu1 %2293, %v1608_v22   ;;  %v1609_v23 = vmul.f32 %v1608_v22, %v1591_v14 }
0x1354   : > { %1611 = vrot.lane.b32.xlu0 %v1609_v23, %s2686_s14 }
0x1356   : > { %2294 = vset.pattern.permute.xlu1 %v2707_v24 }
0x13c6   : > { %v1612_v25 = vpop.permute.xlu0 %1611 }
0x13c7   : > { %v1614_v26 = vsub.f32 %v3254_v31, %v1612_v25 }
0x13c9   : > { %1623 = vperm.xlu1 %2294, %v1614_v26  }
0x13cd   : > { %2295 = vset.pattern.permute.xlu1 %v2691_v33 }
0x13d1   : > { %v1618_v27 = vpop.permute.xlu1 %1617 }
0x13d2   : > { %v1620_v28 = vmul.f32 %v1618_v27, %v1578_v59 }
0x1448   : > { %v1624_v29 = vpop.permute.xlu1 %1623 }
0x1449   : > { %v1626_v30 = vadd.f32 %v1624_v29, %v1620_v28 }
0x144b   : > { %v1627_v32 = vmul.f32 0.70710677, %v1626_v30  ;;  %v1651_v55 = vmul.f32 0.5, %v1626_v30 }
0x144d   : > { %v1628_v34 = vand.u32 2147483647, %v1627_v32  ;;  %vm1648_vm15 = vcmp.ge.f32.partialorder %v1627_v32, 0.0 }
0x144f   : > { %v1629_v35 = vmul.f32 0.3275911, %v1628_v34  ;;  %v1642_v37 = vsub.f32 0.0, %v1628_v34 }
0x1451   : > { %v1630_v36 = vadd.f32 1.0, %v1629_v35  ;;  %v1643_v39 = vmul.f32 %v1642_v37, %v1628_v34 }
0x1453   : > { %2332 = vrcp.f32 %v1630_v36  ;;  %v1644_v42 = vmul.f32 1.442695, %v1643_v39 }
0x1455   : > { %2334 = vpow2.f32 %v1644_v42 }
0x145d   : > { %v2333_v38 = vpop.eup %2332 }
0x145e   : > { %v1633_v40 = vmul.f32 1.0614054, %v2333_v38 }
0x145f   : > { %v2335_v48 = vpop.eup %2334 }
0x1460   : > { %v1957_v41 = vadd.f32 -1.4531521, %v1633_v40 }
0x1462   : > { %v1635_v43 = vmul.f32 %v2333_v38, %v1957_v41 }
0x1464   : > { %v1636_v31 = vadd.f32 1.4214138, %v1635_v43 }
0x1466   : > { %v1637_v44 = vmul.f32 %v2333_v38, %v1636_v31 }
0x1468   : > { %v1958_v33 = vadd.f32 -0.28449672, %v1637_v44 }
0x146a   : > { %v1639_v45 = vmul.f32 %v2333_v38, %v1958_v33 }
0x146c   : > { %v1640_v46 = vadd.f32 0.2548296, %v1639_v45 }
0x146e   : > { %v1641_v47 = vmul.f32 %v2333_v38, %v1640_v46 }
0x1470   : > { %v1646_v49 = vmul.f32 %v2335_v48, %v1641_v47 }
0x1472   : > { %v1647_v50 = vsub.f32 1.0, %v1646_v49 }
0x1474   : > { %v1649_v51 = vsub.f32 0.0, %v1647_v50 }
0x1476   : > { %v1650_v52 = vsel %vm1648_vm15, %v1647_v50, %v1649_v51 }
0x1477   : > { %v1652_v57 = vadd.f32 1.0, %v1650_v52 }
0x1479   : > { %v1653_v58 = vmul.f32 %v1652_v57, %v1651_v55 }
0x147b   : > { %v1654_v59 = vadd.f32 %v1653_v58, %v3272_v54 }
0x147d   : > { %v1687_v60 = vmul.f32 0.2265625, %v1654_v59  ;;  %v1686_v0 = vmul.f32 -0.0234375, %v1654_v59  ;;  %v1713_v61 = vmul.f32 -0.0703125, %v1654_v59  ;;  %v1675_v14 = vmul.f32 0.8671875, %v1654_v59 }
0x147f   : > { %1689 = vrot.lane.b32.xlu0 %v1687_v60, %s2686_s14  ;;  %1738 = vrot.lane.b32.xlu1 %v1686_v0, %s2686_s14 }
0x1483   : > { %1656 = vrot.lane.b32.xlu0 %v1654_v59, %s2684_s1  ;;  %1660 = vrot.lane.b32.xlu1 %v1654_v59, %s2686_s14  ;;  %s2594_s1 = sshll.u32 %s2708_s23, 4  ;;  %s2595_s1 = int_to_ptr.vmem [resolvable:$false] %s2594_s1 }
0x1484   : > { %p2597_p2 = scmp.lt.s32.totalorder %s3306_s29, %s2595_s1 }
0x1487   : > { %1707 = vperm.xlu0 %2296, %v1686_v0   ;;  %1664 = vrot.lane.b32.xlu1 %v1654_v59, %s2685_s16  ;;  %s2596_s16 = scalar_lea.vmem %s2595_s1, 512 }
0x1488   : > { %p2598_p0 = scmp.lt.s32.totalorder %s2596_s16, %s2590_s27 }
0x148a   : > { %p2599_p10 = por %p2598_p0, %p2597_p2 }
0x148b   : > { %1668 = vrot.lane.b32.xlu1 %v1654_v59, %s2687_s22  ;;  %2298 = vset.pattern.permute.xlu0 %v2692_v56 }
0x148c   : > { %p2600_p4 = pnand %p2599_p10, %p2593_p3 }
0x148f   : > { %1724 = vperm.xlu1 %2295, %v1713_v61  }
0x1493   : > { %2297 = vset.pattern.permute.xlu1 %v2704_v53 }
0x1494   : > { %1733 = vperm.xlu1 %2297, %v1686_v0  }
0x14f1   : > { %v1690_v54 = vpop.permute.xlu0 %1689  ;;  %v1739_v63 = vpop.permute.xlu1 %1738 }
0x14f2   : > { %v1692_v3 = vadd.f32 %v1690_v54, %v1686_v0  ;;  %v1741_v2 = vadd.f32 %v1739_v63, %v1687_v60 }
0x14f4   : > { %1744 = vperm.xlu1 %2297, %v1741_v2   ;;  %1697 = vperm.xlu0 %2298, %v1692_v3  }
0x14f5   : > { %v1661_v62 = vpop.permute.xlu1 %1660  ;;  %v1657_v4 = vpop.permute.xlu0 %1656 }
0x14f6   : > { %v1659_v56 = vsel %vm456_vm3, 0.0, %v1657_v4  ;;  %v1663_v6 = vsel %vm465_vm5, 0.0, %v1661_v62  ;;  %vm1712_vm3 = vcmp.eq.s32.totalorder %v450_v15, 15 }
0x14f7   : > { %v1672_v9 = vmul.f32 -0.0234375, %v1659_v56  ;;  %v1673_v10 = vmul.f32 0.2265625, %v1663_v6  ;;  %v1679_v11 = vmul.f32 -0.0703125, %v1663_v6 }
0x14f8   : > { %2299 = vset.pattern.permute.xlu0 %v2704_v53 }
0x14f9   : > { %1718 = vperm.xlu0 %2299, %v1713_v61   ;;  %v1665_v1 = vpop.permute.xlu1 %1664  ;;  %v1674_v16 = vadd.f32 %v1673_v10, %v1672_v9  ;;  %v1680_v17 = vadd.f32 %v1679_v11, %v1675_v14 }
0x14fa   : > { %v1667_v8 = vsel %vm474_vm4, %v1665_v1, 0.0  ;;  %vm1702_vm4 = vcmp.eq.s32.totalorder %v450_v15, 1 }
0x14fb   : > { %v1681_v53 = vmul.f32 0.2265625, %v1667_v8  ;;  %v1677_v22 = vmul.f32 -0.0703125, %v1667_v8  ;;  %v1676_v25 = vadd.f32 %v1675_v14, %v1674_v16 }
0x14fd   : > { %v1669_v5 = vpop.permute.xlu1 %1668  ;;  %v1682_v19 = vadd.f32 %v1681_v53, %v1680_v17  ;;  %v1678_v32 = vadd.f32 %v1677_v22, %v1676_v25 }
0x14fe   : > { %v1671_v13 = vsel %vm481_vm6, %v1669_v5, 0.0 }
0x14ff   : > { %v1683_v18 = vmul.f32 -0.0234375, %v1671_v13 }
0x1501   : > { %v1684_v23 = vadd.f32 %v1683_v18, %v1682_v19 }
0x1506   : > { %v1708_v24 = vpop.permute.xlu0 %1707 }
0x1507   : > { %v1710_v38 = vsel %vm1702_vm4, %v1708_v24, 0.0 }
0x150e   : > { %v1725_v12 = vpop.permute.xlu1 %1724 }
0x150f   : > { %v1727_v21 = vsel %vm1685_vm0, %v1725_v12, 0.0 }
0x1510   : > { %v1728_v27 = vadd.f32 %v1727_v21, %v1684_v23 }
0x1513   : > { %v1734_v20 = vpop.permute.xlu1 %1733 }
0x1514   : > { %v1736_v26 = vsel %vm1729_vm2, %v1734_v20, 0.0 }
0x1515   : > { %v1737_v28 = vadd.f32 %v1736_v26, %v1728_v27 }
0x1573   : > { %v1745_v29 = vpop.permute.xlu1 %1744  ;;  %v1698_v30 = vpop.permute.xlu0 %1697 }
0x1574   : > { %v1747_v34 = vsel %vm1712_vm3, %v1745_v29, 0.0  ;;  %v1700_v35 = vsel %vm1685_vm0, %v1698_v30, 0.0 }
0x1575   : > { %v1748_v36 = vadd.f32 %v1747_v34, %v1737_v28  ;;  %v1701_v37 = vadd.f32 %v1700_v35, %v1678_v32 }
0x1577   : > { %1959 = vst.msk [vmem:[%s447_s28 + $0x8] sm:$0xff] %vm460_vm1, %v1748_v36  ;;  %v1711_v39 = vadd.f32 %v1710_v38, %v1701_v37 }
0x1578   : > { %v1719_v40 = vpop.permute.xlu0 %1718 }
0x1579   : > { %v1721_v41 = vsel %vm1712_vm3, %v1719_v40, 0.0 }
0x157a   : > { %v1722_v42 = vadd.f32 %v1721_v41, %v1711_v39 }
0x157c   : > { %1749 = vst.msk [vmem:[%s447_s28] sm:$0xff] %vm460_vm1, %v1722_v42 }
0x157d   : > { %2603 = shalt.err (!%p2600_p4)
}
0x157e   : > { %s2604_s14 = scalar_lea.hbm %s3304_s26, 256  ;;  %s2608_s20 = scalar_lea.hbm %s3360_s9, 512 }
0x157f   : > { %p2605_p11 = scmp.ne.s32.totalorder %s3304_s26, %s2604_s14  ;;  %p2609_p7 = scmp.lt.u32.totalorder %s3304_s26, %s3360_s9 }
0x1580   : > { %p2610_p6 = scmp.lt.u32.totalorder %s2608_s20, %s2604_s14  ;;  %p2612_p12 = scmp.lt.u32.totalorder %s2604_s14, %s3304_s26 }
0x1581   : > { %p2606_p8 = pnand %p2605_p11, %p3386_p13 }
0x1582   : > { %p2611_p9 = por %p2610_p6, %p2609_p7 }
0x1583   : > { %p2607_p5 = pneg %p2606_p8 }
0x1584   : > { %p2613_p1 = por %p2612_p12, %p2611_p9 }
0x1586   : > { %p2614_p3 = pnand %p2613_p1, %p2607_p5 }
0x1588   : > { %2617 = shalt.err (!%p2614_p3)
}
0x1589   : > { %s2709_s18 = smov 128   ;;  %s2710_s27 = smov 8  }
0x158a   : > { %2157 = dma.vmem_to_hbm [thread:$0]  (%p3386_p13), %s3306_s29, 256, %s3304_s26, %s1753_s15, %s2709_s18, %s2709_s18, %s2710_s27  }
0x158b PF: > { %s1781_s23 = sand.u32 1, %s2660_s30   ;;  %p3387_p2 = scmp.ne.s32.totalorder %s3375_s17, 0 }
0x158c   : > { %p3388_p0 = scmp.ge.s32.totalorder %s2672_s12, 2  ;;  %s1782_s1 = scalar_lea.sflag [#allocation5], %s1781_s23 }
0x158e   : > { %p2189_p10 = pnand %p3388_p0, %p3387_p2 }
0x1590   : > { %2655 = dma.done.wait (!%p2189_p10), %s1782_s1, 256  }
0x1591   : > { %2657 = vsyncadd (!%p2189_p10), %s1782_s1, 4294967040  ;;  %p26_p4 = scmp.ge.s32.totalorder %s2976_s21, 4   ;;  %s3389_s30 = smov %s2664_s10 }
0x1592   : > { %s3390_s10 = smov %s2668_s11  ;;  %s3391_s11 = smov %s2987_s24 }
0x1593   : > { %s3392_s12 = smov %s2976_s21  ;;  %28 = sbr.rel (!%p26_p4) target bundleno = 12 (0xc), region = 134 }
0x159a   :  { %1787 = vsyncpa [#allocation4], 1 }
0x159b   :  { %1789 = vsyncpa [#allocation4 + $0x1], 1 }
0x159c   :  { %1790 = vsyncpa [#allocation7], 1 }
0x159d   :  { %1791 = vsyncpa [#allocation10], 1 }
0x159e   :  { %1792 = vsyncpa [#allocation13], 1 }
0x159f   :  { %1793 = vsyncpa [#allocation16], 1 }
0x15a0   :  { %1794 = vsyncpa [#allocation5], 1 }
0x15a1   :  { %1796 = vsyncpa [#allocation5 + $0x1], 1 }

// kernel: tpu_custom_call.1
= control target key start
LH: loop header
LB: loop body
LE: loop exit
PB: predicated region body
PF: predicated region fallthrough
CT: control target
= control target key end

     0   :  { %s3351_s0 = inlined_call_operand.hbm [shape: f32[2,4,16], index: 0, kind: input, shape index: {}]   ;;  %s3352_s1 = inlined_call_operand.hbm [shape: f32[8,18], index: 1, kind: input, shape index: {}]   ;;  %s3353_s2 = inlined_call_operand.hbm [shape: f32[4,40], index: 2, kind: input, shape index: {}]   ;;  %s3354_s3 = inlined_call_operand.hbm [shape: f32[4,40], index: 3, kind: input, shape index: {}]   ;;  %s3355_s4 = inlined_call_operand.hbm [shape: f32[4,40], index: 4, kind: input, shape index: {}]   ;;  %s3356_s5 = inlined_call_operand.hbm [shape: f32[4,40], index: 5, kind: input, shape index: {}]   ;;  %s3357_s6 = inlined_call_operand.hbm [shape: f32[8,4], index: 6, kind: input, shape index: {}]   ;;  %s3358_s7 = inlined_call_operand.hbm [shape: f32[4,40], index: 7, kind: input, shape index: {}]   ;;  %s3359_s8 = inlined_call_operand.hbm [shape: f32[8,40], index: 8, kind: input, shape index: {}]   ;;  %s3360_s9 = inlined_call_operand.hbm [shape: f32[2,2,8,16], index: 9, kind: output, shape index: {}]  }
   0x1   :  { %3364 = sst [smem:[#allocation25_spill]] %s3352_s1 }
   0x2   :  { %3365 = sst [smem:[#allocation26_spill]] %s3353_s2 }
   0x3   :  { %14 = vsyncpa [#allocation4], 0 }
   0x4   :  { %16 = vsyncpa [#allocation4 + $0x1], 0 }
   0x5   :  { %17 = vsyncpa [#allocation7], 0 }
   0x6   :  { %18 = vsyncpa [#allocation10], 0 }
   0x7   :  { %19 = vsyncpa [#allocation13], 0 }
   0x8   :  { %20 = vsyncpa [#allocation16], 0 }
   0x9   :  { %21 = vsyncpa [#allocation5], 0 }
   0xa   :  { %23 = vsyncpa [#allocation5 + $0x1], 0  ;;  %s2761_s30 = smov 0   ;;  %s2763_s10 = smov 0  }
   0xb   :  { %s2765_s11 = smov 0   ;;  %s2767_s12 = smov 0  }
   0xc LB: > { %s2674_s13 = smov [#allocation6]   ;;  %s2782_s15 = sadd.s32 4294967295, %s2672_s12   ;;  %s2672_s12 = sphi %s2767_s12, %s3392_s12   ;;  %s2668_s11 = sphi %s2765_s11, %s3391_s11   ;;  %s2664_s10 = sphi %s2763_s10, %s3390_s10   ;;  %s2660_s30 = sphi %s2761_s30, %s3389_s30  }
   0xd   : > { %s267_s14 = sshll.u32 %s2674_s13, 4  ;;  %p1916_p0 = scmp.ge.s32.totalorder %s2672_s12, 1  ;;  %s2787_s14 = int_to_ptr.vmem [resolvable:$true] %s267_s14 }
   0xe   : > { %p3361_p1 = scmp.eq.s32.totalorder %s2782_s15, 0  ;;  %p254_p2 = scmp.lt.s32.totalorder %s2672_s12, 3 }
   0xf   : > { %s2675_s17 = smov [#allocation9]   ;;  %s2676_s19 = smov [#allocation12]  }
  0x10   : > { %p2789_p3 = pnand %p1916_p0, %p254_p2  ;;  %s289_s18 = sshll.u32 %s2675_s17, 4  ;;  %s2796_s18 = int_to_ptr.vmem [resolvable:$true] %s289_s18 }
  0x11   : > { %s311_s20 = sshll.u32 %s2676_s19, 4  ;;  %s2677_s22 = smov [#allocation15]   ;;  %s2804_s20 = int_to_ptr.vmem [resolvable:$true] %s311_s20 }
  0x12   : > { %s3366_s16 = scalar_select %p2789_p3, 1, 0 }
  0x13   : > { %p2159_p5 = pneg %p2789_p3  ;;  %s2806_s23 = sshll.u32 %s2677_s22, 4  ;;  %s334_s23 = int_to_ptr.vmem [resolvable:$true] %s2806_s23 }
  0x14   : > { %s3368_s1 = sld [smem:[#allocation25_spill]] }
  0x15   : > { %p2800_p6 = pnand %p2159_p5, %p3361_p1 }
  0x17   : > { %p2816_p8 = pneg %p2800_p6 }
  0x1a   : > { %s2336_s26 = scalar_lea.hbm %s3368_s1, 128 }
  0x1b   : > { %p2337_p7 = scmp.ne.s32.totalorder %s3368_s1, %s2336_s26  ;;  %p2343_p11 = scmp.lt.u32.totalorder %s2336_s26, %s3368_s1 }
  0x1d   : > { %p2339_p9 = pnand %p2816_p8, %p2337_p7 }
  0x1f   : > { %p2340_p10 = pneg %p2339_p9 }
  0x21   : > { %p2345_p12 = pnand %p2343_p11, %p2340_p10 }
  0x23   : > { %2348 = shalt.err (!%p2345_p12)
}
  0x24   : > { %s2349_s19 = scalar_lea.vmem %s2787_s14, 128  ;;  %p2357_p5 = scmp.lt.s32.totalorder %s2787_s14, %s2787_s14 }
  0x25   : > { %p2350_p13 = scmp.ne.s32.totalorder %s2787_s14, %s2349_s19  ;;  %p2358_p4 = scmp.lt.s32.totalorder %s2349_s19, %s2349_s19 }
  0x27   : > { %p2352_p0 = pnand %p2350_p13, %p2816_p8  ;;  %p2359_p7 = por %p2358_p4, %p2357_p5 }
  0x29   : > { %p2353_p2 = pneg %p2352_p0 }
  0x2b   : > { %p2360_p9 = pnand %p2359_p7, %p2353_p2 }
  0x2d   : > { %2363 = shalt.err (!%p2360_p9)
}
  0x2e   : > { %2162 = dma.hbm_to_vmem [thread:$0]  (!%p2800_p6), %s3368_s1, 128, %s2787_s14, [#allocation7]  }
  0x2f   : > { %s2364_s27 = scalar_lea.hbm %s3354_s3, 64 }
  0x30   : > { %p2365_p10 = scmp.ne.s32.totalorder %s3354_s3, %s2364_s27  ;;  %p2371_p12 = scmp.lt.u32.totalorder %s2364_s27, %s3354_s3 }
  0x32   : > { %p2367_p4 = pnand %p2365_p10, %p2816_p8 }
  0x34   : > { %p2368_p11 = pneg %p2367_p4 }
  0x36   : > { %p2373_p13 = pnand %p2371_p12, %p2368_p11 }
  0x38   : > { %2376 = shalt.err (!%p2373_p13)
}
  0x39   : > { %s2377_s14 = scalar_lea.vmem %s2796_s18, 64  ;;  %p2385_p7 = scmp.lt.s32.totalorder %s2796_s18, %s2796_s18 }
  0x3a   : > { %p2378_p0 = scmp.ne.s32.totalorder %s2796_s18, %s2377_s14  ;;  %p2386_p9 = scmp.lt.s32.totalorder %s2377_s14, %s2377_s14 }
  0x3c   : > { %p2380_p2 = pnand %p2378_p0, %p2816_p8  ;;  %p2387_p10 = por %p2386_p9, %p2385_p7 }
  0x3e   : > { %p2381_p5 = pneg %p2380_p2 }
  0x40   : > { %p2388_p4 = pnand %p2387_p10, %p2381_p5 }
  0x42   : > { %2391 = shalt.err (!%p2388_p4)
}
  0x43   : > { %2168 = dma.hbm_to_vmem [thread:$0]  (!%p2800_p6), %s3354_s3, 64, %s2796_s18, [#allocation10]  }
  0x44   : > { %s2392_s27 = scalar_lea.hbm %s3356_s5, 64 }
  0x45   : > { %p2393_p11 = scmp.ne.s32.totalorder %s3356_s5, %s2392_s27  ;;  %p2399_p0 = scmp.lt.u32.totalorder %s2392_s27, %s3356_s5 }
  0x47   : > { %p2395_p12 = pnand %p2393_p11, %p2816_p8 }
  0x49   : > { %p2396_p13 = pneg %p2395_p12 }
  0x4b   : > { %p2401_p2 = pnand %p2399_p0, %p2396_p13 }
  0x4d   : > { %2404 = shalt.err (!%p2401_p2)
}
  0x4e   : > { %s2405_s18 = scalar_lea.vmem %s2804_s20, 64  ;;  %p2413_p10 = scmp.lt.s32.totalorder %s2804_s20, %s2804_s20 }
  0x4f   : > { %p2406_p5 = scmp.ne.s32.totalorder %s2804_s20, %s2405_s18  ;;  %p2414_p4 = scmp.lt.s32.totalorder %s2405_s18, %s2405_s18 }
  0x51   : > { %p2408_p7 = pnand %p2406_p5, %p2816_p8  ;;  %p2415_p11 = por %p2414_p4, %p2413_p10 }
  0x53   : > { %p2409_p9 = pneg %p2408_p7 }
  0x55   : > { %p2416_p12 = pnand %p2415_p11, %p2409_p9 }
  0x57   : > { %2419 = shalt.err (!%p2416_p12)
}
  0x58   : > { %2174 = dma.hbm_to_vmem [thread:$0]  (!%p2800_p6), %s3356_s5, 64, %s2804_s20, [#allocation13]  }
  0x59   : > { %s2678_s24 = smov [#allocation8]   ;;  %s2420_s28 = scalar_lea.hbm %s3358_s7, 64 }
  0x5a   : > { %s278_s25 = sshll.u32 %s2678_s24, 4  ;;  %p2421_p13 = scmp.ne.s32.totalorder %s3358_s7, %s2420_s28  ;;  %s279_s25 = int_to_ptr.vmem [resolvable:$true] %s278_s25 }
  0x5b   : > { %p2427_p5 = scmp.lt.u32.totalorder %s2420_s28, %s3358_s7 }
  0x5c   : > { %p2423_p0 = pnand %p2421_p13, %p2816_p8 }
  0x5e   : > { %p2424_p2 = pneg %p2423_p0 }
  0x60   : > { %p2429_p7 = pnand %p2427_p5, %p2424_p2 }
  0x62   : > { %2432 = shalt.err (!%p2429_p7)
}
  0x63   : > { %s2433_s20 = scalar_lea.vmem %s334_s23, 64  ;;  %p2441_p11 = scmp.lt.s32.totalorder %s334_s23, %s334_s23 }
  0x64   : > { %p2434_p9 = scmp.ne.s32.totalorder %s334_s23, %s2433_s20  ;;  %p2442_p12 = scmp.lt.s32.totalorder %s2433_s20, %s2433_s20 }
  0x66   : > { %p2436_p10 = pnand %p2434_p9, %p2816_p8  ;;  %p2443_p1 = por %p2442_p12, %p2441_p11 }
  0x68   : > { %p2437_p4 = pneg %p2436_p10 }
  0x6a   : > { %p2444_p3 = pnand %p2443_p1, %p2437_p4 }
  0x6c   : > { %2447 = shalt.err (!%p2444_p3)
}
  0x6d   : > { %2180 = dma.hbm_to_vmem [thread:$0]  (!%p2800_p6), %s3358_s7, 64, %s334_s23, [#allocation16]  }
  0x6e   : > { %s3370_s2 = sld [smem:[#allocation26_spill]] }
  0x74   : > { %s2448_s27 = scalar_lea.hbm %s3370_s2, 64 }
  0x75   : > { %p2449_p13 = scmp.ne.s32.totalorder %s3370_s2, %s2448_s27  ;;  %p2455_p3 = scmp.lt.u32.totalorder %s2448_s27, %s3370_s2 }
  0x77   : > { %p2451_p0 = pnand %p2449_p13, %p2816_p8 }
  0x79   : > { %p2452_p1 = pneg %p2451_p0 }
  0x7b   : > { %p2457_p2 = pnand %p2455_p3, %p2452_p1 }
  0x7d   : > { %2460 = shalt.err (!%p2457_p2)
}
  0x7e   : > { %s2461_s18 = scalar_lea.vmem %s279_s25, 64  ;;  %p2469_p10 = scmp.lt.s32.totalorder %s279_s25, %s279_s25 }
  0x7f   : > { %p2462_p5 = scmp.ne.s32.totalorder %s279_s25, %s2461_s18  ;;  %p2470_p4 = scmp.lt.s32.totalorder %s2461_s18, %s2461_s18 }
  0x81   : > { %p2464_p7 = pnand %p2462_p5, %p2816_p8  ;;  %p2471_p11 = por %p2470_p4, %p2469_p10 }
  0x83   : > { %p2465_p9 = pneg %p2464_p7 }
  0x85   : > { %p2472_p12 = pnand %p2471_p11, %p2465_p9 }
  0x87   : > { %2475 = shalt.err (!%p2472_p12)
}
  0x88   : > { %2165 = dma.hbm_to_vmem [thread:$0]  (!%p2800_p6), %s3370_s2, 64, %s279_s25, [#allocation7]  }
  0x89   : > { %s2679_s14 = smov [#allocation11]   ;;  %s2680_s24 = smov [#allocation14]  }
  0x8a   : > { %s300_s22 = sshll.u32 %s2679_s14, 4  ;;  %s322_s26 = sshll.u32 %s2680_s24, 4  ;;  %s301_s22 = int_to_ptr.vmem [resolvable:$true] %s300_s22  ;;  %s323_s26 = int_to_ptr.vmem [resolvable:$true] %s322_s26 }
  0x8b   : > { %s2476_s13 = scalar_lea.hbm %s3355_s4, 64 }
  0x8c   : > { %p2477_p13 = scmp.ne.s32.totalorder %s3355_s4, %s2476_s13  ;;  %p2483_p3 = scmp.lt.u32.totalorder %s2476_s13, %s3355_s4 }
  0x8e   : > { %p2479_p0 = pnand %p2477_p13, %p2816_p8 }
  0x90   : > { %p2480_p1 = pneg %p2479_p0 }
  0x92   : > { %p2485_p2 = pnand %p2483_p3, %p2480_p1 }
  0x94   : > { %2488 = shalt.err (!%p2485_p2)
}
  0x95   : > { %s2489_s25 = scalar_lea.vmem %s301_s22, 64  ;;  %p2497_p10 = scmp.lt.s32.totalorder %s301_s22, %s301_s22 }
  0x96   : > { %p2490_p5 = scmp.ne.s32.totalorder %s301_s22, %s2489_s25  ;;  %p2498_p4 = scmp.lt.s32.totalorder %s2489_s25, %s2489_s25 }
  0x98   : > { %p2492_p7 = pnand %p2490_p5, %p2816_p8  ;;  %p2499_p11 = por %p2498_p4, %p2497_p10 }
  0x9a   : > { %p2493_p9 = pneg %p2492_p7 }
  0x9c   : > { %p2500_p12 = pnand %p2499_p11, %p2493_p9 }
  0x9e   : > { %2503 = shalt.err (!%p2500_p12)
}
  0x9f   : > { %2171 = dma.hbm_to_vmem [thread:$0]  (!%p2800_p6), %s3355_s4, 64, %s301_s22, [#allocation10]  }
  0xa0   : > { %s2504_s28 = scalar_lea.hbm %s3357_s6, 128 }
  0xa1   : > { %p2505_p13 = scmp.ne.s32.totalorder %s3357_s6, %s2504_s28  ;;  %p2511_p3 = scmp.lt.u32.totalorder %s2504_s28, %s3357_s6 }
  0xa3   : > { %p2507_p0 = pnand %p2505_p13, %p2816_p8 }
  0xa5   : > { %p2508_p1 = pneg %p2507_p0 }
  0xa7   : > { %p2513_p2 = pnand %p2511_p3, %p2508_p1 }
  0xa9   : > { %2516 = shalt.err (!%p2513_p2)
}
  0xaa   : > { %s2517_s23 = scalar_lea.vmem %s323_s26, 128  ;;  %p2525_p10 = scmp.lt.s32.totalorder %s323_s26, %s323_s26 }
  0xab   : > { %p2518_p5 = scmp.ne.s32.totalorder %s323_s26, %s2517_s23  ;;  %p2526_p4 = scmp.lt.s32.totalorder %s2517_s23, %s2517_s23 }
  0xad   : > { %p2520_p7 = pnand %p2518_p5, %p2816_p8  ;;  %p2527_p11 = por %p2526_p4, %p2525_p10 }
  0xaf   : > { %p2521_p9 = pneg %p2520_p7 }
  0xb1   : > { %p2528_p12 = pnand %p2527_p11, %p2521_p9 }
  0xb3   : > { %2531 = shalt.err (!%p2528_p12)
}
  0xb4   : > { %2177 = dma.hbm_to_vmem [thread:$0]  (!%p2800_p6), %s3357_s6, 128, %s323_s26, [#allocation13]  }
  0xb5   : > { %s2681_s20 = smov [#allocation17]   ;;  %s2532_s28 = scalar_lea.hbm %s3359_s8, 128 }
  0xb6   : > { %s344_s14 = sshll.u32 %s2681_s20, 4  ;;  %p2533_p13 = scmp.ne.s32.totalorder %s3359_s8, %s2532_s28  ;;  %s345_s14 = int_to_ptr.vmem [resolvable:$true] %s344_s14 }
  0xb7   : > { %p2539_p3 = scmp.lt.u32.totalorder %s2532_s28, %s3359_s8 }
  0xb8   : > { %p2535_p0 = pnand %p2533_p13, %p2816_p8 }
  0xba   : > { %p2536_p1 = pneg %p2535_p0 }
  0xbc   : > { %p2541_p2 = pnand %p2539_p3, %p2536_p1 }
  0xbe   : > { %2544 = shalt.err (!%p2541_p2)
}
  0xbf   : > { %s2545_s26 = scalar_lea.vmem %s345_s14, 128  ;;  %p2553_p10 = scmp.lt.s32.totalorder %s345_s14, %s345_s14 }
  0xc0   : > { %p2546_p5 = scmp.ne.s32.totalorder %s345_s14, %s2545_s26  ;;  %p2554_p4 = scmp.lt.s32.totalorder %s2545_s26, %s2545_s26 }
  0xc2   : > { %p2548_p7 = pnand %p2546_p5, %p2816_p8  ;;  %p2555_p11 = por %p2554_p4, %p2553_p10 }
  0xc4   : > { %p2549_p9 = pneg %p2548_p7 }
  0xc6   : > { %p2556_p12 = pnand %p2555_p11, %p2549_p9 }
  0xc8   : > { %2559 = shalt.err (!%p2556_p12)
}
  0xc9   : > { %2183 = dma.hbm_to_vmem [thread:$0]  (!%p2800_p6), %s3359_s8, 128, %s345_s14, [#allocation16]  }
  0xca   : > { %s1915_s29 = sadd.s32 4294967294, %s2672_s12   ;;  %s2976_s21 = sadd.s32 1, %s2672_s12  }
  0xcb   : > { %s33_s25 = ssub.s32 %s2672_s12, %s2976_s21  ;;  %s36_s20 = sadd.s32 1, %s2668_s11 }
  0xcc   : > { %p34_p8 = scmp.eq.s32.totalorder %s33_s25, 0  ;;  %p43_p13 = scmp.ne.s32.totalorder %s2668_s11, %s2664_s10 }
  0xcd   : > { %p44_p0 = scmp.eq.s32.totalorder %s2672_s12, 0  ;;  %p49_p1 = scmp.ne.s32.totalorder %s2664_s10, %s2660_s30 }
  0xce   : > { %s2987_s24 = scalar_select %p34_p8, %s2668_s11, %s36_s20  }
  0xcf   : > { %p2989_p3 = por %p44_p0, %p43_p13  ;;  %p3372_p2 = scmp.eq.s32.totalorder %s2782_s15, 0 }
  0xd0   : > { %p241_p5 = scmp.eq.s32.totalorder %s2782_s15, 1  ;;  %p247_p7 = scmp.eq.s32.totalorder %s1915_s29, 1 }
  0xd1   : > { %p2995_p6 = por %p3372_p2, %p49_p1  ;;  %p2200_p9 = scmp.lt.s32.totalorder %s2672_s12, 2 }
  0xd2   : > { %s355_s28 = sand.u32 1, %s2668_s11   ;;  %p3002_p10 = por %p241_p5, %p43_p13 }
  0xd3   : > { %p3006_p4 = por %p247_p7, %p49_p1  ;;  %s1926_s19 = sshll.u32 %s355_s28, 2 }
  0xd4   : > { %s3374_s13 = scalar_select %p3002_p10, 1, 0 }
  0xd5   : > { %s3375_s17 = scalar_select %p3006_p4, 1, 0 }
  0xd6   : > { %s1927_s18 = sshll.u32 %s2672_s12, 6  ;;  %s359_s29 = scalar_lea.vmem [#allocation3], %s1926_s19 }
  0xd7   : > { %s3014_s22 = scalar_lea.hbm %s3351_s0, %s1927_s18  ;;  %s366_s25 = sshll.u32 %s359_s29, 4  ;;  %s3016_s25 = int_to_ptr.vmem [resolvable:$true] %s366_s25 }
  0xd8   : > { %p3020_p11 = pnand %p2200_p9, %p2989_p3  ;;  %s356_s1 = scalar_lea.sflag [#allocation4], %s355_s28 }
  0xd9   : > { %s2560_s2 = scalar_lea.hbm %s3014_s22, 64  ;;  %s2565_s26 = scalar_lea.hbm %s3351_s0, 128 }
  0xda   : > { %p2561_p12 = scmp.ne.s32.totalorder %s3014_s22, %s2560_s2  ;;  %p2562_p8 = pneg %p3020_p11 }
  0xdb   : > { %p2566_p1 = scmp.lt.u32.totalorder %s3014_s22, %s3351_s0  ;;  %p2567_p3 = scmp.lt.u32.totalorder %s2565_s26, %s2560_s2 }
  0xdc   : > { %p2563_p13 = pnand %p2562_p8, %p2561_p12  ;;  %p2569_p5 = scmp.lt.u32.totalorder %s2560_s2, %s3014_s22 }
  0xdd   : > { %p2568_p2 = por %p2567_p3, %p2566_p1 }
  0xde   : > { %p2564_p0 = pneg %p2563_p13 }
  0xdf   : > { %p2570_p7 = por %p2569_p5, %p2568_p2 }
  0xe1   : > { %p2571_p9 = pnand %p2570_p7, %p2564_p0 }
  0xe3   : > { %2574 = shalt.err (!%p2571_p9)
}
  0xe4   : > { %s2575_s28 = scalar_lea.vmem %s3016_s25, 64  ;;  %s2682_s29 = smov [#allocation3]  }
  0xe5   : > { %p2576_p12 = scmp.ne.s32.totalorder %s3016_s25, %s2575_s28  ;;  %s2580_s19 = sshll.u32 %s2682_s29, 4  ;;  %s2581_s19 = int_to_ptr.vmem [resolvable:$false] %s2580_s19 }
  0xe6   : > { %s2582_s18 = scalar_lea.vmem %s2581_s19, 128  ;;  %p2583_p10 = scmp.lt.s32.totalorder %s3016_s25, %s2581_s19 }
  0xe7   : > { %p2578_p13 = pnand %p2576_p12, %p2562_p8  ;;  %p2584_p1 = scmp.lt.s32.totalorder %s2582_s18, %s2575_s28 }
  0xe9   : > { %p2579_p4 = pneg %p2578_p13  ;;  %p2585_p3 = por %p2584_p1, %p2583_p10 }
  0xeb   : > { %p2586_p2 = pnand %p2585_p3, %p2579_p4 }
  0xed   : > { %2589 = shalt.err (!%p2586_p2)
}
  0xee   : > { %2187 = dma.hbm_to_vmem [thread:$0]  (!%p3020_p11), %s3014_s22, 64, %s3016_s25, %s356_s1  }
  0xef   : > { %p3377_p0 = scmp.ne.s32.totalorder %s3366_s16, 0 }
  0xf0   : > { %s3052_s2 = sand.u32 (!%p3377_p0), 1, %s2664_s10  }
  0xf1   : > { %375 = sbr.rel (%p3377_p0) target bundleno = 5515 (0x158b), region = 56  ;;  %s1929_s26 = sshll.u32 (!%p3377_p0), %s3052_s2, 2 }
  0xf2   : > { %s378_s27 = scalar_lea.sflag (!%p3377_p0), [#allocation4], %s3052_s2  ;;  %s381_s23 = scalar_lea.vmem (!%p3377_p0), [#allocation3], %s1929_s26 }
  0xf8   : > { %2635 = dma.done.wait (%p2995_p6), %s378_s27, 64  }
  0xf9   : > { %2637 = vsyncadd (%p2995_p6), %s378_s27, 4294967232  ;;  %p3378_p10 = scmp.eq.s32.totalorder %s2782_s15, 0 }
  0xfb   : > { %2639 = dma.done.wait (%p3378_p10), [#allocation7], 192   ;;  %p3379_p4 = pmov %p3378_p10 }
  0xfd   : > { %2641 = vsyncadd (%p3379_p4), [#allocation7], 4294967104  ;;  %p3380_p11 = pmov %p3379_p4 }
  0xfe   : > { %p3381_p8 = pmov %p3379_p4 }
  0xff   : > { %2643 = dma.done.wait (%p3380_p11), [#allocation10], 128  }
 0x100   : > { %2645 = vsyncadd (%p3381_p8), [#allocation10], 4294967168  ;;  %p3382_p5 = pmov %p3379_p4 }
 0x101   : > { %p3383_p7 = pmov %p3379_p4 }
 0x102   : > { %2647 = dma.done.wait (%p3382_p5), [#allocation13], 192  }
 0x103   : > { %2649 = vsyncadd (%p3383_p7), [#allocation13], 4294967104  ;;  %p3384_p6 = pmov %p3379_p4 }
 0x104   : > { %p3385_p9 = pmov %p3379_p4 }
 0x105   : > { %2651 = dma.done.wait (%p3384_p6), [#allocation16], 192  }
 0x106   : > { %2653 = vsyncadd (%p3385_p9), [#allocation16], 4294967104  ;;  %v2683_v0 = vmov 0.0|0.0   ;;  %v3078_v1 = vld [vmem:[%s381_s23] sm:$0xf]  ;;  %vm458_vm0 = vcmask 1043456  }
 0x107   : > { %2087 = vmatprep.subr.bf16.mxu0 %v2683_v0  ;;  %2093 = vmatprep.subr.bf16.mxu1 %v2683_v0  ;;  %vm460_vm1 = vcmask 130048   ;;  %s2684_s1 = smov 2   ;;  %v469_v2 = vsel %vm458_vm0, %v3078_v1, 0.0  ;;  %s2685_s16 = smov 127   ;;  %vm2688_vm2 = vmmov 0   ;;  %v2689_v3 = vmov 0.0  }
 0x108   : > { %453 = vrot.lane.b32.xlu0 %v3078_v1, %s2684_s1  ;;  %471 = vrot.lane.b32.xlu1 %v3078_v1, %s2685_s16  ;;  %470 = vst.msk [vmem:[#allocation2 + $0x10] sm:$0xff] %vm460_vm1, %v469_v2  ;;  %s2686_s14 = smov 1   ;;  %s2687_s22 = smov 126   ;;  %v451_v4 = vld [vmem:[#allocation6] sm:$0xf]  ;;  %v2690_v5 = vmov 0  }
 0x109   : > { %2014 = vmatprep.mubr.msk.f32.mxu0 %vm2688_vm2, %v2689_v3  ;;  %2027 = vmatprep.mubr.msk.f32.mxu1 %vm2688_vm2, %v2689_v3  ;;  %vm456_vm3 = vcmask 15360   ;;  %vm474_vm4 = vcmask 121856   ;;  %vm465_vm5 = vcmask 7168   ;;  %vm481_vm6 = vcmask 113664   ;;  %v485_v25 = vld [vmem:[#allocation8] sm:$0xf] }
 0x10a   : > { %2277 = vset.pattern.permute.xlu0 %v2690_v5  ;;  %vm496_vm7 = vcmask 326656   ;;  %vm571_vm8 = vcmask 125952   ;;  %v2691_v33 = vmov 1   ;;  %v2692_v56 = vmov 2   ;;  %v570_v57 = vld [vmem:[#allocation6] sm:$0xf] }
 0x10b   : > { %2279 = vset.pattern.permute.xlu1 %v2692_v56  ;;  %vm1207_vm14 = vcmask 31744   ;;  %s1938_s25 = sshll.u32 %s3052_s2, 4  ;;  %s1965_s20 = sshll.u32 %s2782_s15, 8 }
 0x10c   : > { %462 = vrot.lane.b32.xlu0 %v3078_v1, %s2686_s14  ;;  %478 = vrot.lane.b32.xlu1 %v3078_v1, %s2687_s22  ;;  %s447_s28 = scalar_lea.vmem [#allocation18], %s1938_s25  ;;  %s3304_s26 = scalar_lea.hbm %s3360_s9, %s1965_s20 }
 0x10d   : > { %s1766_s29 = sshll.u32 %s447_s28, 4  ;;  %s1753_s15 = scalar_lea.sflag [#allocation5], %s3052_s2  ;;  %s3306_s29 = int_to_ptr.vmem [resolvable:$true] %s1766_s29 }
 0x10e   : > { %s2590_s27 = scalar_lea.vmem %s3306_s29, 256  ;;  %p3386_p13 = scmp.ne.s32.totalorder %s3374_s13, 0 }
 0x10f   : > { %v488_v18 = vld [vmem:[#allocation2 + $0x10] sm:$0xff]  ;;  %p2591_p12 = scmp.ne.s32.totalorder %s3306_s29, %s2590_s27  ;;  %s2708_s23 = smov [#allocation18]  }
 0x110   : > { %493 = vperm.xlu0 %2277, %v451_v4  }
 0x111   : > { %p2592_p1 = pnand %p2591_p12, %p3386_p13 }
 0x113   : > { %p2593_p3 = pneg %p2592_p1 }
 0x114   : > { %2278 = vset.pattern.permute.xlu0 %v2691_v33 }
 0x17a   : > { %v454_v6 = vpop.permute.xlu0 %453  ;;  %v472_v7 = vpop.permute.xlu1 %471 }
 0x17b   : > { %v457_v8 = vsel %vm456_vm3, 0.0, %v454_v6  ;;  %v475_v9 = vsel %vm474_vm4, %v472_v7, 0.0 }
 0x17c   : > { %v459_v10 = vsel %vm458_vm0, %v457_v8, 0.0  ;;  %v476_v11 = vsel %vm458_vm0, %v475_v9, 0.0 }
 0x17d   : > { %461 = vst.msk [vmem:[#allocation2] sm:$0xff] %vm460_vm1, %v459_v10  ;;  %477 = vst.msk [vmem:[#allocation2 + $0x18] sm:$0xff] %vm460_vm1, %v476_v11 }
 0x17e   : > { %v463_v12 = vpop.permute.xlu0 %462  ;;  %v479_v13 = vpop.permute.xlu1 %478 }
 0x17f   : > { %v466_v14 = vsel %vm465_vm5, 0.0, %v463_v12  ;;  %v482_v15 = vsel %vm481_vm6, %v479_v13, 0.0 }
 0x180   : > { %v467_v16 = vsel %vm458_vm0, %v466_v14, 0.0  ;;  %v483_v17 = vsel %vm458_vm0, %v482_v15, 0.0 }
 0x181   : > { %468 = vst.msk [vmem:[#allocation2 + $0x8] sm:$0xff] %vm460_vm1, %v467_v16  ;;  %484 = vst.msk [vmem:[#allocation2 + $0x20] sm:$0xff] %vm460_vm1, %v483_v17 }
 0x184   : > { %v486_v19 = vld [vmem:[#allocation2] sm:$0xff]  ;;  %v489_v21 = vld [vmem:[#allocation2 + $0x18] sm:$0xff] }
 0x185   : > { %v2091_v23 = vpack.c.bf16 %v489_v21, %v488_v18 }
 0x188   : > { %v487_v20 = vld [vmem:[#allocation2 + $0x8] sm:$0xff]  ;;  %v490_v24 = vld [vmem:[#allocation2 + $0x20] sm:$0xff] }
 0x189   : > { %v2088_v22 = vpack.c.bf16 %v487_v20, %v486_v19 }
 0x18b   : > { %2089 = vmatpush3.bf16.msra.mxu0 %v2088_v22 }
 0x18c   : > { %2090 = vmatprep.subr.bf16.mxu0 %v2683_v0 }
 0x18f   : > { %2092 = vmatpush3.bf16.msra.mxu0 %v2091_v23  ;;  %v494_v26 = vpop.permute.xlu0 %493 }
 0x190   : > { %2012 = vmatprep.subr.mxu0 %v2689_v3 }
 0x193   : > { %2013 = vmatpush3.msra.mxu0 %v490_v24 }
 0x194   : > { %2015 = vmatmul.mubr.msk.f32.vlgmr.msra.gmra.mrb[0].mxu0 %vm496_vm7, %v485_v25  ;;  %2099 = vmatprep.subr.bf16.mxu0 %v2683_v0 }
 0x195   : > { %2040 = vmatprep.mubr.msk.f32.mxu0 %vm2688_vm2, %v2689_v3 }
 0x267   : > { %v566_v27 = vpop.f32.mrb[0].mxu0 }
 0x268   : > { %v567_v28 = vadd.f32 %v566_v27, %v494_v26  ;;  %v2016_v29 = vpop.f32.mrb[1].mxu0 }
 0x26a   : > { %v572_v30 = vsel %vm571_vm8, %v567_v28, 0.0  ;;  %v583_v31 = vmul.f32 %v567_v28, %v567_v28 }
 0x26b   : > { %573 = vadd.xlane.f32.xlu1 %v572_v30 }
 0x26c   : > { %v584_v32 = vsel %vm571_vm8, %v583_v31, 0.0 }
 0x26d   : > { %585 = vadd.xlane.f32.xlu0 %v584_v32  ;;  %v2693_v32 = vmov 3  }
 0x2f8   : > { %v574_v34 = vpop.xlane.xlu1 %573 }
 0x2f9   : > { %v575_v35 = vsel %vm458_vm0, %v574_v34, 0.0 }
 0x2fa   : > { %v576_v36 = vrot.slane %v575_v35, 4  ;;  %v586_v37 = vpop.xlane.xlu0 %585 }
 0x2fb   : > { %v587_v38 = vsel %vm458_vm0, %v586_v37, 0.0 }
 0x2fc   : > { %v577_v39 = vadd.f32 %v576_v36, %v575_v35  ;;  %v588_v40 = vrot.slane %v587_v38, 4 }
 0x2fe   : > { %v578_v41 = vrot.slane %v577_v39, 2  ;;  %v589_v42 = vadd.f32 %v588_v40, %v587_v38 }
 0x300   : > { %v579_v43 = vadd.f32 %v578_v41, %v577_v39  ;;  %v590_v44 = vrot.slane %v589_v42, 2 }
 0x302   : > { %v580_v45 = vrot.slane %v579_v43, 1  ;;  %v591_v46 = vadd.f32 %v590_v44, %v589_v42 }
 0x304   : > { %v581_v47 = vadd.f32 %v580_v45, %v579_v43  ;;  %v592_v48 = vrot.slane %v591_v46, 1 }
 0x306   : > { %v582_v49 = vmul.f32 0.015625, %v581_v47  ;;  %v593_v50 = vadd.f32 %v592_v48, %v591_v46 }
 0x308   : > { %v595_v51 = vmul.f32 %v582_v49, %v582_v49  ;;  %v594_v52 = vmul.f32 0.015625, %v593_v50 }
 0x30a   : > { %v596_v53 = vsub.f32 %v594_v52, %v595_v51  ;;  %v673_v52 = vld [vmem:[#allocation9] sm:$0xf] }
 0x30c   : > { %v597_v54 = vmax.f32 %v596_v53, 0.0 }
 0x30e   : > { %v598_v55 = vadd.f32 1e-05, %v597_v54 }
 0x310   : > { %2300 = vrsqrt.f32 %v598_v55 }
 0x31a   : > { %v2301_v58 = vpop.eup %2300 }
 0x31b   : > { %v600_v59 = vmul.f32 %v2301_v58, %v570_v57 }
 0x31d   : > { %609 = vperm.xlu0 %2278, %v600_v59   ;;  %v601_v60 = vmul.f32 %v600_v59, %v582_v49 }
 0x31f   : > { %603 = vrot.lane.b32.xlu1 %v601_v60, %s2686_s14 }
 0x391   : > { %v604_v61 = vpop.permute.xlu1 %603 }
 0x392   : > { %v606_v62 = vsub.f32 %v570_v57, %v604_v61 }
 0x394   : > { %615 = vperm.xlu1 %2279, %v606_v62   ;;  %v2694_v62 = vmov 4  }
 0x395   : > { %2281 = vset.pattern.permute.xlu0 %v2694_v62 }
 0x398   : > { %2280 = vset.pattern.permute.xlu1 %v2693_v32 }
 0x39c   : > { %v610_v63 = vpop.permute.xlu0 %609 }
 0x39d   : > { %v612_v2 = vmul.f32 %v610_v63, %v567_v28 }
 0x413   : > { %v616_v4 = vpop.permute.xlu1 %615 }
 0x414   : > { %v618_v5 = vadd.f32 %v616_v4, %v612_v2 }
 0x416   : > { %v619_v6 = vmul.f32 0.70710677, %v618_v5  ;;  %v643_v28 = vmul.f32 0.5, %v618_v5 }
 0x418   : > { %v620_v7 = vand.u32 2147483647, %v619_v6  ;;  %vm640_vm9 = vcmp.ge.f32.partialorder %v619_v6, 0.0 }
 0x41a   : > { %v621_v8 = vmul.f32 0.3275911, %v620_v7  ;;  %v634_v10 = vsub.f32 0.0, %v620_v7 }
 0x41c   : > { %v622_v9 = vadd.f32 1.0, %v621_v8  ;;  %v635_v12 = vmul.f32 %v634_v10, %v620_v7 }
 0x41e   : > { %2302 = vrcp.f32 %v622_v9  ;;  %v636_v15 = vmul.f32 1.442695, %v635_v12 }
 0x420   : > { %2304 = vpow2.f32 %v636_v15 }
 0x428   : > { %v2303_v11 = vpop.eup %2302 }
 0x429   : > { %v625_v13 = vmul.f32 1.0614054, %v2303_v11 }
 0x42a   : > { %v2305_v23 = vpop.eup %2304 }
 0x42b   : > { %v1940_v14 = vadd.f32 -1.4531521, %v625_v13 }
 0x42d   : > { %v627_v16 = vmul.f32 %v2303_v11, %v1940_v14 }
 0x42f   : > { %v628_v17 = vadd.f32 1.4214138, %v627_v16 }
 0x431   : > { %v629_v18 = vmul.f32 %v2303_v11, %v628_v17 }
 0x433   : > { %v1941_v19 = vadd.f32 -0.28449672, %v629_v18 }
 0x435   : > { %v631_v20 = vmul.f32 %v2303_v11, %v1941_v19 }
 0x437   : > { %v632_v21 = vadd.f32 0.2548296, %v631_v20 }
 0x439   : > { %v633_v22 = vmul.f32 %v2303_v11, %v632_v21 }
 0x43b   : > { %v638_v24 = vmul.f32 %v2305_v23, %v633_v22 }
 0x43d   : > { %v639_v25 = vsub.f32 1.0, %v638_v24  ;;  %v2695_v24 = vmov 5  }
 0x43f   : > { %v641_v26 = vsub.f32 0.0, %v639_v25 }
 0x441   : > { %v642_v27 = vsel %vm640_vm9, %v639_v25, %v641_v26  ;;  %v757_v25 = vld [vmem:[#allocation6] sm:$0xf] }
 0x442   : > { %v644_v29 = vadd.f32 1.0, %v642_v27 }
 0x444   : > { %v645_v30 = vmul.f32 %v644_v29, %v643_v28 }
 0x446   : > { %v659_v31 = vsel %vm458_vm0, %v645_v30, 0.0  ;;  %647 = vrot.lane.b32.xlu1 %v645_v30, %s2684_s1 }
 0x447   : > { %660 = vst.msk [vmem:[#allocation2 + $0x10] sm:$0xff] %vm460_vm1, %v659_v31 }
 0x44a   : > { %653 = vrot.lane.b32.xlu1 %v645_v30, %s2686_s14 }
 0x44e   : > { %661 = vrot.lane.b32.xlu1 %v645_v30, %s2685_s16  ;;  %v676_v49 = vld [vmem:[#allocation2 + $0x10] sm:$0xff] }
 0x452   : > { %667 = vrot.lane.b32.xlu1 %v645_v30, %s2687_s22 }
 0x456   : > { %681 = vperm.xlu1 %2280, %v570_v57  }
 0x45a   : > { %2282 = vset.pattern.permute.xlu1 %v2695_v24 }
 0x4b8   : > { %v648_v34 = vpop.permute.xlu1 %647 }
 0x4b9   : > { %v650_v35 = vsel %vm456_vm3, 0.0, %v648_v34 }
 0x4ba   : > { %v651_v36 = vsel %vm458_vm0, %v650_v35, 0.0 }
 0x4bb   : > { %652 = vst.msk [vmem:[#allocation2] sm:$0xff] %vm460_vm1, %v651_v36 }
 0x4bc   : > { %v654_v37 = vpop.permute.xlu1 %653 }
 0x4bd   : > { %v656_v38 = vsel %vm465_vm5, 0.0, %v654_v37 }
 0x4be   : > { %v657_v39 = vsel %vm458_vm0, %v656_v38, 0.0 }
 0x4bf   : > { %658 = vst.msk [vmem:[#allocation2 + $0x8] sm:$0xff] %vm460_vm1, %v657_v39 }
 0x4c0   : > { %v662_v40 = vpop.permute.xlu1 %661 }
 0x4c1   : > { %v664_v41 = vsel %vm474_vm4, %v662_v40, 0.0 }
 0x4c2   : > { %v665_v42 = vsel %vm458_vm0, %v664_v41, 0.0  ;;  %v674_v46 = vld [vmem:[#allocation2] sm:$0xff] }
 0x4c3   : > { %666 = vst.msk [vmem:[#allocation2 + $0x18] sm:$0xff] %vm460_vm1, %v665_v42 }
 0x4c4   : > { %v668_v43 = vpop.permute.xlu1 %667 }
 0x4c5   : > { %v670_v44 = vsel %vm481_vm6, %v668_v43, 0.0 }
 0x4c6   : > { %v671_v45 = vsel %vm458_vm0, %v670_v44, 0.0  ;;  %v675_v47 = vld [vmem:[#allocation2 + $0x8] sm:$0xff] }
 0x4c7   : > { %672 = vst.msk [vmem:[#allocation2 + $0x20] sm:$0xff] %vm460_vm1, %v671_v45  ;;  %v2094_v48 = vpack.c.bf16 %v675_v47, %v674_v46 }
 0x4c9   : > { %2095 = vmatpush3.bf16.msra.mxu1 %v2094_v48 }
 0x4ca   : > { %2096 = vmatprep.subr.bf16.mxu1 %v2683_v0  ;;  %v677_v50 = vld [vmem:[#allocation2 + $0x18] sm:$0xff] }
 0x4cb   : > { %v2097_v51 = vpack.c.bf16 %v677_v50, %v676_v49 }
 0x4cd   : > { %2098 = vmatpush3.bf16.msra.mxu1 %v2097_v51 }
 0x4ce   : > { %2025 = vmatprep.subr.mxu1 %v2689_v3  ;;  %v678_v53 = vld [vmem:[#allocation2 + $0x20] sm:$0xff] }
 0x4d1   : > { %2026 = vmatpush3.msra.mxu1 %v678_v53 }
 0x4d2   : > { %2028 = vmatmul.mubr.msk.f32.vlgmr.msra.gmra.mrb[0].mxu1 %vm496_vm7, %v673_v52  ;;  %2105 = vmatprep.subr.bf16.mxu1 %v2683_v0 }
 0x4d3   : > { %2053 = vmatprep.mubr.msk.f32.mxu1 %vm2688_vm2, %v2689_v3 }
 0x4d5   : > { %v682_v54 = vpop.permute.xlu1 %681 }
 0x5a5   : > { %v753_v55 = vpop.f32.mrb[0].mxu1 }
 0x5a6   : > { %v754_v57 = vadd.f32 %v753_v55, %v682_v54  ;;  %v2029_v58 = vpop.f32.mrb[1].mxu1 }
 0x5a8   : > { %v758_v59 = vsel %vm571_vm8, %v754_v57, 0.0  ;;  %v769_v60 = vmul.f32 %v754_v57, %v754_v57 }
 0x5a9   : > { %759 = vadd.xlane.f32.xlu1 %v758_v59 }
 0x5aa   : > { %v770_v61 = vsel %vm571_vm8, %v769_v60, 0.0 }
 0x5ab   : > { %771 = vadd.xlane.f32.xlu0 %v770_v61 }
 0x636   : > { %v760_v63 = vpop.xlane.xlu1 %759 }
 0x637   : > { %v761_v2 = vsel %vm458_vm0, %v760_v63, 0.0 }
 0x638   : > { %v762_v4 = vrot.slane %v761_v2, 4  ;;  %v772_v5 = vpop.xlane.xlu0 %771 }
 0x639   : > { %v773_v6 = vsel %vm458_vm0, %v772_v5, 0.0 }
 0x63a   : > { %v763_v7 = vadd.f32 %v762_v4, %v761_v2  ;;  %v774_v8 = vrot.slane %v773_v6, 4  ;;  %v2696_v2 = vmov 6  }
 0x63c   : > { %v764_v9 = vrot.slane %v763_v7, 2  ;;  %v775_v10 = vadd.f32 %v774_v8, %v773_v6 }
 0x63e   : > { %v765_v11 = vadd.f32 %v764_v9, %v763_v7  ;;  %v776_v12 = vrot.slane %v775_v10, 2 }
 0x640   : > { %v766_v13 = vrot.slane %v765_v11, 1  ;;  %v777_v14 = vadd.f32 %v776_v12, %v775_v10 }
 0x642   : > { %v767_v15 = vadd.f32 %v766_v13, %v765_v11  ;;  %v778_v16 = vrot.slane %v777_v14, 1 }
 0x644   : > { %v768_v17 = vmul.f32 0.015625, %v767_v15  ;;  %v779_v18 = vadd.f32 %v778_v16, %v777_v14 }
 0x646   : > { %v781_v19 = vmul.f32 %v768_v17, %v768_v17  ;;  %v780_v20 = vmul.f32 0.015625, %v779_v18 }
 0x648   : > { %v782_v21 = vsub.f32 %v780_v20, %v781_v19 }
 0x64a   : > { %v783_v22 = vmax.f32 %v782_v21, 0.0  ;;  %v860_v21 = vld [vmem:[#allocation11] sm:$0xf] }
 0x64c   : > { %v784_v23 = vadd.f32 1e-05, %v783_v22 }
 0x64e   : > { %2306 = vrsqrt.f32 %v784_v23 }
 0x658   : > { %v2307_v26 = vpop.eup %2306 }
 0x659   : > { %v786_v27 = vmul.f32 %v2307_v26, %v757_v25 }
 0x65b   : > { %795 = vperm.xlu0 %2281, %v786_v27   ;;  %v787_v28 = vmul.f32 %v786_v27, %v768_v17 }
 0x65d   : > { %789 = vrot.lane.b32.xlu1 %v787_v28, %s2686_s14 }
 0x6cf   : > { %v790_v29 = vpop.permute.xlu1 %789 }
 0x6d0   : > { %v792_v30 = vsub.f32 %v757_v25, %v790_v29 }
 0x6d2   : > { %801 = vperm.xlu1 %2282, %v792_v30   ;;  %v2697_v30 = vmov 7  }
 0x6d6   : > { %2283 = vset.pattern.permute.xlu1 %v2696_v2 }
 0x6da   : > { %v796_v31 = vpop.permute.xlu0 %795 }
 0x6db   : > { %v798_v32 = vmul.f32 %v796_v31, %v754_v57 }
 0x751   : > { %v802_v34 = vpop.permute.xlu1 %801 }
 0x752   : > { %v804_v35 = vadd.f32 %v802_v34, %v798_v32 }
 0x754   : > { %v805_v36 = vmul.f32 0.70710677, %v804_v35  ;;  %v829_v59 = vmul.f32 0.5, %v804_v35 }
 0x756   : > { %v806_v37 = vand.u32 2147483647, %v805_v36  ;;  %vm826_vm10 = vcmp.ge.f32.partialorder %v805_v36, 0.0 }
 0x758   : > { %v807_v38 = vmul.f32 0.3275911, %v806_v37  ;;  %v820_v40 = vsub.f32 0.0, %v806_v37 }
 0x75a   : > { %v808_v39 = vadd.f32 1.0, %v807_v38  ;;  %v821_v42 = vmul.f32 %v820_v40, %v806_v37 }
 0x75c   : > { %2308 = vrcp.f32 %v808_v39  ;;  %v822_v45 = vmul.f32 1.442695, %v821_v42 }
 0x75e   : > { %2310 = vpow2.f32 %v822_v45 }
 0x766   : > { %v2309_v41 = vpop.eup %2308 }
 0x767   : > { %v811_v43 = vmul.f32 1.0614054, %v2309_v41 }
 0x768   : > { %v2311_v53 = vpop.eup %2310 }
 0x769   : > { %v1943_v44 = vadd.f32 -1.4531521, %v811_v43 }
 0x76b   : > { %v813_v46 = vmul.f32 %v2309_v41, %v1943_v44 }
 0x76d   : > { %v814_v47 = vadd.f32 1.4214138, %v813_v46 }
 0x76f   : > { %v815_v48 = vmul.f32 %v2309_v41, %v814_v47 }
 0x771   : > { %v1944_v49 = vadd.f32 -0.28449672, %v815_v48 }
 0x773   : > { %v817_v50 = vmul.f32 %v2309_v41, %v1944_v49 }
 0x775   : > { %v818_v51 = vadd.f32 0.2548296, %v817_v50 }
 0x777   : > { %v819_v52 = vmul.f32 %v2309_v41, %v818_v51 }
 0x779   : > { %v824_v54 = vmul.f32 %v2311_v53, %v819_v52 }
 0x77b   : > { %v825_v55 = vsub.f32 1.0, %v824_v54  ;;  %v944_v54 = vld [vmem:[#allocation6] sm:$0xf] }
 0x77d   : > { %v827_v57 = vsub.f32 0.0, %v825_v55 }
 0x77f   : > { %v828_v58 = vsel %vm826_vm10, %v825_v55, %v827_v57 }
 0x780   : > { %v830_v60 = vadd.f32 1.0, %v828_v58 }
 0x782   : > { %v831_v61 = vmul.f32 %v830_v60, %v829_v59  ;;  %v2698_v59 = vmov 8  }
 0x784   : > { %v3150_v62 = vadd.f32 %v831_v61, %v3078_v1 }
 0x786   : > { %v846_v63 = vsel %vm458_vm0, %v3150_v62, 0.0  ;;  %834 = vrot.lane.b32.xlu1 %v3150_v62, %s2684_s1 }
 0x787   : > { %847 = vst.msk [vmem:[#allocation2 + $0x10] sm:$0xff] %vm460_vm1, %v846_v63 }
 0x78a   : > { %840 = vrot.lane.b32.xlu1 %v3150_v62, %s2686_s14 }
 0x78e   : > { %848 = vrot.lane.b32.xlu1 %v3150_v62, %s2685_s16  ;;  %v863_v18 = vld [vmem:[#allocation2 + $0x10] sm:$0xff] }
 0x792   : > { %854 = vrot.lane.b32.xlu1 %v3150_v62, %s2687_s22 }
 0x796   : > { %868 = vperm.xlu1 %2283, %v757_v25  }
 0x79a   : > { %2284 = vset.pattern.permute.xlu1 %v2697_v30 }
 0x7f8   : > { %v835_v1 = vpop.permute.xlu1 %834 }
 0x7f9   : > { %v837_v4 = vsel %vm456_vm3, 0.0, %v835_v1 }
 0x7fa   : > { %v838_v5 = vsel %vm458_vm0, %v837_v4, 0.0 }
 0x7fb   : > { %839 = vst.msk [vmem:[#allocation2] sm:$0xff] %vm460_vm1, %v838_v5 }
 0x7fc   : > { %v841_v6 = vpop.permute.xlu1 %840 }
 0x7fd   : > { %v843_v7 = vsel %vm465_vm5, 0.0, %v841_v6 }
 0x7fe   : > { %v844_v8 = vsel %vm458_vm0, %v843_v7, 0.0 }
 0x7ff   : > { %845 = vst.msk [vmem:[#allocation2 + $0x8] sm:$0xff] %vm460_vm1, %v844_v8 }
 0x800   : > { %v849_v9 = vpop.permute.xlu1 %848 }
 0x801   : > { %v851_v10 = vsel %vm474_vm4, %v849_v9, 0.0 }
 0x802   : > { %v852_v11 = vsel %vm458_vm0, %v851_v10, 0.0  ;;  %v861_v15 = vld [vmem:[#allocation2] sm:$0xff] }
 0x803   : > { %853 = vst.msk [vmem:[#allocation2 + $0x18] sm:$0xff] %vm460_vm1, %v852_v11 }
 0x804   : > { %v855_v12 = vpop.permute.xlu1 %854 }
 0x805   : > { %v857_v13 = vsel %vm481_vm6, %v855_v12, 0.0 }
 0x806   : > { %v858_v14 = vsel %vm458_vm0, %v857_v13, 0.0  ;;  %v862_v16 = vld [vmem:[#allocation2 + $0x8] sm:$0xff] }
 0x807   : > { %859 = vst.msk [vmem:[#allocation2 + $0x20] sm:$0xff] %vm460_vm1, %v858_v14  ;;  %v2100_v17 = vpack.c.bf16 %v862_v16, %v861_v15 }
 0x809   : > { %2101 = vmatpush3.bf16.msra.mxu0 %v2100_v17 }
 0x80a   : > { %2102 = vmatprep.subr.bf16.mxu0 %v2683_v0  ;;  %v864_v19 = vld [vmem:[#allocation2 + $0x18] sm:$0xff] }
 0x80b   : > { %v2103_v20 = vpack.c.bf16 %v864_v19, %v863_v18 }
 0x80d   : > { %2104 = vmatpush3.bf16.msra.mxu0 %v2103_v20 }
 0x80e   : > { %2038 = vmatprep.subr.mxu0 %v2689_v3  ;;  %v865_v22 = vld [vmem:[#allocation2 + $0x20] sm:$0xff] }
 0x811   : > { %2039 = vmatpush3.msra.mxu0 %v865_v22 }
 0x812   : > { %2041 = vmatmul.mubr.msk.f32.vlgmr.msra.gmra.mrb[2].mxu0 %vm496_vm7, %v860_v21  ;;  %2056 = vmatprep.subr.mxu0 %v2689_v3 }
 0x813   : > { %2058 = vmatprep.mubr.msk.f32.mxu0 %vm2688_vm2, %v2689_v3 }
 0x815   : > { %v869_v23 = vpop.permute.xlu1 %868 }
 0x8e5   : > { %v940_v24 = vpop.f32.mrb[2].mxu0 }
 0x8e6   : > { %v941_v25 = vadd.f32 %v940_v24, %v869_v23  ;;  %v2042_v26 = vpop.f32.mrb[3].mxu0 }
 0x8e8   : > { %v945_v27 = vsel %vm571_vm8, %v941_v25, 0.0  ;;  %v956_v28 = vmul.f32 %v941_v25, %v941_v25 }
 0x8e9   : > { %946 = vadd.xlane.f32.xlu1 %v945_v27 }
 0x8ea   : > { %v957_v29 = vsel %vm571_vm8, %v956_v28, 0.0 }
 0x8eb   : > { %958 = vadd.xlane.f32.xlu0 %v957_v29 }
 0x976   : > { %v947_v31 = vpop.xlane.xlu1 %946 }
 0x977   : > { %v948_v32 = vsel %vm458_vm0, %v947_v31, 0.0  ;;  %v2699_v31 = vmov 9  }
 0x978   : > { %v949_v34 = vrot.slane %v948_v32, 4  ;;  %v959_v35 = vpop.xlane.xlu0 %958  ;;  %2286 = vset.pattern.permute.xlu0 %v2699_v31 }
 0x979   : > { %v960_v36 = vsel %vm458_vm0, %v959_v35, 0.0 }
 0x97a   : > { %v950_v37 = vadd.f32 %v949_v34, %v948_v32  ;;  %v961_v38 = vrot.slane %v960_v36, 4 }
 0x97c   : > { %v951_v39 = vrot.slane %v950_v37, 2  ;;  %v962_v40 = vadd.f32 %v961_v38, %v960_v36 }
 0x97e   : > { %v952_v41 = vadd.f32 %v951_v39, %v950_v37  ;;  %v963_v42 = vrot.slane %v962_v40, 2 }
 0x980   : > { %v953_v43 = vrot.slane %v952_v41, 1  ;;  %v964_v44 = vadd.f32 %v963_v42, %v962_v40 }
 0x982   : > { %v954_v45 = vadd.f32 %v953_v43, %v952_v41  ;;  %v965_v46 = vrot.slane %v964_v44, 1 }
 0x984   : > { %v955_v47 = vmul.f32 0.015625, %v954_v45  ;;  %v966_v48 = vadd.f32 %v965_v46, %v964_v44 }
 0x986   : > { %v968_v49 = vmul.f32 %v955_v47, %v955_v47  ;;  %v967_v50 = vmul.f32 0.015625, %v966_v48 }
 0x988   : > { %v969_v51 = vsub.f32 %v967_v50, %v968_v49 }
 0x98a   : > { %v970_v52 = vmax.f32 %v969_v51, 0.0  ;;  %v1046_v51 = vld [vmem:[#allocation12] sm:$0xf] }
 0x98c   : > { %v971_v53 = vadd.f32 1e-05, %v970_v52 }
 0x98e   : > { %2312 = vrsqrt.f32 %v971_v53 }
 0x998   : > { %v2313_v55 = vpop.eup %2312 }
 0x999   : > { %v973_v57 = vmul.f32 %v2313_v55, %v944_v54 }
 0x99b   : > { %982 = vperm.xlu1 %2284, %v973_v57   ;;  %v974_v58 = vmul.f32 %v973_v57, %v955_v47 }
 0x99d   : > { %976 = vrot.lane.b32.xlu0 %v974_v58, %s2686_s14 }
 0x99f   : > { %2285 = vset.pattern.permute.xlu1 %v2698_v59 }
 0xa0f   : > { %v977_v60 = vpop.permute.xlu0 %976 }
 0xa10   : > { %v979_v61 = vsub.f32 %v944_v54, %v977_v60 }
 0xa12   : > { %988 = vperm.xlu1 %2285, %v979_v61   ;;  %v2700_v61 = vmov 10  }
 0xa1a   : > { %v983_v63 = vpop.permute.xlu1 %982 }
 0xa1b   : > { %v985_v2 = vmul.f32 %v983_v63, %v941_v25 }
 0xa91   : > { %v989_v1 = vpop.permute.xlu1 %988 }
 0xa92   : > { %v991_v4 = vadd.f32 %v989_v1, %v985_v2 }
 0xa94   : > { %v992_v5 = vmul.f32 0.70710677, %v991_v4  ;;  %v1016_v27 = vmul.f32 0.5, %v991_v4 }
 0xa96   : > { %v993_v6 = vand.u32 2147483647, %v992_v5  ;;  %vm1013_vm11 = vcmp.ge.f32.partialorder %v992_v5, 0.0 }
 0xa98   : > { %v994_v7 = vmul.f32 0.3275911, %v993_v6  ;;  %v1007_v9 = vsub.f32 0.0, %v993_v6 }
 0xa9a   : > { %v995_v8 = vadd.f32 1.0, %v994_v7  ;;  %v1008_v11 = vmul.f32 %v1007_v9, %v993_v6 }
 0xa9c   : > { %2314 = vrcp.f32 %v995_v8  ;;  %v1009_v14 = vmul.f32 1.442695, %v1008_v11 }
 0xa9e   : > { %2316 = vpow2.f32 %v1009_v14 }
 0xaa6   : > { %v2315_v10 = vpop.eup %2314 }
 0xaa7   : > { %v998_v12 = vmul.f32 1.0614054, %v2315_v10 }
 0xaa8   : > { %v2317_v22 = vpop.eup %2316 }
 0xaa9   : > { %v1946_v13 = vadd.f32 -1.4531521, %v998_v12 }
 0xaab   : > { %v1000_v15 = vmul.f32 %v2315_v10, %v1946_v13 }
 0xaad   : > { %v1001_v16 = vadd.f32 1.4214138, %v1000_v15 }
 0xaaf   : > { %v1002_v17 = vmul.f32 %v2315_v10, %v1001_v16 }
 0xab1   : > { %v1947_v18 = vadd.f32 -0.28449672, %v1002_v17 }
 0xab3   : > { %v1004_v19 = vmul.f32 %v2315_v10, %v1947_v18 }
 0xab5   : > { %v1005_v20 = vadd.f32 0.2548296, %v1004_v19 }
 0xab7   : > { %v1006_v21 = vmul.f32 %v2315_v10, %v1005_v20 }
 0xab9   : > { %v1011_v23 = vmul.f32 %v2317_v22, %v1006_v21 }
 0xabb   : > { %v1012_v24 = vsub.f32 1.0, %v1011_v23  ;;  %v2701_v23 = vmov 11  }
 0xabc   : > { %2288 = vset.pattern.permute.xlu1 %v2701_v23 }
 0xabd   : > { %v1014_v25 = vsub.f32 0.0, %v1012_v24 }
 0xabf   : > { %v1015_v26 = vsel %vm1013_vm11, %v1012_v24, %v1014_v25  ;;  %v1130_v24 = vld [vmem:[#allocation6] sm:$0xf] }
 0xac0   : > { %v1017_v28 = vadd.f32 1.0, %v1015_v26 }
 0xac2   : > { %v1018_v29 = vmul.f32 %v1017_v28, %v1016_v27 }
 0xac4   : > { %v1032_v30 = vsel %vm458_vm0, %v1018_v29, 0.0  ;;  %1026 = vrot.lane.b32.xlu1 %v1018_v29, %s2686_s14  ;;  %1020 = vrot.lane.b32.xlu0 %v1018_v29, %s2684_s1 }
 0xac5   : > { %1033 = vst.msk [vmem:[#allocation2 + $0x10] sm:$0xff] %vm460_vm1, %v1032_v30 }
 0xac8   : > { %1040 = vrot.lane.b32.xlu1 %v1018_v29, %s2687_s22  ;;  %1034 = vrot.lane.b32.xlu0 %v1018_v29, %s2685_s16 }
 0xacc   : > { %1054 = vperm.xlu0 %2286, %v944_v54   ;;  %v1049_v48 = vld [vmem:[#allocation2 + $0x10] sm:$0xff] }
 0xad0   : > { %2287 = vset.pattern.permute.xlu0 %v2700_v61 }
 0xb36   : > { %v1027_v32 = vpop.permute.xlu1 %1026  ;;  %v1021_v34 = vpop.permute.xlu0 %1020 }
 0xb37   : > { %v1029_v35 = vsel %vm465_vm5, 0.0, %v1027_v32  ;;  %v1023_v36 = vsel %vm456_vm3, 0.0, %v1021_v34 }
 0xb38   : > { %v1030_v37 = vsel %vm458_vm0, %v1029_v35, 0.0  ;;  %v1024_v38 = vsel %vm458_vm0, %v1023_v36, 0.0 }
 0xb39   : > { %1031 = vst.msk [vmem:[#allocation2 + $0x8] sm:$0xff] %vm460_vm1, %v1030_v37  ;;  %1025 = vst.msk [vmem:[#allocation2] sm:$0xff] %vm460_vm1, %v1024_v38 }
 0xb3a   : > { %v1041_v39 = vpop.permute.xlu1 %1040  ;;  %v1035_v40 = vpop.permute.xlu0 %1034 }
 0xb3b   : > { %v1043_v41 = vsel %vm481_vm6, %v1041_v39, 0.0  ;;  %v1037_v42 = vsel %vm474_vm4, %v1035_v40, 0.0 }
 0xb3c   : > { %v1044_v43 = vsel %vm458_vm0, %v1043_v41, 0.0  ;;  %v1038_v44 = vsel %vm458_vm0, %v1037_v42, 0.0 }
 0xb3d   : > { %1045 = vst.msk [vmem:[#allocation2 + $0x20] sm:$0xff] %vm460_vm1, %v1044_v43  ;;  %1039 = vst.msk [vmem:[#allocation2 + $0x18] sm:$0xff] %vm460_vm1, %v1038_v44 }
 0xb40   : > { %v1047_v45 = vld [vmem:[#allocation2] sm:$0xff]  ;;  %v1048_v46 = vld [vmem:[#allocation2 + $0x8] sm:$0xff] }
 0xb41   : > { %v2106_v47 = vpack.c.bf16 %v1048_v46, %v1047_v45 }
 0xb43   : > { %2107 = vmatpush3.bf16.msra.mxu1 %v2106_v47 }
 0xb44   : > { %2108 = vmatprep.subr.bf16.mxu1 %v2683_v0  ;;  %v1050_v49 = vld [vmem:[#allocation2 + $0x18] sm:$0xff]  ;;  %v1051_v52 = vld [vmem:[#allocation2 + $0x20] sm:$0xff] }
 0xb45   : > { %v2109_v50 = vpack.c.bf16 %v1050_v49, %v1049_v48 }
 0xb47   : > { %2110 = vmatpush3.bf16.msra.mxu1 %v2109_v50 }
 0xb48   : > { %2051 = vmatprep.subr.mxu1 %v2689_v3 }
 0xb4b   : > { %2052 = vmatpush3.msra.mxu1 %v1051_v52  ;;  %v1055_v53 = vpop.permute.xlu0 %1054 }
 0xb4c   : > { %2054 = vmatmul.mubr.msk.f32.vlgmr.msra.gmra.mrb[2].mxu1 %vm496_vm7, %v1046_v51  ;;  %2111 = vmatprep.subr.bf16.mxu1 %v2683_v0 }
 0xb4d   : > { %2071 = vmatprep.mubr.msk.f32.mxu1 %vm2688_vm2, %v2689_v3 }
 0xc1f   : > { %v1126_v54 = vpop.f32.mrb[2].mxu1 }
 0xc20   : > { %v1127_v55 = vadd.f32 %v1126_v54, %v1055_v53  ;;  %v2055_v57 = vpop.f32.mrb[3].mxu1 }
 0xc22   : > { %v1131_v58 = vsel %vm571_vm8, %v1127_v55, 0.0  ;;  %v1142_v59 = vmul.f32 %v1127_v55, %v1127_v55 }
 0xc23   : > { %1132 = vadd.xlane.f32.xlu1 %v1131_v58 }
 0xc24   : > { %v1143_v60 = vsel %vm571_vm8, %v1142_v59, 0.0 }
 0xc25   : > { %1144 = vadd.xlane.f32.xlu0 %v1143_v60 }
 0xcb0   : > { %v1133_v63 = vpop.xlane.xlu1 %1132 }
 0xcb1   : > { %v1134_v2 = vsel %vm458_vm0, %v1133_v63, 0.0 }
 0xcb2   : > { %v1135_v1 = vrot.slane %v1134_v2, 4  ;;  %v1145_v4 = vpop.xlane.xlu0 %1144 }
 0xcb3   : > { %v1146_v5 = vsel %vm458_vm0, %v1145_v4, 0.0 }
 0xcb4   : > { %v1136_v6 = vadd.f32 %v1135_v1, %v1134_v2  ;;  %v1147_v7 = vrot.slane %v1146_v5, 4  ;;  %v2702_v2 = vmov 12  }
 0xcb6   : > { %v1137_v8 = vrot.slane %v1136_v6, 2  ;;  %v1148_v9 = vadd.f32 %v1147_v7, %v1146_v5 }
 0xcb8   : > { %v1138_v10 = vadd.f32 %v1137_v8, %v1136_v6  ;;  %v1149_v11 = vrot.slane %v1148_v9, 2 }
 0xcba   : > { %v1139_v12 = vrot.slane %v1138_v10, 1  ;;  %v1150_v13 = vadd.f32 %v1149_v11, %v1148_v9 }
 0xcbc   : > { %v1140_v14 = vadd.f32 %v1139_v12, %v1138_v10  ;;  %v1151_v15 = vrot.slane %v1150_v13, 1 }
 0xcbe   : > { %v1141_v16 = vmul.f32 0.015625, %v1140_v14  ;;  %v1152_v17 = vadd.f32 %v1151_v15, %v1150_v13 }
 0xcc0   : > { %v1154_v18 = vmul.f32 %v1141_v16, %v1141_v16  ;;  %v1153_v19 = vmul.f32 0.015625, %v1152_v17 }
 0xcc2   : > { %v1155_v20 = vsub.f32 %v1153_v19, %v1154_v18 }
 0xcc4   : > { %v1156_v21 = vmax.f32 %v1155_v20, 0.0  ;;  %v1310_v20 = vld [vmem:[#allocation15] sm:$0xf] }
 0xcc6   : > { %v1157_v22 = vadd.f32 1e-05, %v1156_v21 }
 0xcc8   : > { %2318 = vrsqrt.f32 %v1157_v22 }
 0xcd2   : > { %v2319_v25 = vpop.eup %2318 }
 0xcd3   : > { %v1159_v26 = vmul.f32 %v2319_v25, %v1130_v24 }
 0xcd5   : > { %1168 = vperm.xlu0 %2287, %v1159_v26   ;;  %v1160_v27 = vmul.f32 %v1159_v26, %v1141_v16 }
 0xcd7   : > { %1162 = vrot.lane.b32.xlu1 %v1160_v27, %s2686_s14 }
 0xd49   : > { %v1163_v28 = vpop.permute.xlu1 %1162 }
 0xd4a   : > { %v1165_v29 = vsub.f32 %v1130_v24, %v1163_v28 }
 0xd4c   : > { %1174 = vperm.xlu1 %2288, %v1165_v29   ;;  %v2703_v29 = vmov 13  }
 0xd4d   : > { %2290 = vset.pattern.permute.xlu0 %v2703_v29  ;;  %v1206_v29 = vld [vmem:[#allocation14] sm:$0xff] }
 0xd50   : > { %2289 = vset.pattern.permute.xlu1 %v2702_v2 }
 0xd54   : > { %v1169_v30 = vpop.permute.xlu0 %1168 }
 0xd55   : > { %v1171_v31 = vmul.f32 %v1169_v30, %v1127_v55 }
 0xdcb   : > { %v1175_v32 = vpop.permute.xlu1 %1174 }
 0xdcc   : > { %v1177_v34 = vadd.f32 %v1175_v32, %v1171_v31 }
 0xdce   : > { %v1178_v35 = vmul.f32 0.70710677, %v1177_v34  ;;  %v1202_v58 = vmul.f32 0.5, %v1177_v34 }
 0xdd0   : > { %v1179_v36 = vand.u32 2147483647, %v1178_v35  ;;  %vm1199_vm12 = vcmp.ge.f32.partialorder %v1178_v35, 0.0 }
 0xdd2   : > { %v1180_v37 = vmul.f32 0.3275911, %v1179_v36  ;;  %v1193_v39 = vsub.f32 0.0, %v1179_v36 }
 0xdd4   : > { %v1181_v38 = vadd.f32 1.0, %v1180_v37  ;;  %v1194_v41 = vmul.f32 %v1193_v39, %v1179_v36 }
 0xdd6   : > { %2320 = vrcp.f32 %v1181_v38  ;;  %v1195_v44 = vmul.f32 1.442695, %v1194_v41 }
 0xdd8   : > { %2322 = vpow2.f32 %v1195_v44 }
 0xde0   : > { %v2321_v40 = vpop.eup %2320 }
 0xde1   : > { %v1184_v42 = vmul.f32 1.0614054, %v2321_v40 }
 0xde2   : > { %v2323_v52 = vpop.eup %2322 }
 0xde3   : > { %v1949_v43 = vadd.f32 -1.4531521, %v1184_v42 }
 0xde5   : > { %v1186_v45 = vmul.f32 %v2321_v40, %v1949_v43 }
 0xde7   : > { %v1187_v46 = vadd.f32 1.4214138, %v1186_v45 }
 0xde9   : > { %v1188_v47 = vmul.f32 %v2321_v40, %v1187_v46 }
 0xdeb   : > { %v1950_v48 = vadd.f32 -0.28449672, %v1188_v47 }
 0xded   : > { %v1190_v49 = vmul.f32 %v2321_v40, %v1950_v48 }
 0xdef   : > { %v1191_v50 = vadd.f32 0.2548296, %v1190_v49 }
 0xdf1   : > { %v1192_v51 = vmul.f32 %v2321_v40, %v1191_v50 }
 0xdf3   : > { %v1197_v53 = vmul.f32 %v2323_v52, %v1192_v51 }
 0xdf5   : > { %v1198_v54 = vsub.f32 1.0, %v1197_v53  ;;  %v2704_v53 = vmov 14  }
 0xdf7   : > { %v1200_v55 = vsub.f32 0.0, %v1198_v54 }
 0xdf9   : > { %v1201_v57 = vsel %vm1199_vm12, %v1198_v54, %v1200_v55  ;;  %v1394_v54 = vld [vmem:[#allocation6] sm:$0xf] }
 0xdfa   : > { %v1203_v59 = vadd.f32 1.0, %v1201_v57 }
 0xdfc   : > { %v1204_v60 = vmul.f32 %v1203_v59, %v1202_v58 }
 0xdfe   : > { %v1205_v61 = vadd.f32 %v1204_v60, %v3150_v62 }
 0xe00   : > { %v1296_v63 = vsel %vm458_vm0, %v1205_v61, 0.0  ;;  %1284 = vrot.lane.b32.xlu1 %v1205_v61, %s2684_s1  ;;  %2057 = vmatpush3.msk.msra.mxu0 %vm458_vm0, %v1205_v61 }
 0xe01   : > { %1297 = vst.msk [vmem:[#allocation2 + $0x10] sm:$0xff] %vm460_vm1, %v1296_v63  ;;  %2117 = vmatprep.subr.bf16.mxu0 %v2683_v0  ;;  %2059 = vmatmul.mubr.msk.f32.vlgmr.msra.gmra.mrb[4].mxu0 %vm1207_vm14, %v1206_v29 }
 0xe02   : > { %2084 = vmatprep.mubr.msk.f32.mxu0 %vm2688_vm2, %v2689_v3 }
 0xe04   : > { %1290 = vrot.lane.b32.xlu1 %v1205_v61, %s2686_s14 }
 0xe08   : > { %1298 = vrot.lane.b32.xlu1 %v1205_v61, %s2685_s16  ;;  %v1313_v17 = vld [vmem:[#allocation2 + $0x10] sm:$0xff] }
 0xe0c   : > { %1304 = vrot.lane.b32.xlu1 %v1205_v61, %s2687_s22 }
 0xe10   : > { %1318 = vperm.xlu1 %2289, %v1130_v24  }
 0xe14   : > { %2291 = vset.pattern.permute.xlu1 %v2704_v53 }
 0xe72   : > { %v1285_v62 = vpop.permute.xlu1 %1284 }
 0xe73   : > { %v1287_v1 = vsel %vm456_vm3, 0.0, %v1285_v62 }
 0xe74   : > { %v1288_v4 = vsel %vm458_vm0, %v1287_v1, 0.0 }
 0xe75   : > { %1289 = vst.msk [vmem:[#allocation2] sm:$0xff] %vm460_vm1, %v1288_v4 }
 0xe76   : > { %v1291_v5 = vpop.permute.xlu1 %1290 }
 0xe77   : > { %v1293_v6 = vsel %vm465_vm5, 0.0, %v1291_v5 }
 0xe78   : > { %v1294_v7 = vsel %vm458_vm0, %v1293_v6, 0.0 }
 0xe79   : > { %1295 = vst.msk [vmem:[#allocation2 + $0x8] sm:$0xff] %vm460_vm1, %v1294_v7 }
 0xe7a   : > { %v1299_v8 = vpop.permute.xlu1 %1298 }
 0xe7b   : > { %v1301_v9 = vsel %vm474_vm4, %v1299_v8, 0.0 }
 0xe7c   : > { %v1302_v10 = vsel %vm458_vm0, %v1301_v9, 0.0  ;;  %v1311_v14 = vld [vmem:[#allocation2] sm:$0xff] }
 0xe7d   : > { %1303 = vst.msk [vmem:[#allocation2 + $0x18] sm:$0xff] %vm460_vm1, %v1302_v10 }
 0xe7e   : > { %v1305_v11 = vpop.permute.xlu1 %1304 }
 0xe7f   : > { %v1307_v12 = vsel %vm481_vm6, %v1305_v11, 0.0 }
 0xe80   : > { %v1308_v13 = vsel %vm458_vm0, %v1307_v12, 0.0  ;;  %v1312_v15 = vld [vmem:[#allocation2 + $0x8] sm:$0xff] }
 0xe81   : > { %1309 = vst.msk [vmem:[#allocation2 + $0x20] sm:$0xff] %vm460_vm1, %v1308_v13  ;;  %v2112_v16 = vpack.c.bf16 %v1312_v15, %v1311_v14 }
 0xe83   : > { %2113 = vmatpush3.bf16.msra.mxu1 %v2112_v16 }
 0xe84   : > { %2114 = vmatprep.subr.bf16.mxu1 %v2683_v0  ;;  %v1314_v18 = vld [vmem:[#allocation2 + $0x18] sm:$0xff] }
 0xe85   : > { %v2115_v19 = vpack.c.bf16 %v1314_v18, %v1313_v17 }
 0xe87   : > { %2116 = vmatpush3.bf16.msra.mxu1 %v2115_v19 }
 0xe88   : > { %2069 = vmatprep.subr.mxu1 %v2689_v3  ;;  %v1315_v21 = vld [vmem:[#allocation2 + $0x20] sm:$0xff] }
 0xe8b   : > { %2070 = vmatpush3.msra.mxu1 %v1315_v21 }
 0xe8c   : > { %2072 = vmatmul.mubr.msk.f32.vlgmr.msra.gmra.mrb[4].mxu1 %vm496_vm7, %v1310_v20 }
 0xe8f   : > { %v1319_v22 = vpop.permute.xlu1 %1318 }
 0xf5f   : > { %v1390_v23 = vpop.f32.mrb[4].mxu1 }
 0xf60   : > { %v1391_v24 = vadd.f32 %v1390_v23, %v1319_v22  ;;  %v2073_v25 = vpop.f32.mrb[5].mxu1 }
 0xf62   : > { %v1395_v26 = vsel %vm571_vm8, %v1391_v24, 0.0  ;;  %v1406_v27 = vmul.f32 %v1391_v24, %v1391_v24 }
 0xf63   : > { %1396 = vadd.xlane.f32.xlu1 %v1395_v26 }
 0xf64   : > { %v1407_v28 = vsel %vm571_vm8, %v1406_v27, 0.0 }
 0xf65   : > { %1408 = vadd.xlane.f32.xlu0 %v1407_v28 }
 0xff0   : > { %v1397_v30 = vpop.xlane.xlu1 %1396 }
 0xff1   : > { %v1398_v31 = vsel %vm458_vm0, %v1397_v30, 0.0  ;;  %v2705_v30 = vmov 15  }
 0xff2   : > { %v1399_v32 = vrot.slane %v1398_v31, 4  ;;  %v1409_v34 = vpop.xlane.xlu0 %1408 }
 0xff3   : > { %v1410_v35 = vsel %vm458_vm0, %v1409_v34, 0.0 }
 0xff4   : > { %v1400_v36 = vadd.f32 %v1399_v32, %v1398_v31  ;;  %v1411_v37 = vrot.slane %v1410_v35, 4  ;;  %v3254_v31 = vld [vmem:[#allocation6] sm:$0xff] }
 0xff6   : > { %v1401_v38 = vrot.slane %v1400_v36, 2  ;;  %v1412_v39 = vadd.f32 %v1411_v37, %v1410_v35 }
 0xff8   : > { %v1402_v40 = vadd.f32 %v1401_v38, %v1400_v36  ;;  %v1413_v41 = vrot.slane %v1412_v39, 2 }
 0xffa   : > { %v1403_v42 = vrot.slane %v1402_v40, 1  ;;  %v1414_v43 = vadd.f32 %v1413_v41, %v1412_v39 }
 0xffc   : > { %v1404_v44 = vadd.f32 %v1403_v42, %v1402_v40  ;;  %v1415_v45 = vrot.slane %v1414_v43, 1 }
 0xffe   : > { %v1405_v46 = vmul.f32 0.015625, %v1404_v44  ;;  %v1416_v47 = vadd.f32 %v1415_v45, %v1414_v43 }
0x1000   : > { %v1418_v48 = vmul.f32 %v1405_v46, %v1405_v46  ;;  %v1417_v49 = vmul.f32 0.015625, %v1416_v47 }
0x1002   : > { %v1419_v50 = vsub.f32 %v1417_v49, %v1418_v48 }
0x1004   : > { %v1420_v51 = vmax.f32 %v1419_v50, 0.0 }
0x1006   : > { %v1421_v52 = vadd.f32 1e-05, %v1420_v51  ;;  %v1497_v51 = vld [vmem:[#allocation17] sm:$0xff] }
0x1008   : > { %2324 = vrsqrt.f32 %v1421_v52 }
0x1012   : > { %v2325_v55 = vpop.eup %2324 }
0x1013   : > { %v1423_v57 = vmul.f32 %v2325_v55, %v1394_v54 }
0x1015   : > { %1432 = vperm.xlu0 %2290, %v1423_v57   ;;  %v1424_v58 = vmul.f32 %v1423_v57, %v1405_v46 }
0x1017   : > { %1426 = vrot.lane.b32.xlu1 %v1424_v58, %s2686_s14 }
0x1019   : > { %2296 = vset.pattern.permute.xlu0 %v2691_v33 }
0x1089   : > { %v1427_v59 = vpop.permute.xlu1 %1426 }
0x108a   : > { %v1429_v60 = vsub.f32 %v1394_v54, %v1427_v59  ;;  %v3272_v54 = vpop.f32.mrb[4].mxu0 }
0x108b   : > { %v2060_v55 = vpop.f32.mrb[5].mxu0 }
0x108c   : > { %1438 = vperm.xlu1 %2291, %v1429_v60  }
0x1090   : > { %2292 = vset.pattern.permute.xlu1 %v2705_v30 }
0x1094   : > { %v1433_v61 = vpop.permute.xlu0 %1432 }
0x1095   : > { %v1435_v63 = vmul.f32 %v1433_v61, %v1391_v24 }
0x110b   : > { %v1439_v2 = vpop.permute.xlu1 %1438 }
0x110c   : > { %v1441_v62 = vadd.f32 %v1439_v2, %v1435_v63 }
0x110e   : > { %v1442_v1 = vmul.f32 0.70710677, %v1441_v62  ;;  %v1466_v25 = vmul.f32 0.5, %v1441_v62 }
0x1110   : > { %v1443_v4 = vand.u32 2147483647, %v1442_v1  ;;  %vm1463_vm13 = vcmp.ge.f32.partialorder %v1442_v1, 0.0 }
0x1112   : > { %v1444_v5 = vmul.f32 0.3275911, %v1443_v4  ;;  %v1457_v7 = vsub.f32 0.0, %v1443_v4 }
0x1114   : > { %v1445_v6 = vadd.f32 1.0, %v1444_v5  ;;  %v1458_v9 = vmul.f32 %v1457_v7, %v1443_v4 }
0x1116   : > { %2326 = vrcp.f32 %v1445_v6  ;;  %v1459_v12 = vmul.f32 1.442695, %v1458_v9 }
0x1118   : > { %2328 = vpow2.f32 %v1459_v12 }
0x1120   : > { %v2327_v8 = vpop.eup %2326 }
0x1121   : > { %v1448_v10 = vmul.f32 1.0614054, %v2327_v8 }
0x1122   : > { %v2329_v20 = vpop.eup %2328 }
0x1123   : > { %v1954_v11 = vadd.f32 -1.4531521, %v1448_v10 }
0x1125   : > { %v1450_v13 = vmul.f32 %v2327_v8, %v1954_v11 }
0x1127   : > { %v1451_v14 = vadd.f32 1.4214138, %v1450_v13 }
0x1129   : > { %v1452_v15 = vmul.f32 %v2327_v8, %v1451_v14 }
0x112b   : > { %v1955_v16 = vadd.f32 -0.28449672, %v1452_v15 }
0x112d   : > { %v1454_v17 = vmul.f32 %v2327_v8, %v1955_v16 }
0x112f   : > { %v1455_v18 = vadd.f32 0.2548296, %v1454_v17 }
0x1131   : > { %v1456_v19 = vmul.f32 %v2327_v8, %v1455_v18 }
0x1133   : > { %v1461_v21 = vmul.f32 %v2329_v20, %v1456_v19 }
0x1135   : > { %v1462_v22 = vsub.f32 1.0, %v1461_v21 }
0x1137   : > { %v1464_v23 = vsub.f32 0.0, %v1462_v22 }
0x1139   : > { %v1465_v24 = vsel %vm1463_vm13, %v1462_v22, %v1464_v23 }
0x113a   : > { %v1467_v26 = vadd.f32 1.0, %v1465_v24  ;;  %v2707_v24 = vmov 17  }
0x113c   : > { %v1468_v27 = vmul.f32 %v1467_v26, %v1466_v25 }
0x113e   : > { %v1483_v28 = vsel %vm458_vm0, %v1468_v27, 0.0  ;;  %1471 = vrot.lane.b32.xlu1 %v1468_v27, %s2684_s1 }
0x113f   : > { %1484 = vst.msk [vmem:[#allocation2 + $0x10] sm:$0xff] %vm460_vm1, %v1483_v28 }
0x1142   : > { %1477 = vrot.lane.b32.xlu1 %v1468_v27, %s2686_s14 }
0x1146   : > { %1485 = vrot.lane.b32.xlu1 %v1468_v27, %s2685_s16  ;;  %v1500_v48 = vld [vmem:[#allocation2 + $0x10] sm:$0xff] }
0x114a   : > { %1491 = vrot.lane.b32.xlu1 %v1468_v27, %s2687_s22 }
0x114e   : > { %1505 = vperm.xlu1 %2292, %v3254_v31  }
0x11b0   : > { %v1472_v32 = vpop.permute.xlu1 %1471 }
0x11b1   : > { %v1474_v34 = vsel %vm456_vm3, 0.0, %v1472_v32 }
0x11b2   : > { %v1475_v35 = vsel %vm458_vm0, %v1474_v34, 0.0 }
0x11b3   : > { %1476 = vst.msk [vmem:[#allocation2] sm:$0xff] %vm460_vm1, %v1475_v35 }
0x11b4   : > { %v1478_v36 = vpop.permute.xlu1 %1477 }
0x11b5   : > { %v1480_v37 = vsel %vm465_vm5, 0.0, %v1478_v36 }
0x11b6   : > { %v1481_v38 = vsel %vm458_vm0, %v1480_v37, 0.0 }
0x11b7   : > { %1482 = vst.msk [vmem:[#allocation2 + $0x8] sm:$0xff] %vm460_vm1, %v1481_v38 }
0x11b8   : > { %v1486_v39 = vpop.permute.xlu1 %1485 }
0x11b9   : > { %v1488_v40 = vsel %vm474_vm4, %v1486_v39, 0.0 }
0x11ba   : > { %v1489_v41 = vsel %vm458_vm0, %v1488_v40, 0.0  ;;  %v1498_v45 = vld [vmem:[#allocation2] sm:$0xff] }
0x11bb   : > { %1490 = vst.msk [vmem:[#allocation2 + $0x18] sm:$0xff] %vm460_vm1, %v1489_v41 }
0x11bc   : > { %v1492_v42 = vpop.permute.xlu1 %1491 }
0x11bd   : > { %v1494_v43 = vsel %vm481_vm6, %v1492_v42, 0.0 }
0x11be   : > { %v1495_v44 = vsel %vm458_vm0, %v1494_v43, 0.0  ;;  %v1499_v46 = vld [vmem:[#allocation2 + $0x8] sm:$0xff] }
0x11bf   : > { %1496 = vst.msk [vmem:[#allocation2 + $0x20] sm:$0xff] %vm460_vm1, %v1495_v44  ;;  %v2118_v47 = vpack.c.bf16 %v1499_v46, %v1498_v45 }
0x11c1   : > { %2119 = vmatpush3.bf16.msra.mxu0 %v2118_v47 }
0x11c2   : > { %2120 = vmatprep.subr.bf16.mxu0 %v2683_v0  ;;  %v1501_v49 = vld [vmem:[#allocation2 + $0x18] sm:$0xff] }
0x11c3   : > { %v2121_v50 = vpack.c.bf16 %v1501_v49, %v1500_v48 }
0x11c5   : > { %2122 = vmatpush3.bf16.msra.mxu0 %v2121_v50 }
0x11c6   : > { %2082 = vmatprep.subr.mxu0 %v2689_v3  ;;  %v1502_v52 = vld [vmem:[#allocation2 + $0x20] sm:$0xff]  ;;  %v2706_v3 = vmov 16  }
0x11c7   : > { %2293 = vset.pattern.permute.xlu1 %v2706_v3 }
0x11c9   : > { %2083 = vmatpush3.msra.mxu0 %v1502_v52 }
0x11ca   : > { %2085 = vmatmul.mubr.msk.f32.vlgmr.msra.gmra.mrb[6].mxu0 %vm496_vm7, %v1497_v51 }
0x11cd   : > { %v1506_v57 = vpop.permute.xlu1 %1505 }
0x129d   : > { %v1577_v58 = vpop.f32.mrb[6].mxu0 }
0x129e   : > { %v1578_v59 = vadd.f32 %v1577_v58, %v1506_v57  ;;  %v2086_v60 = vpop.f32.mrb[7].mxu0 }
0x12a0   : > { %v1582_v0 = vsel %vm460_vm1, %v1578_v59, 0.0  ;;  %v1592_v61 = vmul.f32 %v1578_v59, %v1578_v59 }
0x12a1   : > { %1583 = vadd.xlane.f32.xlu1 %v1582_v0 }
0x12a2   : > { %v1593_v63 = vsel %vm460_vm1, %v1592_v61, 0.0 }
0x12a3   : > { %1594 = vadd.xlane.f32.xlu0 %v1593_v63 }
0x132e   : > { %v1584_v2 = vpop.xlane.xlu1 %1583 }
0x132f   : > { %v1585_v62 = vrot.slane %v1584_v2, 4 }
0x1330   : > { %v1595_v1 = vpop.xlane.xlu0 %1594 }
0x1331   : > { %v1586_v4 = vadd.f32 %v1585_v62, %v1584_v2  ;;  %v1596_v5 = vrot.slane %v1595_v1, 4 }
0x1333   : > { %v1587_v6 = vrot.slane %v1586_v4, 2  ;;  %v1597_v7 = vadd.f32 %v1596_v5, %v1595_v1 }
0x1335   : > { %v1588_v8 = vadd.f32 %v1587_v6, %v1586_v4  ;;  %v1598_v9 = vrot.slane %v1597_v7, 2 }
0x1337   : > { %v1589_v10 = vrot.slane %v1588_v8, 1  ;;  %v1599_v11 = vadd.f32 %v1598_v9, %v1597_v7  ;;  %v449_v7 = vlaneseq }
0x1339   : > { %v1590_v12 = vadd.f32 %v1589_v10, %v1588_v8  ;;  %v1600_v13 = vrot.slane %v1599_v11, 1 }
0x133b   : > { %v1591_v14 = vmul.f32 0.0078125, %v1590_v12  ;;  %v1601_v15 = vadd.f32 %v1600_v13, %v1599_v11 }
0x133d   : > { %v1603_v16 = vmul.f32 %v1591_v14, %v1591_v14  ;;  %v1602_v17 = vmul.f32 0.0078125, %v1601_v15  ;;  %v450_v15 = vand.u32 127, %v449_v7 }
0x133f   : > { %v1604_v18 = vsub.f32 %v1602_v17, %v1603_v16  ;;  %vm1685_vm0 = vcmp.eq.s32.totalorder %v450_v15, 0  ;;  %vm1729_vm2 = vcmp.eq.s32.totalorder %v450_v15, 14 }
0x1341   : > { %v1605_v19 = vmax.f32 %v1604_v18, 0.0 }
0x1343   : > { %v1606_v20 = vadd.f32 1e-05, %v1605_v19 }
0x1345   : > { %2330 = vrsqrt.f32 %v1606_v20 }
0x134f   : > { %v2331_v21 = vpop.eup %2330 }
0x1350   : > { %v1608_v22 = vmul.f32 %v2331_v21, %v3254_v31 }
0x1352   : > { %1617 = vperm.xlu1 %2293, %v1608_v22   ;;  %v1609_v23 = vmul.f32 %v1608_v22, %v1591_v14 }
0x1354   : > { %1611 = vrot.lane.b32.xlu0 %v1609_v23, %s2686_s14 }
0x1356   : > { %2294 = vset.pattern.permute.xlu1 %v2707_v24 }
0x13c6   : > { %v1612_v25 = vpop.permute.xlu0 %1611 }
0x13c7   : > { %v1614_v26 = vsub.f32 %v3254_v31, %v1612_v25 }
0x13c9   : > { %1623 = vperm.xlu1 %2294, %v1614_v26  }
0x13cd   : > { %2295 = vset.pattern.permute.xlu1 %v2691_v33 }
0x13d1   : > { %v1618_v27 = vpop.permute.xlu1 %1617 }
0x13d2   : > { %v1620_v28 = vmul.f32 %v1618_v27, %v1578_v59 }
0x1448   : > { %v1624_v29 = vpop.permute.xlu1 %1623 }
0x1449   : > { %v1626_v30 = vadd.f32 %v1624_v29, %v1620_v28 }
0x144b   : > { %v1627_v32 = vmul.f32 0.70710677, %v1626_v30  ;;  %v1651_v55 = vmul.f32 0.5, %v1626_v30 }
0x144d   : > { %v1628_v34 = vand.u32 2147483647, %v1627_v32  ;;  %vm1648_vm15 = vcmp.ge.f32.partialorder %v1627_v32, 0.0 }
0x144f   : > { %v1629_v35 = vmul.f32 0.3275911, %v1628_v34  ;;  %v1642_v37 = vsub.f32 0.0, %v1628_v34 }
0x1451   : > { %v1630_v36 = vadd.f32 1.0, %v1629_v35  ;;  %v1643_v39 = vmul.f32 %v1642_v37, %v1628_v34 }
0x1453   : > { %2332 = vrcp.f32 %v1630_v36  ;;  %v1644_v42 = vmul.f32 1.442695, %v1643_v39 }
0x1455   : > { %2334 = vpow2.f32 %v1644_v42 }
0x145d   : > { %v2333_v38 = vpop.eup %2332 }
0x145e   : > { %v1633_v40 = vmul.f32 1.0614054, %v2333_v38 }
0x145f   : > { %v2335_v48 = vpop.eup %2334 }
0x1460   : > { %v1957_v41 = vadd.f32 -1.4531521, %v1633_v40 }
0x1462   : > { %v1635_v43 = vmul.f32 %v2333_v38, %v1957_v41 }
0x1464   : > { %v1636_v31 = vadd.f32 1.4214138, %v1635_v43 }
0x1466   : > { %v1637_v44 = vmul.f32 %v2333_v38, %v1636_v31 }
0x1468   : > { %v1958_v33 = vadd.f32 -0.28449672, %v1637_v44 }
0x146a   : > { %v1639_v45 = vmul.f32 %v2333_v38, %v1958_v33 }
0x146c   : > { %v1640_v46 = vadd.f32 0.2548296, %v1639_v45 }
0x146e   : > { %v1641_v47 = vmul.f32 %v2333_v38, %v1640_v46 }
0x1470   : > { %v1646_v49 = vmul.f32 %v2335_v48, %v1641_v47 }
0x1472   : > { %v1647_v50 = vsub.f32 1.0, %v1646_v49 }
0x1474   : > { %v1649_v51 = vsub.f32 0.0, %v1647_v50 }
0x1476   : > { %v1650_v52 = vsel %vm1648_vm15, %v1647_v50, %v1649_v51 }
0x1477   : > { %v1652_v57 = vadd.f32 1.0, %v1650_v52 }
0x1479   : > { %v1653_v58 = vmul.f32 %v1652_v57, %v1651_v55 }
0x147b   : > { %v1654_v59 = vadd.f32 %v1653_v58, %v3272_v54 }
0x147d   : > { %v1687_v60 = vmul.f32 0.2265625, %v1654_v59  ;;  %v1686_v0 = vmul.f32 -0.0234375, %v1654_v59  ;;  %v1713_v61 = vmul.f32 -0.0703125, %v1654_v59  ;;  %v1675_v14 = vmul.f32 0.8671875, %v1654_v59 }
0x147f   : > { %1689 = vrot.lane.b32.xlu0 %v1687_v60, %s2686_s14  ;;  %1738 = vrot.lane.b32.xlu1 %v1686_v0, %s2686_s14 }
0x1483   : > { %1656 = vrot.lane.b32.xlu0 %v1654_v59, %s2684_s1  ;;  %1660 = vrot.lane.b32.xlu1 %v1654_v59, %s2686_s14  ;;  %s2594_s1 = sshll.u32 %s2708_s23, 4  ;;  %s2595_s1 = int_to_ptr.vmem [resolvable:$false] %s2594_s1 }
0x1484   : > { %p2597_p2 = scmp.lt.s32.totalorder %s3306_s29, %s2595_s1 }
0x1487   : > { %1707 = vperm.xlu0 %2296, %v1686_v0   ;;  %1664 = vrot.lane.b32.xlu1 %v1654_v59, %s2685_s16  ;;  %s2596_s16 = scalar_lea.vmem %s2595_s1, 512 }
0x1488   : > { %p2598_p0 = scmp.lt.s32.totalorder %s2596_s16, %s2590_s27 }
0x148a   : > { %p2599_p10 = por %p2598_p0, %p2597_p2 }
0x148b   : > { %1668 = vrot.lane.b32.xlu1 %v1654_v59, %s2687_s22  ;;  %2298 = vset.pattern.permute.xlu0 %v2692_v56 }
0x148c   : > { %p2600_p4 = pnand %p2599_p10, %p2593_p3 }
0x148f   : > { %1724 = vperm.xlu1 %2295, %v1713_v61  }
0x1493   : > { %2297 = vset.pattern.permute.xlu1 %v2704_v53 }
0x1494   : > { %1733 = vperm.xlu1 %2297, %v1686_v0  }
0x14f1   : > { %v1690_v54 = vpop.permute.xlu0 %1689  ;;  %v1739_v63 = vpop.permute.xlu1 %1738 }
0x14f2   : > { %v1692_v3 = vadd.f32 %v1690_v54, %v1686_v0  ;;  %v1741_v2 = vadd.f32 %v1739_v63, %v1687_v60 }
0x14f4   : > { %1744 = vperm.xlu1 %2297, %v1741_v2   ;;  %1697 = vperm.xlu0 %2298, %v1692_v3  }
0x14f5   : > { %v1661_v62 = vpop.permute.xlu1 %1660  ;;  %v1657_v4 = vpop.permute.xlu0 %1656 }
0x14f6   : > { %v1659_v56 = vsel %vm456_vm3, 0.0, %v1657_v4  ;;  %v1663_v6 = vsel %vm465_vm5, 0.0, %v1661_v62  ;;  %vm1712_vm3 = vcmp.eq.s32.totalorder %v450_v15, 15 }
0x14f7   : > { %v1672_v9 = vmul.f32 -0.0234375, %v1659_v56  ;;  %v1673_v10 = vmul.f32 0.2265625, %v1663_v6  ;;  %v1679_v11 = vmul.f32 -0.0703125, %v1663_v6 }
0x14f8   : > { %2299 = vset.pattern.permute.xlu0 %v2704_v53 }
0x14f9   : > { %1718 = vperm.xlu0 %2299, %v1713_v61   ;;  %v1665_v1 = vpop.permute.xlu1 %1664  ;;  %v1674_v16 = vadd.f32 %v1673_v10, %v1672_v9  ;;  %v1680_v17 = vadd.f32 %v1679_v11, %v1675_v14 }
0x14fa   : > { %v1667_v8 = vsel %vm474_vm4, %v1665_v1, 0.0  ;;  %vm1702_vm4 = vcmp.eq.s32.totalorder %v450_v15, 1 }
0x14fb   : > { %v1681_v53 = vmul.f32 0.2265625, %v1667_v8  ;;  %v1677_v22 = vmul.f32 -0.0703125, %v1667_v8  ;;  %v1676_v25 = vadd.f32 %v1675_v14, %v1674_v16 }
0x14fd   : > { %v1669_v5 = vpop.permute.xlu1 %1668  ;;  %v1682_v19 = vadd.f32 %v1681_v53, %v1680_v17  ;;  %v1678_v32 = vadd.f32 %v1677_v22, %v1676_v25 }
0x14fe   : > { %v1671_v13 = vsel %vm481_vm6, %v1669_v5, 0.0 }
0x14ff   : > { %v1683_v18 = vmul.f32 -0.0234375, %v1671_v13 }
0x1501   : > { %v1684_v23 = vadd.f32 %v1683_v18, %v1682_v19 }
0x1506   : > { %v1708_v24 = vpop.permute.xlu0 %1707 }
0x1507   : > { %v1710_v38 = vsel %vm1702_vm4, %v1708_v24, 0.0 }
0x150e   : > { %v1725_v12 = vpop.permute.xlu1 %1724 }
0x150f   : > { %v1727_v21 = vsel %vm1685_vm0, %v1725_v12, 0.0 }
0x1510   : > { %v1728_v27 = vadd.f32 %v1727_v21, %v1684_v23 }
0x1513   : > { %v1734_v20 = vpop.permute.xlu1 %1733 }
0x1514   : > { %v1736_v26 = vsel %vm1729_vm2, %v1734_v20, 0.0 }
0x1515   : > { %v1737_v28 = vadd.f32 %v1736_v26, %v1728_v27 }
0x1573   : > { %v1745_v29 = vpop.permute.xlu1 %1744  ;;  %v1698_v30 = vpop.permute.xlu0 %1697 }
0x1574   : > { %v1747_v34 = vsel %vm1712_vm3, %v1745_v29, 0.0  ;;  %v1700_v35 = vsel %vm1685_vm0, %v1698_v30, 0.0 }
0x1575   : > { %v1748_v36 = vadd.f32 %v1747_v34, %v1737_v28  ;;  %v1701_v37 = vadd.f32 %v1700_v35, %v1678_v32 }
0x1577   : > { %1959 = vst.msk [vmem:[%s447_s28 + $0x8] sm:$0xff] %vm460_vm1, %v1748_v36  ;;  %v1711_v39 = vadd.f32 %v1710_v38, %v1701_v37 }
0x1578   : > { %v1719_v40 = vpop.permute.xlu0 %1718 }
0x1579   : > { %v1721_v41 = vsel %vm1712_vm3, %v1719_v40, 0.0 }
0x157a   : > { %v1722_v42 = vadd.f32 %v1721_v41, %v1711_v39 }
0x157c   : > { %1749 = vst.msk [vmem:[%s447_s28] sm:$0xff] %vm460_vm1, %v1722_v42 }
0x157d   : > { %2603 = shalt.err (!%p2600_p4)
}
0x157e   : > { %s2604_s14 = scalar_lea.hbm %s3304_s26, 256  ;;  %s2608_s20 = scalar_lea.hbm %s3360_s9, 512 }
0x157f   : > { %p2605_p11 = scmp.ne.s32.totalorder %s3304_s26, %s2604_s14  ;;  %p2609_p7 = scmp.lt.u32.totalorder %s3304_s26, %s3360_s9 }
0x1580   : > { %p2610_p6 = scmp.lt.u32.totalorder %s2608_s20, %s2604_s14  ;;  %p2612_p12 = scmp.lt.u32.totalorder %s2604_s14, %s3304_s26 }
0x1581   : > { %p2606_p8 = pnand %p2605_p11, %p3386_p13 }
0x1582   : > { %p2611_p9 = por %p2610_p6, %p2609_p7 }
0x1583   : > { %p2607_p5 = pneg %p2606_p8 }
0x1584   : > { %p2613_p1 = por %p2612_p12, %p2611_p9 }
0x1586   : > { %p2614_p3 = pnand %p2613_p1, %p2607_p5 }
0x1588   : > { %2617 = shalt.err (!%p2614_p3)
}
0x1589   : > { %s2709_s18 = smov 128   ;;  %s2710_s27 = smov 8  }
0x158a   : > { %2157 = dma.vmem_to_hbm [thread:$0]  (%p3386_p13), %s3306_s29, 256, %s3304_s26, %s1753_s15, %s2709_s18, %s2709_s18, %s2710_s27  }
0x158b PF: > { %s1781_s23 = sand.u32 1, %s2660_s30   ;;  %p3387_p2 = scmp.ne.s32.totalorder %s3375_s17, 0 }
0x158c   : > { %p3388_p0 = scmp.ge.s32.totalorder %s2672_s12, 2  ;;  %s1782_s1 = scalar_lea.sflag [#allocation5], %s1781_s23 }
0x158e   : > { %p2189_p10 = pnand %p3388_p0, %p3387_p2 }
0x1590   : > { %2655 = dma.done.wait (!%p2189_p10), %s1782_s1, 256  }
0x1591   : > { %2657 = vsyncadd (!%p2189_p10), %s1782_s1, 4294967040  ;;  %p26_p4 = scmp.ge.s32.totalorder %s2976_s21, 4   ;;  %s3389_s30 = smov %s2664_s10 }
0x1592   : > { %s3390_s10 = smov %s2668_s11  ;;  %s3391_s11 = smov %s2987_s24 }
0x1593   : > { %s3392_s12 = smov %s2976_s21  ;;  %28 = sbr.rel (!%p26_p4) target bundleno = 12 (0xc), region = 134 }
0x159a   :  { %1787 = vsyncpa [#allocation4], 1 }
0x159b   :  { %1789 = vsyncpa [#allocation4 + $0x1], 1 }
0x159c   :  { %1790 = vsyncpa [#allocation7], 1 }
0x159d   :  { %1791 = vsyncpa [#allocation10], 1 }
0x159e   :  { %1792 = vsyncpa [#allocation13], 1 }
0x159f   :  { %1793 = vsyncpa [#allocation16], 1 }
0x15a0   :  { %1794 = vsyncpa [#allocation5], 1 }
0x15a1   :  { %1796 = vsyncpa [#allocation5 + $0x1], 1 }

</bundles_post_ra>
